<compile_context>
chip_gen: v6e
topology: v6e:2x2x1
jax: 0.10.0
libtpu: 0.0.40
codegen_flags: <defaults>
</compile_context>

<pallas_src>
import jax
import jax.numpy as jnp
from jax.experimental import pallas as pl
from jax.experimental.pallas import tpu as pltpu


# ----------------------------- fused Pallas kernel ------------------------------


def make_fused_disc_kernel(meta):
    """Builds the fused per-sample kernel: all DownBlocks + the 1x1 prediction conv.

    meta: list of per-block dicts with static geometry:
        cin, cout, norm, pool, pitch, oh, ow, mw, (ph, pw, np_rows if pool).
    Ref order: x, per-block (w, b[, gamma, beta]), wp, bp | f_0..f_{nb-1}, pred
               | one VMEM scratch per pooling block.
    """
    nb = len(meta)

    def kernel(*refs):
        it = iter(refs)
        x_ref = next(it)
        blk_refs = []
        for m in meta:
            r = {"w": next(it), "b": next(it)}
            if m["norm"]:
                r["gamma"] = next(it)
                r["beta"] = next(it)
            blk_refs.append(r)
        wp_ref = next(it)
        bp_ref = next(it)
        f_refs = [next(it) for _ in range(nb)]
        pred_ref = next(it)
        pool_scr = [next(it) if m["pool"] else None for m in meta]

        # input arrives channel-major (Cpad, H*W): lane-dense contiguous DMA; one
        # tile-aligned transpose + lane-slice recovers the (rows, channels) layout.
        c0 = meta[0]["cin"]
        act = x_ref[...].T[:, :c0]                          # (H*W, C0) f32

        last_t = None
        for m, r, f_ref, scr in zip(meta, blk_refs, f_refs, pool_scr):
            pitch, oh, ow, mw = m["pitch"], m["oh"], m["ow"], m["mw"]
            span = 3 * pitch + mw

            # --- conv 4x4 VALID: cast to bf16 first, build ONE j-shift buffer
            # (4 unaligned sublane slices, lane concat), then 4 ALIGNED i-taps
            # (offsets i*pitch, multiples of 8), and a single MXU matmul
            # (bf16 operands / f32 accumulation). ---
            act_bf = act.astype(jnp.bfloat16)
            shifted = jnp.concatenate(
                [act_bf[j:j + span, :] for j in range(4)], axis=1)       # (span, 4*cin)
            patches = jnp.concatenate(
                [shifted[i * pitch:i * pitch + mw, :] for i in range(4)],
                axis=1)                                                  # (mw, 16*cin)
            y = jnp.dot(patches, r["w"][...],                            # w already bf16
                        preferred_element_type=jnp.float32)
            y = y + r["b"][...]

            if m["norm"]:
                # single-pass masked InstanceNorm (biased var, eps=1e-5) + affine.
                # The mask is recomputed in-kernel (iota + compare, no 1-lane DMA);
                # jnp.where keeps the stats robust even if garbage rows are Inf/NaN.
                idx = jax.lax.broadcasted_iota(jnp.int32, (mw, 1), 0)
                if pitch & (pitch - 1) == 0:                 # power-of-two pitch
                    col = jnp.bitwise_and(idx, pitch - 1)
                else:
                    col = idx % pitch
                valid = col < ow
                inv_n = 1.0 / float(oh * ow)
                ym = jnp.where(valid, y, 0.0)
                mean = jnp.sum(ym, axis=0, keepdims=True) * inv_n
                ex2 = jnp.sum(ym * ym, axis=0, keepdims=True) * inv_n
                var = jnp.maximum(ex2 - mean * mean, 0.0)
                y = (y - mean) * jax.lax.rsqrt(var + 1e-5)
                y = y * r["gamma"][...] + r["beta"][...]

            y = jnp.where(y >= 0.0, y, 0.2 * y)             # LeakyReLU(0.2)

            if m["pool"]:
                # 2x2 avg-pool (floor mode): vertical pair-sum with one ALIGNED slice
                # add (offset = pitch), then two stride-2 gathers from a half-sized
                # VMEM scratch for the horizontal pair-sum (was 4 strided gathers).
                n_out = m["np_rows"]
                nv = 2 * n_out
                v = y[0:nv, :] + y[pitch:pitch + nv, :]     # (2*np_rows, cout)
                scr[...] = v
                even = scr[pl.ds(0, n_out, stride=2), :]
                odd = scr[pl.ds(1, n_out, stride=2), :]
                y = (even + odd) * 0.25                     # (np_rows, cout)

            # feature-map output, channel-major (lane-dense spatial) == flat NCHW
            last_t = y.T                                    # (cout, rows)
            f_ref[...] = last_t.astype(f_ref.dtype)
            act = y

        # --- fused final 1x1 prediction conv: (1, C_last) @ (C_last, rows) ---
        pred = jnp.dot(wp_ref[...], last_t.astype(jnp.bfloat16),
                       preferred_element_type=jnp.float32) + bp_ref[...]
        pred_ref[...] = pred.astype(pred_ref.dtype)

    return kernel


# ------------------------------ JAX wrapper -----------------------------------


def discriminator_forward(params, x_nchw):
    """Single-scale Discriminator. Returns (feature_maps [NCHW list], prediction_map NCHW)."""
    B, C0, H, W = x_nchw.shape
    # channel-major flat input, channels zero-padded to a multiple of 8 so the
    # in-kernel transpose is tile-aligned and the HBM read is contiguous.
    cpad = max(8, ((C0 + 7) // 8) * 8)
    x_cm = x_nchw.reshape(B, C0, H * W)
    if cpad != C0:
        x_cm = jnp.pad(x_cm, ((0, 0), (0, cpad - C0), (0, 0)))

    pitch = W
    vh, vw, cin = H, W, C0
    meta = []
    args = [x_cm]
    in_specs = [pl.BlockSpec((None, cpad, H * W), lambda b: (b, 0, 0))]
    out_shapes = []
    out_specs = []
    scratch_shapes = []
    out_geo = []           # (valid_h, valid_w, pitch, rows, channels) per output

    for blk in params["blocks"]:
        kh, kw, wcin, cout = blk["w"].shape
        oh, ow = vh - kh + 1, vw - kw + 1
        mw = (oh - 1) * pitch + ow                          # rows of the wide conv output
        m = dict(cin=wcin, cout=cout, norm=bool(blk["norm"]), pool=bool(blk["pool"]),
                 pitch=pitch, oh=oh, ow=ow, mw=mw)

        # conv weights pre-cast to bf16 (MXU operand dtype): no per-step in-kernel
        # cast, half the weight DMA.  Bias stays f32 (added to the f32 accumulator).
        args += [blk["w"].reshape(kh * kw * wcin, cout).astype(jnp.bfloat16),
                 blk["b"].reshape(1, cout)]
        in_specs += [pl.BlockSpec((kh * kw * wcin, cout), lambda b: (0, 0)),
                     pl.BlockSpec((1, cout), lambda b: (0, 0))]
        if m["norm"]:
            args += [blk["gamma"].reshape(1, cout), blk["beta"].reshape(1, cout)]
            in_specs += [pl.BlockSpec((1, cout), lambda b: (0, 0)),
                         pl.BlockSpec((1, cout), lambda b: (0, 0))]
        if m["pool"]:
            ph, pw = oh // 2, ow // 2
            np_rows = (ph - 1) * pitch + pw
            m.update(ph=ph, pw=pw, np_rows=np_rows)
            scratch_shapes.append(pltpu.VMEM((2 * np_rows, cout), jnp.float32))
            rows_out, ovh, ovw = np_rows, ph, pw
        else:
            rows_out, ovh, ovw = mw, oh, ow

        meta.append(m)
        out_shapes.append(jax.ShapeDtypeStruct((B, cout, rows_out), jnp.float32))
        out_specs.append(pl.BlockSpec((None, cout, rows_out), lambda b: (b, 0, 0)))
        out_geo.append((ovh, ovw, pitch, rows_out, cout))
        vh, vw, cin = ovh, ovw, cout

    # final 1x1 conv params, passed as bf16 (1, C_last) so the pred output is lane-dense
    c_last = cin
    args += [params["final"]["w"].reshape(c_last, 1).T.astype(jnp.bfloat16),
             params["final"]["b"].reshape(1, 1)]
    in_specs += [pl.BlockSpec((1, c_last), lambda b: (0, 0)),
                 pl.BlockSpec((1, 1), lambda b: (0, 0))]
    last_rows = out_geo[-1][3]
    out_shapes.append(jax.ShapeDtypeStruct((B, 1, last_rows), jnp.float32))
    out_specs.append(pl.BlockSpec((None, 1, last_rows), lambda b: (b, 0, 0)))

    outs = pl.pallas_call(
        make_fused_disc_kernel(meta),
        grid=(B,),
        in_specs=in_specs,
        out_specs=tuple(out_specs),
        out_shape=tuple(out_shapes),
        scratch_shapes=tuple(scratch_shapes),
        compiler_params=pltpu.CompilerParams(dimension_semantics=("parallel",)),
    )(*args)

    # epilogue (cheap XLA layout ops on tiny outputs): drop the garbage columns of the
    # wide flat layout and recover NCHW 4-D tensors.
    def to_nchw(flat, vh_, vw_, pitch_, rows_, c_):
        pad = vh_ * pitch_ - rows_
        full = jnp.pad(flat, ((0, 0), (0, 0), (0, pad)))
        return full.reshape(B, c_, vh_, pitch_)[:, :, :, :vw_]

    feature_maps = [to_nchw(o, *g) for o, g in zip(outs[:-1], out_geo)]
    gv = out_geo[-1]
    prediction_map = to_nchw(outs[-1], gv[0], gv[1], gv[2], gv[3], 1)
    return feature_maps, prediction_map


def multiscale_discriminator_forward(params_by_scale, x_dict, kp=None):
    out_dict = {}
    for scale, params in params_by_scale.items():
        key = "prediction_" + scale
        fmaps, pred = discriminator_forward(params, x_dict[key])
        out_dict["feature_maps_" + scale] = fmaps
        out_dict["prediction_map_" + scale] = pred
    return out_dict


# ------------------------- parameter initialization ------------------------


def init_discriminator_params(key, num_channels=3, block_expansion=8, num_blocks=2,
                              max_features=32):
    blocks = []
    for i in range(num_blocks):
        cin = num_channels if i == 0 else min(max_features, block_expansion * 2 ** i)
        cout = min(max_features, block_expansion * 2 ** (i + 1))
        key, kw_, kb_, kg_, kbt_ = jax.random.split(key, 5)
        blocks.append(dict(
            w=jax.random.normal(kw_, (4, 4, cin, cout), jnp.float32) * 0.05,
            b=jax.random.normal(kb_, (cout,), jnp.float32) * 0.05,
            gamma=1.0 + 0.1 * jax.random.normal(kg_, (cout,), jnp.float32),
            beta=0.1 * jax.random.normal(kbt_, (cout,), jnp.float32),
            norm=(i != 0),
            pool=(i != num_blocks - 1),
        ))
    key, kw_, kb_ = jax.random.split(key, 3)
    cin_last = blocks[-1]["w"].shape[-1]
    final = dict(
        w=jax.random.normal(kw_, (cin_last, 1), jnp.float32) * 0.05,
        b=jax.random.normal(kb_, (1,), jnp.float32) * 0.05,
    )
    return dict(blocks=blocks, final=final)


# ----------------------------- pure-JAX reference ---------------------------


def ref_down_block(x_nhwc, blk):
    y = jax.lax.conv_general_dilated(
        x_nhwc, blk["w"], (1, 1), "VALID",
        dimension_numbers=("NHWC", "HWIO", "NHWC"))
    y = y + blk["b"]
    if blk["norm"]:
        mean = jnp.mean(y, axis=(1, 2), keepdims=True)
        var = jnp.mean(jnp.square(y - mean), axis=(1, 2), keepdims=True)
        y = (y - mean) * jax.lax.rsqrt(var + 1e-5) * blk["gamma"] + blk["beta"]
    y = jnp.where(y >= 0.0, y, 0.2 * y)
    if blk["pool"]:
        B, H, W, C = y.shape
        ph, pw = H // 2, W // 2
        y = y[:, :2 * ph, :2 * pw, :].reshape(B, ph, 2, pw, 2, C).mean(axis=(2, 4))
    return y


def ref_discriminator(params, x_nchw):
    out = jnp.transpose(x_nchw, (0, 2, 3, 1))
    fmaps = []
    for blk in params["blocks"]:
        out = ref_down_block(out, blk)
        fmaps.append(jnp.transpose(out, (0, 3, 1, 2)))
    pred = jnp.einsum("bhwc,co->bhwo", out, params["final"]["w"]) + params["final"]["b"]
    return fmaps, jnp.transpose(pred, (0, 3, 1, 2))


# ---------------------------------- main ------------------------------------


if __name__ == "__main__":
    root = jax.random.PRNGKey(0)
    kx1, kx2, kp1, kp2 = jax.random.split(root, 4)

    # MultiScaleDiscriminator(scales=(1, 0.5), num_channels=3, block_expansion=8,
    #                         num_blocks=2, max_features=32, sn=False, use_kp=False)
    scales = ["1", "0.5"]
    params_by_scale = {
        "1": init_discriminator_params(kp1),
        "0.5": init_discriminator_params(kp2),
    }
    x = {
        "prediction_1": jax.random.normal(kx1, (2, 3, 32, 32), jnp.float32),
        "prediction_0.5": jax.random.normal(kx2, (2, 3, 16, 16), jnp.float32),
    }

    out = multiscale_discriminator_forward(params_by_scale, x, kp=None)
    out = jax.block_until_ready(out)

    # correctness check against a pure-f32 JAX reference.  The kernel feeds the MXU
    # bf16 operands (f32 accumulation), so tolerance is 2e-2 instead of exact-f32.
    for scale in scales:
        ref_fmaps, ref_pred = ref_discriminator(params_by_scale[scale],
                                                x["prediction_" + scale])
        got_fmaps = out["feature_maps_" + scale]
        got_pred = out["prediction_map_" + scale]
        assert len(got_fmaps) == len(ref_fmaps)
        for a, b in zip(got_fmaps, ref_fmaps):
            assert a.shape == b.shape, (a.shape, b.shape)
            assert jnp.allclose(a, b, atol=2e-2, rtol=2e-2), \
                float(jnp.max(jnp.abs(a - b)))
        assert got_pred.shape == ref_pred.shape
        assert jnp.allclose(got_pred, ref_pred, atol=2e-2, rtol=2e-2), \
            float(jnp.max(jnp.abs(got_pred - ref_pred)))

    print("KERNEL_OK")
</pallas_src>

<mosaic_0001>
module attributes {stable_mosaic.version = 11 : i64} {
  func.func @kernel(%arg0: i32, %arg1: memref<1x8x1024xf32, #tpu.memory_space<vmem>>, %arg2: memref<48x16xbf16, #tpu.memory_space<vmem>>, %arg3: memref<1x16xf32, #tpu.memory_space<vmem>>, %arg4: memref<256x32xbf16, #tpu.memory_space<vmem>>, %arg5: memref<1x32xf32, #tpu.memory_space<vmem>>, %arg6: memref<1x32xf32, #tpu.memory_space<vmem>>, %arg7: memref<1x32xf32, #tpu.memory_space<vmem>>, %arg8: memref<1x32xbf16, #tpu.memory_space<vmem>>, %arg9: memref<1x1xf32, #tpu.memory_space<vmem>>, %arg10: memref<1x16x430xf32, #tpu.memory_space<vmem>>, %arg11: memref<1x32x331xf32, #tpu.memory_space<vmem>>, %arg12: memref<1x1x331xf32, #tpu.memory_space<vmem>>, %arg13: memref<860x16xf32, #tpu.memory_space<vmem>>) attributes {dimension_semantics = [#tpu.dimension_semantics<parallel>], iteration_bounds = array<i64: 2>, scalar_prefetch = 0 : i64, scratch_operands = 1 : i64, tpu.core_type = #tpu.core_type<tc>, window_params = [{transform_indices = @transform_0, window_bounds = array<i64: 1, 8, 1024>}, {pipeline_mode = #tpu.pipeline_mode<synchronous>, transform_indices = @transform_1, window_bounds = array<i64: 48, 16>}, {pipeline_mode = #tpu.pipeline_mode<synchronous>, transform_indices = @transform_2, window_bounds = array<i64: 1, 16>}, {pipeline_mode = #tpu.pipeline_mode<synchronous>, transform_indices = @transform_3, window_bounds = array<i64: 256, 32>}, {pipeline_mode = #tpu.pipeline_mode<synchronous>, transform_indices = @transform_4, window_bounds = array<i64: 1, 32>}, {pipeline_mode = #tpu.pipeline_mode<synchronous>, transform_indices = @transform_5, window_bounds = array<i64: 1, 32>}, {pipeline_mode = #tpu.pipeline_mode<synchronous>, transform_indices = @transform_6, window_bounds = array<i64: 1, 32>}, {pipeline_mode = #tpu.pipeline_mode<synchronous>, transform_indices = @transform_7, window_bounds = array<i64: 1, 32>}, {pipeline_mode = #tpu.pipeline_mode<synchronous>, transform_indices = @transform_8, window_bounds = array<i64: 1, 1>}, {transform_indices = @transform_9, window_bounds = array<i64: 1, 16, 430>}, {transform_indices = @transform_10, window_bounds = array<i64: 1, 32, 331>}, {transform_indices = @transform_11, window_bounds = array<i64: 1, 1, 331>}]} {
    %c0 = arith.constant 0 : index
    %c0_0 = arith.constant 0 : index
    %c0_1 = arith.constant 0 : index
    %0 = vector.load %arg1[%c0, %c0_0, %c0_1] : memref<1x8x1024xf32, #tpu.memory_space<vmem>>, vector<1x8x1024xf32>
    %1 = vector.shape_cast %0 : vector<1x8x1024xf32> to vector<8x1024xf32>
    %2 = tpu.transpose %1, [1, 0] : vector<8x1024xf32> -> vector<1024x8xf32>
    %3 = vector.extract_strided_slice %2 {offsets = [0, 0], sizes = [1024, 3], strides = [1, 1]} : vector<1024x8xf32> to vector<1024x3xf32>
    %4 = arith.truncf %3 : vector<1024x3xf32> to vector<1024x3xbf16>
    %5 = vector.extract_strided_slice %4 {offsets = [0, 0], sizes = [1021, 3], strides = [1, 1]} : vector<1024x3xbf16> to vector<1021x3xbf16>
    %6 = vector.extract_strided_slice %4 {offsets = [1, 0], sizes = [1021, 3], strides = [1, 1]} : vector<1024x3xbf16> to vector<1021x3xbf16>
    %7 = vector.extract_strided_slice %4 {offsets = [2, 0], sizes = [1021, 3], strides = [1, 1]} : vector<1024x3xbf16> to vector<1021x3xbf16>
    %8 = vector.extract_strided_slice %4 {offsets = [3, 0], sizes = [1021, 3], strides = [1, 1]} : vector<1024x3xbf16> to vector<1021x3xbf16>
    %9 = tpu.concatenate %5, %6, %7, %8 in 1 : vector<1021x3xbf16>, vector<1021x3xbf16>, vector<1021x3xbf16>, vector<1021x3xbf16> -> vector<1021x12xbf16>
    %10 = vector.extract_strided_slice %9 {offsets = [0, 0], sizes = [925, 12], strides = [1, 1]} : vector<1021x12xbf16> to vector<925x12xbf16>
    %11 = vector.extract_strided_slice %9 {offsets = [32, 0], sizes = [925, 12], strides = [1, 1]} : vector<1021x12xbf16> to vector<925x12xbf16>
    %12 = vector.extract_strided_slice %9 {offsets = [64, 0], sizes = [925, 12], strides = [1, 1]} : vector<1021x12xbf16> to vector<925x12xbf16>
    %13 = vector.extract_strided_slice %9 {offsets = [96, 0], sizes = [925, 12], strides = [1, 1]} : vector<1021x12xbf16> to vector<925x12xbf16>
    %14 = tpu.concatenate %10, %11, %12, %13 in 1 : vector<925x12xbf16>, vector<925x12xbf16>, vector<925x12xbf16>, vector<925x12xbf16> -> vector<925x48xbf16>
    %c0_2 = arith.constant 0 : index
    %c0_3 = arith.constant 0 : index
    %15 = vector.load %arg2[%c0_2, %c0_3] : memref<48x16xbf16, #tpu.memory_space<vmem>>, vector<48x16xbf16>
    %cst = arith.constant dense<0.000000e+00> : vector<925x16xf32>
    %16 = tpu.matmul %14, %15, %cst {dimension_numbers = #tpu.dot_dimension_numbers<[1], [0], [0], [1], [0, 0, 1, 1], [], []>} : vector<925x48xbf16>, vector<48x16xbf16>, vector<925x16xf32> -> vector<925x16xf32>
    %c0_4 = arith.constant 0 : index
    %c0_5 = arith.constant 0 : index
    %17 = vector.load %arg3[%c0_4, %c0_5] : memref<1x16xf32, #tpu.memory_space<vmem>>, vector<1x16xf32>
    %18 = vector.broadcast %17 : vector<1x16xf32> to vector<925x16xf32>
    %19 = arith.addf %16, %18 : vector<925x16xf32>
    %cst_6 = arith.constant 0.000000e+00 : f32
    %20 = vector.broadcast %cst_6 : f32 to vector<925x16xf32>
    %21 = arith.cmpf oge, %19, %20 : vector<925x16xf32>
    %cst_7 = arith.constant 2.000000e-01 : f32
    %22 = vector.broadcast %cst_7 : f32 to vector<925x16xf32>
    %23 = arith.mulf %22, %19 : vector<925x16xf32>
    %24 = arith.select %21, %19, %23 : vector<925x16xi1>, vector<925x16xf32>
    %25 = vector.extract_strided_slice %24 {offsets = [0, 0], sizes = [860, 16], strides = [1, 1]} : vector<925x16xf32> to vector<860x16xf32>
    %26 = vector.extract_strided_slice %24 {offsets = [32, 0], sizes = [860, 16], strides = [1, 1]} : vector<925x16xf32> to vector<860x16xf32>
    %27 = arith.addf %25, %26 : vector<860x16xf32>
    %c0_8 = arith.constant 0 : index
    %c0_9 = arith.constant 0 : index
    %28 = vector.load %arg13[%c0_8, %c0_9] : memref<860x16xf32, #tpu.memory_space<vmem>>, vector<860x16xf32>
    tpu.vector_store %arg13[%c0_8, %c0_9], %27 {strides = array<i32>} : memref<860x16xf32, #tpu.memory_space<vmem>>, vector<860x16xf32>,
    %c0_10 = arith.constant 0 : index
    %c0_11 = arith.constant 0 : index
    %29 = tpu.strided_load %arg13[%c0_10, %c0_11] {strides = array<i32: 2, 1>} : memref<860x16xf32, #tpu.memory_space<vmem>>, vector<430x16xf32>
    %c1 = arith.constant 1 : index
    %c0_12 = arith.constant 0 : index
    %30 = tpu.strided_load %arg13[%c1, %c0_12] {strides = array<i32: 2, 1>} : memref<860x16xf32, #tpu.memory_space<vmem>>, vector<430x16xf32>
    %31 = arith.addf %29, %30 : vector<430x16xf32>
    %cst_13 = arith.constant 2.500000e-01 : f32
    %32 = vector.broadcast %cst_13 : f32 to vector<430x16xf32>
    %33 = arith.mulf %31, %32 : vector<430x16xf32>
    %34 = tpu.transpose %33, [1, 0] : vector<430x16xf32> -> vector<16x430xf32>
    %c0_14 = arith.constant 0 : index
    %c0_15 = arith.constant 0 : index
    %c0_16 = arith.constant 0 : index
    %35 = vector.load %arg10[%c0_14, %c0_15, %c0_16] : memref<1x16x430xf32, #tpu.memory_space<vmem>>, vector<1x16x430xf32>
    %36 = vector.shape_cast %35 : vector<1x16x430xf32> to vector<16x430xf32>
    %37 = vector.shape_cast %34 : vector<16x430xf32> to vector<1x16x430xf32>
    tpu.vector_store %arg10[%c0_14, %c0_15, %c0_16], %37 {strides = array<i32>} : memref<1x16x430xf32, #tpu.memory_space<vmem>>, vector<1x16x430xf32>,
    %38 = arith.truncf %33 : vector<430x16xf32> to vector<430x16xbf16>
    %39 = vector.extract_strided_slice %38 {offsets = [0, 0], sizes = [427, 16], strides = [1, 1]} : vector<430x16xbf16> to vector<427x16xbf16>
    %40 = vector.extract_strided_slice %38 {offsets = [1, 0], sizes = [427, 16], strides = [1, 1]} : vector<430x16xbf16> to vector<427x16xbf16>
    %41 = vector.extract_strided_slice %38 {offsets = [2, 0], sizes = [427, 16], strides = [1, 1]} : vector<430x16xbf16> to vector<427x16xbf16>
    %42 = vector.extract_strided_slice %38 {offsets = [3, 0], sizes = [427, 16], strides = [1, 1]} : vector<430x16xbf16> to vector<427x16xbf16>
    %43 = tpu.concatenate %39, %40, %41, %42 in 1 : vector<427x16xbf16>, vector<427x16xbf16>, vector<427x16xbf16>, vector<427x16xbf16> -> vector<427x64xbf16>
    %44 = vector.extract_strided_slice %43 {offsets = [0, 0], sizes = [331, 64], strides = [1, 1]} : vector<427x64xbf16> to vector<331x64xbf16>
    %45 = vector.extract_strided_slice %43 {offsets = [32, 0], sizes = [331, 64], strides = [1, 1]} : vector<427x64xbf16> to vector<331x64xbf16>
    %46 = vector.extract_strided_slice %43 {offsets = [64, 0], sizes = [331, 64], strides = [1, 1]} : vector<427x64xbf16> to vector<331x64xbf16>
    %47 = vector.extract_strided_slice %43 {offsets = [96, 0], sizes = [331, 64], strides = [1, 1]} : vector<427x64xbf16> to vector<331x64xbf16>
    %48 = tpu.concatenate %44, %45, %46, %47 in 1 : vector<331x64xbf16>, vector<331x64xbf16>, vector<331x64xbf16>, vector<331x64xbf16> -> vector<331x256xbf16>
    %c0_17 = arith.constant 0 : index
    %c0_18 = arith.constant 0 : index
    %49 = vector.load %arg4[%c0_17, %c0_18] : memref<256x32xbf16, #tpu.memory_space<vmem>>, vector<256x32xbf16>
    %cst_19 = arith.constant dense<0.000000e+00> : vector<331x32xf32>
    %50 = tpu.matmul %48, %49, %cst_19 {dimension_numbers = #tpu.dot_dimension_numbers<[1], [0], [0], [1], [0, 0, 1, 1], [], []>} : vector<331x256xbf16>, vector<256x32xbf16>, vector<331x32xf32> -> vector<331x32xf32>
    %c0_20 = arith.constant 0 : index
    %c0_21 = arith.constant 0 : index
    %51 = vector.load %arg5[%c0_20, %c0_21] : memref<1x32xf32, #tpu.memory_space<vmem>>, vector<1x32xf32>
    %52 = vector.broadcast %51 : vector<1x32xf32> to vector<331x32xf32>
    %53 = arith.addf %50, %52 : vector<331x32xf32>
    %54 = tpu.iota {dimensions = array<i32: 0>} : vector<331x1xi32>
    %c31_i32 = arith.constant 31 : i32
    %55 = vector.broadcast %c31_i32 : i32 to vector<331x1xi32>
    %56 = arith.andi %54, %55 : vector<331x1xi32>
    %c11_i32 = arith.constant 11 : i32
    %57 = vector.broadcast %c11_i32 : i32 to vector<331x1xi32>
    %58 = arith.cmpi slt, %56, %57 : vector<331x1xi32>
    %cst_22 = arith.constant 0.000000e+00 : f32
    %59 = vector.shape_cast %58 : vector<331x1xi1> to vector<331x1xi1>
    %60 = vector.broadcast %59 : vector<331x1xi1> to vector<331x32xi1>
    %61 = vector.broadcast %cst_22 : f32 to vector<331x32xf32>
    %62 = arith.select %60, %53, %61 : vector<331x32xi1>, vector<331x32xf32>
    %cst_23 = arith.constant dense<0.000000e+00> : vector<32xf32>
    %63 = vector.multi_reduction <add>, %62, %cst_23 [0] : vector<331x32xf32> to vector<32xf32>
    %64 = vector.shape_cast %63 : vector<32xf32> to vector<1x32xf32>
    %cst_24 = arith.constant 0.00826446246 : f32
    %65 = vector.broadcast %cst_24 : f32 to vector<1x32xf32>
    %66 = arith.mulf %64, %65 : vector<1x32xf32>
    %67 = arith.mulf %62, %62 : vector<331x32xf32>
    %cst_25 = arith.constant dense<0.000000e+00> : vector<32xf32>
    %68 = vector.multi_reduction <add>, %67, %cst_25 [0] : vector<331x32xf32> to vector<32xf32>
    %69 = vector.shape_cast %68 : vector<32xf32> to vector<1x32xf32>
    %cst_26 = arith.constant 0.00826446246 : f32
    %70 = vector.broadcast %cst_26 : f32 to vector<1x32xf32>
    %71 = arith.mulf %69, %70 : vector<1x32xf32>
    %72 = arith.mulf %66, %66 : vector<1x32xf32>
    %73 = arith.subf %71, %72 : vector<1x32xf32>
    %cst_27 = arith.constant 0.000000e+00 : f32
    %74 = vector.broadcast %cst_27 : f32 to vector<1x32xf32>
    %75 = arith.maximumf %73, %74 : vector<1x32xf32>
    %76 = vector.broadcast %66 : vector<1x32xf32> to vector<331x32xf32>
    %77 = arith.subf %53, %76 : vector<331x32xf32>
    %cst_28 = arith.constant 9.99999974E-6 : f32
    %78 = vector.broadcast %cst_28 : f32 to vector<1x32xf32>
    %79 = arith.addf %75, %78 : vector<1x32xf32>
    %80 = math.rsqrt %79 : vector<1x32xf32>
    %81 = vector.broadcast %80 : vector<1x32xf32> to vector<331x32xf32>
    %82 = arith.mulf %77, %81 : vector<331x32xf32>
    %c0_29 = arith.constant 0 : index
    %c0_30 = arith.constant 0 : index
    %83 = vector.load %arg6[%c0_29, %c0_30] : memref<1x32xf32, #tpu.memory_space<vmem>>, vector<1x32xf32>
    %84 = vector.broadcast %83 : vector<1x32xf32> to vector<331x32xf32>
    %85 = arith.mulf %82, %84 : vector<331x32xf32>
    %c0_31 = arith.constant 0 : index
    %c0_32 = arith.constant 0 : index
    %86 = vector.load %arg7[%c0_31, %c0_32] : memref<1x32xf32, #tpu.memory_space<vmem>>, vector<1x32xf32>
    %87 = vector.broadcast %86 : vector<1x32xf32> to vector<331x32xf32>
    %88 = arith.addf %85, %87 : vector<331x32xf32>
    %cst_33 = arith.constant 0.000000e+00 : f32
    %89 = vector.broadcast %cst_33 : f32 to vector<331x32xf32>
    %90 = arith.cmpf oge, %88, %89 : vector<331x32xf32>
    %cst_34 = arith.constant 2.000000e-01 : f32
    %91 = vector.broadcast %cst_34 : f32 to vector<331x32xf32>
    %92 = arith.mulf %91, %88 : vector<331x32xf32>
    %93 = arith.select %90, %88, %92 : vector<331x32xi1>, vector<331x32xf32>
    %94 = tpu.transpose %93, [1, 0] : vector<331x32xf32> -> vector<32x331xf32>
    %c0_35 = arith.constant 0 : index
    %c0_36 = arith.constant 0 : index
    %c0_37 = arith.constant 0 : index
    %95 = vector.load %arg11[%c0_35, %c0_36, %c0_37] : memref<1x32x331xf32, #tpu.memory_space<vmem>>, vector<1x32x331xf32>
    %96 = vector.shape_cast %95 : vector<1x32x331xf32> to vector<32x331xf32>
    %97 = vector.shape_cast %94 : vector<32x331xf32> to vector<1x32x331xf32>
    tpu.vector_store %arg11[%c0_35, %c0_36, %c0_37], %97 {strides = array<i32>} : memref<1x32x331xf32, #tpu.memory_space<vmem>>, vector<1x32x331xf32>,
    %c0_38 = arith.constant 0 : index
    %c0_39 = arith.constant 0 : index
    %98 = vector.load %arg8[%c0_38, %c0_39] : memref<1x32xbf16, #tpu.memory_space<vmem>>, vector<1x32xbf16>
    %99 = arith.truncf %94 : vector<32x331xf32> to vector<32x331xbf16>
    %cst_40 = arith.constant dense<0.000000e+00> : vector<1x331xf32>
    %100 = tpu.matmul %98, %99, %cst_40 {dimension_numbers = #tpu.dot_dimension_numbers<[1], [0], [0], [1], [0, 0, 1, 1], [], []>} : vector<1x32xbf16>, vector<32x331xbf16>, vector<1x331xf32> -> vector<1x331xf32>
    %c0_41 = arith.constant 0 : index
    %c0_42 = arith.constant 0 : index
    %101 = vector.load %arg9[%c0_41, %c0_42] : memref<1x1xf32, #tpu.memory_space<vmem>>, vector<1x1xf32>
    %102 = vector.broadcast %101 : vector<1x1xf32> to vector<1x331xf32>
    %103 = arith.addf %100, %102 : vector<1x331xf32>
    %c0_43 = arith.constant 0 : index
    %c0_44 = arith.constant 0 : index
    %c0_45 = arith.constant 0 : index
    %104 = vector.load %arg12[%c0_43, %c0_44, %c0_45] : memref<1x1x331xf32, #tpu.memory_space<vmem>>, vector<1x1x331xf32>
    %105 = vector.shape_cast %104 : vector<1x1x331xf32> to vector<1x331xf32>
    %106 = vector.shape_cast %103 : vector<1x331xf32> to vector<1x1x331xf32>
    tpu.vector_store %arg12[%c0_43, %c0_44, %c0_45], %106 {strides = array<i32>} : memref<1x1x331xf32, #tpu.memory_space<vmem>>, vector<1x1x331xf32>,
    return
  }
  func.func @transform_0(%arg0: i32) -> (i32, i32, i32) {
    %c0_i32 = arith.constant 0 : i32
    %c0_i32_0 = arith.constant 0 : i32
    %c0_i32_1 = arith.constant 0 : i32
    return %arg0, %c0_i32, %c0_i32_0 : i32, i32, i32
  }
  func.func @transform_1(%arg0: i32) -> (i32, i32) {
    %c0_i32 = arith.constant 0 : i32
    %c0_i32_0 = arith.constant 0 : i32
    %c0_i32_1 = arith.constant 0 : i32
    return %c0_i32, %c0_i32_0 : i32, i32
  }
  func.func @transform_2(%arg0: i32) -> (i32, i32) {
    %c0_i32 = arith.constant 0 : i32
    %c0_i32_0 = arith.constant 0 : i32
    %c0_i32_1 = arith.constant 0 : i32
    return %c0_i32, %c0_i32_0 : i32, i32
  }
  func.func @transform_3(%arg0: i32) -> (i32, i32) {
    %c0_i32 = arith.constant 0 : i32
    %c0_i32_0 = arith.constant 0 : i32
    %c0_i32_1 = arith.constant 0 : i32
    return %c0_i32, %c0_i32_0 : i32, i32
  }
  func.func @transform_4(%arg0: i32) -> (i32, i32) {
    %c0_i32 = arith.constant 0 : i32
    %c0_i32_0 = arith.constant 0 : i32
    %c0_i32_1 = arith.constant 0 : i32
    return %c0_i32, %c0_i32_0 : i32, i32
  }
  func.func @transform_5(%arg0: i32) -> (i32, i32) {
    %c0_i32 = arith.constant 0 : i32
    %c0_i32_0 = arith.constant 0 : i32
    %c0_i32_1 = arith.constant 0 : i32
    return %c0_i32, %c0_i32_0 : i32, i32
  }
  func.func @transform_6(%arg0: i32) -> (i32, i32) {
    %c0_i32 = arith.constant 0 : i32
    %c0_i32_0 = arith.constant 0 : i32
    %c0_i32_1 = arith.constant 0 : i32
    return %c0_i32, %c0_i32_0 : i32, i32
  }
  func.func @transform_7(%arg0: i32) -> (i32, i32) {
    %c0_i32 = arith.constant 0 : i32
    %c0_i32_0 = arith.constant 0 : i32
    %c0_i32_1 = arith.constant 0 : i32
    return %c0_i32, %c0_i32_0 : i32, i32
  }
  func.func @transform_8(%arg0: i32) -> (i32, i32) {
    %c0_i32 = arith.constant 0 : i32
    %c0_i32_0 = arith.constant 0 : i32
    %c0_i32_1 = arith.constant 0 : i32
    return %c0_i32, %c0_i32_0 : i32, i32
  }
  func.func @transform_9(%arg0: i32) -> (i32, i32, i32) {
    %c0_i32 = arith.constant 0 : i32
    %c0_i32_0 = arith.constant 0 : i32
    %c0_i32_1 = arith.constant 0 : i32
    return %arg0, %c0_i32, %c0_i32_0 : i32, i32, i32
  }
  func.func @transform_10(%arg0: i32) -> (i32, i32, i32) {
    %c0_i32 = arith.constant 0 : i32
    %c0_i32_0 = arith.constant 0 : i32
    %c0_i32_1 = arith.constant 0 : i32
    return %arg0, %c0_i32, %c0_i32_0 : i32, i32, i32
  }
  func.func @transform_11(%arg0: i32) -> (i32, i32, i32) {
    %c0_i32 = arith.constant 0 : i32
    %c0_i32_0 = arith.constant 0 : i32
    %c0_i32_1 = arith.constant 0 : i32
    return %arg0, %c0_i32, %c0_i32_0 : i32, i32, i32
  }
}

</mosaic_0001>

<bundles_post_ra>
// kernel: tpu_custom_call.1
= control target key start
LH: loop header
LB: loop body
LE: loop exit
PB: predicated region body
PF: predicated region fallthrough
CT: control target
= control target key end

     0   :  { %s13674_s0 = inlined_call_operand.vmem [shape: f32[2,8,1024], index: 0, kind: input, shape index: {}]   ;;  %s13675_s1 = inlined_call_operand.vmem [shape: bf16[48,16], index: 1, kind: input, shape index: {}]   ;;  %s13676_s2 = inlined_call_operand.vmem [shape: f32[1,16], index: 2, kind: input, shape index: {}]   ;;  %s13677_s3 = inlined_call_operand.vmem [shape: bf16[256,32], index: 3, kind: input, shape index: {}]   ;;  %s13678_s4 = inlined_call_operand.vmem [shape: f32[1,32], index: 4, kind: input, shape index: {}]   ;;  %s13679_s5 = inlined_call_operand.vmem [shape: f32[1,32], index: 5, kind: input, shape index: {}]   ;;  %s13680_s6 = inlined_call_operand.vmem [shape: f32[1,32], index: 6, kind: input, shape index: {}]   ;;  %s13681_s7 = inlined_call_operand.vmem [shape: bf16[1,32], index: 7, kind: input, shape index: {}]   ;;  %s13682_s8 = inlined_call_operand.<no memory space> [shape: f32[1,1], index: 8, kind: input, shape index: {}]   ;;  %s13683_s9 = inlined_call_operand.hbm [shape: f32[2,16,430], index: 9, kind: output, shape index: {0}]   ;;  %s13684_s10 = inlined_call_operand.hbm [shape: f32[2,32,331], index: 10, kind: output, shape index: {1}]   ;;  %s13685_s11 = inlined_call_operand.hbm [shape: f32[2,1,331], index: 11, kind: output, shape index: {2}]  }
   0x1   :  { %13879 = sst [smem:[#allocation74_spill]] %s13674_s0  ;;  %v17_v0 = vstv %s13682_s8 }
   0x2   :  { %13880 = sst [smem:[#allocation75_spill]] %s13675_s1  ;;  %18 = vst [vmem:[#allocation3] sm:$0x1] %v17_v0 }
   0x3   :  { %13881 = sst [smem:[#allocation76_spill]] %s13676_s2 }
   0x4   :  { %13882 = sst [smem:[#allocation77_spill]] %s13677_s3 }
   0x5   :  { %19 = vsyncpa [#allocation5], 0 }
   0x6   :  { %21 = vsyncpa [#allocation5 + $0x1], 0 }
   0x7   :  { %22 = vsyncpa [#allocation7], 0 }
   0x8   :  { %24 = vsyncpa [#allocation7 + $0x1], 0  ;;  %s8246_s19 = smov 0   ;;  %s8248_s20 = smov 0  }
   0x9   :  { %s8250_s21 = smov 0   ;;  %s8252_s22 = smov 0  }
   0xa LB: > { %s8267_s8 = sadd.s32 4294967295, %s8162_s22   ;;  %s13801_s23 = sadd.s32 4294967294, %s8162_s22   ;;  %s8162_s22 = sphi %s8252_s22, %s14288_s22   ;;  %s8158_s21 = sphi %s8250_s21, %s14287_s21   ;;  %s8154_s20 = sphi %s8248_s20, %s14286_s20   ;;  %s8150_s19 = sphi %s8246_s19, %s14285_s19  }
   0xb   : > { %s8271_s24 = sadd.s32 1, %s8162_s22   ;;  %s231_s25 = sadd.s32 1, %s8158_s21 }
   0xc   : > { %s228_s26 = ssub.s32 %s8162_s22, %s8271_s24  ;;  %p241_p0 = scmp.ne.s32.totalorder %s8158_s21, %s8154_s20 }
   0xd   : > { %p229_p1 = scmp.eq.s32.totalorder %s228_s26, 0  ;;  %p242_p2 = scmp.eq.s32.totalorder %s8267_s8, 1 }
   0xe   : > { %p247_p3 = scmp.ne.s32.totalorder %s8154_s20, %s8150_s19  ;;  %p248_p4 = scmp.eq.s32.totalorder %s13801_s23, 1 }
   0xf   : > { %s8284_s27 = scalar_select %p229_p1, %s8158_s21, %s231_s25  }
  0x10   : > { %p8286_p5 = por %p242_p2, %p241_p0  ;;  %p8290_p6 = por %p248_p4, %p247_p3 }
  0x11   : > { %p7333_p7 = scmp.ge.s32.totalorder %s8162_s22, 1  ;;  %p350_p8 = scmp.lt.s32.totalorder %s8162_s22, 3 }
  0x13   : > { %p351_p9 = pnand %p7333_p7, %p350_p8 }
  0x15   : > { %354 = sbr.rel (%p351_p9) target bundleno = 2237 (0x8bd), region = 56 }
  0x1a   : > { %p400_p10 = scmp.lt.s32.totalorder %s8267_s8, 1  ;;  %s13885_s0 = sld [smem:[#allocation74_spill]]  ;;  %vm734_vm0 = vsmask.f32 7424  ;;  %vm1438_vm1 = vcmask 1046528   ;;  %vm2078_vm3 = vcmask 23552  }
  0x1b   : > { %s8164_s16 = smov 3   ;;  %s8165_s17 = smov 6   ;;  %vm1694_vm2 = vsmask.f32 6400  ;;  %vm2207_vm4 = vcmask 48128   ;;  %vm2336_vm5 = vcmask 72704  }
  0x1c   : > { %s401_s30 = scalar_select %p400_p10, %s8267_s8, 1  ;;  %vm2875_vm6 = vcmask 97280   ;;  %vm2992_vm7 = vcmask 195584   ;;  %vm13855_vm8 = vcmask 293888   ;;  %vm3257_vm9 = vcmask 392192  }
  0x1d   : > { %s8166_s18 = smov 9   ;;  %s13928_s1 = sld [smem:[#allocation75_spill]]  ;;  %vm4311_vm13 = vcmask 130048  }
  0x1e   : > { %s7427_s12 = sshll.u32 %s401_s30, 6  ;;  %s8167_s13 = smov 12  }
  0x1f   : > { %s13816_s25 = smov 24   ;;  %s13814_s26 = smov 36  }
  0x20   : > { %s404_s15 = scalar_lea.vmem %s13885_s0, %s7427_s12  ;;  %s14027_s2 = sld [smem:[#allocation76_spill]] }
  0x21   : > { %v410_v1 = vld [vmem:[%s404_s15 + $0x20] sm:$0xff]  ;;  %v411_v2 = vld [vmem:[%s404_s15 + $0x28] sm:$0xff]  ;;  %v412_v7 = vld [vmem:[%s404_s15 + $0x30] sm:$0xff]  ;;  %s8170_s30 = smov 16   ;;  %s13878_s12 = smov 32  }
  0x22   : > { %v406_v3 = vld [vmem:[%s404_s15] sm:$0xff]  ;;  %v7856_v4 = vpack.i.bf16 %v411_v2, %v410_v1  ;;  %v407_v5 = vld [vmem:[%s404_s15 + $0x8] sm:$0xff]  ;;  %v413_v8 = vld [vmem:[%s404_s15 + $0x38] sm:$0xff]  ;;  %s8172_s14 = smov 48   ;;  %s14140_s3 = sld [smem:[#allocation77_spill]] }
  0x23   : > { %v7692_v6 = vpack.i.bf16 %v407_v5, %v406_v3  ;;  %v408_v9 = vld [vmem:[%s404_s15 + $0x10] sm:$0xff]  ;;  %v409_v10 = vld [vmem:[%s404_s15 + $0x18] sm:$0xff]  ;;  %v7938_v11 = vpack.i.bf16 %v413_v8, %v412_v7  ;;  %s13496_s15 = sand.u32 1, %s8154_s20   ;;  %s7625_s23 = smul.u32 1536, %s8267_s8 }
  0x24   : > { %7857 = vxpose.xlu1.b32.start.end [1/1] (short) %v7856_v4, 128  ;;  %v7774_v12 = vpack.i.bf16 %v409_v10, %v408_v9 }
  0x25   : > { %7693 = vxpose.xlu0.b32.start.end [1/1] (short) %v7692_v6, 128 }
  0x61   : > { %7939 = vxpose.xlu1.b32.start.end [1/1] (short) %v7938_v11, 128 }
  0x62   : > { %7775 = vxpose.xlu0.b32.start.end [1/1] (short) %v7774_v12, 128 }
  0xa0   : > { %v8301_v13 = vpop.trf.xlu1 }
  0xa1   : > { %v8303_v14 = vpop.trf.xlu0 }
  0xa2   : > { %v7695_v25 = vunpack.i.l.bf16 %v8303_v14 }
  0xa4   : > { %v8305_v15 = vpop.trf.xlu1 }
  0xa5   : > { %v8307_v16 = vpop.trf.xlu0 }
  0xa6   : > { %v7700_v23 = vunpack.i.l.bf16 %v8307_v16 }
  0xa8   : > { %v8309_v17 = vpop.trf.xlu1  ;;  %v8328_v28 = vpack.c.bf16 %v7700_v23, %v7695_v25 }
  0xa9   : > { %13886 = vst [vmem:[#allocation11_spill] sm:$0xff] %v8309_v17  ;;  %v8311_v18 = vpop.trf.xlu0 }
  0xaa   : > { %v7705_v29 = vunpack.i.l.bf16 %v8311_v18  ;;  %v13687_v36 = vshll.u32 %v8328_v28, 16  ;;  %v13688_v47 = vshrl.u32 %v8328_v28, 16 }
  0xac   : > { %v8313_v19 = vpop.trf.xlu1  ;;  %v740_v43 = vrot.slane %v13687_v36, 1 }
  0xad   : > { %13887 = vst [vmem:[#allocation12_spill] sm:$0xff] %v8313_v19  ;;  %v8315_v20 = vpop.trf.xlu0 }
  0xae   : > { %v7710_v26 = vunpack.i.l.bf16 %v8315_v20  ;;  %v741_v51 = vor.u32 %v740_v43, %v13688_v47 }
  0xb0   : > { %v8317_v21 = vpop.trf.xlu1  ;;  %v8334_v32 = vpack.c.bf16 %v7710_v26, %v7705_v29 }
  0xb1   : > { %13888 = vst [vmem:[#allocation13_spill] sm:$0xff] %v8317_v21  ;;  %v8319_v22 = vpop.trf.xlu0 }
  0xb2   : > { %v7715_v33 = vunpack.i.l.bf16 %v8319_v22  ;;  %v13689_v39 = vshll.u32 %v8334_v32, 16 }
  0xb4   : > { %v8322_v24 = vpop.trf.xlu1  ;;  %v8361_v48 = vrot.slane %v13689_v39, 1 }
  0xb5   : > { %13889 = vst [vmem:[#allocation14_spill] sm:$0xff] %v8322_v24  ;;  %v8326_v27 = vpop.trf.xlu0 }
  0xb6   : > { %v7720_v30 = vunpack.i.l.bf16 %v8326_v27  ;;  %v746_v55 = vsel %vm734_vm0, %v741_v51, %v8361_v48 }
  0xb8   : > { %v8332_v31 = vpop.trf.xlu1  ;;  %v8339_v35 = vpack.c.bf16 %v7720_v30, %v7715_v33 }
  0xb9   : > { %13890 = vst [vmem:[#allocation15_spill] sm:$0xff] %v8332_v31  ;;  %v8337_v34 = vpop.trf.xlu0 }
  0xba   : > { %v7725_v40 = vunpack.i.l.bf16 %v8337_v34  ;;  %v751_v42 = vshll.u32 %v8339_v35, 16  ;;  %v755_v54 = vshrl.u32 %v8339_v35, 16 }
  0xbc   : > { %v8342_v37 = vpop.trf.xlu1  ;;  %v8365_v49 = vrot.slane %v751_v42, 1 }
  0xbd   : > { %13891 = vst [vmem:[#allocation16_spill] sm:$0xff] %v8342_v37  ;;  %v8344_v38 = vpop.trf.xlu0 }
  0xbe   : > { %v7730_v41 = vunpack.i.l.bf16 %v8344_v38  ;;  %v757_v58 = vor.u32 %v755_v54, %v8365_v49 }
  0xc0   : > { %v8352_v44 = vpack.c.bf16 %v7730_v41, %v7725_v40  ;;  %v8354_v45 = vpop.trf.xlu1 }
  0xc1   : > { %13892 = vst [vmem:[#allocation17_spill] sm:$0xff] %v8354_v45  ;;  %v8356_v46 = vpop.trf.xlu0 }
  0xc2   : > { %v759_v50 = vshll.u32 %v8352_v44, 16  ;;  %v7735_v56 = vunpack.i.l.bf16 %v8356_v46  ;;  %v763_v3 = vshrl.u32 %v8352_v44, 16 }
  0xc4   : > { %v8370_v52 = vpop.trf.xlu1  ;;  %v761_v59 = vrot.slane %v759_v50, 1 }
  0xc5   : > { %13893 = vst [vmem:[#allocation18_spill] sm:$0xff] %v8370_v52  ;;  %v8372_v53 = vpop.trf.xlu0 }
  0xc6   : > { %v7740_v57 = vunpack.i.l.bf16 %v8372_v53  ;;  %v762_v62 = vsel %vm734_vm0, %v757_v58, %v761_v59  ;;  %v765_v6 = vor.u32 %v763_v3, %v761_v59 }
  0xc7   : > { %1246 = vrot.lane.b32.xlu0 %v746_v55, %s8164_s16  ;;  %1250 = vrot.lane.b32.xlu1 %v762_v62, %s8164_s16 }
  0xc8   : > { %v8381_v60 = vpack.c.bf16 %v7740_v57, %v7735_v56  ;;  %v8383_v61 = vpop.trf.xlu1  ;;  %v1444_v56 = vrot.slane %v8352_v44, 1  ;;  %v13686_v57 = vrot.slane %v8339_v35, 1 }
  0xc9   : > { %13894 = vst [vmem:[#allocation19_spill] sm:$0xff] %v8383_v61  ;;  %v8386_v63 = vpop.trf.xlu0 }
  0xca   : > { %v13692_v0 = vshll.u32 %v8381_v60, 16  ;;  %v7745_v4 = vunpack.i.l.bf16 %v8386_v63  ;;  %v771_v26 = vshrl.u32 %v8381_v60, 16  ;;  %v1445_v62 = vsel %vm1438_vm1, %v13686_v57, %v1444_v56 }
  0xcb   : > { %v1707_v57 = vrot.slane %v759_v50, 2  ;;  %v1446_v39 = vrot.slane %v8381_v60, 1 }
  0xcc   : > { %v8390_v1 = vpop.trf.xlu1  ;;  %v769_v7 = vrot.slane %v13692_v0, 1 }
  0xcd   : > { %13895 = vst [vmem:[#allocation20_spill] sm:$0xff] %v8390_v1  ;;  %v8392_v2 = vpop.trf.xlu0 }
  0xce   : > { %v7750_v5 = vunpack.i.l.bf16 %v8392_v2  ;;  %v770_v10 = vsel %vm734_vm0, %v765_v6, %v769_v7  ;;  %v773_v33 = vor.u32 %v771_v26, %v769_v7 }
  0xcf   : > { %1252 = vrot.lane.b32.xlu1 %v770_v10, %s8164_s16 }
  0xd0   : > { %v8399_v8 = vpack.c.bf16 %v7750_v5, %v7745_v4  ;;  %v8401_v9 = vpop.trf.xlu1 }
  0xd1   : > { %13896 = vst [vmem:[#allocation21_spill] sm:$0xff] %v8401_v9  ;;  %v8404_v11 = vpop.trf.xlu0 }
  0xd2   : > { %v13691_v12 = vshll.u32 %v8399_v8, 16  ;;  %v7755_v29 = vunpack.i.l.bf16 %v8404_v11  ;;  %v779_v5 = vshrl.u32 %v8399_v8, 16 }
  0xd4   : > { %v8408_v23 = vpop.trf.xlu1  ;;  %v777_v40 = vrot.slane %v13691_v12, 1 }
  0xd5   : > { %13897 = vst [vmem:[#allocation22_spill] sm:$0xff] %v8408_v23  ;;  %v8410_v25 = vpop.trf.xlu0  ;;  %v1714_v23 = vrot.slane %v779_v5, 1 }
  0xd6   : > { %v7760_v30 = vunpack.i.l.bf16 %v8410_v25  ;;  %v778_v51 = vsel %vm734_vm0, %v773_v33, %v777_v40  ;;  %v781_v10 = vor.u32 %v779_v5, %v777_v40  ;;  %v1703_v40 = vrot.slane %v751_v42, 2 }
  0xd7   : > { %1254 = vrot.lane.b32.xlu1 %v778_v51, %s8164_s16  ;;  %v1706_v51 = vrot.slane %v763_v3, 1 }
  0xd8   : > { %v8417_v41 = vpack.c.bf16 %v7760_v30, %v7755_v29  ;;  %v8419_v43 = vpop.trf.xlu1 }
  0xd9   : > { %13898 = vst [vmem:[#allocation23_spill] sm:$0xff] %v8419_v43  ;;  %v8422_v55 = vpop.trf.xlu0  ;;  %v1708_v50 = vor.u32 %v1707_v57, %v1706_v51  ;;  %v1710_v57 = vrot.slane %v771_v26, 1  ;;  %v13903_v51 = vshll.u32 %v8381_v60, 16 }
  0xda   : > { %v13690_v58 = vshll.u32 %v8417_v41, 16  ;;  %v7765_v6 = vunpack.i.l.bf16 %v8422_v55  ;;  %v787_v0 = vshrl.u32 %v8417_v41, 16 }
  0xdb   : > { %1570 = vrot.lane.b32.xlu1 %v1445_v62, %s8165_s17  ;;  %v1702_v62 = vrot.slane %v755_v54, 1 }
  0xdc   : > { %v8428_v59 = vpop.trf.xlu1  ;;  %v785_v29 = vrot.slane %v13690_v58, 1  ;;  %v7703_v58 = vunpack.i.h.bf16 %v8307_v16 }
  0xdd   : > { %13899 = vst [vmem:[#allocation24_spill] sm:$0xff] %v8428_v59  ;;  %v8433_v4 = vpop.trf.xlu0 }
  0xde   : > { %v7770_v7 = vunpack.i.l.bf16 %v8433_v4  ;;  %v786_v36 = vsel %vm734_vm0, %v781_v10, %v785_v29  ;;  %v1447_v10 = vsel %vm1438_vm1, %v1444_v56, %v1446_v39  ;;  %v789_v16 = vor.u32 %v787_v0, %v785_v29 }
  0xdf   : > { %1256 = vrot.lane.b32.xlu0 %v786_v36, %s8164_s16  ;;  %v8462_v36 = vor.u32 %v1703_v40, %v1702_v62  ;;  %v1448_v56 = vrot.slane %v8399_v8, 1  ;;  %v7713_v29 = vunpack.i.h.bf16 %v8315_v20 }
  0xe0   : > { %v8441_v30 = vpack.c.bf16 %v7770_v7, %v7765_v6  ;;  %v8443_v33 = vpop.trf.xlu1  ;;  %v7698_v7 = vunpack.i.h.bf16 %v8303_v14 }
  0xe1   : > { %13900 = vst [vmem:[#allocation25_spill] sm:$0xff] %v8443_v33  ;;  %v8446_v47 = vpop.trf.xlu0  ;;  %v1709_v14 = vsel %vm1694_vm2, %v8462_v36, %v1708_v50  ;;  %v1711_v33 = vrot.slane %v13903_v51, 2  ;;  %v1449_v51 = vsel %vm1438_vm1, %v1446_v39, %v1448_v56 }
  0xe2   : > { %v791_v6 = vshll.u32 %v8441_v30, 16  ;;  %v8464_v42 = vpack.c.bf16 %v7703_v58, %v7698_v7  ;;  %v1450_v58 = vrot.slane %v8417_v41, 1  ;;  %v795_v40 = vshrl.u32 %v8441_v30, 16 }
  0xe3   : > { %1572 = vrot.lane.b32.xlu0 %v1447_v10, %s8165_s17  ;;  %v7708_v7 = vunpack.i.h.bf16 %v8311_v18  ;;  %v1452_v39 = vrot.slane %v8441_v30, 1 }
  0xe4   : > { %v8455_v3 = vpop.trf.xlu1  ;;  %v793_v54 = vrot.slane %v791_v6, 1  ;;  %v799_v26 = vshll.u32 %v8464_v42, 16  ;;  %v1451_v59 = vsel %vm1438_vm1, %v1448_v56, %v1450_v58  ;;  %v1454_v5 = vrot.slane %v8464_v42, 1 }
  0xe5   : > { %13901 = vst [vmem:[#allocation26_spill] sm:$0xff] %v8455_v3  ;;  %v8458_v12 = vpop.trf.xlu0  ;;  %v8491_v20 = vpack.c.bf16 %v7713_v29, %v7708_v7  ;;  %v13907_v29 = vshll.u32 %v8417_v41, 16 }
  0xe6   : > { %v794_v10 = vsel %vm734_vm0, %v789_v16, %v793_v54 }
  0xe7   : > { %1258 = vrot.lane.b32.xlu1 %v794_v10, %s8164_s16  ;;  %1954 = vrot.lane.b32.xlu0 %v1709_v14, %s8166_s18  ;;  %v797_v10 = vor.u32 %v795_v40, %v793_v54  ;;  %v801_v14 = vrot.slane %v799_v26, 1  ;;  %v1719_v7 = vrot.slane %v13907_v29, 2 }
  0xe8   : > { %v8468_v3 = vpop.trf.xlu1 }
  0xe9   : > { %13902 = vst [vmem:[#allocation27_spill] sm:$0xff] %v8468_v3  ;;  %v8474_v62 = vpop.trf.xlu0  ;;  %v1712_v3 = vor.u32 %v1711_v33, %v1710_v57  ;;  %v13906_v33 = vshll.u32 %v8399_v8, 16  ;;  %v1722_v57 = vrot.slane %v795_v40, 1  ;;  %v802_v54 = vsel %vm734_vm0, %v797_v10, %v801_v14 }
  0xea   : > { %v1453_v40 = vsel %vm1438_vm1, %v1450_v58, %v1452_v39  ;;  %v7733_v58 = vunpack.i.h.bf16 %v8344_v38  ;;  %v1727_v38 = vrot.slane %v799_v26, 2  ;;  %v7743_v26 = vunpack.i.h.bf16 %v8372_v53 }
  0xeb   : > { %1574 = vrot.lane.b32.xlu1 %v1449_v51, %s8165_s17  ;;  %1576 = vrot.lane.b32.xlu0 %v1451_v59, %s8165_s17  ;;  %v1713_v18 = vsel %vm1694_vm2, %v1708_v50, %v1712_v3  ;;  %v1715_v56 = vrot.slane %v13906_v33, 2  ;;  %v1723_v51 = vrot.slane %v791_v6, 2  ;;  %v7723_v59 = vunpack.i.h.bf16 %v8326_v27 }
  0xec   : > { %v8484_v16 = vpop.trf.xlu1  ;;  %v1718_v50 = vrot.slane %v787_v0, 1  ;;  %v7718_v33 = vunpack.i.h.bf16 %v8319_v22  ;;  %v807_v6 = vshll.u32 %v8491_v20, 16  ;;  %v803_v22 = vshrl.u32 %v8464_v42, 16 }
  0xed   : > { %13904 = vst [vmem:[#allocation28_spill] sm:$0xff] %v8484_v16  ;;  %v8487_v43 = vpop.trf.xlu0  ;;  %v1724_v27 = vor.u32 %v1723_v51, %v1722_v57 }
  0xee   : > { %v8518_v0 = vpack.c.bf16 %v7723_v59, %v7718_v33  ;;  %v1720_v29 = vor.u32 %v1719_v7, %v1718_v50  ;;  %v805_v59 = vor.u32 %v803_v22, %v801_v14  ;;  %v1726_v50 = vrot.slane %v803_v22, 1 }
  0xef   : > { %1260 = vrot.lane.b32.xlu1 %v802_v54, %s8164_s16  ;;  %1956 = vrot.lane.b32.xlu0 %v1713_v18, %s8166_s18  ;;  %v1455_v54 = vsel %vm1438_vm1, %v1452_v39, %v1454_v5  ;;  %v1456_v7 = vrot.slane %v8491_v20, 1 }
  0xf0   : > { %v8494_v9 = vpop.trf.xlu1  ;;  %v1725_v57 = vsel %vm1694_vm2, %v1720_v29, %v1724_v27  ;;  %v815_v33 = vshll.u32 %v8518_v0, 16  ;;  %v1728_v14 = vor.u32 %v1727_v38, %v1726_v50 }
  0xf1   : > { %13905 = vst [vmem:[#allocation29_spill] sm:$0xff] %v8494_v9  ;;  %v8500_v16 = vpop.trf.xlu0  ;;  %v1716_v9 = vor.u32 %v1715_v56, %v1714_v23  ;;  %v809_v23 = vrot.slane %v807_v6, 1  ;;  %v811_v56 = vshrl.u32 %v8491_v20, 16  ;;  %v1457_v22 = vsel %vm1438_vm1, %v1454_v5, %v1456_v7 }
  0xf3   : > { %1578 = vrot.lane.b32.xlu1 %v1453_v40, %s8165_s17  ;;  %1580 = vrot.lane.b32.xlu0 %v1455_v54, %s8165_s17  ;;  %v1717_v39 = vsel %vm1694_vm2, %v1712_v3, %v1716_v9  ;;  %v7728_v40 = vunpack.i.h.bf16 %v8337_v34  ;;  %v810_v3 = vsel %vm734_vm0, %v805_v59, %v809_v23  ;;  %v1730_v1 = vrot.slane %v811_v56, 1 }
  0xf4   : > { %v8510_v10 = vpop.trf.xlu1  ;;  %v1721_v34 = vsel %vm1694_vm2, %v1716_v9, %v1720_v29  ;;  %v813_v59 = vor.u32 %v811_v56, %v809_v23  ;;  %v819_v9 = vshrl.u32 %v8518_v0, 16  ;;  %v1458_v23 = vrot.slane %v8518_v0, 1 }
  0xf5   : > { %13908 = vst [vmem:[#allocation30_spill] sm:$0xff] %v8510_v10  ;;  %v8514_v18 = vpop.trf.xlu0  ;;  %v8534_v54 = vpack.c.bf16 %v7733_v58, %v7728_v40  ;;  %v817_v58 = vrot.slane %v815_v33, 1  ;;  %v7748_v56 = vunpack.i.h.bf16 %v8386_v63 }
  0xf6   : > { %v1734_v38 = vrot.slane %v819_v9, 1  ;;  %v1459_v63 = vsel %vm1438_vm1, %v1456_v7, %v1458_v23  ;;  %v7763_v7 = vunpack.i.h.bf16 %v8410_v25 }
  0xf7   : > { %1958 = vrot.lane.b32.xlu1 %v1717_v39, %s8166_s18  ;;  %1962 = vrot.lane.b32.xlu0 %v1725_v57, %s8166_s18  ;;  %v1731_v39 = vrot.slane %v807_v6, 2  ;;  %v7738_v57 = vunpack.i.h.bf16 %v8356_v46  ;;  %v823_v29 = vshll.u32 %v8534_v54, 16  ;;  %v1729_v6 = vsel %vm1694_vm2, %v1724_v27, %v1728_v14 }
  0xf8   : > { %v8522_v10 = vpop.trf.xlu1  ;;  %v7753_v46 = vunpack.i.h.bf16 %v8392_v2  ;;  %v818_v5 = vsel %vm734_vm0, %v813_v59, %v817_v58  ;;  %v821_v2 = vor.u32 %v819_v9, %v817_v58  ;;  %v7758_v58 = vunpack.i.h.bf16 %v8404_v11 }
  0xf9   : > { %13909 = vst [vmem:[#allocation31_spill] sm:$0xff] %v8522_v10  ;;  %v8527_v51 = vpop.trf.xlu0  ;;  %v8556_v53 = vpack.c.bf16 %v7743_v26, %v7738_v57  ;;  %v825_v27 = vrot.slane %v823_v29, 1  ;;  %v827_v26 = vshrl.u32 %v8534_v54, 16 }
  0xfa   : > { %v8594_v25 = vpack.c.bf16 %v7763_v7, %v7758_v58 }
  0xfb   : > { %1960 = vrot.lane.b32.xlu1 %v1721_v34, %s8166_s18  ;;  %1262 = vrot.lane.b32.xlu0 %v810_v3, %s8164_s16  ;;  %v1732_v3 = vor.u32 %v1731_v39, %v1730_v1  ;;  %v826_v57 = vsel %vm734_vm0, %v821_v2, %v825_v27  ;;  %v829_v11 = vor.u32 %v827_v26, %v825_v27 }
  0xfc   : > { %v8537_v10 = vpop.trf.xlu1 }
  0xfd   : > { %13910 = vst [vmem:[#allocation32_spill] sm:$0xff] %v8537_v10  ;;  %v8540_v61 = vpop.trf.xlu0  ;;  %v1733_v1 = vsel %vm1694_vm2, %v1728_v14, %v1732_v3  ;;  %v1460_v14 = vrot.slane %v8534_v54, 1  ;;  %v1738_v10 = vrot.slane %v827_v26, 1 }
  0xff   : > { %1964 = vrot.lane.b32.xlu1 %v1729_v6, %s8166_s18  ;;  %1582 = vrot.lane.b32.xlu0 %v1457_v22, %s8165_s17  ;;  %v8570_v22 = vpack.c.bf16 %v7753_v46, %v7748_v56  ;;  %v831_v6 = vshll.u32 %v8556_v53, 16 }
 0x100   : > { %v8547_v40 = vpop.trf.xlu1 }
 0x101   : > { %13911 = vst [vmem:[#allocation33_spill] sm:$0xff] %v8547_v40  ;;  %v8552_v34 = vpop.trf.xlu0  ;;  %v1735_v40 = vrot.slane %v815_v33, 2  ;;  %v833_v56 = vrot.slane %v831_v6, 1  ;;  %v839_v2 = vshll.u32 %v8570_v22, 16  ;;  %v1464_v26 = vrot.slane %v8570_v22, 1 }
 0x103   : > { %1264 = vrot.lane.b32.xlu1 %v818_v5, %s8164_s16  ;;  %1966 = vrot.lane.b32.xlu0 %v1733_v1, %s8166_s18  ;;  %v1736_v33 = vor.u32 %v1735_v40, %v1734_v38  ;;  %v1739_v5 = vrot.slane %v823_v29, 2  ;;  %v1461_v40 = vsel %vm1438_vm1, %v1458_v23, %v1460_v14  ;;  %v835_v38 = vshrl.u32 %v8556_v53, 16 }
 0x104   : > { %v8562_v50 = vpop.trf.xlu1  ;;  %v7773_v23 = vunpack.i.h.bf16 %v8433_v4  ;;  %v841_v27 = vrot.slane %v839_v2, 1  ;;  %v1747_v52 = vrot.slane %v839_v2, 2 }
 0x105   : > { %13912 = vst [vmem:[#allocation34_spill] sm:$0xff] %v8562_v50  ;;  %v8565_v39 = vpop.trf.xlu0  ;;  %v1737_v9 = vsel %vm1694_vm2, %v1732_v3, %v1736_v33  ;;  %v1740_v29 = vor.u32 %v1739_v5, %v1738_v10  ;;  %v7768_v3 = vunpack.i.h.bf16 %v8422_v55  ;;  %v1742_v10 = vrot.slane %v835_v38, 1 }
 0x106   : > { %v1743_v5 = vrot.slane %v831_v6, 2  ;;  %v837_v4 = vor.u32 %v835_v38, %v833_v56  ;;  %v847_v6 = vshll.u32 %v8594_v25, 16  ;;  %v7782_v38 = vunpack.i.l.bf16 %v8458_v12 }
 0x107   : > { %1584 = vrot.lane.b32.xlu1 %v1459_v63, %s8165_s17  ;;  %1266 = vrot.lane.b32.xlu0 %v826_v57, %s8164_s16  ;;  %v1462_v63 = vrot.slane %v8556_v53, 1  ;;  %v834_v57 = vsel %vm734_vm0, %v829_v11, %v833_v56  ;;  %v8608_v55 = vpack.c.bf16 %v7773_v23, %v7768_v3  ;;  %v7777_v56 = vunpack.i.l.bf16 %v8446_v47 }
 0x108   : > { %v8574_v59 = vpop.trf.xlu1  ;;  %v1744_v7 = vor.u32 %v1743_v5, %v1742_v10  ;;  %v842_v45 = vsel %vm734_vm0, %v837_v4, %v841_v27  ;;  %v849_v2 = vrot.slane %v847_v6, 1  ;;  %v851_v5 = vshrl.u32 %v8594_v25, 16 }
 0x109   : > { %13913 = vst [vmem:[#allocation35_spill] sm:$0xff] %v8574_v59  ;;  %v8578_v50 = vpop.trf.xlu0  ;;  %v843_v59 = vshrl.u32 %v8570_v22, 16  ;;  %13916 = vst [vmem:[#allocation38_spill] sm:$0xff] %v8608_v55  ;;  %v1465_v23 = vsel %vm1438_vm1, %v1462_v63, %v1464_v26  ;;  %v8632_v4 = vpack.c.bf16 %v7782_v38, %v7777_v56  ;;  %v1751_v31 = vrot.slane %v847_v6, 2 }
 0x10a   : > { %v1745_v3 = vsel %vm1694_vm2, %v1740_v29, %v1744_v7  ;;  %v853_v56 = vor.u32 %v851_v5, %v849_v2  ;;  %v1468_v19 = vrot.slane %v8608_v55, 1 }
 0x10b   : > { %1968 = vrot.lane.b32.xlu1 %v1737_v9, %s8166_s18  ;;  %1586 = vrot.lane.b32.xlu0 %v1461_v40, %s8165_s17  ;;  %v1741_v9 = vsel %vm1694_vm2, %v1736_v33, %v1740_v29  ;;  %v1746_v11 = vrot.slane %v843_v59, 1  ;;  %v1463_v33 = vsel %vm1438_vm1, %v1460_v14, %v1462_v63  ;;  %13919 = vst [vmem:[#allocation41_spill] sm:$0xff] %v8632_v4  ;;  %v7787_v29 = vunpack.i.l.bf16 %v8474_v62 }
 0x10c   : > { %v8586_v46 = vpop.trf.xlu1  ;;  %v7792_v63 = vunpack.i.l.bf16 %v8487_v43 }
 0x10d   : > { %13914 = vst [vmem:[#allocation36_spill] sm:$0xff] %v8586_v46  ;;  %v8589_v1 = vpop.trf.xlu0  ;;  %v1748_v14 = vor.u32 %v1747_v52, %v1746_v11 }
 0x10e   : > { %v8646_v38 = vpack.c.bf16 %v7792_v63, %v7787_v29 }
 0x10f   : > { %1268 = vrot.lane.b32.xlu1 %v834_v57, %s8164_s16  ;;  %1970 = vrot.lane.b32.xlu0 %v1741_v9, %s8166_s18  ;;  %v855_v9 = vshll.u32 %v8608_v55, 16  ;;  %v1749_v11 = vsel %vm1694_vm2, %v1744_v7, %v1748_v14 }
 0x110   : > { %v8600_v46 = vpop.trf.xlu1  ;;  %13921 = vst [vmem:[#allocation43_spill] sm:$0xff] %v8646_v38 }
 0x111   : > { %13915 = vst [vmem:[#allocation37_spill] sm:$0xff] %v8600_v46  ;;  %v8604_v40 = vpop.trf.xlu0  ;;  %v1755_v7 = vrot.slane %v855_v9, 2 }
 0x113   : > { %1588 = vrot.lane.b32.xlu1 %v1463_v33, %s8165_s17  ;;  %1270 = vrot.lane.b32.xlu0 %v842_v45, %s8164_s16  ;;  %v845_v45 = vor.u32 %v843_v59, %v841_v27  ;;  %v1466_v33 = vrot.slane %v8594_v25, 1  ;;  %v857_v59 = vrot.slane %v855_v9, 1  ;;  %v1750_v27 = vrot.slane %v851_v5, 1 }
 0x114   : > { %v8611_v58 = vpop.trf.xlu1 }
 0x115   : > { %13917 = vst [vmem:[#allocation39_spill] sm:$0xff] %v8611_v58  ;;  %v8616_v37 = vpop.trf.xlu0  ;;  %v850_v52 = vsel %vm734_vm0, %v845_v45, %v849_v2  ;;  %v858_v6 = vsel %vm734_vm0, %v853_v56, %v857_v59  ;;  %v1752_v21 = vor.u32 %v1751_v31, %v1750_v27  ;;  %v7802_v2 = vunpack.i.l.bf16 %v8514_v18 }
 0x116   : > { %v1469_v9 = vsel %vm1438_vm1, %v1466_v33, %v1468_v19  ;;  %v871_v31 = vshll.u32 %v8646_v38, 16  ;;  %v7807_v27 = vunpack.i.l.bf16 %v8527_v51  ;;  %v7812_v56 = vunpack.i.l.bf16 %v8540_v61 }
 0x117   : > { %1972 = vrot.lane.b32.xlu1 %v1745_v3, %s8166_s18  ;;  %1590 = vrot.lane.b32.xlu0 %v1465_v23, %s8165_s17  ;;  %v859_v3 = vshrl.u32 %v8608_v55, 16  ;;  %v863_v23 = vshll.u32 %v8632_v4, 16  ;;  %v1753_v63 = vsel %vm1694_vm2, %v1748_v14, %v1752_v21 }
 0x118   : > { %v8624_v57 = vpop.trf.xlu1 }
 0x119   : > { %13918 = vst [vmem:[#allocation40_spill] sm:$0xff] %v8624_v57  ;;  %v8626_v10 = vpop.trf.xlu0  ;;  %v1754_v45 = vrot.slane %v859_v3, 1  ;;  %v865_v5 = vrot.slane %v863_v23, 1  ;;  %v1759_v55 = vrot.slane %v863_v23, 2  ;;  %v7817_v23 = vunpack.i.l.bf16 %v8552_v34 }
 0x11b   : > { %1272 = vrot.lane.b32.xlu1 %v850_v52, %s8164_s16  ;;  %1974 = vrot.lane.b32.xlu0 %v1749_v11, %s8166_s18  ;;  %v7797_v52 = vunpack.i.l.bf16 %v8500_v16  ;;  %v1756_v29 = vor.u32 %v1755_v7, %v1754_v45 }
 0x11c   : > { %v8639_v57 = vpop.trf.xlu1 }
 0x11d   : > { %13920 = vst [vmem:[#allocation42_spill] sm:$0xff] %v8639_v57  ;;  %v8642_v24 = vpop.trf.xlu0  ;;  %v1467_v57 = vsel %vm1438_vm1, %v1464_v26, %v1466_v33  ;;  %v867_v26 = vshrl.u32 %v8632_v4, 16  ;;  %v8662_v11 = vpack.c.bf16 %v7802_v2, %v7797_v52  ;;  %v1757_v14 = vsel %vm1694_vm2, %v1752_v21, %v1756_v29 }
 0x11e   : > { %v1470_v33 = vrot.slane %v8632_v4, 1  ;;  %v1472_v52 = vrot.slane %v8646_v38, 1 }
 0x11f   : > { %1592 = vrot.lane.b32.xlu1 %v1467_v57, %s8165_s17  ;;  %1274 = vrot.lane.b32.xlu0 %v858_v6, %s8164_s16  ;;  %v861_v57 = vor.u32 %v859_v3, %v857_v59  ;;  %13922 = vst [vmem:[#allocation44_spill] sm:$0xff] %v8662_v11  ;;  %v869_v7 = vor.u32 %v867_v26, %v865_v5  ;;  %v873_v6 = vrot.slane %v871_v31, 1  ;;  %v1758_v17 = vrot.slane %v867_v26, 1 }
 0x120   : > { %v8672_v3 = vpack.c.bf16 %v7812_v56, %v7807_v27  ;;  %v1471_v59 = vsel %vm1438_vm1, %v1468_v19, %v1470_v33  ;;  %v879_v21 = vshll.u32 %v8662_v11, 16  ;;  %v1763_v26 = vrot.slane %v871_v31, 2 }
 0x121   : > { %v866_v45 = vsel %vm734_vm0, %v861_v57, %v865_v5  ;;  %v874_v2 = vsel %vm734_vm0, %v869_v7, %v873_v6  ;;  %v1760_v5 = vor.u32 %v1759_v55, %v1758_v17  ;;  %v7822_v57 = vunpack.i.l.bf16 %v8565_v39 }
 0x122   : > { %13923 = vst [vmem:[#allocation45_spill] sm:$0xff] %v8672_v3  ;;  %v1473_v27 = vsel %vm1438_vm1, %v1470_v33, %v1472_v52  ;;  %v881_v56 = vrot.slane %v879_v21, 1  ;;  %v883_v7 = vshrl.u32 %v8662_v11, 16  ;;  %v887_v17 = vshll.u32 %v8672_v3, 16 }
 0x123   : > { %1976 = vrot.lane.b32.xlu1 %v1753_v63, %s8166_s18  ;;  %1594 = vrot.lane.b32.xlu0 %v1469_v9, %s8165_s17  ;;  %v875_v63 = vshrl.u32 %v8646_v38, 16  ;;  %v8688_v55 = vpack.c.bf16 %v7822_v57, %v7817_v23  ;;  %v7827_v31 = vunpack.i.l.bf16 %v8578_v50  ;;  %v7837_v23 = vunpack.i.l.bf16 %v8604_v40 }
 0x124   : > { %v7842_v57 = vunpack.i.l.bf16 %v8616_v37  ;;  %v1771_v38 = vrot.slane %v887_v17, 2 }
 0x125   : > { %v1762_v9 = vrot.slane %v875_v63, 1  ;;  %v877_v19 = vor.u32 %v875_v63, %v873_v6  ;;  %v1474_v6 = vrot.slane %v8662_v11, 1  ;;  %v1767_v63 = vrot.slane %v879_v21, 2 }
 0x126   : > { %v1476_v21 = vrot.slane %v8672_v3, 1  ;;  %v899_v4 = vshrl.u32 %v8688_v55, 16 }
 0x127   : > { %1276 = vrot.lane.b32.xlu1 %v866_v45, %s8164_s16  ;;  %1978 = vrot.lane.b32.xlu0 %v1757_v14, %s8166_s18  ;;  %v1761_v45 = vsel %vm1694_vm2, %v1756_v29, %v1760_v5  ;;  %v1764_v14 = vor.u32 %v1763_v26, %v1762_v9  ;;  %v882_v33 = vsel %vm734_vm0, %v877_v19, %v881_v56  ;;  %v889_v9 = vrot.slane %v887_v17, 1 }
 0x128   : > { %v885_v29 = vor.u32 %v883_v7, %v881_v56  ;;  %v1766_v26 = vrot.slane %v883_v7, 1  ;;  %v1475_v19 = vsel %vm1438_vm1, %v1472_v52, %v1474_v6 }
 0x12a   : > { %v890_v56 = vsel %vm734_vm0, %v885_v29, %v889_v9  ;;  %v1768_v7 = vor.u32 %v1767_v63, %v1766_v26  ;;  %v1478_v26 = vrot.slane %v8688_v55, 1 }
 0x12b   : > { %1596 = vrot.lane.b32.xlu1 %v1471_v59, %s8165_s17  ;;  %1278 = vrot.lane.b32.xlu0 %v874_v2, %s8164_s16  ;;  %v7832_v59 = vunpack.i.l.bf16 %v8589_v1  ;;  %v1765_v2 = vsel %vm1694_vm2, %v1760_v5, %v1764_v14  ;;  %v895_v5 = vshll.u32 %v8688_v55, 16 }
 0x12c   : > { %v1769_v52 = vsel %vm1694_vm2, %v1764_v14, %v1768_v7 }
 0x12f   : > { %1980 = vrot.lane.b32.xlu1 %v1761_v45, %s8166_s18  ;;  %1598 = vrot.lane.b32.xlu0 %v1473_v27, %s8165_s17  ;;  %v891_v45 = vshrl.u32 %v8672_v3, 16  ;;  %v8700_v27 = vpack.c.bf16 %v7832_v59, %v7827_v31  ;;  %v1477_v31 = vsel %vm1438_vm1, %v1474_v6, %v1476_v21 }
 0x131   : > { %v1770_v11 = vrot.slane %v891_v45, 1  ;;  %v893_v59 = vor.u32 %v891_v45, %v889_v9  ;;  %v903_v29 = vshll.u32 %v8700_v27, 16  ;;  %v1775_v9 = vrot.slane %v895_v5, 2 }
 0x133   : > { %1280 = vrot.lane.b32.xlu1 %v882_v33, %s8164_s16  ;;  %1982 = vrot.lane.b32.xlu0 %v1765_v2, %s8166_s18  ;;  %v8708_v33 = vpack.c.bf16 %v7842_v57, %v7837_v23  ;;  %v897_v2 = vrot.slane %v895_v5, 1  ;;  %v1772_v3 = vor.u32 %v1771_v38, %v1770_v11  ;;  %v905_v14 = vrot.slane %v903_v29, 1 }
 0x134   : > { %v1774_v38 = vrot.slane %v899_v4, 1  ;;  %v907_v11 = vshrl.u32 %v8700_v27, 16 }
 0x135   : > { %v911_v17 = vshll.u32 %v8708_v33, 16  ;;  %v898_v63 = vsel %vm734_vm0, %v893_v59, %v897_v2  ;;  %v901_v6 = vor.u32 %v899_v4, %v897_v2  ;;  %v1773_v45 = vsel %vm1694_vm2, %v1768_v7, %v1772_v3 }
 0x136   : > { %v909_v23 = vor.u32 %v907_v11, %v905_v14  ;;  %v747_v7 = vshrl.u32 %v8334_v32, 16  ;;  %v1480_v59 = vrot.slane %v8700_v27, 1 }
 0x137   : > { %1600 = vrot.lane.b32.xlu1 %v1475_v19, %s8165_s17  ;;  %1282 = vrot.lane.b32.xlu0 %v890_v56, %s8164_s16  ;;  %v8723_v57 = vrot.slane %v911_v17, 1  ;;  %v1479_v19 = vsel %vm1438_vm1, %v1476_v21, %v1478_v26  ;;  %v906_v56 = vsel %vm734_vm0, %v901_v6, %v905_v14  ;;  %v1778_v6 = vrot.slane %v907_v11, 1 }
 0x138   : > { %v749_v21 = vor.u32 %v747_v7, %v8361_v48  ;;  %v13727_v14 = vshrl.u32 %v8708_v33, 16  ;;  %v1439_v48 = vrot.slane %v8328_v28, 1  ;;  %v1698_v11 = vrot.slane %v747_v7, 1 }
 0x139   : > { %v914_v4 = vsel %vm734_vm0, %v909_v23, %v8723_v57  ;;  %v1251_v2 = vpop.permute.xlu1 %1250  ;;  %v8746_v23 = vpop.permute.xlu0 %1246  ;;  %v13927_v7 = vrot.slane %v8339_v35, 1 }
 0x13b   : > { %1984 = vrot.lane.b32.xlu1 %v1769_v52, %s8166_s18  ;;  %1602 = vrot.lane.b32.xlu0 %v1477_v31, %s8165_s17  ;;  %v1776_v31 = vor.u32 %v1775_v9, %v1774_v38  ;;  %v1440_v52 = vrot.slane %v8334_v32, 1  ;;  %v1779_v9 = vrot.slane %v903_v29, 2 }
 0x13d   : > { %v1777_v5 = vsel %vm1694_vm2, %v1772_v3, %v1776_v31  ;;  %v754_v3 = vsel %vm734_vm0, %v749_v21, %v8365_v49  ;;  %v1780_v49 = vor.u32 %v1779_v9, %v1778_v6  ;;  %v1443_v9 = vsel %vm1438_vm1, %v1440_v52, %v13927_v7 }
 0x13e   : > { %v7847_v7 = vunpack.i.l.bf16 %v8626_v10 }
 0x13f   : > { %1284 = vrot.lane.b32.xlu1 %v898_v63, %s8164_s16  ;;  %1986 = vrot.lane.b32.xlu0 %v1773_v45, %s8166_s18  ;;  %v13726_v63 = vrot.slane %v8708_v33, 1  ;;  %v1481_v45 = vsel %vm1438_vm1, %v1478_v26, %v1480_v59  ;;  %v13924_v26 = vshll.u32 %v8334_v32, 16 }
 0x141   : > { %v1253_v38 = vpop.permute.xlu1 %1252  ;;  %v1483_v29 = vsel %vm1438_vm1, %v1480_v59, %v13726_v63 }
 0x143   : > { %1604 = vrot.lane.b32.xlu1 %v1479_v19, %s8165_s17  ;;  %1286 = vrot.lane.b32.xlu0 %v906_v56, %s8164_s16  ;;  %v1441_v19 = vsel %vm1438_vm1, %v1439_v48, %v1440_v52  ;;  %v1699_v56 = vrot.slane %v13924_v26, 2  ;;  %v13926_v48 = vshll.u32 %v8328_v28, 16  ;;  %v1781_v26 = vsel %vm1694_vm2, %v1776_v31, %v1780_v49  ;;  %v8021_v31 = vld [vmem:[%s13928_s1 + $0x10] sm:$0xff]  }
 0x144   : > { %7493 = vmatprep.subr.bf16.mxu0 %v8021_v31 }
 0x145   : > { %v1696_v59 = vrot.slane %v13926_v48, 2  ;;  %v1700_v63 = vor.u32 %v1699_v56, %v1698_v11  ;;  %7494 = vmatpush3.bf16.msra.mxu0 %v8021_v31 }
 0x147   : > { %1988 = vrot.lane.b32.xlu1 %v1777_v5, %s8166_s18  ;;  %1288 = vrot.lane.b32.xlu0 %v914_v4, %s8164_s16  ;;  %v1782_v4 = vrot.slane %v13727_v14, 1  ;;  %v1783_v5 = vrot.slane %v911_v17, 2  ;;  %v1705_v56 = vsel %vm1694_vm2, %v1700_v63, %v8462_v36  ;;  %v2086_v36 = vsel %vm2078_vm3, %v8352_v44, %v1253_v38 }
 0x149   : > { %v1255_v21 = vpop.permute.xlu1 %1254  ;;  %v8766_v17 = vor.u32 %v1783_v5, %v1782_v4 }
 0x14a   : > { %v2088_v31 = vsel %vm2078_vm3, %v8381_v60, %v1255_v21 }
 0x14b   : > { %1248 = vrot.lane.b32.xlu1 %v754_v3, %s8164_s16  ;;  %1606 = vrot.lane.b32.xlu0 %v1481_v45, %s8165_s17  ;;  %v13925_v3 = vshrl.u32 %v8328_v28, 16  ;;  %v1785_v48 = vsel %vm1694_vm2, %v1780_v49, %v8766_v17 }
 0x14d   : > { %v1695_v45 = vrot.slane %v13925_v3, 1 }
 0x14f   : > { %1566 = vrot.lane.b32.xlu1 %v1441_v19, %s8165_s17  ;;  %1608 = vrot.lane.b32.xlu0 %v1483_v29, %s8165_s17  ;;  %v1697_v19 = vor.u32 %v1696_v59, %v1695_v45  ;;  %v1571_v29 = vpop.permute.xlu1 %1570  ;;  %v8022_v59 = vld [vmem:[%s13928_s1 + $0x8] sm:$0xff]  }
 0x150   : > { %7495 = vmatprep.subr.bf16.mxu0 %v8022_v59 }
 0x151   : > { %v1257_v6 = vpop.permute.xlu0 %1256  ;;  %v1701_v14 = vsel %vm1694_vm2, %v1697_v19, %v1700_v63  ;;  %7496 = vmatpush3.bf16.msra.mxu0 %v8022_v59  ;;  %v8023_v19 = vld [vmem:[%s13928_s1] sm:$0xff]   ;;  %s8177_s1 = smov [#allocation6]  }
 0x152   : > { %7497 = vmatprep.subr.bf16.mxu0 %v8023_v19 }
 0x153   : > { %1568 = vrot.lane.b32.xlu1 %v1443_v9, %s8165_s17  ;;  %1990 = vrot.lane.b32.xlu0 %v1781_v26, %s8166_s18  ;;  %v7852_v9 = vunpack.i.l.bf16 %v8642_v24 }
 0x155   : > { %v1573_v3 = vpop.permute.xlu0 %1572  ;;  %7498 = vmatpush3.bf16.msra.mxu0 %v8023_v19 }
 0x157   : > { %1950 = vrot.lane.b32.xlu1 %v1701_v14, %s8166_s18  ;;  %1992 = vrot.lane.b32.xlu0 %v1785_v48, %s8166_s18  ;;  %v2084_v14 = vsel %vm2078_vm3, %v8339_v35, %v1251_v2  ;;  %v2215_v35 = vsel %vm2207_vm4, %v2086_v36, %v1573_v3  ;;  %v7780_v3 = vunpack.i.h.bf16 %v8446_v47  ;;  %v7785_v48 = vunpack.i.h.bf16 %v8458_v12 }
 0x158   : > { %v2213_v49 = vsel %vm2207_vm4, %v2084_v14, %v1571_v29  ;;  %v8805_v29 = vpack.c.bf16 %v7852_v9, %v7847_v7  ;;  %v2090_v47 = vsel %vm2078_vm3, %v8399_v8, %v1257_v6  ;;  %v13931_v9 = vshrl.u32 %v8708_v33, 16 }
 0x159   : > { %v1259_v52 = vpop.permute.xlu1 %1258  ;;  %v1955_v11 = vpop.permute.xlu0 %1954  ;;  %v8818_v36 = vpack.c.bf16 %v7785_v48, %v7780_v3 }
 0x15a   : > { %v8785_v45 = vsel %vm2336_vm5, %v2213_v49, %v1955_v11  ;;  %13929 = vst [vmem:[#allocation46_spill] sm:$0xff] %v8805_v29  ;;  %v919_v59 = vshll.u32 %v8805_v29, 16  ;;  %v2092_v60 = vsel %vm2078_vm3, %v8417_v41, %v1259_v52  ;;  %v917_v19 = vor.u32 %v13931_v9, %v8723_v57 }
 0x15b   : > { %1952 = vrot.lane.b32.xlu1 %v1705_v56, %s8166_s18  ;;  %13930 = vst [vmem:[#allocation47_spill] sm:$0xff] %v8818_v36  ;;  %v923_v6 = vshrl.u32 %v8805_v29, 16  ;;  %v927_v52 = vshll.u32 %v8818_v36, 16 }
 0x15c   : > { %v921_v8 = vrot.slane %v919_v59, 1 }
 0x15d   : > { %v1575_v4 = vpop.permute.xlu1 %1574  ;;  %v1577_v5 = vpop.permute.xlu0 %1576 }
 0x15e   : > { %v2217_v11 = vsel %vm2207_vm4, %v2088_v31, %v1575_v4  ;;  %v2219_v12 = vsel %vm2207_vm4, %v2090_v47, %v1577_v5  ;;  %v922_v48 = vsel %vm734_vm0, %v917_v19, %v921_v8  ;;  %v925_v31 = vor.u32 %v923_v6, %v921_v8 }
 0x15f   : > { %2523 = vrot.lane.b32.xlu1 %v8785_v45, %s8167_s13  ;;  %v1791_v8 = vrot.slane %v927_v52, 2 }
 0x161   : > { %v1261_v2 = vpop.permute.xlu1 %1260  ;;  %v1957_v63 = vpop.permute.xlu0 %1956 }
 0x162   : > { %v8798_v26 = vsel %vm2336_vm5, %v2215_v35, %v1957_v63  ;;  %v2094_v41 = vsel %vm2078_vm3, %v8441_v30, %v1261_v2  ;;  %v1484_v30 = vrot.slane %v8805_v29, 1  ;;  %v929_v2 = vrot.slane %v927_v52, 1 }
 0x163   : > { %2525 = vrot.lane.b32.xlu0 %v8798_v26, %s8167_s13  ;;  %v7800_v52 = vunpack.i.h.bf16 %v8500_v16 }
 0x165   : > { %v1579_v44 = vpop.permute.xlu1 %1578  ;;  %v1581_v38 = vpop.permute.xlu0 %1580 }
 0x166   : > { %v2221_v21 = vsel %vm2207_vm4, %v2092_v60, %v1579_v44  ;;  %v2223_v5 = vsel %vm2207_vm4, %v2094_v41, %v1581_v38  ;;  %v931_v38 = vshrl.u32 %v8818_v36, 16  ;;  %v930_v60 = vsel %vm734_vm0, %v925_v31, %v929_v2 }
 0x167   : > { %v7795_v41 = vunpack.i.h.bf16 %v8487_v43 }
 0x168   : > { %v1790_v19 = vrot.slane %v931_v38, 1 }
 0x169   : > { %v1959_v56 = vpop.permute.xlu1 %1958  ;;  %v1963_v14 = vpop.permute.xlu0 %1962 }
 0x16a   : > { %v8813_v49 = vsel %vm2336_vm5, %v2217_v11, %v1959_v56  ;;  %v8827_v63 = vsel %vm2336_vm5, %v2221_v21, %v1963_v14  ;;  %v1786_v11 = vrot.slane %v923_v6, 1  ;;  %v1787_v56 = vrot.slane %v919_v59, 2 }
 0x16b   : > { %2641 = vrot.lane.b32.xlu1 %v8813_v49, %s13816_s25  ;;  %v7790_v59 = vunpack.i.h.bf16 %v8474_v62  ;;  %v1792_v31 = vor.u32 %v1791_v8, %v1790_v19  ;;  %v7805_v62 = vunpack.i.h.bf16 %v8514_v18  ;;  %v933_v8 = vor.u32 %v931_v38, %v929_v2 }
 0x16c   : > { %v1788_v9 = vor.u32 %v1787_v56, %v1786_v11 }
 0x16d   : > { %v1961_v4 = vpop.permute.xlu1 %1960  ;;  %v1263_v35 = vpop.permute.xlu0 %1262  ;;  %v8869_v11 = vpack.c.bf16 %v7795_v41, %v7790_v59 }
 0x16e   : > { %v8830_v7 = vsel %vm2336_vm5, %v2219_v12, %v1961_v4  ;;  %v13932_v12 = vrot.slane %v8708_v33, 1  ;;  %v1486_v4 = vrot.slane %v8818_v36, 1  ;;  %v2096_v18 = vsel %vm2078_vm3, %v8464_v42, %v1263_v35 }
 0x16f   : > { %2643 = vrot.lane.b32.xlu0 %v8830_v7, %s13816_s25  ;;  %2759 = vrot.lane.b32.xlu1 %v8827_v63, %s13814_s26  ;;  %13933 = vst [vmem:[#allocation48_spill] sm:$0xff] %v8869_v11  ;;  %v935_v16 = vshll.u32 %v8869_v11, 16  ;;  %v1488_v35 = vrot.slane %v8869_v11, 1 }
 0x170   : > { %v1485_v21 = vsel %vm1438_vm1, %v13932_v12, %v1484_v30 }
 0x171   : > { %v1965_v44 = vpop.permute.xlu1 %1964  ;;  %v1583_v3 = vpop.permute.xlu0 %1582  ;;  %v937_v59 = vrot.slane %v935_v16, 1 }
 0x172   : > { %v8845_v57 = vsel %vm2336_vm5, %v2223_v5, %v1965_v44  ;;  %v1487_v44 = vsel %vm1438_vm1, %v1484_v30, %v1486_v4 }
 0x173   : > { %2761 = vrot.lane.b32.xlu0 %v8845_v57, %s13814_s26  ;;  %1290 = vrot.lane.b32.xlu1 %v922_v48, %s8164_s16  ;;  %v1789_v48 = vsel %vm1694_vm2, %v8766_v17, %v1788_v9  ;;  %v8879_v17 = vpack.c.bf16 %v7805_v62, %v7800_v52 }
 0x175   : > { %v1265_v14 = vpop.permute.xlu1 %1264  ;;  %v1967_v47 = vpop.permute.xlu0 %1966  ;;  %13934 = vst [vmem:[#allocation49_spill] sm:$0xff] %v8879_v17  ;;  %v943_v41 = vshll.u32 %v8879_v17, 16  ;;  %v947_v36 = vshrl.u32 %v8879_v17, 16 }
 0x176   : > { %v2098_v42 = vsel %vm2078_vm3, %v8491_v20, %v1265_v14 }
 0x177   : > { %1292 = vrot.lane.b32.xlu0 %v930_v60, %s8164_s16  ;;  %1610 = vrot.lane.b32.xlu1 %v1485_v21, %s8165_s17  ;;  %v1793_v60 = vsel %vm1694_vm2, %v1788_v9, %v1792_v31  ;;  %v2225_v21 = vsel %vm2207_vm4, %v2096_v18, %v1583_v3  ;;  %v945_v62 = vrot.slane %v943_v41, 1 }
 0x179   : > { %v1585_v6 = vpop.permute.xlu1 %1584  ;;  %v8862_v5 = vpop.permute.xlu0 %1266 }
 0x17a   : > { %v2227_v3 = vsel %vm2207_vm4, %v2098_v42, %v1585_v6  ;;  %v1489_v6 = vsel %vm1438_vm1, %v1486_v4, %v1488_v35  ;;  %v7810_v42 = vunpack.i.h.bf16 %v8527_v51 }
 0x17b   : > { %1612 = vrot.lane.b32.xlu0 %v1487_v44, %s8165_s17  ;;  %1994 = vrot.lane.b32.xlu1 %v1789_v48, %s8166_s18  ;;  %v8899_v44 = vsel %vm2336_vm5, %v2225_v21, %v1967_v47  ;;  %v939_v48 = vshrl.u32 %v8869_v11, 16  ;;  %v938_v47 = vsel %vm734_vm0, %v933_v8, %v937_v59  ;;  %v1795_v21 = vrot.slane %v935_v16, 2 }
 0x17c   : > { %v1490_v8 = vrot.slane %v8879_v17, 1  ;;  %v1799_v16 = vrot.slane %v943_v41, 2 }
 0x17d   : > { %v1969_v43 = vpop.permute.xlu1 %1968  ;;  %v8873_v56 = vpop.permute.xlu0 %1586  ;;  %v941_v52 = vor.u32 %v939_v48, %v937_v59  ;;  %v1794_v18 = vrot.slane %v939_v48, 1  ;;  %v1798_v48 = vrot.slane %v947_v36, 1 }
 0x17e   : > { %v1491_v4 = vsel %vm1438_vm1, %v1488_v35, %v1490_v8 }
 0x17f   : > { %1996 = vrot.lane.b32.xlu0 %v1793_v60, %s8166_s18  ;;  %2527 = vrot.lane.b32.xlu1 %v8813_v49, %s8167_s13  ;;  %v8916_v60 = vsel %vm2336_vm5, %v2227_v3, %v1969_v43  ;;  %v946_v43 = vsel %vm734_vm0, %v941_v52, %v945_v62  ;;  %v1796_v59 = vor.u32 %v1795_v21, %v1794_v18  ;;  %v7815_v3 = vunpack.i.h.bf16 %v8540_v61 }
 0x180   : > { %13935 = vst [vmem:[#allocation50_spill] sm:$0xff] %v8916_v60  ;;  %v8939_v52 = vor.u32 %v1799_v16, %v1798_v48  ;;  %v7820_v61 = vunpack.i.h.bf16 %v8552_v34  ;;  %v7825_v21 = vunpack.i.h.bf16 %v8565_v39  ;;  %v8004_v34 = vunpack.i.h.bf16 %v8600_v46 }
 0x181   : > { %v8881_v30 = vpop.permute.xlu1 %1268  ;;  %v8883_v12 = vpop.permute.xlu0 %1970  ;;  %v1797_v17 = vsel %vm1694_vm2, %v1792_v31, %v1796_v59  ;;  %v8943_v41 = vpack.c.bf16 %v7815_v3, %v7810_v42  ;;  %v8009_v39 = vunpack.i.h.bf16 %v8611_v58  ;;  %v949_v3 = vor.u32 %v947_v36, %v945_v62 }
 0x182   : > { %v1801_v35 = vsel %vm1694_vm2, %v1796_v59, %v8939_v52  ;;  %v2100_v59 = vsel %vm2078_vm3, %v8518_v0, %v8862_v5  ;;  %v2102_v36 = vsel %vm2078_vm3, %v8534_v54, %v8881_v30 }
 0x183   : > { %2529 = vrot.lane.b32.xlu0 %v8830_v7, %s8167_s13  ;;  %2645 = vrot.lane.b32.xlu1 %v8827_v63, %s13816_s25  ;;  %13936 = vst [vmem:[#allocation51_spill] sm:$0xff] %v8943_v41  ;;  %v2229_v48 = vsel %vm2207_vm4, %v2100_v59, %v8873_v56  ;;  %v8988_v0 = vpack.c.bf16 %v8009_v39, %v8004_v34  ;;  %v1492_v5 = vrot.slane %v8943_v41, 1 }
 0x185   : > { %v8893_v9 = vpop.permute.xlu1 %1588  ;;  %v8895_v19 = vpop.permute.xlu0 %1270  ;;  %13939 = vst [vmem:[#allocation54_spill] sm:$0xff] %v8988_v0 }
 0x186   : > { %v2231_v56 = vsel %vm2207_vm4, %v2102_v36, %v8893_v9 }
 0x187   : > { %2647 = vrot.lane.b32.xlu0 %v8845_v57, %s13816_s25  ;;  %2763 = vrot.lane.b32.xlu1 %v8899_v44, %s13814_s26 }
 0x189   : > { %v8910_v2 = vpop.permute.xlu1 %1972  ;;  %v8912_v38 = vpop.permute.xlu0 %1590 }
 0x18a   : > { %v9003_v34 = vsel %vm2336_vm5, %v2231_v56, %v8910_v2  ;;  %v13736_v2 = vshll.u32 %v8988_v0, 16 }
 0x18b   : > { %2765 = vrot.lane.b32.xlu0 %v8916_v60, %s13814_s26  ;;  %1294 = vrot.lane.b32.xlu1 %v938_v47, %s8164_s16  ;;  %13940 = vst [vmem:[#allocation55_spill] sm:$0xff] %v9003_v34 }
 0x18d   : > { %v8922_v20 = vpop.permute.xlu1 %1272  ;;  %v8924_v14 = vpop.permute.xlu0 %1974 }
 0x18f   : > { %1296 = vrot.lane.b32.xlu0 %v946_v43, %s8164_s16  ;;  %1614 = vrot.lane.b32.xlu1 %v1489_v6, %s8165_s17  ;;  %v951_v6 = vshll.u32 %v8943_v41, 16  ;;  %v8961_v43 = vpack.c.bf16 %v7825_v21, %v7820_v61  ;;  %v955_v61 = vshrl.u32 %v8943_v41, 16  ;;  %v8981_v21 = vsel %vm2336_vm5, %v2229_v48, %v8883_v12 }
 0x190   : > { %13938 = vst [vmem:[#allocation53_spill] sm:$0xff] %v8981_v21 }
 0x191   : > { %v8933_v47 = vpop.permute.xlu1 %1592  ;;  %v8935_v11 = vpop.permute.xlu0 %1274  ;;  %13937 = vst [vmem:[#allocation52_spill] sm:$0xff] %v8961_v43  ;;  %v1802_v48 = vrot.slane %v955_v61, 1  ;;  %v1803_v58 = vrot.slane %v951_v6, 2  ;;  %v963_v54 = vshrl.u32 %v8961_v43, 16 }
 0x193   : > { %1616 = vrot.lane.b32.xlu0 %v1491_v4, %s8165_s17  ;;  %1998 = vrot.lane.b32.xlu1 %v1797_v17, %s8166_s18  ;;  %v953_v4 = vrot.slane %v951_v6, 1  ;;  %v1494_v6 = vrot.slane %v8961_v43, 1  ;;  %v1806_v36 = vrot.slane %v963_v54, 1 }
 0x195   : > { %v8945_v18 = vpop.permute.xlu1 %1976  ;;  %v8947_v51 = vpop.permute.xlu0 %1594  ;;  %v954_v59 = vsel %vm734_vm0, %v949_v3, %v953_v4  ;;  %v957_v39 = vor.u32 %v955_v61, %v953_v4  ;;  %v1493_v3 = vsel %vm1438_vm1, %v1490_v8, %v1492_v5  ;;  %v1804_v61 = vor.u32 %v1803_v58, %v1802_v48 }
 0x196   : > { %v9026_v8 = vrot.slane %v13736_v2, 1  ;;  %v7835_v58 = vunpack.i.h.bf16 %v8589_v1 }
 0x197   : > { %2000 = vrot.lane.b32.xlu0 %v1801_v35, %s8166_s18  ;;  %2531 = vrot.lane.b32.xlu1 %v8827_v63, %s8167_s13  ;;  %v959_v35 = vshll.u32 %v8961_v43, 16  ;;  %v13737_v43 = vshrl.u32 %v8988_v0, 16  ;;  %v1805_v48 = vsel %vm1694_vm2, %v8939_v52, %v1804_v61  ;;  %v7855_v0 = vunpack.i.h.bf16 %v8642_v24 }
 0x198   : > { %13941 = vst [vmem:[#allocation56_spill] sm:$0xff] %v9026_v8  ;;  %v7859_v24 = vunpack.i.l.bf16 %v8301_v13 }
 0x199   : > { %v8956_v31 = vpop.permute.xlu1 %1276  ;;  %v8958_v17 = vpop.permute.xlu0 %1978  ;;  %v961_v46 = vrot.slane %v959_v35, 1  ;;  %v1807_v56 = vrot.slane %v959_v35, 2  ;;  %v1495_v35 = vsel %vm1438_vm1, %v1492_v5, %v1494_v6 }
 0x19b   : > { %2533 = vrot.lane.b32.xlu0 %v8845_v57, %s8167_s13  ;;  %2649 = vrot.lane.b32.xlu1 %v8899_v44, %s13816_s25  ;;  %v962_v4 = vsel %vm734_vm0, %v957_v39, %v961_v46  ;;  %v1808_v39 = vor.u32 %v1807_v56, %v1806_v36 }
 0x19d   : > { %v8974_v16 = vpop.permute.xlu1 %1596  ;;  %v8976_v42 = vpop.permute.xlu0 %1278  ;;  %v1809_v52 = vsel %vm1694_vm2, %v1804_v61, %v1808_v39 }
 0x19f   : > { %2651 = vrot.lane.b32.xlu0 %v8916_v60, %s13816_s25  ;;  %2767 = vrot.lane.b32.xlu1 %v8981_v21, %s13814_s26 }
 0x1a1   : > { %v8996_v12 = vpop.permute.xlu1 %1980  ;;  %v8998_v62 = vpop.permute.xlu0 %1598 }
 0x1a3   : > { %2769 = vrot.lane.b32.xlu0 %v9003_v34, %s13814_s26  ;;  %1298 = vrot.lane.b32.xlu1 %v954_v59, %s8164_s16  ;;  %v7830_v59 = vunpack.i.h.bf16 %v8578_v50  ;;  %v9038_v50 = vor.u32 %v13737_v43, %v9026_v8 }
 0x1a5   : > { %v9009_v30 = vpop.permute.xlu1 %1280  ;;  %v9011_v9 = vpop.permute.xlu0 %1982  ;;  %13942 = vst [vmem:[#allocation57_spill] sm:$0xff] %v9038_v50  ;;  %v9044_v5 = vpack.c.bf16 %v7835_v58, %v7830_v59 }
 0x1a7   : > { %1300 = vrot.lane.b32.xlu0 %v962_v4, %s8164_s16  ;;  %1618 = vrot.lane.b32.xlu1 %v1493_v3, %s8165_s17  ;;  %v7840_v3 = vunpack.i.h.bf16 %v8604_v40  ;;  %v7845_v4 = vunpack.i.h.bf16 %v8616_v37  ;;  %13943 = vst [vmem:[#allocation58_spill] sm:$0xff] %v9044_v5  ;;  %v967_v40 = vshll.u32 %v9044_v5, 16  ;;  %v2104_v37 = vsel %vm2078_vm3, %v8556_v53, %v8895_v19 }
 0x1a8   : > { %v2233_v61 = vsel %vm2207_vm4, %v2104_v37, %v8912_v38  ;;  %v2106_v53 = vsel %vm2078_vm3, %v8570_v22, %v8922_v20  ;;  %v1496_v19 = vrot.slane %v9044_v5, 1 }
 0x1a9   : > { %v9020_v41 = vpop.permute.xlu1 %1600  ;;  %v9022_v29 = vpop.permute.xlu0 %1282  ;;  %v9052_v56 = vpack.c.bf16 %v7845_v4, %v7840_v3  ;;  %v9074_v4 = vsel %vm2336_vm5, %v2233_v61, %v8924_v14  ;;  %v969_v2 = vrot.slane %v967_v40, 1  ;;  %v2235_v38 = vsel %vm2207_vm4, %v2106_v53, %v8933_v47 }
 0x1aa   : > { %13945 = vst [vmem:[#allocation60_spill] sm:$0xff] %v9074_v4  ;;  %v9090_v61 = vsel %vm2336_vm5, %v2235_v38, %v8945_v18  ;;  %v1497_v47 = vsel %vm1438_vm1, %v1494_v6, %v1496_v19 }
 0x1ab   : > { %1620 = vrot.lane.b32.xlu0 %v1495_v35, %s8165_s17  ;;  %2002 = vrot.lane.b32.xlu1 %v1805_v48, %s8166_s18  ;;  %13944 = vst [vmem:[#allocation59_spill] sm:$0xff] %v9052_v56  ;;  %v971_v48 = vshrl.u32 %v9044_v5, 16  ;;  %v975_v3 = vshll.u32 %v9052_v56, 16  ;;  %13946 = vst [vmem:[#allocation61_spill] sm:$0xff] %v9090_v61  ;;  %v979_v8 = vshrl.u32 %v9052_v56, 16 }
 0x1ad   : > { %v9042_v1 = vpop.permute.xlu1 %1984  ;;  %v9047_v36 = vpop.permute.xlu0 %1602  ;;  %v977_v14 = vrot.slane %v975_v3, 1  ;;  %v973_v50 = vor.u32 %v971_v48, %v969_v2 }
 0x1af   : > { %2004 = vrot.lane.b32.xlu0 %v1809_v52, %s8166_s18  ;;  %2535 = vrot.lane.b32.xlu1 %v8899_v44, %s8167_s13  ;;  %v965_v52 = vor.u32 %v963_v54, %v961_v46  ;;  %v1810_v46 = vrot.slane %v971_v48, 1  ;;  %v1811_v54 = vrot.slane %v967_v40, 2  ;;  %v1498_v40 = vrot.slane %v9052_v56, 1 }
 0x1b0   : > { %v978_v18 = vsel %vm734_vm0, %v973_v50, %v977_v14  ;;  %v7850_v48 = vunpack.i.h.bf16 %v8626_v10 }
 0x1b1   : > { %v9054_v35 = vpop.permute.xlu1 %1284  ;;  %v9066_v59 = vpop.permute.xlu0 %1986  ;;  %v970_v43 = vsel %vm734_vm0, %v965_v52, %v969_v2  ;;  %v1812_v53 = vor.u32 %v1811_v54, %v1810_v46  ;;  %v1814_v52 = vrot.slane %v979_v8, 1  ;;  %v1815_v2 = vrot.slane %v975_v3, 2 }
 0x1b2   : > { %v1499_v6 = vsel %vm1438_vm1, %v1496_v19, %v1498_v40  ;;  %v9116_v3 = vpack.c.bf16 %v7855_v0, %v7850_v48 }
 0x1b3   : > { %2537 = vrot.lane.b32.xlu0 %v8916_v60, %s8167_s13  ;;  %2653 = vrot.lane.b32.xlu1 %v8981_v21, %s13816_s25  ;;  %v1813_v56 = vsel %vm1694_vm2, %v1808_v39, %v1812_v53  ;;  %v1816_v50 = vor.u32 %v1815_v2, %v1814_v52  ;;  %v7864_v39 = vunpack.i.l.bf16 %v8305_v15  ;;  %v981_v2 = vor.u32 %v979_v8, %v977_v14 }
 0x1b4   : > { %13947 = vst [vmem:[#allocation62_spill] sm:$0xff] %v9116_v3  ;;  %v983_v19 = vshll.u32 %v9116_v3, 16 }
 0x1b5   : > { %v9068_v58 = vpop.permute.xlu1 %1604  ;;  %v9094_v22 = vpop.permute.xlu0 %1286  ;;  %v1817_v46 = vsel %vm1694_vm2, %v1812_v53, %v1816_v50  ;;  %v9133_v0 = vpack.c.bf16 %v7864_v39, %v7859_v24 }
 0x1b6   : > { %v985_v48 = vrot.slane %v983_v19, 1 }
 0x1b7   : > { %2655 = vrot.lane.b32.xlu0 %v9003_v34, %s13816_s25  ;;  %2771 = vrot.lane.b32.xlu1 %v9074_v4, %s13814_s26  ;;  %13948 = vst [vmem:[#allocation63_spill] sm:$0xff] %v9133_v0 }
 0x1b8   : > { %v986_v14 = vsel %vm734_vm0, %v981_v2, %v985_v48 }
 0x1b9   : > { %v9086_v37 = vpop.permute.xlu1 %1988  ;;  %v9107_v38 = vpop.permute.xlu0 %1288 }
 0x1bb   : > { %2773 = vrot.lane.b32.xlu0 %v9090_v61, %s13814_s26  ;;  %1302 = vrot.lane.b32.xlu1 %v970_v43, %s8164_s16 }
 0x1bd   : > { %v9099_v20 = vpop.permute.xlu1 %1248  ;;  %v9119_v10 = vpop.permute.xlu0 %1606 }
 0x1bf   : > { %1304 = vrot.lane.b32.xlu0 %v978_v18, %s8164_s16  ;;  %1622 = vrot.lane.b32.xlu1 %v1497_v47, %s8165_s17 }
 0x1c1   : > { %v9109_v43 = vpop.permute.xlu1 %1566  ;;  %v9140_v18 = vpop.permute.xlu0 %1608 }
 0x1c3   : > { %1624 = vrot.lane.b32.xlu0 %v1499_v6, %s8165_s17  ;;  %2006 = vrot.lane.b32.xlu1 %v1813_v56, %s8166_s18  ;;  %v2108_v56 = vsel %vm2078_vm3, %v8594_v25, %v8935_v11  ;;  %v13950_v25 = vld [vmem:[#allocation38_spill] sm:$0xff]  ;;  %v991_v6 = vshll.u32 %v9133_v0, 16 }
 0x1c4   : > { %v2237_v47 = vsel %vm2207_vm4, %v2108_v56, %v8947_v51  ;;  %v2110_v11 = vsel %vm2078_vm3, %v13950_v25, %v8956_v31  ;;  %v987_v51 = vshrl.u32 %v9116_v3, 16  ;;  %v1500_v31 = vrot.slane %v9116_v3, 1 }
 0x1c5   : > { %v9121_v54 = vpop.permute.xlu1 %1568  ;;  %v9144_v52 = vsel %vm2336_vm5, %v2237_v47, %v8958_v17  ;;  %v2239_v17 = vsel %vm2207_vm4, %v2110_v11, %v8974_v16  ;;  %v9162_v24 = vpop.permute.xlu0 %1990  ;;  %v993_v56 = vrot.slane %v991_v6, 1  ;;  %v1819_v16 = vrot.slane %v983_v19, 2 }
 0x1c6   : > { %13949 = vst [vmem:[#allocation64_spill] sm:$0xff] %v9144_v52  ;;  %v9159_v8 = vsel %vm2336_vm5, %v2239_v17, %v8996_v12  ;;  %v1818_v47 = vrot.slane %v987_v51, 1  ;;  %v995_v25 = vshrl.u32 %v9133_v0, 16  ;;  %v1501_v2 = vsel %vm1438_vm1, %v1498_v40, %v1500_v31 }
 0x1c7   : > { %2008 = vrot.lane.b32.xlu0 %v1817_v46, %s8166_s18  ;;  %2539 = vrot.lane.b32.xlu1 %v8981_v21, %s8167_s13  ;;  %13951 = vst [vmem:[#allocation38_spill] sm:$0xff] %v9159_v8  ;;  %v989_v46 = vor.u32 %v987_v51, %v985_v48  ;;  %v13745_v48 = vrot.slane %v9133_v0, 1 }
 0x1c8   : > { %v1820_v11 = vor.u32 %v1819_v16, %v1818_v47  ;;  %v1822_v17 = vrot.slane %v995_v25, 1 }
 0x1c9   : > { %v1951_v53 = vpop.permute.xlu1 %1950  ;;  %v994_v12 = vsel %vm734_vm0, %v989_v46, %v993_v56  ;;  %v9174_v5 = vpop.permute.xlu0 %1992  ;;  %v1503_v19 = vsel %vm1438_vm1, %v1500_v31, %v13745_v48  ;;  %v13952_v46 = vld [vmem:[#allocation11_spill] sm:$0xff] }
 0x1ca   : > { %v1821_v51 = vsel %vm1694_vm2, %v1816_v50, %v1820_v11  ;;  %v7869_v40 = vunpack.i.l.bf16 %v13952_v46  ;;  %v13955_v50 = vld [vmem:[#allocation14_spill] sm:$0xff] }
 0x1cb   : > { %2541 = vrot.lane.b32.xlu0 %v9003_v34, %s8167_s13  ;;  %2657 = vrot.lane.b32.xlu1 %v9074_v4, %s13816_s25  ;;  %v13953_v34 = vld [vmem:[#allocation12_spill] sm:$0xff]  ;;  %v7884_v21 = vunpack.i.l.bf16 %v13955_v50 }
 0x1cd   : > { %v1953_v39 = vpop.permute.xlu1 %1952 }
 0x1cf   : > { %2659 = vrot.lane.b32.xlu0 %v9090_v61, %s13816_s25  ;;  %2775 = vrot.lane.b32.xlu1 %v9144_v52, %s13814_s26 }
 0x1d1   : > { %v2524_v3 = vpop.permute.xlu1 %2523 }
 0x1d3   : > { %2777 = vrot.lane.b32.xlu0 %v9159_v8, %s13814_s26  ;;  %1306 = vrot.lane.b32.xlu1 %v986_v14, %s8164_s16  ;;  %v1823_v14 = vrot.slane %v991_v6, 2  ;;  %v13954_v6 = vld [vmem:[#allocation13_spill] sm:$0xff] }
 0x1d4   : > { %v7879_v16 = vunpack.i.l.bf16 %v13954_v6 }
 0x1d5   : > { %v9184_v47 = vor.u32 %v1823_v14, %v1822_v17  ;;  %v2526_v31 = vpop.permute.xlu0 %2525 }
 0x1d7   : > { %1308 = vrot.lane.b32.xlu0 %v994_v12, %s8164_s16  ;;  %1626 = vrot.lane.b32.xlu1 %v1501_v2, %s8165_s17  ;;  %v7874_v12 = vunpack.i.l.bf16 %v13953_v34  ;;  %v2080_v2 = vsel %vm2078_vm3, %v8328_v28, %v8746_v23  ;;  %v2082_v23 = vsel %vm2078_vm3, %v8334_v32, %v9099_v20 }
 0x1d8   : > { %v2209_v60 = vsel %vm2207_vm4, %v2080_v2, %v9109_v43 }
 0x1d9   : > { %v9195_v17 = vpack.c.bf16 %v7874_v12, %v7869_v40  ;;  %v2338_v14 = vsel %vm2336_vm5, %v2209_v60, %v1951_v53  ;;  %v9206_v40 = vpack.c.bf16 %v7884_v21, %v7879_v16  ;;  %v2211_v60 = vsel %vm2207_vm4, %v2082_v23, %v9121_v54  ;;  %v13958_v21 = vld [vmem:[#allocation41_spill] sm:$0xff]  ;;  %v13959_v23 = vld [vmem:[#allocation43_spill] sm:$0xff] }
 0x1da   : > { %v2877_v28 = vsel %vm2875_vm6, %v2338_v14, %v2524_v3  ;;  %v2340_v12 = vsel %vm2336_vm5, %v2211_v60, %v1953_v39  ;;  %v2112_v3 = vsel %vm2078_vm3, %v13958_v21, %v8976_v42  ;;  %v997_v42 = vor.u32 %v995_v25, %v993_v56 }
 0x1db   : > { %1628 = vrot.lane.b32.xlu0 %v1503_v19, %s8165_s17  ;;  %2010 = vrot.lane.b32.xlu1 %v1821_v51, %s8166_s18  ;;  %v1825_v19 = vsel %vm1694_vm2, %v1820_v11, %v9184_v47  ;;  %13956 = vst [vmem:[#allocation11_spill] sm:$0xff] %v9195_v17  ;;  %13957 = vst [vmem:[#allocation12_spill] sm:$0xff] %v9206_v40  ;;  %v999_v32 = vshll.u32 %v9195_v17, 16  ;;  %v2879_v20 = vsel %vm2875_vm6, %v2340_v12, %v2526_v31 }
 0x1dc   : > { %v2241_v16 = vsel %vm2207_vm4, %v2112_v3, %v8998_v62  ;;  %v2114_v62 = vsel %vm2078_vm3, %v13959_v23, %v9009_v30  ;;  %v1011_v60 = vshrl.u32 %v9206_v40, 16  ;;  %v13749_v3 = vrot.slane %v9206_v40, 1 }
 0x1dd   : > { %v2642_v48 = vpop.permute.xlu1 %2641  ;;  %v9231_v31 = vsel %vm2336_vm5, %v2241_v16, %v9011_v9  ;;  %v1001_v14 = vrot.slane %v999_v32, 1  ;;  %v2243_v9 = vsel %vm2207_vm4, %v2114_v62, %v9020_v41  ;;  %v1827_v12 = vrot.slane %v999_v32, 2  ;;  %v13961_v62 = vld [vmem:[#allocation15_spill] sm:$0xff] }
 0x1de   : > { %v2994_v43 = vsel %vm2992_vm7, %v2877_v28, %v2642_v48  ;;  %v1003_v28 = vshrl.u32 %v9195_v17, 16  ;;  %v9250_v56 = vsel %vm2336_vm5, %v2243_v9, %v9042_v1  ;;  %v13960_v16 = vrot.slane %v9133_v0, 1  ;;  %v13962_v9 = vld [vmem:[#allocation16_spill] sm:$0xff] }
 0x1df   : > { %2012 = vrot.lane.b32.xlu0 %v1825_v19, %s8166_s18  ;;  %2543 = vrot.lane.b32.xlu1 %v9074_v4, %s8167_s13  ;;  %v1007_v19 = vshll.u32 %v9206_v40, 16  ;;  %v1002_v30 = vsel %vm734_vm0, %v997_v42, %v1001_v14 }
 0x1e0   : > { %v1005_v25 = vor.u32 %v1003_v28, %v1001_v14  ;;  %v1826_v41 = vrot.slane %v1003_v28, 1 }
 0x1e1   : > { %v2760_v11 = vpop.permute.xlu1 %2759  ;;  %v2644_v51 = vpop.permute.xlu0 %2643 }
 0x1e2   : > { %v3111_v53 = vsel %vm13855_vm8, %v2994_v43, %v2760_v11  ;;  %v2996_v54 = vsel %vm2992_vm7, %v2879_v20, %v2644_v51  ;;  %v1009_v51 = vrot.slane %v1007_v19, 1  ;;  %v1828_v42 = vor.u32 %v1827_v12, %v1826_v41 }
 0x1e3   : > { %7499 = vmatprep.mubr.msk.bf16.mxu0 %vm3257_vm9, %v3111_v53  ;;  %2545 = vrot.lane.b32.xlu0 %v9090_v61, %s8167_s13  ;;  %v1504_v53 = vrot.slane %v9195_v17, 1 }
 0x1e4   : > { %2661 = vrot.lane.b32.xlu1 %v9144_v52, %s13816_s25  ;;  %v1010_v1 = vsel %vm734_vm0, %v1005_v25, %v1009_v51  ;;  %v7894_v25 = vunpack.i.l.bf16 %v13962_v9 }
 0x1e5   : > { %v9223_v48 = vpop.permute.xlu1 %1290  ;;  %v2762_v39 = vpop.permute.xlu0 %2761  ;;  %v1507_v28 = vsel %vm1438_vm1, %v1504_v53, %v13749_v3 }
 0x1e6   : > { %v3113_v2 = vsel %vm13855_vm8, %v2996_v54, %v2762_v39  ;;  %v1830_v54 = vrot.slane %v1011_v60, 1  ;;  %v1831_v39 = vrot.slane %v1007_v19, 2  ;;  %v7889_v19 = vunpack.i.l.bf16 %v13961_v62 }
 0x1e7   : > { %2663 = vrot.lane.b32.xlu0 %v9159_v8, %s13816_s25  ;;  %7500 = vmatmul.mubr.msk.bf16.vlgmr.msra.gmra.mxu0 %vm3257_vm9, %v3113_v2  ;;  %v1505_v2 = vsel %vm1438_vm1, %v13960_v16, %v1504_v53 }
 0x1e8   : > { %2779 = vrot.lane.b32.xlu1 %v9231_v31, %s13814_s26  ;;  %v9274_v23 = vor.u32 %v1831_v39, %v1830_v54  ;;  %v9286_v54 = vpack.c.bf16 %v7894_v25, %v7889_v19 }
 0x1e9   : > { %v9244_v43 = vpop.permute.xlu1 %1610  ;;  %v9246_v11 = vpop.permute.xlu0 %1292 }
 0x1ea   : > { %v1833_v53 = vsel %vm1694_vm2, %v1828_v42, %v9274_v23  ;;  %13965 = vst [vmem:[#allocation13_spill] sm:$0xff] %v9286_v54 }
 0x1eb   : > { %2781 = vrot.lane.b32.xlu0 %v9250_v56, %s13814_s26 }
 0x1ec   : > { %1310 = vrot.lane.b32.xlu1 %v1002_v30, %s8164_s16  ;;  %v1829_v30 = vsel %vm1694_vm2, %v9184_v47, %v1828_v42  ;;  %v1015_v42 = vshll.u32 %v9286_v54, 16 }
 0x1ed   : > { %v9258_v20 = vpop.permute.xlu1 %1994  ;;  %v9260_v21 = vpop.permute.xlu0 %1612 }
 0x1ef   : > { %1312 = vrot.lane.b32.xlu0 %v1010_v1, %s8164_s16  ;;  %v13963_v1 = vld [vmem:[#allocation17_spill] sm:$0xff] }
 0x1f0   : > { %1630 = vrot.lane.b32.xlu1 %v1505_v2, %s8165_s17  ;;  %v7899_v16 = vunpack.i.l.bf16 %v13963_v1  ;;  %v13964_v2 = vld [vmem:[#allocation18_spill] sm:$0xff] }
 0x1f1   : > { %v2528_v32 = vpop.permute.xlu1 %2527  ;;  %v9269_v14 = vpop.permute.xlu0 %1996  ;;  %v7904_v17 = vunpack.i.l.bf16 %v13964_v2 }
 0x1f2   : > { %v2881_v39 = vsel %vm2875_vm6, %v8785_v45, %v2528_v32  ;;  %v13966_v32 = vld [vmem:[#allocation44_spill] sm:$0xff] }
 0x1f3   : > { %1632 = vrot.lane.b32.xlu0 %v1507_v28, %s8165_s17  ;;  %v9294_v3 = vpack.c.bf16 %v7904_v17, %v7899_v16  ;;  %v2116_v17 = vsel %vm2078_vm3, %v13966_v32, %v9022_v29  ;;  %v1013_v29 = vor.u32 %v1011_v60, %v1009_v51 }
 0x1f4   : > { %2014 = vrot.lane.b32.xlu1 %v1829_v30, %s8166_s18 }
 0x1f5   : > { %v2646_v41 = vpop.permute.xlu1 %2645  ;;  %v2530_v12 = vpop.permute.xlu0 %2529  ;;  %v1027_v32 = vshrl.u32 %v9294_v3, 16 }
 0x1f6   : > { %v2998_v47 = vsel %vm2992_vm7, %v2881_v39, %v2646_v41  ;;  %v2883_v45 = vsel %vm2875_vm6, %v8798_v26, %v2530_v12  ;;  %v1017_v12 = vrot.slane %v1015_v42, 1  ;;  %v1019_v39 = vshrl.u32 %v9286_v54, 16 }
 0x1f7   : > { %2016 = vrot.lane.b32.xlu0 %v1833_v53, %s8166_s18  ;;  %v1023_v53 = vshll.u32 %v9294_v3, 16 }
 0x1f8   : > { %2547 = vrot.lane.b32.xlu1 %v9144_v52, %s8167_s13  ;;  %v1021_v60 = vor.u32 %v1019_v39, %v1017_v12  ;;  %v13972_v52 = vld [vmem:[#allocation22_spill] sm:$0xff] }
 0x1f9   : > { %v2764_v28 = vpop.permute.xlu1 %2763  ;;  %v2648_v30 = vpop.permute.xlu0 %2647  ;;  %v7924_v61 = vunpack.i.l.bf16 %v13972_v52 }
 0x1fa   : > { %v3115_v0 = vsel %vm13855_vm8, %v2998_v47, %v2764_v28  ;;  %v3000_v19 = vsel %vm2992_vm7, %v2883_v45, %v2648_v30  ;;  %v13967_v47 = vld [vmem:[#allocation45_spill] sm:$0xff]  ;;  %v1025_v45 = vrot.slane %v1023_v53, 1 }
 0x1fb   : > { %2549 = vrot.lane.b32.xlu0 %v9159_v8, %s8167_s13  ;;  %7503 = vmatprep.mubr.msk.bf16.mxu0 %vm3257_vm9, %v3115_v0  ;;  %v2245_v0 = vsel %vm2207_vm4, %v2116_v17, %v9047_v36  ;;  %v2118_v36 = vsel %vm2078_vm3, %v13967_v47, %v9054_v35  ;;  %v1018_v35 = vsel %vm734_vm0, %v1013_v29, %v1017_v12  ;;  %v1508_v17 = vrot.slane %v9286_v54, 1  ;;  %v13969_v54 = vld [vmem:[#allocation19_spill] sm:$0xff]  ;;  %v13970_v8 = vld [vmem:[#allocation20_spill] sm:$0xff] }
 0x1fc   : > { %2665 = vrot.lane.b32.xlu1 %v9231_v31, %s13816_s25  ;;  %v9317_v26 = vsel %vm2336_vm5, %v2245_v0, %v9066_v59  ;;  %v2247_v59 = vsel %vm2207_vm4, %v2118_v36, %v9068_v58  ;;  %v1834_v58 = vrot.slane %v1019_v39, 1  ;;  %v1838_v47 = vrot.slane %v1027_v32, 1 }
 0x1fd   : > { %v9309_v25 = vpop.permute.xlu1 %1294  ;;  %v2766_v41 = vpop.permute.xlu0 %2765  ;;  %v9336_v51 = vsel %vm2336_vm5, %v2247_v59, %v9086_v37  ;;  %v1026_v37 = vsel %vm734_vm0, %v1021_v60, %v1025_v45  ;;  %v1839_v36 = vrot.slane %v1023_v53, 2  ;;  %v13968_v29 = vrot.slane %v9206_v40, 1 }
 0x1fe   : > { %v3117_v16 = vsel %vm13855_vm8, %v3000_v19, %v2766_v41  ;;  %v1835_v19 = vrot.slane %v1015_v42, 2  ;;  %v7909_v53 = vunpack.i.l.bf16 %v13969_v54 }
 0x1ff   : > { %2667 = vrot.lane.b32.xlu0 %v9250_v56, %s13816_s25  ;;  %7504 = vmatmul.mubr.msk.bf16.gmra.mxu0 %vm3257_vm9, %v3117_v16  ;;  %v13756_v16 = vrot.slane %v9294_v3, 1  ;;  %v1509_v12 = vsel %vm1438_vm1, %v13968_v29, %v1508_v17 }
 0x200   : > { %2783 = vrot.lane.b32.xlu1 %v9317_v26, %s13814_s26  ;;  %v1836_v39 = vor.u32 %v1835_v19, %v1834_v58 }
 0x201   : > { %v9330_v28 = vpop.permute.xlu1 %1614  ;;  %v9332_v30 = vpop.permute.xlu0 %1296  ;;  %v1511_v60 = vsel %vm1438_vm1, %v1508_v17, %v13756_v16 }
 0x202   : > { %v1837_v58 = vsel %vm1694_vm2, %v9274_v23, %v1836_v39 }
 0x203   : > { %2785 = vrot.lane.b32.xlu0 %v9336_v51, %s13814_s26 }
 0x204   : > { %1314 = vrot.lane.b32.xlu1 %v1018_v35, %s8164_s16  ;;  %v9360_v35 = vor.u32 %v1839_v36, %v1838_v47 }
 0x205   : > { %v9344_v41 = vpop.permute.xlu1 %1998  ;;  %v9346_v0 = vpop.permute.xlu0 %1616 }
 0x206   : > { %v1841_v17 = vsel %vm1694_vm2, %v1836_v39, %v9360_v35 }
 0x207   : > { %1316 = vrot.lane.b32.xlu0 %v1026_v37, %s8164_s16  ;;  %v7914_v37 = vunpack.i.l.bf16 %v13970_v8 }
 0x208   : > { %1634 = vrot.lane.b32.xlu1 %v1509_v12, %s8165_s17  ;;  %v13971_v12 = vld [vmem:[#allocation21_spill] sm:$0xff] }
 0x209   : > { %v2532_v42 = vpop.permute.xlu1 %2531  ;;  %v9355_v59 = vpop.permute.xlu0 %2000  ;;  %v7919_v40 = vunpack.i.l.bf16 %v13971_v12  ;;  %v9372_v47 = vpack.c.bf16 %v7914_v37, %v7909_v53 }
 0x20a   : > { %v2885_v36 = vsel %vm2875_vm6, %v8813_v49, %v2532_v42 }
 0x20b   : > { %1636 = vrot.lane.b32.xlu0 %v1511_v60, %s8165_s17  ;;  %13973 = vst [vmem:[#allocation14_spill] sm:$0xff] %v9372_v47  ;;  %v9380_v16 = vpack.c.bf16 %v7924_v61, %v7919_v40  ;;  %v1031_v39 = vshll.u32 %v9372_v47, 16  ;;  %v2120_v61 = vsel %vm2078_vm3, %v8688_v55, %v9094_v22  ;;  %v1029_v55 = vor.u32 %v1027_v32, %v1025_v45 }
 0x20c   : > { %2018 = vrot.lane.b32.xlu1 %v1837_v58, %s8166_s18 }
 0x20d   : > { %v2650_v19 = vpop.permute.xlu1 %2649  ;;  %v2534_v29 = vpop.permute.xlu0 %2533  ;;  %v1033_v22 = vrot.slane %v1031_v39, 1 }
 0x20e   : > { %v3002_v23 = vsel %vm2992_vm7, %v2885_v36, %v2650_v19  ;;  %v2887_v49 = vsel %vm2875_vm6, %v8830_v7, %v2534_v29  ;;  %v1039_v19 = vshll.u32 %v9380_v16, 16  ;;  %v1035_v29 = vshrl.u32 %v9372_v47, 16 }
 0x20f   : > { %2020 = vrot.lane.b32.xlu0 %v1841_v17, %s8166_s18 }
 0x210   : > { %2551 = vrot.lane.b32.xlu1 %v9231_v31, %s8167_s13  ;;  %v1037_v32 = vor.u32 %v1035_v29, %v1033_v22 }
 0x211   : > { %v2768_v60 = vpop.permute.xlu1 %2767  ;;  %v2652_v58 = vpop.permute.xlu0 %2651 }
 0x212   : > { %v3119_v4 = vsel %vm13855_vm8, %v3002_v23, %v2768_v60  ;;  %v3004_v40 = vsel %vm2992_vm7, %v2887_v49, %v2652_v58  ;;  %v1041_v23 = vrot.slane %v1039_v19, 1  ;;  %v1043_v60 = vshrl.u32 %v9380_v16, 16 }
 0x213   : > { %2553 = vrot.lane.b32.xlu0 %v9250_v56, %s8167_s13  ;;  %7507 = vmatprep.mubr.msk.bf16.mxu0 %vm3257_vm9, %v3119_v4  ;;  %v2249_v4 = vsel %vm2207_vm4, %v2120_v61, %v9119_v10  ;;  %v2122_v10 = vsel %vm2078_vm3, %v8700_v27, %v9107_v38  ;;  %v1034_v27 = vsel %vm734_vm0, %v1029_v55, %v1033_v22  ;;  %v1512_v38 = vrot.slane %v9372_v47, 1 }
 0x214   : > { %2669 = vrot.lane.b32.xlu1 %v9317_v26, %s13816_s25  ;;  %v9403_v7 = vsel %vm2336_vm5, %v2249_v4, %v9162_v24  ;;  %v2251_v24 = vsel %vm2207_vm4, %v2122_v10, %v9140_v18  ;;  %v1842_v18 = vrot.slane %v1035_v29, 1  ;;  %v1843_v58 = vrot.slane %v1031_v39, 2  ;;  %v13975_v10 = vld [vmem:[#allocation23_spill] sm:$0xff] }
 0x215   : > { %v9395_v42 = vpop.permute.xlu1 %1298  ;;  %v2770_v53 = vpop.permute.xlu0 %2769  ;;  %v9422_v45 = vsel %vm2336_vm5, %v2251_v24, %v9174_v5  ;;  %v1042_v5 = vsel %vm734_vm0, %v1037_v32, %v1041_v23  ;;  %v1847_v4 = vrot.slane %v1039_v19, 2  ;;  %v7929_v24 = vunpack.i.l.bf16 %v13975_v10 }
 0x216   : > { %v3121_v37 = vsel %vm13855_vm8, %v3004_v40, %v2770_v53  ;;  %v1514_v40 = vrot.slane %v9380_v16, 1  ;;  %v1846_v53 = vrot.slane %v1043_v60, 1  ;;  %v1844_v22 = vor.u32 %v1843_v58, %v1842_v18 }
 0x217   : > { %2671 = vrot.lane.b32.xlu0 %v9336_v51, %s13816_s25  ;;  %7508 = vmatmul.mubr.msk.bf16.gmra.mxu0 %vm3257_vm9, %v3121_v37  ;;  %v13974_v37 = vrot.slane %v9294_v3, 1 }
 0x218   : > { %2787 = vrot.lane.b32.xlu1 %v9403_v7, %s13814_s26  ;;  %v1515_v19 = vsel %vm1438_vm1, %v1512_v38, %v1514_v40  ;;  %v9448_v47 = vor.u32 %v1847_v4, %v1846_v53  ;;  %v7867_v53 = vunpack.i.h.bf16 %v8305_v15 }
 0x219   : > { %v9416_v17 = vpop.permute.xlu1 %1618  ;;  %v9418_v36 = vpop.permute.xlu0 %1300  ;;  %v1513_v55 = vsel %vm1438_vm1, %v13974_v37, %v1512_v38  ;;  %v1845_v37 = vsel %vm1694_vm2, %v9360_v35, %v1844_v22  ;;  %v7862_v38 = vunpack.i.h.bf16 %v8301_v13 }
 0x21b   : > { %2789 = vrot.lane.b32.xlu0 %v9422_v45, %s13814_s26  ;;  %v9471_v13 = vpack.c.bf16 %v7867_v53, %v7862_v38 }
 0x21c   : > { %1318 = vrot.lane.b32.xlu1 %v1034_v27, %s8164_s16  ;;  %v13976_v27 = vld [vmem:[#allocation24_spill] sm:$0xff] }
 0x21d   : > { %v9430_v49 = vpop.permute.xlu1 %2002  ;;  %v9432_v61 = vpop.permute.xlu0 %1620  ;;  %v7934_v32 = vunpack.i.l.bf16 %v13976_v27  ;;  %13977 = vst [vmem:[#allocation41_spill] sm:$0xff] %v9471_v13 }
 0x21f   : > { %1320 = vrot.lane.b32.xlu0 %v1042_v5, %s8164_s16  ;;  %v9454_v5 = vpack.c.bf16 %v7934_v32, %v7929_v24 }
 0x220   : > { %1638 = vrot.lane.b32.xlu1 %v1513_v55, %s8165_s17  ;;  %v1849_v55 = vsel %vm1694_vm2, %v1844_v22, %v9448_v47 }
 0x221   : > { %v2536_v39 = vpop.permute.xlu1 %2535  ;;  %v9441_v29 = vpop.permute.xlu0 %2004  ;;  %v1047_v22 = vshll.u32 %v9454_v5, 16 }
 0x222   : > { %v2889_v35 = vsel %vm2875_vm6, %v8827_v63, %v2536_v39  ;;  %v2124_v63 = vsel %vm2078_vm3, %v8708_v33, %v9223_v48  ;;  %v1045_v33 = vor.u32 %v1043_v60, %v1041_v23  ;;  %v13978_v48 = vld [vmem:[#allocation46_spill] sm:$0xff] }
 0x223   : > { %1640 = vrot.lane.b32.xlu0 %v1515_v19, %s8165_s17  ;;  %v1049_v53 = vrot.slane %v1047_v22, 1 }
 0x224   : > { %2022 = vrot.lane.b32.xlu1 %v1845_v37, %s8166_s18 }
 0x225   : > { %v2654_v18 = vpop.permute.xlu1 %2653  ;;  %v2538_v58 = vpop.permute.xlu0 %2537 }
 0x226   : > { %v3006_v4 = vsel %vm2992_vm7, %v2889_v35, %v2654_v18  ;;  %v2891_v15 = vsel %vm2875_vm6, %v8845_v57, %v2538_v58  ;;  %v2126_v58 = vsel %vm2078_vm3, %v13978_v48, %v9246_v11  ;;  %v1055_v35 = vshll.u32 %v9471_v13, 16 }
 0x227   : > { %2024 = vrot.lane.b32.xlu0 %v1849_v55, %s8166_s18  ;;  %v2253_v55 = vsel %vm2207_vm4, %v2124_v63, %v9244_v43  ;;  %v1051_v43 = vshrl.u32 %v9454_v5, 16  ;;  %v1050_v11 = vsel %vm734_vm0, %v1045_v33, %v1049_v53  ;;  %v1516_v63 = vrot.slane %v9454_v5, 1 }
 0x228   : > { %2555 = vrot.lane.b32.xlu1 %v9317_v26, %s8167_s13  ;;  %v9488_v57 = vsel %vm2336_vm5, %v2253_v55, %v9258_v20  ;;  %v2255_v20 = vsel %vm2207_vm4, %v2126_v58, %v9260_v21  ;;  %v1855_v33 = vrot.slane %v1055_v35, 2 }
 0x229   : > { %v2772_v19 = vpop.permute.xlu1 %2771  ;;  %v2656_v24 = vpop.permute.xlu0 %2655  ;;  %v9508_v23 = vsel %vm2336_vm5, %v2255_v20, %v9269_v14  ;;  %v1053_v60 = vor.u32 %v1051_v43, %v1049_v53  ;;  %v1851_v14 = vrot.slane %v1047_v22, 2  ;;  %v1517_v55 = vsel %vm1438_vm1, %v1514_v40, %v1516_v63 }
 0x22a   : > { %v3123_v32 = vsel %vm13855_vm8, %v3006_v4, %v2772_v19  ;;  %v3008_v39 = vsel %vm2992_vm7, %v2891_v15, %v2656_v24  ;;  %v1057_v24 = vrot.slane %v1055_v35, 1  ;;  %v7877_v40 = vunpack.i.h.bf16 %v13953_v34 }
 0x22b   : > { %2557 = vrot.lane.b32.xlu0 %v9336_v51, %s8167_s13  ;;  %7511 = vmatprep.mubr.msk.bf16.mxu0 %vm3257_vm9, %v3123_v32  ;;  %v1059_v32 = vshrl.u32 %v9471_v13, 16 }
 0x22c   : > { %2673 = vrot.lane.b32.xlu1 %v9403_v7, %s13816_s25 }
 0x22d   : > { %v9481_v37 = vpop.permute.xlu1 %1302  ;;  %v2774_v18 = vpop.permute.xlu0 %2773  ;;  %v1854_v53 = vrot.slane %v1059_v32, 1 }
 0x22e   : > { %v3125_v38 = vsel %vm13855_vm8, %v3008_v39, %v2774_v18  ;;  %v1850_v39 = vrot.slane %v1051_v43, 1  ;;  %v1058_v18 = vsel %vm734_vm0, %v1053_v60, %v1057_v24  ;;  %v7872_v43 = vunpack.i.h.bf16 %v13952_v46 }
 0x22f   : > { %2675 = vrot.lane.b32.xlu0 %v9422_v45, %s13816_s25  ;;  %7512 = vmatmul.mubr.msk.bf16.gmra.mxu0 %vm3257_vm9, %v3125_v38  ;;  %v1518_v38 = vrot.slane %v9471_v13, 1  ;;  %v9538_v35 = vor.u32 %v1855_v33, %v1854_v53 }
 0x230   : > { %2791 = vrot.lane.b32.xlu1 %v9488_v57, %s13814_s26  ;;  %v1852_v20 = vor.u32 %v1851_v14, %v1850_v39  ;;  %v7882_v39 = vunpack.i.h.bf16 %v13954_v6  ;;  %v7887_v14 = vunpack.i.h.bf16 %v13955_v50 }
 0x231   : > { %v9502_v4 = vpop.permute.xlu1 %1622  ;;  %v9504_v19 = vpop.permute.xlu0 %1304  ;;  %v1519_v22 = vsel %vm1438_vm1, %v1516_v63, %v1518_v38  ;;  %v9544_v63 = vpack.c.bf16 %v7877_v40, %v7872_v43 }
 0x232   : > { %v1853_v60 = vsel %vm1694_vm2, %v9448_v47, %v1852_v20  ;;  %v1857_v46 = vsel %vm1694_vm2, %v1852_v20, %v9538_v35  ;;  %v9552_v6 = vpack.c.bf16 %v7887_v14, %v7882_v39  ;;  %v13981_v20 = vld [vmem:[#allocation50_spill] sm:$0xff] }
 0x233   : > { %2793 = vrot.lane.b32.xlu0 %v9508_v23, %s13814_s26  ;;  %13979 = vst [vmem:[#allocation43_spill] sm:$0xff] %v9544_v63  ;;  %v1063_v33 = vshll.u32 %v9544_v63, 16 }
 0x234   : > { %1322 = vrot.lane.b32.xlu1 %v1050_v11, %s8164_s16  ;;  %13980 = vst [vmem:[#allocation15_spill] sm:$0xff] %v9552_v6  ;;  %v1071_v14 = vshll.u32 %v9552_v6, 16 }
 0x235   : > { %v9515_v21 = vpop.permute.xlu1 %2006  ;;  %v9517_v15 = vpop.permute.xlu0 %1624 }
 0x237   : > { %1324 = vrot.lane.b32.xlu0 %v1058_v18, %s8164_s16 }
 0x238   : > { %1642 = vrot.lane.b32.xlu1 %v1517_v55, %s8165_s17 }
 0x239   : > { %v2540_v48 = vpop.permute.xlu1 %2539  ;;  %v9527_v58 = vpop.permute.xlu0 %2008 }
 0x23a   : > { %v2893_v34 = vsel %vm2875_vm6, %v8899_v44, %v2540_v48  ;;  %v13982_v48 = vld [vmem:[#allocation47_spill] sm:$0xff] }
 0x23b   : > { %1644 = vrot.lane.b32.xlu0 %v1519_v22, %s8165_s17  ;;  %v2128_v22 = vsel %vm2078_vm3, %v13982_v48, %v9309_v25  ;;  %v1061_v25 = vor.u32 %v1059_v32, %v1057_v24  ;;  %v1859_v48 = vrot.slane %v1063_v33, 2 }
 0x23c   : > { %2026 = vrot.lane.b32.xlu1 %v1853_v60, %s8166_s18 }
 0x23d   : > { %v2658_v11 = vpop.permute.xlu1 %2657  ;;  %v2542_v18 = vpop.permute.xlu0 %2541 }
 0x23e   : > { %v3010_v47 = vsel %vm2992_vm7, %v2893_v34, %v2658_v11  ;;  %v2895_v44 = vsel %vm2875_vm6, %v13981_v20, %v2542_v18  ;;  %v2257_v11 = vsel %vm2207_vm4, %v2128_v22, %v9330_v28  ;;  %v1067_v34 = vshrl.u32 %v9544_v63, 16 }
 0x23f   : > { %2028 = vrot.lane.b32.xlu0 %v1857_v46, %s8166_s18  ;;  %v9575_v18 = vsel %vm2336_vm5, %v2257_v11, %v9344_v41  ;;  %v1065_v46 = vrot.slane %v1063_v33, 1  ;;  %v1075_v20 = vshrl.u32 %v9552_v6, 16 }
 0x240   : > { %2559 = vrot.lane.b32.xlu1 %v9403_v7, %s8167_s13 }
 0x241   : > { %v2776_v55 = vpop.permute.xlu1 %2775  ;;  %v2660_v53 = vpop.permute.xlu0 %2659  ;;  %v1069_v32 = vor.u32 %v1067_v34, %v1065_v46  ;;  %v1862_v11 = vrot.slane %v1075_v20, 1 }
 0x242   : > { %v3127_v50 = vsel %vm13855_vm8, %v3010_v47, %v2776_v55  ;;  %v3012_v43 = vsel %vm2992_vm7, %v2895_v44, %v2660_v53  ;;  %v13983_v47 = vld [vmem:[#allocation48_spill] sm:$0xff]  ;;  %v1520_v44 = vrot.slane %v9544_v63, 1 }
 0x243   : > { %2561 = vrot.lane.b32.xlu0 %v9422_v45, %s8167_s13  ;;  %7515 = vmatprep.mubr.msk.bf16.mxu0 %vm3257_vm9, %v3127_v50  ;;  %v2130_v28 = vsel %vm2078_vm3, %v13983_v47, %v9332_v30  ;;  %v1073_v50 = vrot.slane %v1071_v14, 1  ;;  %v1066_v30 = vsel %vm734_vm0, %v1061_v25, %v1065_v46 }
 0x244   : > { %2677 = vrot.lane.b32.xlu1 %v9488_v57, %s13816_s25  ;;  %v2259_v41 = vsel %vm2207_vm4, %v2130_v28, %v9346_v0  ;;  %v1858_v0 = vrot.slane %v1067_v34, 1  ;;  %v1521_v25 = vsel %vm1438_vm1, %v1518_v38, %v1520_v44 }
 0x245   : > { %v9567_v40 = vpop.permute.xlu1 %1306  ;;  %v2778_v60 = vpop.permute.xlu0 %2777  ;;  %v9594_v24 = vsel %vm2336_vm5, %v2259_v41, %v9355_v59  ;;  %v1074_v59 = vsel %vm734_vm0, %v1069_v32, %v1073_v50  ;;  %v7897_v41 = vunpack.i.h.bf16 %v13962_v9 }
 0x246   : > { %v3129_v39 = vsel %vm13855_vm8, %v3012_v43, %v2778_v60  ;;  %v1522_v60 = vrot.slane %v9552_v6, 1  ;;  %v1860_v46 = vor.u32 %v1859_v48, %v1858_v0  ;;  %v7907_v0 = vunpack.i.h.bf16 %v13964_v2 }
 0x247   : > { %2679 = vrot.lane.b32.xlu0 %v9508_v23, %s13816_s25  ;;  %7516 = vmatmul.mubr.msk.bf16.gmra.mxu0 %vm3257_vm9, %v3129_v39  ;;  %v1863_v39 = vrot.slane %v1071_v14, 2  ;;  %v7892_v14 = vunpack.i.h.bf16 %v13961_v62  ;;  %v13985_v62 = vld [vmem:[#allocation53_spill] sm:$0xff] }
 0x248   : > { %2795 = vrot.lane.b32.xlu1 %v9575_v18, %s13814_s26  ;;  %v1523_v47 = vsel %vm1438_vm1, %v1520_v44, %v1522_v60  ;;  %v1861_v38 = vsel %vm1694_vm2, %v9538_v35, %v1860_v46 }
 0x249   : > { %v9588_v55 = vpop.permute.xlu1 %1626  ;;  %v9590_v53 = vpop.permute.xlu0 %1308  ;;  %v9618_v28 = vor.u32 %v1863_v39, %v1862_v11 }
 0x24b   : > { %2797 = vrot.lane.b32.xlu0 %v9594_v24, %s13814_s26  ;;  %v1865_v44 = vsel %vm1694_vm2, %v1860_v46, %v9618_v28  ;;  %v13987_v46 = vld [vmem:[#allocation55_spill] sm:$0xff] }
 0x24c   : > { %1326 = vrot.lane.b32.xlu1 %v1066_v30, %s8164_s16  ;;  %v7902_v30 = vunpack.i.h.bf16 %v13963_v1 }
 0x24d   : > { %v9602_v22 = vpop.permute.xlu1 %2010  ;;  %v9604_v43 = vpop.permute.xlu0 %1628 }
 0x24e   : > { %v9637_v11 = vpack.c.bf16 %v7907_v0, %v7902_v30 }
 0x24f   : > { %1328 = vrot.lane.b32.xlu0 %v1074_v59, %s8164_s16  ;;  %v9630_v59 = vpack.c.bf16 %v7897_v41, %v7892_v14 }
 0x250   : > { %1646 = vrot.lane.b32.xlu1 %v1521_v25, %s8165_s17  ;;  %13986 = vst [vmem:[#allocation17_spill] sm:$0xff] %v9637_v11 }
 0x251   : > { %v2544_v33 = vpop.permute.xlu1 %2543  ;;  %v9613_v34 = vpop.permute.xlu0 %2012  ;;  %13984 = vst [vmem:[#allocation16_spill] sm:$0xff] %v9630_v59  ;;  %v1079_v25 = vshll.u32 %v9630_v59, 16 }
 0x252   : > { %v2897_v9 = vsel %vm2875_vm6, %v13985_v62, %v2544_v33  ;;  %v13988_v33 = vld [vmem:[#allocation49_spill] sm:$0xff] }
 0x253   : > { %1648 = vrot.lane.b32.xlu0 %v1523_v47, %s8165_s17  ;;  %v2132_v14 = vsel %vm2078_vm3, %v13988_v33, %v9395_v42  ;;  %v1077_v42 = vor.u32 %v1075_v20, %v1073_v50  ;;  %v1081_v62 = vrot.slane %v1079_v25, 1  ;;  %v1867_v33 = vrot.slane %v1079_v25, 2 }
 0x254   : > { %2030 = vrot.lane.b32.xlu1 %v1861_v38, %s8166_s18  ;;  %v2261_v30 = vsel %vm2207_vm4, %v2132_v14, %v9416_v17  ;;  %v13990_v17 = vld [vmem:[#allocation51_spill] sm:$0xff] }
 0x255   : > { %v2546_v32 = vpop.permute.xlu0 %2545 }
 0x256   : > { %v2662_v48 = vpop.permute.xlu1 %2661  ;;  %v2899_v47 = vsel %vm2875_vm6, %v13987_v46, %v2546_v32  ;;  %v1087_v32 = vshll.u32 %v9637_v11, 16  ;;  %v1091_v46 = vshrl.u32 %v9637_v11, 16 }
 0x257   : > { %2032 = vrot.lane.b32.xlu0 %v1865_v44, %s8166_s18  ;;  %v3014_v1 = vsel %vm2992_vm7, %v2897_v9, %v2662_v48  ;;  %v9661_v44 = vsel %vm2336_vm5, %v2261_v30, %v9430_v49  ;;  %v1083_v9 = vshrl.u32 %v9630_v59, 16 }
 0x258   : > { %2563 = vrot.lane.b32.xlu1 %v9488_v57, %s8167_s13  ;;  %13989 = vst [vmem:[#allocation18_spill] sm:$0xff] %v9661_v44  ;;  %v1870_v30 = vrot.slane %v1091_v46, 1 }
 0x259   : > { %v2664_v35 = vpop.permute.xlu0 %2663  ;;  %v1085_v20 = vor.u32 %v1083_v9, %v1081_v62 }
 0x25a   : > { %v2780_v2 = vpop.permute.xlu1 %2779  ;;  %v3016_v41 = vsel %vm2992_vm7, %v2899_v47, %v2664_v35  ;;  %v2134_v35 = vsel %vm2078_vm3, %v13990_v17, %v9418_v36  ;;  %v1082_v36 = vsel %vm734_vm0, %v1077_v42, %v1081_v62  ;;  %v1524_v47 = vrot.slane %v9630_v59, 1 }
 0x25b   : > { %v3131_v39 = vsel %vm13855_vm8, %v3014_v1, %v2780_v2  ;;  %2565 = vrot.lane.b32.xlu0 %v9508_v23, %s8167_s13  ;;  %v2263_v49 = vsel %vm2207_vm4, %v2134_v35, %v9432_v61  ;;  %v1866_v61 = vrot.slane %v1083_v9, 1 }
 0x25c   : > { %2681 = vrot.lane.b32.xlu1 %v9575_v18, %s13816_s25  ;;  %7519 = vmatprep.mubr.msk.bf16.mxu0 %vm3257_vm9, %v3131_v39  ;;  %v9678_v2 = vsel %vm2336_vm5, %v2263_v49, %v9441_v29  ;;  %v1089_v39 = vrot.slane %v1087_v32, 1  ;;  %v1525_v42 = vsel %vm1438_vm1, %v1522_v60, %v1524_v47  ;;  %v7917_v49 = vunpack.i.h.bf16 %v13970_v8  ;;  %v13993_v8 = vld [vmem:[#allocation60_spill] sm:$0xff] }
 0x25d   : > { %v2782_v38 = vpop.permute.xlu0 %2781  ;;  %13991 = vst [vmem:[#allocation44_spill] sm:$0xff] %v9678_v2  ;;  %v1868_v62 = vor.u32 %v1867_v33, %v1866_v61  ;;  %v7927_v61 = vunpack.i.h.bf16 %v13972_v52 }
 0x25e   : > { %v9655_v0 = vpop.permute.xlu1 %1310  ;;  %v3133_v48 = vsel %vm13855_vm8, %v3016_v41, %v2782_v38  ;;  %v1090_v41 = vsel %vm734_vm0, %v1085_v20, %v1089_v39  ;;  %v1526_v38 = vrot.slane %v9637_v11, 1  ;;  %v14012_v11 = vld [vmem:[#allocation28_spill] sm:$0xff] }
 0x25f   : > { %2683 = vrot.lane.b32.xlu0 %v9594_v24, %s13816_s25  ;;  %7520 = vmatmul.mubr.msk.bf16.gmra.mxu0 %vm3257_vm9, %v3133_v48  ;;  %v1871_v48 = vrot.slane %v1087_v32, 2  ;;  %v7912_v32 = vunpack.i.h.bf16 %v13969_v54  ;;  %v1869_v60 = vsel %vm1694_vm2, %v9618_v28, %v1868_v62 }
 0x260   : > { %2799 = vrot.lane.b32.xlu1 %v9661_v44, %s13814_s26  ;;  %v1527_v17 = vsel %vm1438_vm1, %v1524_v47, %v1526_v38 }
 0x261   : > { %v9674_v1 = vpop.permute.xlu0 %1312  ;;  %v9704_v35 = vor.u32 %v1871_v48, %v1870_v30 }
 0x262   : > { %v9680_v50 = vpop.permute.xlu1 %1630 }
 0x263   : > { %2801 = vrot.lane.b32.xlu0 %v9678_v2, %s13814_s26  ;;  %v1873_v47 = vsel %vm1694_vm2, %v1868_v62, %v9704_v35  ;;  %v13995_v62 = vld [vmem:[#allocation61_spill] sm:$0xff] }
 0x264   : > { %1330 = vrot.lane.b32.xlu1 %v1082_v36, %s8164_s16  ;;  %v7922_v36 = vunpack.i.h.bf16 %v13971_v12 }
 0x265   : > { %v9688_v14 = vpop.permute.xlu0 %1632 }
 0x266   : > { %v9690_v29 = vpop.permute.xlu1 %2014  ;;  %v9723_v30 = vpack.c.bf16 %v7927_v61, %v7922_v36 }
 0x267   : > { %1332 = vrot.lane.b32.xlu0 %v1090_v41, %s8164_s16  ;;  %v9716_v41 = vpack.c.bf16 %v7917_v49, %v7912_v32 }
 0x268   : > { %1650 = vrot.lane.b32.xlu1 %v1525_v42, %s8165_s17  ;;  %13994 = vst [vmem:[#allocation19_spill] sm:$0xff] %v9723_v30 }
 0x269   : > { %v9699_v25 = vpop.permute.xlu0 %2016  ;;  %13992 = vst [vmem:[#allocation45_spill] sm:$0xff] %v9716_v41  ;;  %v1095_v42 = vshll.u32 %v9716_v41, 16 }
 0x26a   : > { %v2548_v9 = vpop.permute.xlu1 %2547 }
 0x26b   : > { %1652 = vrot.lane.b32.xlu0 %v1527_v17, %s8165_s17  ;;  %v2901_v54 = vsel %vm2875_vm6, %v13993_v8, %v2548_v9  ;;  %v13996_v9 = vld [vmem:[#allocation52_spill] sm:$0xff]  ;;  %v1097_v8 = vrot.slane %v1095_v42, 1 }
 0x26c   : > { %2034 = vrot.lane.b32.xlu1 %v1869_v60, %s8166_s18  ;;  %v2136_v32 = vsel %vm2078_vm3, %v13996_v9, %v9481_v37  ;;  %v1093_v37 = vor.u32 %v1091_v46, %v1089_v39  ;;  %v1875_v9 = vrot.slane %v1095_v42, 2 }
 0x26d   : > { %v2550_v20 = vpop.permute.xlu0 %2549  ;;  %v2265_v36 = vsel %vm2207_vm4, %v2136_v32, %v9502_v4  ;;  %v13998_v4 = vld [vmem:[#allocation58_spill] sm:$0xff] }
 0x26e   : > { %v2666_v33 = vpop.permute.xlu1 %2665  ;;  %v2903_v17 = vsel %vm2875_vm6, %v13995_v62, %v2550_v20  ;;  %v1103_v20 = vshll.u32 %v9723_v30, 16  ;;  %v1107_v62 = vshrl.u32 %v9723_v30, 16 }
 0x26f   : > { %2036 = vrot.lane.b32.xlu0 %v1873_v47, %s8166_s18  ;;  %v3018_v12 = vsel %vm2992_vm7, %v2901_v54, %v2666_v33  ;;  %v9747_v47 = vsel %vm2336_vm5, %v2265_v36, %v9515_v21  ;;  %v1099_v54 = vshrl.u32 %v9716_v41, 16 }
 0x270   : > { %2567 = vrot.lane.b32.xlu1 %v9575_v18, %s8167_s13  ;;  %13997 = vst [vmem:[#allocation20_spill] sm:$0xff] %v9747_v47  ;;  %v1878_v36 = vrot.slane %v1107_v62, 1 }
 0x271   : > { %v2668_v28 = vpop.permute.xlu0 %2667  ;;  %v1101_v46 = vor.u32 %v1099_v54, %v1097_v8 }
 0x272   : > { %v2784_v52 = vpop.permute.xlu1 %2783  ;;  %v3020_v49 = vsel %vm2992_vm7, %v2903_v17, %v2668_v28  ;;  %v2138_v28 = vsel %vm2078_vm3, %v13998_v4, %v9504_v19  ;;  %v1098_v19 = vsel %vm734_vm0, %v1093_v37, %v1097_v8  ;;  %v1528_v17 = vrot.slane %v9716_v41, 1  ;;  %v14011_v41 = vld [vmem:[#allocation27_spill] sm:$0xff] }
 0x273   : > { %v3135_v48 = vsel %vm13855_vm8, %v3018_v12, %v2784_v52  ;;  %2569 = vrot.lane.b32.xlu0 %v9594_v24, %s8167_s13  ;;  %v2267_v21 = vsel %vm2207_vm4, %v2138_v28, %v9517_v15  ;;  %v1874_v15 = vrot.slane %v1099_v54, 1 }
 0x274   : > { %2685 = vrot.lane.b32.xlu1 %v9661_v44, %s13816_s25  ;;  %7523 = vmatprep.mubr.msk.bf16.mxu0 %vm3257_vm9, %v3135_v48  ;;  %v9764_v52 = vsel %vm2336_vm5, %v2267_v21, %v9527_v58  ;;  %v1105_v48 = vrot.slane %v1103_v20, 1  ;;  %v1529_v37 = vsel %vm1438_vm1, %v1526_v38, %v1528_v17  ;;  %v7937_v21 = vunpack.i.h.bf16 %v13976_v27 }
 0x275   : > { %v2786_v60 = vpop.permute.xlu0 %2785  ;;  %13999 = vst [vmem:[#allocation21_spill] sm:$0xff] %v9764_v52  ;;  %v1876_v8 = vor.u32 %v1875_v9, %v1874_v15  ;;  %v14001_v9 = vld [vmem:[#allocation26_spill] sm:$0xff] }
 0x276   : > { %v9741_v61 = vpop.permute.xlu1 %1314  ;;  %v3137_v33 = vsel %vm13855_vm8, %v3020_v49, %v2786_v60  ;;  %v1106_v49 = vsel %vm734_vm0, %v1101_v46, %v1105_v48  ;;  %v13759_v60 = vrot.slane %v9723_v30, 1 }
 0x277   : > { %2687 = vrot.lane.b32.xlu0 %v9678_v2, %s13816_s25  ;;  %7524 = vmatmul.mubr.msk.bf16.gmra.mxu0 %vm3257_vm9, %v3137_v33  ;;  %v1879_v33 = vrot.slane %v1103_v20, 2  ;;  %v7932_v20 = vunpack.i.h.bf16 %v13975_v10  ;;  %v1877_v38 = vsel %vm1694_vm2, %v9704_v35, %v1876_v8  ;;  %v14003_v10 = vld [vmem:[#allocation64_spill] sm:$0xff] }
 0x278   : > { %2803 = vrot.lane.b32.xlu1 %v9747_v47, %s13814_s26  ;;  %v1531_v4 = vsel %vm1438_vm1, %v1528_v17, %v13759_v60 }
 0x279   : > { %v9760_v12 = vpop.permute.xlu0 %1316  ;;  %v9790_v28 = vor.u32 %v1879_v33, %v1878_v36  ;;  %v9802_v36 = vpack.c.bf16 %v7937_v21, %v7932_v20  ;;  %v14005_v20 = vld [vmem:[#allocation38_spill] sm:$0xff] }
 0x27a   : > { %v9766_v39 = vpop.permute.xlu1 %1634 }
 0x27b   : > { %2805 = vrot.lane.b32.xlu0 %v9764_v52, %s13814_s26  ;;  %v1881_v17 = vsel %vm1694_vm2, %v1876_v8, %v9790_v28  ;;  %14002 = vst [vmem:[#allocation22_spill] sm:$0xff] %v9802_v36  ;;  %v1111_v8 = vshll.u32 %v9802_v36, 16 }
 0x27c   : > { %1334 = vrot.lane.b32.xlu1 %v1098_v19, %s8164_s16  ;;  %v14000_v19 = vld [vmem:[#allocation25_spill] sm:$0xff] }
 0x27d   : > { %v9774_v32 = vpop.permute.xlu0 %1636  ;;  %v7941_v15 = vunpack.i.l.bf16 %v14000_v19 }
 0x27e   : > { %v9776_v58 = vpop.permute.xlu1 %2018 }
 0x27f   : > { %1336 = vrot.lane.b32.xlu0 %v1106_v49, %s8164_s16  ;;  %v7946_v49 = vunpack.i.l.bf16 %v14001_v9 }
 0x280   : > { %1654 = vrot.lane.b32.xlu1 %v1529_v37, %s8165_s17 }
 0x281   : > { %v9785_v42 = vpop.permute.xlu0 %2020  ;;  %v9809_v33 = vpack.c.bf16 %v7946_v49, %v7941_v15 }
 0x282   : > { %v2552_v54 = vpop.permute.xlu1 %2551 }
 0x283   : > { %1656 = vrot.lane.b32.xlu0 %v1531_v4, %s8165_s17  ;;  %v2905_v27 = vsel %vm2875_vm6, %v14003_v10, %v2552_v54  ;;  %14004 = vst [vmem:[#allocation23_spill] sm:$0xff] %v9809_v33  ;;  %v14006_v54 = vld [vmem:[#allocation59_spill] sm:$0xff] }
 0x284   : > { %2038 = vrot.lane.b32.xlu1 %v1877_v38, %s8166_s18  ;;  %v2140_v15 = vsel %vm2078_vm3, %v14006_v54, %v9567_v40  ;;  %v1109_v40 = vor.u32 %v1107_v62, %v1105_v48 }
 0x285   : > { %v2554_v46 = vpop.permute.xlu0 %2553 }
 0x286   : > { %v2670_v37 = vpop.permute.xlu1 %2669  ;;  %v2907_v21 = vsel %vm2875_vm6, %v14005_v20, %v2554_v46  ;;  %v1119_v46 = vshll.u32 %v9809_v33, 16 }
 0x287   : > { %2040 = vrot.lane.b32.xlu0 %v1881_v17, %s8166_s18  ;;  %v3022_v4 = vsel %vm2992_vm7, %v2905_v27, %v2670_v37  ;;  %v2269_v17 = vsel %vm2207_vm4, %v2140_v15, %v9588_v55  ;;  %v14008_v55 = vld [vmem:[#allocation62_spill] sm:$0xff]  ;;  %v1123_v15 = vshrl.u32 %v9809_v33, 16 }
 0x288   : > { %2571 = vrot.lane.b32.xlu1 %v9661_v44, %s8167_s13  ;;  %v1121_v54 = vrot.slane %v1119_v46, 1 }
 0x289   : > { %v2672_v35 = vpop.permute.xlu0 %2671 }
 0x28a   : > { %v2788_v38 = vpop.permute.xlu1 %2787  ;;  %v3024_v49 = vsel %vm2992_vm7, %v2907_v21, %v2672_v35  ;;  %v1115_v35 = vshrl.u32 %v9802_v36, 16 }
 0x28b   : > { %v3139_v60 = vsel %vm13855_vm8, %v3022_v4, %v2788_v38  ;;  %2573 = vrot.lane.b32.xlu0 %v9678_v2, %s8167_s13  ;;  %v9833_v4 = vsel %vm2336_vm5, %v2269_v17, %v9602_v22  ;;  %v2142_v38 = vsel %vm2078_vm3, %v14008_v55, %v9590_v53  ;;  %v13766_v55 = vrot.slane %v9809_v33, 1 }
 0x28c   : > { %2689 = vrot.lane.b32.xlu1 %v9747_v47, %s13816_s25  ;;  %7527 = vmatprep.mubr.msk.bf16.mxu0 %vm3257_vm9, %v3139_v60  ;;  %14007 = vst [vmem:[#allocation24_spill] sm:$0xff] %v9833_v4  ;;  %v1113_v60 = vrot.slane %v1111_v8, 1  ;;  %v2271_v22 = vsel %vm2207_vm4, %v2142_v38, %v9604_v43  ;;  %v1882_v43 = vrot.slane %v1115_v35, 1  ;;  %v1886_v38 = vrot.slane %v1123_v15, 1 }
 0x28d   : > { %v2790_v37 = vpop.permute.xlu0 %2789  ;;  %v9850_v21 = vsel %vm2336_vm5, %v2271_v22, %v9613_v34  ;;  %v1887_v22 = vrot.slane %v1119_v46, 2  ;;  %v7951_v46 = vunpack.i.l.bf16 %v14011_v41 }
 0x28e   : > { %v9827_v10 = vpop.permute.xlu1 %1318  ;;  %v3141_v27 = vsel %vm13855_vm8, %v3024_v49, %v2790_v37  ;;  %14009 = vst [vmem:[#allocation46_spill] sm:$0xff] %v9850_v21  ;;  %v1117_v62 = vor.u32 %v1115_v35, %v1113_v60  ;;  %v1114_v53 = vsel %vm734_vm0, %v1109_v40, %v1113_v60  ;;  %v1532_v49 = vrot.slane %v9802_v36, 1 }
 0x28f   : > { %2691 = vrot.lane.b32.xlu0 %v9764_v52, %s13816_s25  ;;  %7528 = vmatmul.mubr.msk.bf16.gmra.mxu0 %vm3257_vm9, %v3141_v27  ;;  %v1883_v37 = vrot.slane %v1111_v8, 2  ;;  %v14010_v40 = vrot.slane %v9723_v30, 1  ;;  %v9876_v36 = vor.u32 %v1887_v22, %v1886_v38  ;;  %v7956_v30 = vunpack.i.l.bf16 %v14012_v11 }
 0x290   : > { %2807 = vrot.lane.b32.xlu1 %v9833_v4, %s13814_s26  ;;  %v1122_v27 = vsel %vm734_vm0, %v1117_v62, %v1121_v54  ;;  %v1535_v62 = vsel %vm1438_vm1, %v1532_v49, %v13766_v55 }
 0x291   : > { %v9846_v20 = vpop.permute.xlu0 %1320  ;;  %v1533_v60 = vsel %vm1438_vm1, %v14010_v40, %v1532_v49  ;;  %v1884_v35 = vor.u32 %v1883_v37, %v1882_v43  ;;  %v14013_v37 = vld [vmem:[#allocation29_spill] sm:$0xff]  ;;  %v9888_v38 = vpack.c.bf16 %v7956_v30, %v7951_v46 }
 0x292   : > { %v9852_v48 = vpop.permute.xlu1 %1638 }
 0x293   : > { %2809 = vrot.lane.b32.xlu0 %v9850_v21, %s13814_s26  ;;  %v1885_v40 = vsel %vm1694_vm2, %v9790_v28, %v1884_v35  ;;  %v1889_v49 = vsel %vm1694_vm2, %v1884_v35, %v9876_v36  ;;  %14015 = vst [vmem:[#allocation50_spill] sm:$0xff] %v9888_v38  ;;  %v1127_v30 = vshll.u32 %v9888_v38, 16 }
 0x294   : > { %1338 = vrot.lane.b32.xlu1 %v1114_v53, %s8164_s16 }
 0x295   : > { %v9860_v17 = vpop.permute.xlu0 %1640 }
 0x296   : > { %v9862_v34 = vpop.permute.xlu1 %2022 }
 0x297   : > { %1340 = vrot.lane.b32.xlu0 %v1122_v27, %s8164_s16  ;;  %v7961_v27 = vunpack.i.l.bf16 %v14013_v37 }
 0x298   : > { %1658 = vrot.lane.b32.xlu1 %v1533_v60, %s8165_s17  ;;  %v14014_v60 = vld [vmem:[#allocation30_spill] sm:$0xff] }
 0x299   : > { %v9871_v8 = vpop.permute.xlu0 %2024  ;;  %v7966_v59 = vunpack.i.l.bf16 %v14014_v60 }
 0x29a   : > { %v2556_v53 = vpop.permute.xlu1 %2555 }
 0x29b   : > { %1660 = vrot.lane.b32.xlu0 %v1535_v62, %s8165_s17  ;;  %v2909_v28 = vsel %vm2875_vm6, %v9231_v31, %v2556_v53  ;;  %v9895_v62 = vpack.c.bf16 %v7966_v59, %v7961_v27  ;;  %v14017_v31 = vld [vmem:[#allocation63_spill] sm:$0xff] }
 0x29c   : > { %2042 = vrot.lane.b32.xlu1 %v1885_v40, %s8166_s18 }
 0x29d   : > { %v2558_v43 = vpop.permute.xlu0 %2557  ;;  %14016 = vst [vmem:[#allocation47_spill] sm:$0xff] %v9895_v62 }
 0x29e   : > { %v2674_v6 = vpop.permute.xlu1 %2673  ;;  %v2911_v35 = vsel %vm2875_vm6, %v9250_v56, %v2558_v43  ;;  %v1135_v56 = vshll.u32 %v9895_v62, 16 }
 0x29f   : > { %2044 = vrot.lane.b32.xlu0 %v1889_v49, %s8166_s18  ;;  %v3026_v40 = vsel %vm2992_vm7, %v2909_v28, %v2674_v6  ;;  %v2144_v6 = vsel %vm2078_vm3, %v14017_v31, %v9655_v0  ;;  %v1125_v0 = vor.u32 %v1123_v15, %v1121_v54  ;;  %v1131_v49 = vshrl.u32 %v9888_v38, 16 }
 0x2a0   : > { %2575 = vrot.lane.b32.xlu1 %v9747_v47, %s8167_s13  ;;  %v2273_v53 = vsel %vm2207_vm4, %v2144_v6, %v9680_v50  ;;  %v14018_v50 = vld [vmem:[#allocation11_spill] sm:$0xff]  ;;  %v1139_v31 = vshrl.u32 %v9895_v62, 16  ;;  %v1536_v6 = vrot.slane %v9888_v38, 1  ;;  %v14021_v38 = vrot.slane %v9809_v33, 1 }
 0x2a1   : > { %v2676_v22 = vpop.permute.xlu0 %2675  ;;  %v9919_v43 = vsel %vm2336_vm5, %v2273_v53, %v9690_v29  ;;  %v2146_v28 = vsel %vm2078_vm3, %v14018_v50, %v9674_v1 }
 0x2a2   : > { %v2792_v55 = vpop.permute.xlu1 %2791  ;;  %v3028_v59 = vsel %vm2992_vm7, %v2911_v35, %v2676_v22  ;;  %v2275_v29 = vsel %vm2207_vm4, %v2146_v28, %v9688_v14  ;;  %v1137_v35 = vrot.slane %v1135_v56, 1  ;;  %v1890_v14 = vrot.slane %v1131_v49, 1 }
 0x2a3   : > { %v3143_v2 = vsel %vm13855_vm8, %v3026_v40, %v2792_v55  ;;  %2577 = vrot.lane.b32.xlu0 %v9764_v52, %s8167_s13  ;;  %v9936_v40 = vsel %vm2336_vm5, %v2275_v29, %v9699_v25  ;;  %v1895_v52 = vrot.slane %v1135_v56, 2  ;;  %v14025_v56 = vrot.slane %v9895_v62, 1 }
 0x2a4   : > { %2693 = vrot.lane.b32.xlu1 %v9833_v4, %s13816_s25  ;;  %7531 = vmatprep.mubr.msk.bf16.mxu0 %vm3257_vm9, %v3143_v2  ;;  %v1129_v2 = vrot.slane %v1127_v30, 1 }
 0x2a5   : > { %v2794_v55 = vpop.permute.xlu0 %2793  ;;  %v1539_v33 = vsel %vm1438_vm1, %v1536_v6, %v14025_v56 }
 0x2a6   : > { %v9913_v46 = vpop.permute.xlu1 %1322  ;;  %v3145_v27 = vsel %vm13855_vm8, %v3028_v59, %v2794_v55  ;;  %v1133_v15 = vor.u32 %v1131_v49, %v1129_v2  ;;  %v1130_v1 = vsel %vm734_vm0, %v1125_v0, %v1129_v2  ;;  %v1891_v59 = vrot.slane %v1127_v30, 2  ;;  %v14019_v55 = vld [vmem:[#allocation31_spill] sm:$0xff] }
 0x2a7   : > { %2695 = vrot.lane.b32.xlu0 %v9850_v21, %s13816_s25  ;;  %7532 = vmatmul.mubr.msk.bf16.gmra.mxu0 %vm3257_vm9, %v3145_v27  ;;  %v7971_v53 = vunpack.i.l.bf16 %v14019_v55  ;;  %v14020_v27 = vld [vmem:[#allocation32_spill] sm:$0xff]  ;;  %v1894_v2 = vrot.slane %v1139_v31, 1  ;;  %v1537_v30 = vsel %vm1438_vm1, %v14021_v38, %v1536_v6 }
 0x2a8   : > { %2811 = vrot.lane.b32.xlu1 %v9919_v43, %s13814_s26  ;;  %v7976_v25 = vunpack.i.l.bf16 %v14020_v27  ;;  %v1138_v29 = vsel %vm734_vm0, %v1133_v15, %v1137_v35  ;;  %v1892_v49 = vor.u32 %v1891_v59, %v1890_v14  ;;  %v14024_v27 = vld [vmem:[#allocation34_spill] sm:$0xff]  ;;  %v7501_v15 = vpop.f32.mrf.mxu0 }
 0x2a9   : > { %v9932_v22 = vpop.permute.xlu0 %1324  ;;  %v7986_v55 = vunpack.i.l.bf16 %v14024_v27  ;;  %v9968_v38 = vor.u32 %v1895_v52, %v1894_v2 }
 0x2aa   : > { %v9938_v54 = vpop.permute.xlu1 %1642  ;;  %v9958_v47 = vpack.c.bf16 %v7976_v25, %v7971_v53  ;;  %v1893_v14 = vsel %vm1694_vm2, %v9876_v36, %v1892_v49  ;;  %v3408_v25 = vpop.f32.mrf.mxu0  ;;  %v9984_v36 = vld [vmem:[%s14027_s2] ss:$0 sm:$0xff] }
 0x2ab   : > { %2813 = vrot.lane.b32.xlu0 %v9936_v40, %s13814_s26  ;;  %v1897_v27 = vsel %vm1694_vm2, %v1892_v49, %v9968_v38 }
 0x2ac   : > { %1342 = vrot.lane.b32.xlu1 %v1130_v1, %s8164_s16  ;;  %14022 = vst [vmem:[#allocation48_spill] sm:$0xff] %v9958_v47  ;;  %v14023_v1 = vld [vmem:[#allocation33_spill] sm:$0xff]  ;;  %v1143_v59 = vshll.u32 %v9958_v47, 16  ;;  %v1147_v52 = vshrl.u32 %v9958_v47, 16  ;;  %v7502_v6 = vpop.f32.mrf.mxu0 }
 0x2ad   : > { %v9948_v50 = vpop.permute.xlu0 %1644  ;;  %v7981_v44 = vunpack.i.l.bf16 %v14023_v1 }
 0x2ae   : > { %v9950_v28 = vpop.permute.xlu1 %2026 }
 0x2af   : > { %1344 = vrot.lane.b32.xlu0 %v1138_v29, %s8164_s16  ;;  %v9975_v53 = vpack.c.bf16 %v7986_v55, %v7981_v44  ;;  %v1141_v44 = vor.u32 %v1139_v31, %v1137_v35  ;;  %v9997_v31 = vrot.slane %v1147_v52, 1  ;;  %v3411_v35 = vpop.f32.mrf.mxu0 }
 0x2b0   : > { %1662 = vrot.lane.b32.xlu1 %v1537_v30, %s8165_s17 }
 0x2b1   : > { %v9963_v63 = vpop.permute.xlu0 %2028  ;;  %14026 = vst [vmem:[#allocation53_spill] sm:$0xff] %v9975_v53  ;;  %v1151_v49 = vshll.u32 %v9975_v53, 16 }
 0x2b2   : > { %v2560_v0 = vpop.permute.xlu1 %2559 }
 0x2b3   : > { %1664 = vrot.lane.b32.xlu0 %v1539_v33, %s8165_s17  ;;  %v1145_v33 = vrot.slane %v1143_v59, 1  ;;  %v2913_v55 = vsel %vm2875_vm6, %v9317_v26, %v2560_v0 }
 0x2b4   : > { %2046 = vrot.lane.b32.xlu1 %v1893_v14, %s8166_s18  ;;  %v3417_v14 = vadd.f32 %v7501_v15, %v9984_v36 }
 0x2b5   : > { %v2562_v29 = vpop.permute.xlu0 %2561  ;;  %v1146_v0 = vsel %vm734_vm0, %v1141_v44, %v1145_v33  ;;  %v1149_v15 = vor.u32 %v1147_v52, %v1145_v33  ;;  %v13777_v44 = vshrl.u32 %v9975_v53, 16 }
 0x2b6   : > { %v2678_v30 = vpop.permute.xlu1 %2677  ;;  %v2915_v26 = vsel %vm2875_vm6, %v9336_v51, %v2562_v29  ;;  %v10010_v51 = vrot.slane %v1151_v49, 1  ;;  %vm3869_vm10 = vcmp.ge.f32.partialorder %v3417_v14, 0.0 }
 0x2b7   : > { %2048 = vrot.lane.b32.xlu0 %v1897_v27, %s8166_s18  ;;  %v3030_v27 = vsel %vm2992_vm7, %v2913_v55, %v2678_v30  ;;  %v1899_v30 = vrot.slane %v1143_v59, 2  ;;  %v14028_v55 = vld [vmem:[#allocation12_spill] sm:$0xff] }
 0x2b8   : > { %2579 = vrot.lane.b32.xlu1 %v9833_v4, %s8167_s13 }
 0x2b9   : > { %v2680_v2 = vpop.permute.xlu0 %2679 }
 0x2ba   : > { %v2796_v56 = vpop.permute.xlu1 %2795 }
 0x2bb   : > { %v3147_v1 = vsel %vm13855_vm8, %v3030_v27, %v2796_v56  ;;  %2581 = vrot.lane.b32.xlu0 %v9850_v21, %s8167_s13  ;;  %v2148_v27 = vsel %vm2078_vm3, %v14028_v55, %v9741_v61  ;;  %v3409_v56 = vadd.f32 %v9984_v36, %v3408_v25  ;;  %v3032_v21 = vsel %vm2992_vm7, %v2915_v26, %v2680_v2  ;;  %v14029_v61 = vld [vmem:[#allocation13_spill] sm:$0xff] }
 0x2bc   : > { %2697 = vrot.lane.b32.xlu1 %v9919_v43, %s13816_s25  ;;  %7535 = vmatprep.mubr.msk.bf16.mxu0 %vm3257_vm9, %v3147_v1  ;;  %v2277_v29 = vsel %vm2207_vm4, %v2148_v27, %v9766_v39  ;;  %v2150_v25 = vsel %vm2078_vm3, %v14029_v61, %v9760_v12  ;;  %v3981_v2 = vmul.f32 0.2, %v3417_v14  ;;  %v3420_v26 = vadd.f32 %v7502_v6, %v9984_v36 }
 0x2bd   : > { %v2798_v4 = vpop.permute.xlu0 %2797  ;;  %v10024_v33 = vsel %vm2336_vm5, %v2277_v29, %v9776_v58  ;;  %v1903_v58 = vrot.slane %v1151_v49, 2  ;;  %v3979_v6 = vmul.f32 0.2, %v3409_v56  ;;  %v3412_v55 = vadd.f32 %v9984_v36, %v3411_v35 }
 0x2be   : > { %v10014_v1 = vpop.permute.xlu1 %1326  ;;  %v3149_v52 = vsel %vm13855_vm8, %v3032_v21, %v2798_v4  ;;  %v2279_v4 = vsel %vm2207_vm4, %v2150_v25, %v9774_v32  ;;  %v1154_v32 = vsel %vm734_vm0, %v1149_v15, %v10010_v51  ;;  %vm3867_vm11 = vcmp.ge.f32.partialorder %v3409_v56, 0.0 }
 0x2bf   : > { %v7505_v39 = vpop.f32.mrf.mxu0  ;;  %2699 = vrot.lane.b32.xlu0 %v9936_v40, %s13816_s25  ;;  %7536 = vmatmul.mubr.msk.bf16.gmra.mxu0 %vm3257_vm9, %v3149_v52  ;;  %v10037_v21 = vsel %vm2336_vm5, %v2279_v4, %v9785_v42  ;;  %v4093_v25 = vsel %vm3869_vm10, %v3417_v14, %v3981_v2  ;;  %v1902_v35 = vrot.slane %v13777_v44, 1  ;;  %vm3870_vm15 = vcmp.ge.f32.partialorder %v3420_v26, 0.0 }
 0x2c0   : > { %2815 = vrot.lane.b32.xlu1 %v10024_v33, %s13814_s26  ;;  %v3433_v12 = vadd.f32 %v7505_v39, %v9984_v36  ;;  %v3982_v39 = vmul.f32 0.2, %v3420_v26  ;;  %v3980_v14 = vmul.f32 0.2, %v3412_v55 }
 0x2c1   : > { %v3424_v27 = vpop.f32.mrf.mxu0  ;;  %v10040_v29 = vpop.permute.xlu0 %1328 }
 0x2c2   : > { %14030 = vst [vmem:[#allocation55_spill] sm:$0xff] %v10040_v29  ;;  %vm3873_vm12 = vcmp.ge.f32.partialorder %v3433_v12, 0.0  ;;  %v3985_v52 = vmul.f32 0.2, %v3433_v12  ;;  %v10044_v61 = vpop.permute.xlu1 %1646  ;;  %v3425_v49 = vadd.f32 %v9984_v36, %v3424_v27  ;;  %v4091_v27 = vsel %vm3867_vm11, %v3409_v56, %v3979_v6 }
 0x2c3   : > { %14031 = vst [vmem:[#allocation49_spill] sm:$0xff] %v10044_v61  ;;  %v7506_v42 = vpop.f32.mrf.mxu0  ;;  %2817 = vrot.lane.b32.xlu0 %v10037_v21, %s13814_s26  ;;  %v14032_v56 = vrot.slane %v9958_v47, 1  ;;  %v14033_v6 = vrot.slane %v9895_v62, 1 }
 0x2c4   : > { %v10051_v4 = vsel %vm3873_vm12, %v3433_v12, %v3985_v52  ;;  %vm3871_vm14 = vcmp.ge.f32.partialorder %v3425_v49, 0.0  ;;  %v3983_v15 = vmul.f32 0.2, %v3425_v49  ;;  %1346 = vrot.lane.b32.xlu1 %v1146_v0, %s8164_s16  ;;  %v3436_v59 = vadd.f32 %v7506_v42, %v9984_v36 }
 0x2c5   : > { %v4205_v2 = vadd.f32 %v10051_v4, %v4093_v25  ;;  %v3427_v29 = vpop.f32.mrf.mxu0  ;;  %v10057_v61 = vpop.permute.xlu0 %1648  ;;  %vm3868_vm12 = vcmp.ge.f32.partialorder %v3412_v55, 0.0  ;;  %v1541_v25 = vsel %vm1438_vm1, %v14033_v6, %v14032_v56  ;;  %v4094_v42 = vsel %vm3870_vm15, %v3420_v26, %v3982_v39  ;;  %v14036_v39 = vld [vmem:[#allocation35_spill] sm:$0xff]  ;;  %v14037_v6 = vld [vmem:[#allocation36_spill] sm:$0xff] }
 0x2c6   : > { %v10059_v13 = vsel %vm3871_vm14, %v3425_v49, %v3983_v15  ;;  %vm3874_vm10 = vcmp.ge.f32.partialorder %v3436_v59, 0.0  ;;  %v3986_v12 = vmul.f32 0.2, %v3436_v59  ;;  %v10061_v52 = vpop.permute.xlu1 %2030  ;;  %v3428_v44 = vadd.f32 %v9984_v36, %v3427_v29 }
 0x2c7   : > { %4314 = vst.msk [vmem:[#allocation2 + $0x10] sm:$0xff] %vm4311_vm13, %v4205_v2  ;;  %v4203_v0 = vadd.f32 %v10059_v13, %v4091_v27  ;;  %1348 = vrot.lane.b32.xlu0 %v1154_v32, %s8164_s16  ;;  %v1900_v49 = vor.u32 %v1899_v30, %v9997_v31  ;;  %v4092_v62 = vsel %vm3868_vm12, %v3412_v55, %v3980_v14  ;;  %v14034_v31 = vrot.slane %v9975_v53, 1  ;;  %v14038_v55 = vld [vmem:[#allocation37_spill] sm:$0xff] }
 0x2c8   : > { %v10074_v15 = vsel %vm3874_vm10, %v3436_v59, %v3986_v12  ;;  %vm3872_vm11 = vcmp.ge.f32.partialorder %v3428_v44, 0.0  ;;  %v3984_v29 = vmul.f32 0.2, %v3428_v44  ;;  %1666 = vrot.lane.b32.xlu1 %v1541_v25, %s8165_s17  ;;  %v14035_v30 = vrot.slane %v9958_v47, 1  ;;  %v14045_v47 = vld [vmem:[#allocation42_spill] sm:$0xff] }
 0x2c9   : > { %4312 = vst.msk [vmem:[#allocation2] sm:$0xff] %vm4311_vm13, %v4203_v0  ;;  %v4206_v27 = vadd.f32 %v10074_v15, %v4094_v42  ;;  %v10079_v2 = vpop.permute.xlu0 %2032  ;;  %v10088_v26 = vor.u32 %v1903_v58, %v1902_v35  ;;  %v7991_v12 = vunpack.i.l.bf16 %v14036_v39  ;;  %v7996_v0 = vunpack.i.l.bf16 %v14037_v6  ;;  %v14039_v42 = vld [vmem:[#allocation39_spill] sm:$0xff] }
 0x2ca   : > { %v10081_v56 = vsel %vm3872_vm11, %v3428_v44, %v3984_v29  ;;  %v2564_v32 = vpop.permute.xlu1 %2563  ;;  %v1543_v59 = vsel %vm1438_vm1, %v14035_v30, %v14034_v31  ;;  %v1901_v44 = vsel %vm1694_vm2, %v9968_v38, %v1900_v49  ;;  %v8001_v14 = vunpack.i.l.bf16 %v14038_v55 }
 0x2cb   : > { %4315 = vst.msk [vmem:[#allocation2 + $0x18] sm:$0xff] %vm4311_vm13, %v4206_v27  ;;  %v4204_v25 = vadd.f32 %v10081_v56, %v4092_v62  ;;  %1668 = vrot.lane.b32.xlu0 %v1543_v59, %s8165_s17  ;;  %v8006_v58 = vunpack.i.l.bf16 %v14039_v42  ;;  %v1905_v27 = vsel %vm1694_vm2, %v1900_v49, %v10088_v26  ;;  %v10103_v31 = vpack.c.bf16 %v7996_v0, %v7991_v12 }
 0x2cc   : > { %2050 = vrot.lane.b32.xlu1 %v1901_v44, %s8166_s18  ;;  %v2917_v38 = vsel %vm2875_vm6, %v9403_v7, %v2564_v32  ;;  %v2152_v7 = vsel %vm2078_vm3, %v9294_v3, %v9827_v10  ;;  %v14041_v3 = vshrl.u32 %v9975_v53, 16 }
 0x2cd   : > { %4313 = vst.msk [vmem:[#allocation2 + $0x8] sm:$0xff] %vm4311_vm13, %v4204_v25  ;;  %v2566_v35 = vpop.permute.xlu0 %2565  ;;  %14040 = vst [vmem:[#allocation51_spill] sm:$0xff] %v10103_v31  ;;  %v10108_v62 = vpack.c.bf16 %v8006_v58, %v8001_v14  ;;  %v1159_v49 = vshll.u32 %v10103_v31, 16  ;;  %v2281_v14 = vsel %vm2207_vm4, %v2152_v7, %v9852_v48  ;;  %v1163_v48 = vshrl.u32 %v10103_v31, 16 }
 0x2ce   : > { %v2682_v29 = vpop.permute.xlu1 %2681  ;;  %v2919_v12 = vsel %vm2875_vm6, %v9422_v45, %v2566_v35  ;;  %v10134_v58 = vsel %vm2336_vm5, %v2281_v14, %v9862_v34  ;;  %v1157_v10 = vor.u32 %v14041_v3, %v10010_v51 }
 0x2cf   : > { %2052 = vrot.lane.b32.xlu0 %v1905_v27, %s8166_s18  ;;  %v3034_v59 = vsel %vm2992_vm7, %v2917_v38, %v2682_v29  ;;  %v1167_v55 = vshll.u32 %v10108_v62, 16  ;;  %v1161_v29 = vrot.slane %v1159_v49, 1  ;;  %v14042_v27 = vld [vmem:[#allocation14_spill] sm:$0xff]  ;;  %v13780_v7 = vshrl.u32 %v10108_v62, 16 }
 0x2d0   : > { %2583 = vrot.lane.b32.xlu1 %v9919_v43, %s8167_s13  ;;  %v2154_v38 = vsel %vm2078_vm3, %v14042_v27, %v9846_v20  ;;  %v1907_v3 = vrot.slane %v1159_v49, 2 }
 0x2d1   : > { %v2684_v30 = vpop.permute.xlu0 %2683  ;;  %v1165_v51 = vor.u32 %v1163_v48, %v1161_v29  ;;  %v1910_v49 = vrot.slane %v13780_v7, 1  ;;  %v14044_v7 = vld [vmem:[#allocation40_spill] sm:$0xff] }
 0x2d2   : > { %v2800_v25 = vpop.permute.xlu1 %2799  ;;  %v3036_v32 = vsel %vm2992_vm7, %v2919_v12, %v2684_v30  ;;  %v1544_v30 = vrot.slane %v10103_v31, 1  ;;  %v10154_v12 = vrot.slane %v1167_v55, 1  ;;  %v14043_v31 = vrot.slane %v9975_v53, 1 }
 0x2d3   : > { %v3151_v44 = vsel %vm13855_vm8, %v3034_v59, %v2800_v25  ;;  %2585 = vrot.lane.b32.xlu0 %v9936_v40, %s8167_s13  ;;  %v2283_v59 = vsel %vm2207_vm4, %v2154_v38, %v9860_v17  ;;  %v1162_v17 = vsel %vm734_vm0, %v1157_v10, %v1161_v29 }
 0x2d4   : > { %2701 = vrot.lane.b32.xlu1 %v10024_v33, %s13816_s25  ;;  %7539 = vmatprep.mubr.msk.bf16.mxu0 %vm3257_vm9, %v3151_v44  ;;  %v10159_v20 = vsel %vm2336_vm5, %v2283_v59, %v9871_v8 }
 0x2d5   : > { %v2802_v0 = vpop.permute.xlu0 %2801 }
 0x2d6   : > { %v10129_v42 = vpop.permute.xlu1 %1330  ;;  %v3153_v45 = vsel %vm13855_vm8, %v3036_v32, %v2802_v0 }
 0x2d7   : > { %v7509_v35 = vpop.f32.mrf.mxu0  ;;  %2703 = vrot.lane.b32.xlu0 %v10037_v21, %s13816_s25  ;;  %7540 = vmatmul.mubr.msk.bf16.gmra.mxu0 %vm3257_vm9, %v3153_v45 }
 0x2d8   : > { %2819 = vrot.lane.b32.xlu1 %v10134_v58, %s13814_s26  ;;  %v3449_v34 = vadd.f32 %v7509_v35, %v9984_v36  ;;  %v1906_v35 = vrot.slane %v1163_v48, 1  ;;  %v1170_v48 = vsel %vm734_vm0, %v1165_v51, %v10154_v12  ;;  %v1545_v51 = vsel %vm1438_vm1, %v14043_v31, %v1544_v30 }
 0x2d9   : > { %v3440_v25 = vpop.f32.mrf.mxu0  ;;  %v10152_v44 = vpop.permute.xlu0 %1332 }
 0x2da   : > { %vm3877_vm14 = vcmp.ge.f32.partialorder %v3449_v34, 0.0  ;;  %v3989_v32 = vmul.f32 0.2, %v3449_v34  ;;  %v10161_v0 = vpop.permute.xlu1 %1650  ;;  %v3441_v14 = vadd.f32 %v9984_v36, %v3440_v25 }
 0x2db   : > { %v7510_v45 = vpop.f32.mrf.mxu0  ;;  %2821 = vrot.lane.b32.xlu0 %v10159_v20, %s13814_s26 }
 0x2dc   : > { %v10168_v38 = vsel %vm3877_vm14, %v3449_v34, %v3989_v32  ;;  %vm3875_vm15 = vcmp.ge.f32.partialorder %v3441_v14, 0.0  ;;  %v3987_v8 = vmul.f32 0.2, %v3441_v14  ;;  %1350 = vrot.lane.b32.xlu1 %v1162_v17, %s8164_s16  ;;  %v3452_v59 = vadd.f32 %v7510_v45, %v9984_v36 }
 0x2dd   : > { %v4209_v25 = vadd.f32 %v10168_v38, %v10051_v4  ;;  %v3443_v10 = vpop.f32.mrf.mxu0  ;;  %v10174_v29 = vpop.permute.xlu0 %1652  ;;  %v1911_v34 = vrot.slane %v1167_v55, 2  ;;  %v1908_v55 = vor.u32 %v1907_v3, %v1906_v35  ;;  %v14046_v3 = vrot.slane %v10108_v62, 1 }
 0x2de   : > { %v10180_v32 = vsel %vm3875_vm15, %v3441_v14, %v3987_v8  ;;  %vm3878_vm10 = vcmp.ge.f32.partialorder %v3452_v59, 0.0  ;;  %v3990_v27 = vmul.f32 0.2, %v3452_v59  ;;  %v10182_v17 = vpop.permute.xlu1 %2034  ;;  %v3444_v45 = vadd.f32 %v9984_v36, %v3443_v10 }
 0x2df   : > { %4318 = vst.msk [vmem:[#allocation2 + $0x30] sm:$0xff] %vm4311_vm13, %v4209_v25  ;;  %v4207_v4 = vadd.f32 %v10180_v32, %v10059_v13  ;;  %1352 = vrot.lane.b32.xlu0 %v1170_v48, %s8164_s16  ;;  %v8011_v10 = vunpack.i.l.bf16 %v14044_v7  ;;  %v8016_v25 = vunpack.i.l.bf16 %v14045_v47 }
 0x2e0   : > { %v10192_v14 = vsel %vm3878_vm10, %v3452_v59, %v3990_v27  ;;  %vm3876_vm12 = vcmp.ge.f32.partialorder %v3444_v45, 0.0  ;;  %v3988_v8 = vmul.f32 0.2, %v3444_v45  ;;  %1670 = vrot.lane.b32.xlu1 %v1545_v51, %s8165_s17  ;;  %v1547_v27 = vsel %vm1438_vm1, %v1544_v30, %v14046_v3 }
 0x2e1   : > { %4316 = vst.msk [vmem:[#allocation2 + $0x20] sm:$0xff] %vm4311_vm13, %v4207_v4  ;;  %v4210_v13 = vadd.f32 %v10192_v14, %v10074_v15  ;;  %v10200_v53 = vpop.permute.xlu0 %2036  ;;  %v10207_v59 = vor.u32 %v1911_v34, %v1910_v49  ;;  %v1909_v4 = vsel %vm1694_vm2, %v10088_v26, %v1908_v55  ;;  %v10216_v15 = vpack.c.bf16 %v8016_v25, %v8011_v10 }
 0x2e2   : > { %v10202_v31 = vsel %vm3876_vm12, %v3444_v45, %v3988_v8  ;;  %v2568_v35 = vpop.permute.xlu1 %2567  ;;  %v7944_v34 = vunpack.i.h.bf16 %v14000_v19 }
 0x2e3   : > { %4319 = vst.msk [vmem:[#allocation2 + $0x38] sm:$0xff] %vm4311_vm13, %v4210_v13  ;;  %v4208_v48 = vadd.f32 %v10202_v31, %v10081_v56  ;;  %1672 = vrot.lane.b32.xlu0 %v1547_v27, %s8165_s17  ;;  %v1913_v49 = vsel %vm1694_vm2, %v1908_v55, %v10207_v59  ;;  %v7949_v56 = vunpack.i.h.bf16 %v14001_v9  ;;  %v2921_v26 = vsel %vm2875_vm6, %v9488_v57, %v2568_v35 }
 0x2e4   : > { %2054 = vrot.lane.b32.xlu1 %v1909_v4, %s8166_s18  ;;  %v1175_v8 = vshll.u32 %v10216_v15, 16  ;;  %v2156_v57 = vsel %vm2078_vm3, %v9380_v16, %v9913_v46  ;;  %v14047_v16 = vshrl.u32 %v10108_v62, 16 }
 0x2e5   : > { %4317 = vst.msk [vmem:[#allocation2 + $0x28] sm:$0xff] %vm4311_vm13, %v4208_v48  ;;  %v2570_v45 = vpop.permute.xlu0 %2569  ;;  %v10230_v13 = vpack.c.bf16 %v7949_v56, %v7944_v34  ;;  %v2285_v27 = vsel %vm2207_vm4, %v2156_v57, %v9938_v54  ;;  %v1179_v54 = vshrl.u32 %v10216_v15, 16 }
 0x2e6   : > { %v2686_v30 = vpop.permute.xlu1 %2685  ;;  %v2923_v9 = vsel %vm2875_vm6, %v9508_v23, %v2570_v45  ;;  %v1177_v3 = vrot.slane %v1175_v8, 1  ;;  %v10251_v4 = vsel %vm2336_vm5, %v2285_v27, %v9950_v28  ;;  %v1173_v46 = vor.u32 %v14047_v16, %v10154_v12 }
 0x2e7   : > { %2056 = vrot.lane.b32.xlu0 %v1913_v49, %s8166_s18  ;;  %v3038_v10 = vsel %vm2992_vm7, %v2921_v26, %v2686_v30  ;;  %v1183_v30 = vshll.u32 %v10230_v13, 16  ;;  %v2158_v49 = vsel %vm2078_vm3, %v9454_v5, %v9932_v22  ;;  %v1187_v57 = vshrl.u32 %v10230_v13, 16 }
 0x2e8   : > { %2587 = vrot.lane.b32.xlu1 %v10024_v33, %s8167_s13  ;;  %v2287_v34 = vsel %vm2207_vm4, %v2158_v49, %v9948_v50  ;;  %v1181_v12 = vor.u32 %v1179_v54, %v1177_v3  ;;  %v1178_v22 = vsel %vm734_vm0, %v1173_v46, %v1177_v3  ;;  %v1548_v50 = vrot.slane %v10216_v15, 1 }
 0x2e9   : > { %v2688_v51 = vpop.permute.xlu0 %2687  ;;  %v1914_v16 = vrot.slane %v1179_v54, 1  ;;  %v1915_v46 = vrot.slane %v1175_v8, 2  ;;  %v1550_v8 = vrot.slane %v10230_v13, 1  ;;  %v1918_v54 = vrot.slane %v1187_v57, 1 }
 0x2ea   : > { %v2804_v25 = vpop.permute.xlu1 %2803  ;;  %v3040_v55 = vsel %vm2992_vm7, %v2923_v9, %v2688_v51  ;;  %v10273_v51 = vsel %vm2336_vm5, %v2287_v34, %v9963_v63  ;;  %v10282_v9 = vrot.slane %v1183_v30, 1 }
 0x2eb   : > { %v3155_v19 = vsel %vm13855_vm8, %v3038_v10, %v2804_v25  ;;  %2589 = vrot.lane.b32.xlu0 %v10037_v21, %s8167_s13 }
 0x2ec   : > { %2705 = vrot.lane.b32.xlu1 %v10134_v58, %s13816_s25  ;;  %7543 = vmatprep.mubr.msk.bf16.mxu0 %vm3257_vm9, %v3155_v19 }
 0x2ed   : > { %v2806_v35 = vpop.permute.xlu0 %2805 }
 0x2ee   : > { %v10246_v48 = vpop.permute.xlu1 %1334  ;;  %v3157_v23 = vsel %vm13855_vm8, %v3040_v55, %v2806_v35 }
 0x2ef   : > { %v7513_v45 = vpop.f32.mrf.mxu0  ;;  %2707 = vrot.lane.b32.xlu0 %v10159_v20, %s13816_s25  ;;  %7544 = vmatmul.mubr.msk.bf16.gmra.mxu0 %vm3257_vm9, %v3157_v23 }
 0x2f0   : > { %2823 = vrot.lane.b32.xlu1 %v10251_v4, %s13814_s26  ;;  %v3465_v28 = vadd.f32 %v7513_v45, %v9984_v36  ;;  %v1186_v45 = vsel %vm734_vm0, %v1181_v12, %v10282_v9 }
 0x2f1   : > { %v3456_v56 = vpop.f32.mrf.mxu0  ;;  %v10269_v26 = vpop.permute.xlu0 %1336 }
 0x2f2   : > { %vm3881_vm11 = vcmp.ge.f32.partialorder %v3465_v28, 0.0  ;;  %v3993_v10 = vmul.f32 0.2, %v3465_v28  ;;  %v10275_v25 = vpop.permute.xlu1 %1654  ;;  %v3457_v5 = vadd.f32 %v9984_v36, %v3456_v56 }
 0x2f3   : > { %v7514_v19 = vpop.f32.mrf.mxu0  ;;  %2825 = vrot.lane.b32.xlu0 %v10273_v51, %s13814_s26 }
 0x2f4   : > { %v10285_v63 = vsel %vm3881_vm11, %v3465_v28, %v3993_v10  ;;  %vm3879_vm14 = vcmp.ge.f32.partialorder %v3457_v5, 0.0  ;;  %v3991_v55 = vmul.f32 0.2, %v3457_v5  ;;  %1354 = vrot.lane.b32.xlu1 %v1178_v22, %s8164_s16  ;;  %v3468_v35 = vadd.f32 %v7514_v19, %v9984_v36 }
 0x2f5   : > { %v4213_v3 = vadd.f32 %v10285_v63, %v10168_v38  ;;  %v3459_v27 = vpop.f32.mrf.mxu0  ;;  %v10291_v23 = vpop.permute.xlu0 %1656  ;;  %v14048_v10 = vrot.slane %v10108_v62, 1  ;;  %v1919_v19 = vrot.slane %v1183_v30, 2 }
 0x2f6   : > { %v10295_v49 = vsel %vm3879_vm14, %v3457_v5, %v3991_v55  ;;  %vm3882_vm15 = vcmp.ge.f32.partialorder %v3468_v35, 0.0  ;;  %v3994_v28 = vmul.f32 0.2, %v3468_v35  ;;  %v10297_v34 = vpop.permute.xlu1 %2038  ;;  %v3460_v56 = vadd.f32 %v9984_v36, %v3459_v27 }
 0x2f7   : > { %4322 = vst.msk [vmem:[#allocation2 + $0x50] sm:$0xff] %vm4311_vm13, %v4213_v3  ;;  %v4211_v38 = vadd.f32 %v10295_v49, %v10180_v32  ;;  %v1549_v22 = vsel %vm1438_vm1, %v14048_v10, %v1548_v50  ;;  %1356 = vrot.lane.b32.xlu0 %v1186_v45, %s8164_s16  ;;  %v1916_v3 = vor.u32 %v1915_v46, %v1914_v16  ;;  %v7959_v10 = vunpack.i.h.bf16 %v14012_v11 }
 0x2f8   : > { %v10310_v12 = vsel %vm3882_vm15, %v3468_v35, %v3994_v28  ;;  %vm3880_vm10 = vcmp.ge.f32.partialorder %v3460_v56, 0.0  ;;  %v3992_v5 = vmul.f32 0.2, %v3460_v56  ;;  %1674 = vrot.lane.b32.xlu1 %v1549_v22, %s8165_s17  ;;  %v1551_v35 = vsel %vm1438_vm1, %v1548_v50, %v1550_v8 }
 0x2f9   : > { %4320 = vst.msk [vmem:[#allocation2 + $0x40] sm:$0xff] %vm4311_vm13, %v4211_v38  ;;  %v4214_v32 = vadd.f32 %v10310_v12, %v10192_v14  ;;  %v10316_v55 = vpop.permute.xlu0 %2040  ;;  %v7954_v28 = vunpack.i.h.bf16 %v14011_v41  ;;  %v1917_v14 = vsel %vm1694_vm2, %v10207_v59, %v1916_v3  ;;  %v10332_v16 = vor.u32 %v1919_v19, %v1918_v54 }
 0x2fa   : > { %v10318_v27 = vsel %vm3880_vm10, %v3460_v56, %v3992_v5  ;;  %v2572_v45 = vpop.permute.xlu1 %2571  ;;  %v7964_v50 = vunpack.i.h.bf16 %v14013_v37  ;;  %v7969_v41 = vunpack.i.h.bf16 %v14014_v60 }
 0x2fb   : > { %4323 = vst.msk [vmem:[#allocation2 + $0x58] sm:$0xff] %vm4311_vm13, %v4214_v32  ;;  %v4212_v30 = vadd.f32 %v10318_v27, %v10202_v31  ;;  %1676 = vrot.lane.b32.xlu0 %v1551_v35, %s8165_s17  ;;  %v1921_v31 = vsel %vm1694_vm2, %v1916_v3, %v10332_v16  ;;  %v10339_v56 = vpack.c.bf16 %v7959_v10, %v7954_v28  ;;  %v14050_v28 = vld [vmem:[#allocation49_spill] sm:$0xff] }
 0x2fc   : > { %2058 = vrot.lane.b32.xlu1 %v1917_v14, %s8166_s18  ;;  %v10344_v59 = vpack.c.bf16 %v7969_v41, %v7964_v50  ;;  %v2925_v37 = vsel %vm2875_vm6, %v9575_v18, %v2572_v45  ;;  %v14049_v18 = vld [vmem:[#allocation41_spill] sm:$0xff] }
 0x2fd   : > { %4321 = vst.msk [vmem:[#allocation2 + $0x48] sm:$0xff] %vm4311_vm13, %v4212_v30  ;;  %v2574_v11 = vpop.permute.xlu0 %2573  ;;  %v1191_v5 = vshll.u32 %v10339_v56, 16  ;;  %v2160_v32 = vsel %vm2078_vm3, %v14049_v18, %v10014_v1  ;;  %v1189_v1 = vor.u32 %v1187_v57, %v10282_v9 }
 0x2fe   : > { %v2690_v46 = vpop.permute.xlu1 %2689  ;;  %v2927_v19 = vsel %vm2875_vm6, %v9594_v24, %v2574_v11  ;;  %v1199_v35 = vshll.u32 %v10344_v59, 16  ;;  %v2289_v10 = vsel %vm2207_vm4, %v2160_v32, %v14050_v28  ;;  %v1195_v11 = vshrl.u32 %v10339_v56, 16 }
 0x2ff   : > { %2060 = vrot.lane.b32.xlu0 %v1921_v31, %s8166_s18  ;;  %v3042_v38 = vsel %vm2992_vm7, %v2925_v37, %v2690_v46  ;;  %v10370_v14 = vsel %vm2336_vm5, %v2289_v10, %v10061_v52  ;;  %v1193_v41 = vrot.slane %v1191_v5, 1  ;;  %v14051_v46 = vld [vmem:[#allocation55_spill] sm:$0xff]  ;;  %v14063_v7 = vrot.slane %v10344_v59, 1 }
 0x300   : > { %2591 = vrot.lane.b32.xlu1 %v10134_v58, %s8167_s13  ;;  %v14052_v31 = vld [vmem:[#allocation43_spill] sm:$0xff]  ;;  %v10390_v57 = vrot.slane %v1199_v35, 1  ;;  %v1922_v10 = vrot.slane %v1195_v11, 1 }
 0x301   : > { %v2692_v60 = vpop.permute.xlu0 %2691  ;;  %v2162_v37 = vsel %vm2078_vm3, %v14052_v31, %v14051_v46  ;;  %v1197_v9 = vor.u32 %v1195_v11, %v1193_v41 }
 0x302   : > { %v2808_v22 = vpop.permute.xlu1 %2807  ;;  %v3044_v3 = vsel %vm2992_vm7, %v2927_v19, %v2692_v60  ;;  %v1552_v60 = vrot.slane %v10339_v56, 1  ;;  %v1203_v19 = vshrl.u32 %v10344_v59, 16 }
 0x303   : > { %v3159_v54 = vsel %vm13855_vm8, %v3042_v38, %v2808_v22  ;;  %2593 = vrot.lane.b32.xlu0 %v10159_v20, %s8167_s13  ;;  %v2291_v38 = vsel %vm2207_vm4, %v2162_v37, %v10057_v61  ;;  %v1194_v61 = vsel %vm734_vm0, %v1189_v1, %v1193_v41  ;;  %v1202_v11 = vsel %vm734_vm0, %v1197_v9, %v10390_v57 }
 0x304   : > { %2709 = vrot.lane.b32.xlu1 %v10251_v4, %s13816_s25  ;;  %7547 = vmatprep.mubr.msk.bf16.mxu0 %vm3257_vm9, %v3159_v54  ;;  %v10395_v18 = vsel %vm2336_vm5, %v2291_v38, %v10079_v2  ;;  %v1553_v9 = vsel %vm1438_vm1, %v1550_v8, %v1552_v60 }
 0x305   : > { %v2810_v45 = vpop.permute.xlu0 %2809  ;;  %14053 = vst [vmem:[#allocation60_spill] sm:$0xff] %v10395_v18 }
 0x306   : > { %v10365_v30 = vpop.permute.xlu1 %1338  ;;  %v3161_v24 = vsel %vm13855_vm8, %v3044_v3, %v2810_v45 }
 0x307   : > { %v7517_v50 = vpop.f32.mrf.mxu0  ;;  %2711 = vrot.lane.b32.xlu0 %v10273_v51, %s13816_s25  ;;  %7548 = vmatmul.mubr.msk.bf16.gmra.mxu0 %vm3257_vm9, %v3161_v24  ;;  %v1923_v24 = vrot.slane %v1191_v5, 2  ;;  %v1926_v5 = vrot.slane %v1203_v19, 1 }
 0x308   : > { %2827 = vrot.lane.b32.xlu1 %v10370_v14, %s13814_s26  ;;  %v3481_v52 = vadd.f32 %v7517_v50, %v9984_v36  ;;  %v13783_v50 = vrot.slane %v10344_v59, 1 }
 0x309   : > { %v3472_v22 = vpop.f32.mrf.mxu0  ;;  %v10388_v54 = vpop.permute.xlu0 %1340 }
 0x30a   : > { %vm3885_vm12 = vcmp.ge.f32.partialorder %v3481_v52, 0.0  ;;  %v3997_v32 = vmul.f32 0.2, %v3481_v52  ;;  %v10397_v3 = vpop.permute.xlu1 %1658  ;;  %v3473_v45 = vadd.f32 %v9984_v36, %v3472_v22  ;;  %v1555_v8 = vsel %vm1438_vm1, %v1552_v60, %v13783_v50 }
 0x30b   : > { %v7518_v28 = vpop.f32.mrf.mxu0  ;;  %2829 = vrot.lane.b32.xlu0 %v10395_v18, %s13814_s26 }
 0x30c   : > { %v10404_v46 = vsel %vm3885_vm12, %v3481_v52, %v3997_v32  ;;  %vm3883_vm11 = vcmp.ge.f32.partialorder %v3473_v45, 0.0  ;;  %v3995_v2 = vmul.f32 0.2, %v3473_v45  ;;  %1358 = vrot.lane.b32.xlu1 %v1194_v61, %s8164_s16  ;;  %v3484_v31 = vadd.f32 %v7518_v28, %v9984_v36 }
 0x30d   : > { %v4217_v37 = vadd.f32 %v10404_v46, %v10285_v63  ;;  %v3475_v1 = vpop.f32.mrf.mxu0  ;;  %v10410_v41 = vpop.permute.xlu0 %1660  ;;  %v1927_v52 = vrot.slane %v1199_v35, 2  ;;  %v1924_v35 = vor.u32 %v1923_v24, %v1922_v10  ;;  %v14054_v24 = vld [vmem:[#allocation31_spill] sm:$0xff] }
 0x30e   : > { %v10416_v38 = vsel %vm3883_vm11, %v3473_v45, %v3995_v2  ;;  %vm3886_vm14 = vcmp.ge.f32.partialorder %v3484_v31, 0.0  ;;  %v3998_v22 = vmul.f32 0.2, %v3484_v31  ;;  %v10418_v32 = vpop.permute.xlu1 %2042  ;;  %v3476_v61 = vadd.f32 %v9984_v36, %v3475_v1 }
 0x30f   : > { %4326 = vst.msk [vmem:[#allocation2 + $0x70] sm:$0xff] %vm4311_vm13, %v4217_v37  ;;  %v4215_v63 = vadd.f32 %v10416_v38, %v10295_v49  ;;  %1360 = vrot.lane.b32.xlu0 %v1202_v11, %s8164_s16  ;;  %v10441_v10 = vor.u32 %v1927_v52, %v1926_v5  ;;  %v14055_v11 = vld [vmem:[#allocation32_spill] sm:$0xff]  ;;  %v14057_v5 = vld [vmem:[#allocation34_spill] sm:$0xff] }
 0x310   : > { %v10428_v45 = vsel %vm3886_vm14, %v3484_v31, %v3998_v22  ;;  %vm3884_vm15 = vcmp.ge.f32.partialorder %v3476_v61, 0.0  ;;  %v3996_v28 = vmul.f32 0.2, %v3476_v61  ;;  %1678 = vrot.lane.b32.xlu1 %v1553_v9, %s8165_s17  ;;  %v7974_v31 = vunpack.i.h.bf16 %v14054_v24 }
 0x311   : > { %4324 = vst.msk [vmem:[#allocation2 + $0x60] sm:$0xff] %vm4311_vm13, %v4215_v63  ;;  %v4218_v2 = vadd.f32 %v10428_v45, %v10310_v12  ;;  %v10434_v37 = vpop.permute.xlu0 %2044  ;;  %v7979_v22 = vunpack.i.h.bf16 %v14055_v11  ;;  %v14056_v63 = vld [vmem:[#allocation33_spill] sm:$0xff]  ;;  %v7989_v52 = vunpack.i.h.bf16 %v14057_v5 }
 0x312   : > { %v10436_v49 = vsel %vm3884_vm15, %v3476_v61, %v3996_v28  ;;  %v2576_v1 = vpop.permute.xlu1 %2575  ;;  %v1925_v61 = vsel %vm1694_vm2, %v10332_v16, %v1924_v35  ;;  %v7984_v60 = vunpack.i.h.bf16 %v14056_v63  ;;  %v14058_v16 = vld [vmem:[#allocation18_spill] sm:$0xff] }
 0x313   : > { %4327 = vst.msk [vmem:[#allocation2 + $0x78] sm:$0xff] %vm4311_vm13, %v4218_v2  ;;  %v4216_v12 = vadd.f32 %v10436_v49, %v10318_v27  ;;  %1680 = vrot.lane.b32.xlu0 %v1555_v8, %s8165_s17  ;;  %v1929_v2 = vsel %vm1694_vm2, %v1924_v35, %v10441_v10  ;;  %v10457_v24 = vpack.c.bf16 %v7979_v22, %v7974_v31  ;;  %v14059_v31 = vld [vmem:[#allocation44_spill] sm:$0xff] }
 0x314   : > { %2062 = vrot.lane.b32.xlu1 %v1925_v61, %s8166_s18  ;;  %v10462_v27 = vpack.c.bf16 %v7989_v52, %v7984_v60  ;;  %v2929_v8 = vsel %vm2875_vm6, %v14058_v16, %v2576_v1  ;;  %v14060_v1 = vld [vmem:[#allocation15_spill] sm:$0xff] }
 0x315   : > { %4325 = vst.msk [vmem:[#allocation2 + $0x68] sm:$0xff] %vm4311_vm13, %v4216_v12  ;;  %v2578_v9 = vpop.permute.xlu0 %2577  ;;  %v1207_v35 = vshll.u32 %v10457_v24, 16  ;;  %v2164_v60 = vsel %vm2078_vm3, %v14060_v1, %v10129_v42  ;;  %v1205_v42 = vor.u32 %v1203_v19, %v10390_v57 }
 0x316   : > { %v2694_v28 = vpop.permute.xlu1 %2693  ;;  %v2931_v22 = vsel %vm2875_vm6, %v14059_v31, %v2578_v9  ;;  %v1556_v31 = vrot.slane %v10457_v24, 1 }
 0x317   : > { %2064 = vrot.lane.b32.xlu0 %v1929_v2, %s8166_s18  ;;  %v3046_v12 = vsel %vm2992_vm7, %v2929_v8, %v2694_v28  ;;  %v1215_v28 = vshll.u32 %v10462_v27, 16  ;;  %v2293_v2 = vsel %vm2207_vm4, %v2164_v60, %v10161_v0  ;;  %v1211_v0 = vshrl.u32 %v10457_v24, 16 }
 0x318   : > { %2595 = vrot.lane.b32.xlu1 %v10251_v4, %s8167_s13  ;;  %v10488_v8 = vsel %vm2336_vm5, %v2293_v2, %v10182_v17 }
 0x319   : > { %v2696_v11 = vpop.permute.xlu0 %2695  ;;  %v10508_v19 = vrot.slane %v1215_v28, 1 }
 0x31a   : > { %v2812_v61 = vpop.permute.xlu1 %2811  ;;  %v3048_v5 = vsel %vm2992_vm7, %v2931_v22, %v2696_v11  ;;  %v1209_v11 = vrot.slane %v1207_v35, 1 }
 0x31b   : > { %v3163_v63 = vsel %vm13855_vm8, %v3046_v12, %v2812_v61  ;;  %2597 = vrot.lane.b32.xlu0 %v10273_v51, %s8167_s13  ;;  %v14061_v61 = vld [vmem:[#allocation16_spill] sm:$0xff] }
 0x31c   : > { %2713 = vrot.lane.b32.xlu1 %v10370_v14, %s13816_s25  ;;  %7551 = vmatprep.mubr.msk.bf16.mxu0 %vm3257_vm9, %v3163_v63  ;;  %v2166_v63 = vsel %vm2078_vm3, %v14061_v61, %v10152_v44  ;;  %v1213_v57 = vor.u32 %v1211_v0, %v1209_v11  ;;  %v1930_v61 = vrot.slane %v1211_v0, 1 }
 0x31d   : > { %v2814_v52 = vpop.permute.xlu0 %2813  ;;  %v2295_v22 = vsel %vm2207_vm4, %v2166_v63, %v10174_v29  ;;  %v1210_v29 = vsel %vm734_vm0, %v1205_v42, %v1209_v11  ;;  %v1931_v63 = vrot.slane %v1207_v35, 2  ;;  %v14062_v35 = vshrl.u32 %v10462_v27, 16 }
 0x31e   : > { %v10483_v16 = vpop.permute.xlu1 %1342  ;;  %v3165_v9 = vsel %vm13855_vm8, %v3048_v5, %v2814_v52  ;;  %v10513_v44 = vsel %vm2336_vm5, %v2295_v22, %v10200_v53  ;;  %v1218_v0 = vsel %vm734_vm0, %v1213_v57, %v10508_v19  ;;  %v1557_v57 = vsel %vm1438_vm1, %v14063_v7, %v1556_v31 }
 0x31f   : > { %v7521_v12 = vpop.f32.mrf.mxu0  ;;  %2715 = vrot.lane.b32.xlu0 %v10395_v18, %s13816_s25  ;;  %7552 = vmatmul.mubr.msk.bf16.gmra.mxu0 %vm3257_vm9, %v3165_v9  ;;  %v1934_v50 = vrot.slane %v14062_v35, 1  ;;  %v14064_v7 = vrot.slane %v10462_v27, 1 }
 0x320   : > { %2831 = vrot.lane.b32.xlu1 %v10488_v8, %s13814_s26  ;;  %v3497_v17 = vadd.f32 %v7521_v12, %v9984_v36 }
 0x321   : > { %v3488_v1 = vpop.f32.mrf.mxu0  ;;  %v10506_v60 = vpop.permute.xlu0 %1344 }
 0x322   : > { %vm3889_vm10 = vcmp.ge.f32.partialorder %v3497_v17, 0.0  ;;  %v4001_v52 = vmul.f32 0.2, %v3497_v17  ;;  %v10515_v2 = vpop.permute.xlu1 %1662  ;;  %v3489_v9 = vadd.f32 %v9984_v36, %v3488_v1 }
 0x323   : > { %v7522_v12 = vpop.f32.mrf.mxu0  ;;  %2833 = vrot.lane.b32.xlu0 %v10513_v44, %s13814_s26 }
 0x324   : > { %v10522_v5 = vsel %vm3889_vm10, %v3497_v17, %v4001_v52  ;;  %vm3887_vm12 = vcmp.ge.f32.partialorder %v3489_v9, 0.0  ;;  %v3999_v53 = vmul.f32 0.2, %v3489_v9  ;;  %1362 = vrot.lane.b32.xlu1 %v1210_v29, %s8164_s16  ;;  %v3500_v22 = vadd.f32 %v7522_v12, %v9984_v36 }
 0x325   : > { %v4221_v1 = vadd.f32 %v10522_v5, %v10404_v46  ;;  %v3491_v42 = vpop.f32.mrf.mxu0  ;;  %v10528_v11 = vpop.permute.xlu0 %1664  ;;  %v1935_v17 = vrot.slane %v1215_v28, 2  ;;  %v1932_v28 = vor.u32 %v1931_v63, %v1930_v61  ;;  %v1559_v61 = vsel %vm1438_vm1, %v1556_v31, %v14064_v7 }
 0x326   : > { %v10534_v52 = vsel %vm3887_vm12, %v3489_v9, %v3999_v53  ;;  %vm3890_vm11 = vcmp.ge.f32.partialorder %v3500_v22, 0.0  ;;  %v4002_v47 = vmul.f32 0.2, %v3500_v22  ;;  %v10536_v29 = vpop.permute.xlu1 %2046  ;;  %v3492_v12 = vadd.f32 %v9984_v36, %v3491_v42 }
 0x327   : > { %4330 = vst.msk [vmem:[#allocation2 + $0x90] sm:$0xff] %vm4311_vm13, %v4221_v1  ;;  %v4219_v46 = vadd.f32 %v10534_v52, %v10416_v38  ;;  %1364 = vrot.lane.b32.xlu0 %v1218_v0, %s8164_s16  ;;  %v7994_v63 = vunpack.i.h.bf16 %v14036_v39  ;;  %v1933_v0 = vsel %vm1694_vm2, %v10441_v10, %v1932_v28 }
 0x328   : > { %v10546_v9 = vsel %vm3890_vm11, %v3500_v22, %v4002_v47  ;;  %vm3888_vm14 = vcmp.ge.f32.partialorder %v3492_v12, 0.0  ;;  %v4000_v53 = vmul.f32 0.2, %v3492_v12  ;;  %1682 = vrot.lane.b32.xlu1 %v1557_v57, %s8165_s17  ;;  %v10559_v47 = vor.u32 %v1935_v17, %v1934_v50 }
 0x329   : > { %4328 = vst.msk [vmem:[#allocation2 + $0x80] sm:$0xff] %vm4311_vm13, %v4219_v46  ;;  %v4222_v1 = vadd.f32 %v10546_v9, %v10428_v45  ;;  %v10552_v42 = vpop.permute.xlu0 %2048  ;;  %v7999_v22 = vunpack.i.h.bf16 %v14037_v6 }
 0x32a   : > { %v10554_v38 = vsel %vm3888_vm14, %v3492_v12, %v4000_v53  ;;  %v2580_v35 = vpop.permute.xlu1 %2579  ;;  %v1937_v39 = vsel %vm1694_vm2, %v1932_v28, %v10559_v47  ;;  %v14066_v53 = vld [vmem:[#allocation21_spill] sm:$0xff] }
 0x32b   : > { %4331 = vst.msk [vmem:[#allocation2 + $0x98] sm:$0xff] %vm4311_vm13, %v4222_v1  ;;  %v4220_v45 = vadd.f32 %v10554_v38, %v10436_v49  ;;  %1684 = vrot.lane.b32.xlu0 %v1559_v61, %s8165_s17  ;;  %v10573_v6 = vpack.c.bf16 %v7999_v22, %v7994_v63  ;;  %v14065_v49 = vld [vmem:[#allocation20_spill] sm:$0xff] }
 0x32c   : > { %2066 = vrot.lane.b32.xlu1 %v1933_v0, %s8166_s18  ;;  %v2933_v10 = vsel %vm2875_vm6, %v14065_v49, %v2580_v35  ;;  %v14067_v35 = vld [vmem:[#allocation17_spill] sm:$0xff] }
 0x32d   : > { %4329 = vst.msk [vmem:[#allocation2 + $0x88] sm:$0xff] %vm4311_vm13, %v4220_v45  ;;  %v2582_v50 = vpop.permute.xlu0 %2581  ;;  %v1223_v28 = vshll.u32 %v10573_v6, 16  ;;  %v2168_v7 = vsel %vm2078_vm3, %v14067_v35, %v10246_v48  ;;  %v14068_v48 = vshrl.u32 %v10462_v27, 16 }
 0x32e   : > { %v2698_v31 = vpop.permute.xlu1 %2697  ;;  %v2935_v1 = vsel %vm2875_vm6, %v14066_v53, %v2582_v50  ;;  %v2297_v22 = vsel %vm2207_vm4, %v2168_v7, %v10275_v25  ;;  %v1227_v25 = vshrl.u32 %v10573_v6, 16 }
 0x32f   : > { %2068 = vrot.lane.b32.xlu0 %v1937_v39, %s8166_s18  ;;  %v3050_v12 = vsel %vm2992_vm7, %v2933_v10, %v2698_v31  ;;  %v10601_v50 = vsel %vm2336_vm5, %v2297_v22, %v10297_v34  ;;  %v1221_v39 = vor.u32 %v14068_v48, %v10508_v19  ;;  %v1225_v49 = vrot.slane %v1223_v28, 1  ;;  %v14069_v10 = vld [vmem:[#allocation45_spill] sm:$0xff]  ;;  %v14070_v22 = vld [vmem:[#allocation54_spill] sm:$0xff] }
 0x330   : > { %2599 = vrot.lane.b32.xlu1 %v10370_v14, %s8167_s13  ;;  %v1560_v19 = vrot.slane %v10573_v6, 1 }
 0x331   : > { %v2700_v17 = vpop.permute.xlu0 %2699  ;;  %v1229_v53 = vor.u32 %v1227_v25, %v1225_v49  ;;  %v1226_v7 = vsel %vm734_vm0, %v1221_v39, %v1225_v49 }
 0x332   : > { %v2816_v46 = vpop.permute.xlu1 %2815  ;;  %v3052_v61 = vsel %vm2992_vm7, %v2935_v1, %v2700_v17  ;;  %v2170_v17 = vsel %vm2078_vm3, %v14069_v10, %v10269_v26 }
 0x333   : > { %v3167_v57 = vsel %vm13855_vm8, %v3050_v12, %v2816_v46  ;;  %2601 = vrot.lane.b32.xlu0 %v10395_v18, %s8167_s13  ;;  %v2299_v12 = vsel %vm2207_vm4, %v2170_v17, %v10291_v23 }
 0x334   : > { %2717 = vrot.lane.b32.xlu1 %v10488_v8, %s13816_s25  ;;  %7555 = vmatprep.mubr.msk.bf16.mxu0 %vm3257_vm9, %v3167_v57  ;;  %v10623_v1 = vsel %vm2336_vm5, %v2299_v12, %v10316_v55  ;;  %v1939_v55 = vrot.slane %v1223_v28, 2  ;;  %v14071_v12 = vld [vmem:[#allocation56_spill] sm:$0xff]  ;;  %v14072_v28 = vshrl.u32 %v14070_v22, 16 }
 0x335   : > { %v2818_v63 = vpop.permute.xlu0 %2817 }
 0x336   : > { %v10596_v45 = vpop.permute.xlu1 %1346  ;;  %v3169_v0 = vsel %vm13855_vm8, %v3052_v61, %v2818_v63  ;;  %v1938_v63 = vrot.slane %v1227_v25, 1  ;;  %v1234_v25 = vsel %vm734_vm0, %v1229_v53, %v14071_v12  ;;  %v14074_v53 = vrot.slane %v10462_v27, 1 }
 0x337   : > { %v7525_v31 = vpop.f32.mrf.mxu0  ;;  %2719 = vrot.lane.b32.xlu0 %v10513_v44, %s13816_s25  ;;  %7556 = vmatmul.mubr.msk.bf16.gmra.mxu0 %vm3257_vm9, %v3169_v0 }
 0x338   : > { %2835 = vrot.lane.b32.xlu1 %v10601_v50, %s13814_s26  ;;  %v3513_v34 = vadd.f32 %v7525_v31, %v9984_v36  ;;  %v10630_v36 = vld [vmem:[%s14027_s2] ss:$0 sm:$0xff]  ;;  %v1561_v12 = vsel %vm1438_vm1, %v14074_v53, %v1560_v19  ;;  %v14075_v53 = vrot.slane %v14070_v22, 1 }
 0x339   : > { %v3504_v46 = vpop.f32.mrf.mxu0  ;;  %v10618_v57 = vpop.permute.xlu0 %1348 }
 0x33a   : > { %vm3893_vm15 = vcmp.ge.f32.partialorder %v3513_v34, 0.0  ;;  %v4005_v26 = vmul.f32 0.2, %v3513_v34  ;;  %v10625_v35 = vpop.permute.xlu1 %1666  ;;  %v3505_v23 = vadd.f32 %v10630_v36, %v3504_v46  ;;  %v1942_v46 = vrot.slane %v14072_v28, 1 }
 0x33b   : > { %v7526_v61 = vpop.f32.mrf.mxu0  ;;  %2837 = vrot.lane.b32.xlu0 %v10623_v1, %s13814_s26  ;;  %v1940_v28 = vor.u32 %v1939_v55, %v1938_v63  ;;  %v1563_v63 = vsel %vm1438_vm1, %v1560_v19, %v14075_v53 }
 0x33c   : > { %v10637_v31 = vsel %vm3893_vm15, %v3513_v34, %v4005_v26  ;;  %vm3891_vm10 = vcmp.ge.f32.partialorder %v3505_v23, 0.0  ;;  %v4003_v48 = vmul.f32 0.2, %v3505_v23  ;;  %1366 = vrot.lane.b32.xlu1 %v1226_v7, %s8164_s16  ;;  %v3516_v10 = vadd.f32 %v10630_v36, %v7526_v61 }
 0x33d   : > { %v4225_v17 = vadd.f32 %v10637_v31, %v10522_v5  ;;  %v3507_v39 = vpop.f32.mrf.mxu0  ;;  %v10643_v49 = vpop.permute.xlu0 %1668  ;;  %v14073_v34 = vshll.u32 %v14070_v22, 16 }
 0x33e   : > { %v10651_v0 = vsel %vm3891_vm10, %v3505_v23, %v4003_v48  ;;  %vm3894_vm12 = vcmp.ge.f32.partialorder %v3516_v10, 0.0  ;;  %v4006_v7 = vmul.f32 0.2, %v3516_v10  ;;  %v10653_v61 = vpop.permute.xlu1 %2050  ;;  %v3508_v5 = vadd.f32 %v10630_v36, %v3507_v39 }
 0x33f   : > { %v1943_v26 = vrot.slane %v14073_v34, 2  ;;  %4334 = vst.msk [vmem:[#allocation2 + $0xb0] sm:$0xff] %vm4311_vm13, %v4225_v17  ;;  %v4223_v18 = vadd.f32 %v10651_v0, %v10534_v52  ;;  %1368 = vrot.lane.b32.xlu0 %v1234_v25, %s8164_s16 }
 0x340   : > { %v10663_v23 = vsel %vm3894_vm12, %v3516_v10, %v4006_v7  ;;  %vm3892_vm11 = vcmp.ge.f32.partialorder %v3508_v5, 0.0  ;;  %v4004_v48 = vmul.f32 0.2, %v3508_v5  ;;  %1686 = vrot.lane.b32.xlu1 %v1561_v12, %s8165_s17  ;;  %v14077_v12 = vld [vmem:[#allocation46_spill] sm:$0xff] }
 0x341   : > { %4332 = vst.msk [vmem:[#allocation2 + $0xa0] sm:$0xff] %vm4311_vm13, %v4223_v18  ;;  %v4226_v17 = vadd.f32 %v10663_v23, %v10546_v9  ;;  %v10669_v39 = vpop.permute.xlu0 %2052  ;;  %v10676_v55 = vor.u32 %v1943_v26, %v1942_v46  ;;  %v1941_v18 = vsel %vm1694_vm2, %v10559_v47, %v1940_v28 }
 0x342   : > { %v10671_v52 = vsel %vm3892_vm11, %v3508_v5, %v4004_v48  ;;  %v2584_v34 = vpop.permute.xlu1 %2583  ;;  %v14078_v48 = vld [vmem:[#allocation19_spill] sm:$0xff] }
 0x343   : > { %4335 = vst.msk [vmem:[#allocation2 + $0xb8] sm:$0xff] %vm4311_vm13, %v4226_v17  ;;  %v4224_v10 = vadd.f32 %v10671_v52, %v10554_v38  ;;  %1688 = vrot.lane.b32.xlu0 %v1563_v63, %s8165_s17  ;;  %v1945_v19 = vsel %vm1694_vm2, %v1940_v28, %v10676_v55  ;;  %v14076_v38 = vld [vmem:[#allocation24_spill] sm:$0xff]  ;;  %v2172_v17 = vsel %vm2078_vm3, %v14078_v48, %v10365_v30  ;;  %v14079_v30 = vld [vmem:[#allocation22_spill] sm:$0xff] }
 0x344   : > { %2070 = vrot.lane.b32.xlu1 %v1941_v18, %s8166_s18  ;;  %v2937_v46 = vsel %vm2875_vm6, %v14076_v38, %v2584_v34  ;;  %v2301_v63 = vsel %vm2207_vm4, %v2172_v17, %v10397_v3 }
 0x345   : > { %4333 = vst.msk [vmem:[#allocation2 + $0xa8] sm:$0xff] %vm4311_vm13, %v4224_v10  ;;  %v2586_v9 = vpop.permute.xlu0 %2585 }
 0x346   : > { %v2702_v25 = vpop.permute.xlu1 %2701  ;;  %v2939_v28 = vsel %vm2875_vm6, %v14077_v12, %v2586_v9  ;;  %v10713_v9 = vsel %vm2336_vm5, %v2301_v63, %v10418_v32 }
 0x347   : > { %2072 = vrot.lane.b32.xlu0 %v1945_v19, %s8166_s18  ;;  %v3054_v26 = vsel %vm2992_vm7, %v2937_v46, %v2702_v25  ;;  %v2174_v19 = vsel %vm2078_vm3, %v14079_v30, %v10388_v54 }
 0x348   : > { %2603 = vrot.lane.b32.xlu1 %v10488_v8, %s8167_s13  ;;  %v2303_v38 = vsel %vm2207_vm4, %v2174_v19, %v10410_v41  ;;  %v14080_v19 = vld [vmem:[#allocation23_spill] sm:$0xff] }
 0x349   : > { %v2704_v47 = vpop.permute.xlu0 %2703 }
 0x34a   : > { %v2820_v7 = vpop.permute.xlu1 %2819  ;;  %v3056_v34 = vsel %vm2992_vm7, %v2939_v28, %v2704_v47  ;;  %v10730_v47 = vsel %vm2336_vm5, %v2303_v38, %v10434_v37 }
 0x34b   : > { %v3171_v5 = vsel %vm13855_vm8, %v3054_v26, %v2820_v7  ;;  %2605 = vrot.lane.b32.xlu0 %v10513_v44, %s8167_s13 }
 0x34c   : > { %2721 = vrot.lane.b32.xlu1 %v10601_v50, %s13816_s25  ;;  %7559 = vmatprep.mubr.msk.bf16.mxu0 %vm3257_vm9, %v3171_v5 }
 0x34d   : > { %v2822_v53 = vpop.permute.xlu0 %2821 }
 0x34e   : > { %v10708_v10 = vpop.permute.xlu1 %1350  ;;  %v3173_v18 = vsel %vm13855_vm8, %v3056_v34, %v2822_v53 }
 0x34f   : > { %v7529_v25 = vpop.f32.mrf.mxu0  ;;  %2723 = vrot.lane.b32.xlu0 %v10623_v1, %s13816_s25  ;;  %7560 = vmatmul.mubr.msk.bf16.gmra.mxu0 %vm3257_vm9, %v3173_v18 }
 0x350   : > { %2839 = vrot.lane.b32.xlu1 %v10713_v9, %s13814_s26  ;;  %v3529_v3 = vadd.f32 %v10630_v36, %v7529_v25 }
 0x351   : > { %v3520_v32 = vpop.f32.mrf.mxu0  ;;  %v10726_v46 = vpop.permute.xlu0 %1352 }
 0x352   : > { %vm3897_vm14 = vcmp.ge.f32.partialorder %v3529_v3, 0.0  ;;  %v4009_v26 = vmul.f32 0.2, %v3529_v3  ;;  %v10732_v7 = vpop.permute.xlu1 %1670  ;;  %v3521_v54 = vadd.f32 %v10630_v36, %v3520_v32 }
 0x353   : > { %v7530_v5 = vpop.f32.mrf.mxu0  ;;  %2841 = vrot.lane.b32.xlu0 %v10730_v47, %s13814_s26 }
 0x354   : > { %v10737_v12 = vsel %vm3897_vm14, %v3529_v3, %v4009_v26  ;;  %vm3895_vm15 = vcmp.ge.f32.partialorder %v3521_v54, 0.0  ;;  %v4007_v41 = vmul.f32 0.2, %v3521_v54  ;;  %2607 = vrot.lane.b32.xlu1 %v10601_v50, %s8167_s13  ;;  %v3532_v37 = vadd.f32 %v10630_v36, %v7530_v5 }
 0x355   : > { %v4229_v28 = vadd.f32 %v10737_v12, %v10637_v31  ;;  %v3523_v48 = vpop.f32.mrf.mxu0  ;;  %v10744_v17 = vpop.permute.xlu0 %1672  ;;  %v2176_v3 = vsel %vm2078_vm3, %v14080_v19, %v10483_v16 }
 0x356   : > { %v10746_v34 = vsel %vm3895_vm15, %v3521_v54, %v4007_v41  ;;  %vm3898_vm10 = vcmp.ge.f32.partialorder %v3532_v37, 0.0  ;;  %v4010_v53 = vmul.f32 0.2, %v3532_v37  ;;  %v10748_v63 = vpop.permute.xlu1 %2054  ;;  %v3524_v18 = vadd.f32 %v10630_v36, %v3523_v48 }
 0x357   : > { %4338 = vst.msk [vmem:[#allocation2 + $0xd0] sm:$0xff] %vm4311_vm13, %v4229_v28  ;;  %v4227_v25 = vadd.f32 %v10746_v34, %v10651_v0  ;;  %2609 = vrot.lane.b32.xlu0 %v10623_v1, %s8167_s13  ;;  %v2305_v32 = vsel %vm2207_vm4, %v2176_v3, %v10515_v2 }
 0x358   : > { %v10756_v31 = vsel %vm3898_vm10, %v3532_v37, %v4010_v53  ;;  %vm3896_vm12 = vcmp.ge.f32.partialorder %v3524_v18, 0.0  ;;  %v4008_v30 = vmul.f32 0.2, %v3524_v18  ;;  %2725 = vrot.lane.b32.xlu1 %v10713_v9, %s13816_s25  ;;  %v10774_v5 = vsel %vm2336_vm5, %v2305_v32, %v10536_v29 }
 0x359   : > { %4336 = vst.msk [vmem:[#allocation2 + $0xc0] sm:$0xff] %vm4311_vm13, %v4227_v25  ;;  %v4230_v38 = vadd.f32 %v10756_v31, %v10663_v23  ;;  %v10766_v0 = vpop.permute.xlu0 %2056  ;;  %v14081_v23 = vld [vmem:[#allocation50_spill] sm:$0xff] }
 0x35a   : > { %v10770_v26 = vsel %vm3896_vm12, %v3524_v18, %v4008_v30  ;;  %v2588_v54 = vpop.permute.xlu1 %2587  ;;  %v2178_v41 = vsel %vm2078_vm3, %v14081_v23, %v10506_v60  ;;  %v14082_v18 = vld [vmem:[#allocation47_spill] sm:$0xff] }
 0x35b   : > { %4339 = vst.msk [vmem:[#allocation2 + $0xd8] sm:$0xff] %vm4311_vm13, %v4230_v38  ;;  %v4228_v16 = vadd.f32 %v10770_v26, %v10671_v52  ;;  %2727 = vrot.lane.b32.xlu0 %v10730_v47, %s13816_s25  ;;  %v2307_v2 = vsel %vm2207_vm4, %v2178_v41, %v10528_v11  ;;  %v2941_v60 = vsel %vm2875_vm6, %v9919_v43, %v2588_v54 }
 0x35c   : > { %2843 = vrot.lane.b32.xlu1 %v10774_v5, %s13814_s26  ;;  %v10791_v37 = vsel %vm2336_vm5, %v2307_v2, %v10552_v42  ;;  %v2180_v43 = vsel %vm2078_vm3, %v14082_v18, %v10596_v45  ;;  %v14083_v45 = vld [vmem:[#allocation48_spill] sm:$0xff] }
 0x35d   : > { %4337 = vst.msk [vmem:[#allocation2 + $0xc8] sm:$0xff] %vm4311_vm13, %v4228_v16  ;;  %v2590_v29 = vpop.permute.xlu0 %2589  ;;  %v2309_v19 = vsel %vm2207_vm4, %v2180_v43, %v10625_v35  ;;  %v2182_v54 = vsel %vm2078_vm3, %v14083_v45, %v10618_v57 }
 0x35e   : > { %v2706_v52 = vpop.permute.xlu1 %2705  ;;  %v2943_v42 = vsel %vm2875_vm6, %v9936_v40, %v2590_v29  ;;  %v10819_v40 = vsel %vm2336_vm5, %v2309_v19, %v10653_v61  ;;  %v2311_v16 = vsel %vm2207_vm4, %v2182_v54, %v10643_v49  ;;  %v14084_v19 = vld [vmem:[#allocation53_spill] sm:$0xff] }
 0x35f   : > { %2845 = vrot.lane.b32.xlu0 %v10791_v37, %s13814_s26  ;;  %v3058_v11 = vsel %vm2992_vm7, %v2941_v60, %v2706_v52  ;;  %v10836_v41 = vsel %vm2336_vm5, %v2311_v16, %v10669_v39 }
 0x360   : > { %2611 = vrot.lane.b32.xlu1 %v10713_v9, %s8167_s13 }
 0x361   : > { %v2708_v28 = vpop.permute.xlu0 %2707 }
 0x362   : > { %v2824_v48 = vpop.permute.xlu1 %2823  ;;  %v3060_v25 = vsel %vm2992_vm7, %v2943_v42, %v2708_v28 }
 0x363   : > { %v3175_v53 = vsel %vm13855_vm8, %v3058_v11, %v2824_v48  ;;  %2613 = vrot.lane.b32.xlu0 %v10730_v47, %s8167_s13 }
 0x364   : > { %2729 = vrot.lane.b32.xlu1 %v10774_v5, %s13816_s25  ;;  %7563 = vmatprep.mubr.msk.bf16.mxu0 %vm3257_vm9, %v3175_v53 }
 0x365   : > { %v2826_v30 = vpop.permute.xlu0 %2825 }
 0x366   : > { %v10814_v3 = vpop.permute.xlu1 %1354  ;;  %v3177_v38 = vsel %vm13855_vm8, %v3060_v25, %v2826_v30 }
 0x367   : > { %v7533_v32 = vpop.f32.mrf.mxu0  ;;  %2731 = vrot.lane.b32.xlu0 %v10791_v37, %s13816_s25  ;;  %7564 = vmatmul.mubr.msk.bf16.gmra.mxu0 %vm3257_vm9, %v3177_v38  ;;  %v2184_v38 = vsel %vm2078_vm3, %v14084_v19, %v10708_v10 }
 0x368   : > { %2847 = vrot.lane.b32.xlu1 %v10819_v40, %s13814_s26  ;;  %v3545_v35 = vadd.f32 %v10630_v36, %v7533_v32  ;;  %v2313_v45 = vsel %vm2207_vm4, %v2184_v38, %v10732_v7 }
 0x369   : > { %v3536_v61 = vpop.f32.mrf.mxu0  ;;  %v10832_v23 = vpop.permute.xlu0 %1356  ;;  %v10872_v16 = vsel %vm2336_vm5, %v2313_v45, %v10748_v63 }
 0x36a   : > { %vm3901_vm11 = vcmp.ge.f32.partialorder %v3545_v35, 0.0  ;;  %v4013_v2 = vmul.f32 0.2, %v3545_v35  ;;  %v1675_v29 = vpop.permute.xlu1 %1674  ;;  %v3537_v57 = vadd.f32 %v10630_v36, %v3536_v61 }
 0x36b   : > { %v7534_v52 = vpop.f32.mrf.mxu0  ;;  %2849 = vrot.lane.b32.xlu0 %v10836_v41, %s13814_s26 }
 0x36c   : > { %v10841_v60 = vsel %vm3901_vm11, %v3545_v35, %v4013_v2  ;;  %vm3899_vm14 = vcmp.ge.f32.partialorder %v3537_v57, 0.0  ;;  %v4011_v49 = vmul.f32 0.2, %v3537_v57  ;;  %2615 = vrot.lane.b32.xlu1 %v10774_v5, %s8167_s13  ;;  %v3548_v28 = vadd.f32 %v10630_v36, %v7534_v52 }
 0x36d   : > { %v4233_v39 = vadd.f32 %v10841_v60, %v10737_v12  ;;  %v3539_v11 = vpop.f32.mrf.mxu0  ;;  %v1677_v48 = vpop.permute.xlu0 %1676 }
 0x36e   : > { %v10848_v53 = vsel %vm3899_vm14, %v3537_v57, %v4011_v49  ;;  %vm3902_vm15 = vcmp.ge.f32.partialorder %v3548_v28, 0.0  ;;  %v4014_v42 = vmul.f32 0.2, %v3548_v28  ;;  %v2059_v18 = vpop.permute.xlu1 %2058  ;;  %v3540_v43 = vadd.f32 %v10630_v36, %v3539_v11 }
 0x36f   : > { %4342 = vst.msk [vmem:[#allocation2 + $0xf0] sm:$0xff] %vm4311_vm13, %v4233_v39  ;;  %v4231_v25 = vadd.f32 %v10848_v53, %v10746_v34  ;;  %2617 = vrot.lane.b32.xlu0 %v10791_v37, %s8167_s13 }
 0x370   : > { %v10856_v30 = vsel %vm3902_vm15, %v3548_v28, %v4014_v42  ;;  %vm3900_vm10 = vcmp.ge.f32.partialorder %v3540_v43, 0.0  ;;  %v4012_v12 = vmul.f32 0.2, %v3540_v43  ;;  %2733 = vrot.lane.b32.xlu1 %v10819_v40, %s13816_s25 }
 0x371   : > { %4340 = vst.msk [vmem:[#allocation2 + $0xe0] sm:$0xff] %vm4311_vm13, %v4231_v25  ;;  %v4234_v32 = vadd.f32 %v10856_v30, %v10756_v31  ;;  %v2061_v34 = vpop.permute.xlu0 %2060  ;;  %v14085_v31 = vld [vmem:[#allocation51_spill] sm:$0xff] }
 0x372   : > { %v10868_v54 = vsel %vm3900_vm10, %v3540_v43, %v4012_v12  ;;  %v2592_v35 = vpop.permute.xlu1 %2591  ;;  %v2186_v61 = vsel %vm2078_vm3, %v14085_v31, %v10726_v46 }
 0x373   : > { %4343 = vst.msk [vmem:[#allocation2 + $0xf8] sm:$0xff] %vm4311_vm13, %v4234_v32  ;;  %v4232_v10 = vadd.f32 %v10868_v54, %v10770_v26  ;;  %2735 = vrot.lane.b32.xlu0 %v10836_v41, %s13816_s25  ;;  %v2315_v7 = vsel %vm2207_vm4, %v2186_v61, %v10744_v17  ;;  %v2945_v46 = vsel %vm2875_vm6, %v10024_v33, %v2592_v35 }
 0x374   : > { %2851 = vrot.lane.b32.xlu1 %v10872_v16, %s13814_s26  ;;  %v10889_v2 = vsel %vm2336_vm5, %v2315_v7, %v10766_v0  ;;  %v2188_v33 = vsel %vm2078_vm3, %v10108_v62, %v10814_v3  ;;  %v2190_v62 = vsel %vm2078_vm3, %v10216_v15, %v10832_v23 }
 0x375   : > { %4341 = vst.msk [vmem:[#allocation2 + $0xe8] sm:$0xff] %vm4311_vm13, %v4232_v10  ;;  %v2594_v63 = vpop.permute.xlu0 %2593  ;;  %v2317_v11 = vsel %vm2207_vm4, %v2188_v33, %v1675_v29  ;;  %v2319_v29 = vsel %vm2207_vm4, %v2190_v62, %v1677_v48 }
 0x376   : > { %v2710_v26 = vpop.permute.xlu1 %2709  ;;  %v2947_v0 = vsel %vm2875_vm6, %v10037_v21, %v2594_v63  ;;  %v10913_v25 = vsel %vm2336_vm5, %v2317_v11, %v2059_v18  ;;  %v10926_v19 = vsel %vm2336_vm5, %v2319_v29, %v2061_v34 }
 0x377   : > { %2853 = vrot.lane.b32.xlu0 %v10889_v2, %s13814_s26  ;;  %v3062_v17 = vsel %vm2992_vm7, %v2945_v46, %v2710_v26 }
 0x378   : > { %2619 = vrot.lane.b32.xlu1 %v10819_v40, %s8167_s13 }
 0x379   : > { %v2712_v57 = vpop.permute.xlu0 %2711 }
 0x37a   : > { %v2828_v52 = vpop.permute.xlu1 %2827  ;;  %v3064_v28 = vsel %vm2992_vm7, %v2947_v0, %v2712_v57 }
 0x37b   : > { %v3179_v49 = vsel %vm13855_vm8, %v3062_v17, %v2828_v52  ;;  %2621 = vrot.lane.b32.xlu0 %v10836_v41, %s8167_s13 }
 0x37c   : > { %2737 = vrot.lane.b32.xlu1 %v10872_v16, %s13816_s25  ;;  %7567 = vmatprep.mubr.msk.bf16.mxu0 %vm3257_vm9, %v3179_v49 }
 0x37d   : > { %v2830_v39 = vpop.permute.xlu0 %2829 }
 0x37e   : > { %v1359_v42 = vpop.permute.xlu1 %1358  ;;  %v3181_v43 = vsel %vm13855_vm8, %v3064_v28, %v2830_v39 }
 0x37f   : > { %v7537_v21 = vpop.f32.mrf.mxu0  ;;  %2739 = vrot.lane.b32.xlu0 %v10889_v2, %s13816_s25  ;;  %7568 = vmatmul.mubr.msk.bf16.gmra.mxu0 %vm3257_vm9, %v3181_v43  ;;  %v2192_v17 = vsel %vm2078_vm3, %v10230_v13, %v1359_v42 }
 0x380   : > { %2855 = vrot.lane.b32.xlu1 %v10913_v25, %s13814_s26  ;;  %v3561_v3 = vadd.f32 %v10630_v36, %v7537_v21 }
 0x381   : > { %v3552_v12 = vpop.f32.mrf.mxu0  ;;  %v1361_v18 = vpop.permute.xlu0 %1360 }
 0x382   : > { %vm3905_vm12 = vcmp.ge.f32.partialorder %v3561_v3, 0.0  ;;  %v4017_v38 = vmul.f32 0.2, %v3561_v3  ;;  %v1679_v32 = vpop.permute.xlu1 %1678  ;;  %v3553_v45 = vadd.f32 %v10630_v36, %v3552_v12  ;;  %v2194_v13 = vsel %vm2078_vm3, %v10339_v56, %v1361_v18 }
 0x383   : > { %v7538_v35 = vpop.f32.mrf.mxu0  ;;  %2857 = vrot.lane.b32.xlu0 %v10926_v19, %s13814_s26 }
 0x384   : > { %v10931_v15 = vsel %vm3905_vm12, %v3561_v3, %v4017_v38  ;;  %vm3903_vm11 = vcmp.ge.f32.partialorder %v3553_v45, 0.0  ;;  %v4015_v23 = vmul.f32 0.2, %v3553_v45  ;;  %2623 = vrot.lane.b32.xlu1 %v10872_v16, %s8167_s13  ;;  %v3564_v48 = vadd.f32 %v10630_v36, %v7538_v35 }
 0x385   : > { %v4237_v34 = vadd.f32 %v10931_v15, %v10841_v60  ;;  %v3555_v10 = vpop.f32.mrf.mxu0  ;;  %v1681_v31 = vpop.permute.xlu0 %1680 }
 0x386   : > { %v10938_v61 = vsel %vm3903_vm11, %v3553_v45, %v4015_v23  ;;  %vm3906_vm14 = vcmp.ge.f32.partialorder %v3564_v48, 0.0  ;;  %v4018_v7 = vmul.f32 0.2, %v3564_v48  ;;  %v2063_v63 = vpop.permute.xlu1 %2062  ;;  %v3556_v26 = vadd.f32 %v10630_v36, %v3555_v10  ;;  %v4537_v45 = vld [vmem:[#allocation2 + $0x41] ss:$2 sm:$0xff] }
 0x387   : > { %4346 = vst.msk [vmem:[#allocation2 + $0x110] sm:$0xff] %vm4311_vm13, %v4237_v34  ;;  %v4235_v46 = vadd.f32 %v10938_v61, %v10848_v53  ;;  %2625 = vrot.lane.b32.xlu0 %v10889_v2, %s8167_s13  ;;  %v2321_v53 = vsel %vm2207_vm4, %v2192_v17, %v1679_v32  ;;  %v4429_v32 = vld [vmem:[#allocation2 + $0x40] ss:$2 sm:$0xff]  ;;  %v4431_v34 = vld [vmem:[#allocation2 + $0x50] ss:$2 sm:$0xff] }
 0x388   : > { %v10946_v57 = vsel %vm3906_vm14, %v3564_v48, %v4018_v7  ;;  %vm3904_vm15 = vcmp.ge.f32.partialorder %v3556_v26, 0.0  ;;  %v4016_v60 = vmul.f32 0.2, %v3556_v26  ;;  %2741 = vrot.lane.b32.xlu1 %v10913_v25, %s13816_s25  ;;  %v10960_v28 = vsel %vm2336_vm5, %v2321_v53, %v2063_v63  ;;  %v4433_v17 = vld [vmem:[#allocation2 + $0x60] ss:$2 sm:$0xff] }
 0x389   : > { %4344 = vst.msk [vmem:[#allocation2 + $0x100] sm:$0xff] %vm4311_vm13, %v4235_v46  ;;  %v4238_v52 = vadd.f32 %v10946_v57, %v10856_v30  ;;  %v2065_v49 = vpop.permute.xlu0 %2064  ;;  %14086 = vst [vmem:[#allocation61_spill] sm:$0xff] %v10960_v28  ;;  %v2323_v30 = vsel %vm2207_vm4, %v2194_v13, %v1681_v31  ;;  %v4640_v10 = vadd.f32 %v4537_v45, %v4429_v32 }
 0x38a   : > { %v10956_v0 = vsel %vm3904_vm15, %v3556_v26, %v4016_v60  ;;  %v2596_v33 = vpop.permute.xlu1 %2595  ;;  %v10973_v42 = vsel %vm2336_vm5, %v2323_v30, %v2065_v49  ;;  %v4539_v26 = vld [vmem:[#allocation2 + $0x51] ss:$2 sm:$0xff] }
 0x38b   : > { %4347 = vst.msk [vmem:[#allocation2 + $0x118] sm:$0xff] %vm4311_vm13, %v4238_v52  ;;  %v4236_v39 = vadd.f32 %v10956_v0, %v10868_v54  ;;  %2743 = vrot.lane.b32.xlu0 %v10926_v19, %s13816_s25  ;;  %14087 = vst [vmem:[#allocation52_spill] sm:$0xff] %v10973_v42  ;;  %v2949_v56 = vsel %vm2875_vm6, %v10134_v58, %v2596_v33  ;;  %v4541_v33 = vld [vmem:[#allocation2 + $0x61] ss:$2 sm:$0xff] }
 0x38c   : > { %2859 = vrot.lane.b32.xlu1 %v10960_v28, %s13814_s26 }
 0x38d   : > { %4345 = vst.msk [vmem:[#allocation2 + $0x108] sm:$0xff] %vm4311_vm13, %v4236_v39  ;;  %v2598_v11 = vpop.permute.xlu0 %2597 }
 0x38e   : > { %v2714_v43 = vpop.permute.xlu1 %2713  ;;  %v2951_v29 = vsel %vm2875_vm6, %v10159_v20, %v2598_v11 }
 0x38f   : > { %2861 = vrot.lane.b32.xlu0 %v10973_v42, %s13814_s26  ;;  %v3066_v21 = vsel %vm2992_vm7, %v2949_v56, %v2714_v43  ;;  %v4641_v43 = vadd.f32 %v4539_v26, %v4431_v34  ;;  %v11005_v56 = vmul.f32 0.25, %v4640_v10  ;;  %v4437_v10 = vld [vmem:[#allocation2 + $0x80] ss:$2 sm:$0xff] }
 0x390   : > { %2627 = vrot.lane.b32.xlu1 %v10913_v25, %s8167_s13 }
 0x391   : > { %v2716_v54 = vpop.permute.xlu0 %2715  ;;  %14088 = vst [vmem:[#allocation58_spill] sm:$0xff] %v11005_v56  ;;  %v11026_v34 = vmul.f32 0.25, %v4641_v43 }
 0x392   : > { %v2832_v62 = vpop.permute.xlu1 %2831  ;;  %v3068_v12 = vsel %vm2992_vm7, %v2951_v29, %v2716_v54  ;;  %v4445_v29 = vld [vmem:[#allocation2 + $0xc0] ss:$2 sm:$0xff] }
 0x393   : > { %v3183_v3 = vsel %vm13855_vm8, %v3066_v21, %v2832_v62  ;;  %2629 = vrot.lane.b32.xlu0 %v10926_v19, %s8167_s13  ;;  %14090 = vst [vmem:[#allocation26_spill] sm:$0xff] %v11026_v34 }
 0x394   : > { %2745 = vrot.lane.b32.xlu1 %v10960_v28, %s13816_s25  ;;  %7571 = vmatprep.mubr.msk.bf16.mxu0 %vm3257_vm9, %v3183_v3 }
 0x395   : > { %v2834_v58 = vpop.permute.xlu0 %2833 }
 0x396   : > { %v1363_v18 = vpop.permute.xlu1 %1362  ;;  %v3185_v38 = vsel %vm13855_vm8, %v3068_v12, %v2834_v58  ;;  %v4435_v12 = vld [vmem:[#allocation2 + $0x70] ss:$2 sm:$0xff]  ;;  %v4543_v58 = vld [vmem:[#allocation2 + $0x71] ss:$2 sm:$0xff] }
 0x397   : > { %v7541_v35 = vpop.f32.mrf.mxu0  ;;  %2747 = vrot.lane.b32.xlu0 %v10973_v42, %s13816_s25  ;;  %7572 = vmatmul.mubr.msk.bf16.gmra.mxu0 %vm3257_vm9, %v3185_v38  ;;  %v2196_v46 = vsel %vm2078_vm3, %v10344_v59, %v1363_v18  ;;  %v4642_v18 = vadd.f32 %v4541_v33, %v4433_v17  ;;  %v4643_v26 = vadd.f32 %v4543_v58, %v4435_v12  ;;  %v4557_v33 = vld [vmem:[#allocation2 + $0xe1] ss:$2 sm:$0xff] }
 0x398   : > { %v3577_v20 = vadd.f32 %v10630_v36, %v7541_v35  ;;  %v4553_v35 = vld [vmem:[#allocation2 + $0xc1] ss:$2 sm:$0xff] }
 0x399   : > { %v3568_v23 = vpop.f32.mrf.mxu0  ;;  %v1365_v48 = vpop.permute.xlu0 %1364  ;;  %v11038_v17 = vmul.f32 0.25, %v4642_v18 }
 0x39a   : > { %vm3909_vm10 = vcmp.ge.f32.partialorder %v3577_v20, 0.0  ;;  %v4021_v31 = vmul.f32 0.2, %v3577_v20  ;;  %v1683_v7 = vpop.permute.xlu1 %1682  ;;  %v3569_v63 = vadd.f32 %v10630_v36, %v3568_v23  ;;  %v2198_v38 = vsel %vm2078_vm3, %v10457_v24, %v1365_v48 }
 0x39b   : > { %v7542_v60 = vpop.f32.mrf.mxu0  ;;  %v2325_v13 = vsel %vm2207_vm4, %v2196_v46, %v1683_v7  ;;  %v4447_v7 = vld [vmem:[#allocation2 + $0xd0] ss:$2 sm:$0xff]  ;;  %v4545_v46 = vld [vmem:[#allocation2 + $0x81] ss:$2 sm:$0xff]  ;;  %14092 = vst [vmem:[#allocation38_spill] sm:$0xff] %v11038_v17 }
 0x39c   : > { %v10999_v52 = vsel %vm3909_vm10, %v3577_v20, %v4021_v31  ;;  %vm3907_vm12 = vcmp.ge.f32.partialorder %v3569_v63, 0.0  ;;  %v4019_v49 = vmul.f32 0.2, %v3569_v63  ;;  %v3580_v53 = vadd.f32 %v10630_v36, %v7542_v60 }
 0x39d   : > { %v4241_v39 = vadd.f32 %v10999_v52, %v10931_v15  ;;  %v3571_v30 = vpop.f32.mrf.mxu0  ;;  %v1685_v11 = vpop.permute.xlu0 %1684  ;;  %v4648_v60 = vadd.f32 %v4553_v35, %v4445_v29 }
 0x39e   : > { %v11007_v59 = vsel %vm3907_vm12, %v3569_v63, %v4019_v49  ;;  %vm3910_vm11 = vcmp.ge.f32.partialorder %v3580_v53, 0.0  ;;  %v4022_v54 = vmul.f32 0.2, %v3580_v53  ;;  %v2067_v21 = vpop.permute.xlu1 %2066  ;;  %v3572_v62 = vadd.f32 %v10630_v36, %v3571_v30  ;;  %v4555_v63 = vld [vmem:[#allocation2 + $0xd1] ss:$2 sm:$0xff] }
 0x39f   : > { %4350 = vst.msk [vmem:[#allocation2 + $0x130] sm:$0xff] %vm4311_vm13, %v4241_v39  ;;  %v4239_v3 = vadd.f32 %v11007_v59, %v10938_v61  ;;  %v11014_v15 = vsel %vm2336_vm5, %v2325_v13, %v2067_v21  ;;  %v2327_v20 = vsel %vm2207_vm4, %v2198_v38, %v1685_v11  ;;  %v4439_v49 = vld [vmem:[#allocation2 + $0x90] ss:$2 sm:$0xff]  ;;  %v11044_v39 = vpack.c.bf16 %v11026_v34, %v11005_v56  ;;  %v4547_v13 = vld [vmem:[#allocation2 + $0x91] ss:$2 sm:$0xff] }
 0x3a0   : > { %14089 = vst [vmem:[#allocation25_spill] sm:$0xff] %v11014_v15  ;;  %v11018_v32 = vsel %vm3910_vm11, %v3580_v53, %v4022_v54  ;;  %vm3908_vm14 = vcmp.ge.f32.partialorder %v3572_v62, 0.0  ;;  %v4020_v45 = vmul.f32 0.2, %v3572_v62  ;;  %2863 = vrot.lane.b32.xlu1 %v11014_v15, %s13814_s26  ;;  %v4449_v53 = vld [vmem:[#allocation2 + $0xe0] ss:$2 sm:$0xff]  ;;  %v4649_v30 = vadd.f32 %v4555_v63, %v4447_v7 }
 0x3a1   : > { %4348 = vst.msk [vmem:[#allocation2 + $0x120] sm:$0xff] %vm4311_vm13, %v4239_v3  ;;  %v4242_v61 = vadd.f32 %v11018_v32, %v10946_v57  ;;  %v2069_v23 = vpop.permute.xlu0 %2068  ;;  %v4644_v11 = vadd.f32 %v4545_v46, %v4437_v10  ;;  %v4451_v54 = vld [vmem:[#allocation2 + $0xf0] ss:$2 sm:$0xff]  ;;  %v4559_v21 = vld [vmem:[#allocation2 + $0xf1] ss:$2 sm:$0xff]  ;;  %v4650_v3 = vadd.f32 %v4557_v33, %v4449_v53  ;;  %v11051_v29 = vmul.f32 0.25, %v4648_v60 }
 0x3a2   : > { %v11028_v24 = vsel %vm3908_vm14, %v3572_v62, %v4020_v45  ;;  %v2600_v48 = vpop.permute.xlu1 %2599  ;;  %v11031_v31 = vsel %vm2336_vm5, %v2327_v20, %v2069_v23  ;;  %v11047_v62 = vmul.f32 0.25, %v4643_v26  ;;  %v4645_v12 = vadd.f32 %v4547_v13, %v4439_v49 }
 0x3a3   : > { %14091 = vst [vmem:[#allocation64_spill] sm:$0xff] %v11031_v31  ;;  %4351 = vst.msk [vmem:[#allocation2 + $0x138] sm:$0xff] %vm4311_vm13, %v4242_v61  ;;  %v4240_v57 = vadd.f32 %v11028_v24, %v10956_v0  ;;  %2865 = vrot.lane.b32.xlu0 %v11031_v31, %s13814_s26  ;;  %v4924_v18 = vshll.u32 %v11044_v39, 16  ;;  %v2953_v38 = vsel %vm2875_vm6, %v10251_v4, %v2600_v48  ;;  %v11062_v61 = vmul.f32 0.25, %v4649_v30 }
 0x3a4   : > { %2631 = vrot.lane.b32.xlu1 %v10960_v28, %s8167_s13  ;;  %14093 = vst [vmem:[#allocation59_spill] sm:$0xff] %v11047_v62  ;;  %14094 = vst [vmem:[#allocation62_spill] sm:$0xff] %v11051_v29  ;;  %v11057_v58 = vpack.c.bf16 %v11047_v62, %v11038_v17  ;;  %v4651_v35 = vadd.f32 %v4559_v21, %v4451_v54  ;;  %v11064_v20 = vmul.f32 0.25, %v4644_v11  ;;  %v13785_v7 = vshrl.u32 %v11044_v39, 16  ;;  %v4441_v11 = vld [vmem:[#allocation2 + $0xa0] ss:$2 sm:$0xff] }
 0x3a5   : > { %4349 = vst.msk [vmem:[#allocation2 + $0x128] sm:$0xff] %vm4311_vm13, %v4240_v57  ;;  %v2602_v0 = vpop.permute.xlu0 %2601  ;;  %14095 = vst [vmem:[#allocation27_spill] sm:$0xff] %v11062_v61  ;;  %v11071_v26 = vmul.f32 0.25, %v4650_v3  ;;  %v11075_v4 = vpack.c.bf16 %v11062_v61, %v11051_v29  ;;  %v11077_v48 = vmul.f32 0.25, %v4645_v12  ;;  %v11087_v13 = vrot.slane %v4924_v18, 1 }
 0x3a6   : > { %v2718_v43 = vpop.permute.xlu1 %2717  ;;  %14096 = vst [vmem:[#allocation28_spill] sm:$0xff] %v11064_v20  ;;  %v2955_v46 = vsel %vm2875_vm6, %v10273_v51, %v2602_v0  ;;  %v13788_v57 = vshll.u32 %v11057_v58, 16  ;;  %v11085_v33 = vmul.f32 0.25, %v4651_v35  ;;  %v4453_v0 = vld [vmem:[#allocation2 + $0x100] ss:$2 sm:$0xff]  ;;  %v11104_v35 = vrot.slane %v4924_v18, 2 }
 0x3a7   : > { %2633 = vrot.lane.b32.xlu0 %v10973_v42, %s8167_s13  ;;  %v3070_v23 = vsel %vm2992_vm7, %v2953_v38, %v2718_v43  ;;  %14097 = vst [vmem:[#allocation29_spill] sm:$0xff] %v11071_v26  ;;  %14098 = vst [vmem:[#allocation30_spill] sm:$0xff] %v11077_v48  ;;  %v11091_v30 = vpack.c.bf16 %v11077_v48, %v11064_v20  ;;  %v4561_v54 = vld [vmem:[#allocation2 + $0x101] ss:$2 sm:$0xff]  ;;  %v14100_v29 = vshll.u32 %v11075_v4, 16 }
 0x3a8   : > { %2749 = vrot.lane.b32.xlu1 %v11014_v15, %s13816_s25  ;;  %14099 = vst [vmem:[#allocation63_spill] sm:$0xff] %v11085_v33  ;;  %v4549_v21 = vld [vmem:[#allocation2 + $0xa1] ss:$2 sm:$0xff]  ;;  %v11097_v12 = vpack.c.bf16 %v11085_v33, %v11071_v26  ;;  %v4652_v60 = vadd.f32 %v4561_v54, %v4453_v0 }
 0x3a9   : > { %v2720_v45 = vpop.permute.xlu0 %2719  ;;  %v11114_v33 = vadd.f32 %v4549_v21, %v4441_v11  ;;  %v11122_v0 = vrot.slane %v14100_v29, 1  ;;  %v14113_v56 = vshrl.u32 %v11091_v30, 16 }
 0x3aa   : > { %v2836_v10 = vpop.permute.xlu1 %2835  ;;  %v3072_v49 = vsel %vm2992_vm7, %v2955_v46, %v2720_v45  ;;  %v11102_v45 = vrot.slane %v13785_v7, 1  ;;  %v4563_v46 = vld [vmem:[#allocation2 + $0x111] ss:$2 sm:$0xff]  ;;  %v4964_v54 = vshll.u32 %v11097_v12, 16  ;;  %v13794_v20 = vshrl.u32 %v11097_v12, 16 }
 0x3ab   : > { %v3187_v63 = vsel %vm13855_vm8, %v3070_v23, %v2836_v10  ;;  %2751 = vrot.lane.b32.xlu0 %v11031_v31, %s13816_s25  ;;  %v11109_v10 = vrot.slane %v13788_v57, 1  ;;  %v4960_v57 = vshrl.u32 %v11075_v4, 16  ;;  %v11132_v29 = vmul.f32 0.25, %v4652_v60  ;;  %v4443_v60 = vld [vmem:[#allocation2 + $0xb0] ss:$2 sm:$0xff]  ;;  %s8174_s25 = smov 64  }
 0x3ac   : > { %7575 = vmatprep.mubr.msk.bf16.mxu0 %vm3257_vm9, %v3187_v63  ;;  %v4455_v63 = vld [vmem:[#allocation2 + $0x110] ss:$2 sm:$0xff]  ;;  %v4567_v17 = vld [vmem:[#allocation2 + $0x131] ss:$2 sm:$0xff]  ;;  %v5326_v42 = vrot.slane %v14113_v56, 1 }
 0x3ad   : > { %v2838_v53 = vpop.permute.xlu0 %2837  ;;  %v4653_v38 = vadd.f32 %v4563_v46, %v4455_v63  ;;  %14101 = vst [vmem:[#allocation11_spill] sm:$0xff] %v11132_v29 }
 0x3ae   : > { %v1367_v43 = vpop.permute.xlu1 %1366  ;;  %v3189_v51 = vsel %vm13855_vm8, %v3072_v49, %v2838_v53 }
 0x3af   : > { %v7545_v3 = vpop.f32.mrf.mxu0  ;;  %7576 = vmatmul.mubr.msk.bf16.gmra.mxu0 %vm3257_vm9, %v3189_v51  ;;  %v2200_v61 = vsel %vm2078_vm3, %v10462_v27, %v1367_v43 }
 0x3b0   : > { %v3593_v23 = vadd.f32 %v10630_v36, %v7545_v3 }
 0x3b1   : > { %v3584_v53 = vpop.f32.mrf.mxu0  ;;  %v1369_v51 = vpop.permute.xlu0 %1368 }
 0x3b2   : > { %vm3913_vm15 = vcmp.ge.f32.partialorder %v3593_v23, 0.0  ;;  %v4025_v18 = vmul.f32 0.2, %v3593_v23  ;;  %v1687_v3 = vpop.permute.xlu1 %1686  ;;  %v3585_v26 = vadd.f32 %v10630_v36, %v3584_v53 }
 0x3b3   : > { %v7546_v49 = vpop.f32.mrf.mxu0  ;;  %v2329_v48 = vsel %vm2207_vm4, %v2200_v61, %v1687_v3 }
 0x3b4   : > { %v11125_v11 = vsel %vm3913_vm15, %v3593_v23, %v4025_v18  ;;  %vm3911_vm10 = vcmp.ge.f32.partialorder %v3585_v26, 0.0  ;;  %v4023_v21 = vmul.f32 0.2, %v3585_v26  ;;  %v3596_v7 = vadd.f32 %v10630_v36, %v7546_v49 }
 0x3b5   : > { %v4245_v53 = vadd.f32 %v11125_v11, %v10999_v52  ;;  %v3587_v27 = vpop.f32.mrf.mxu0  ;;  %v1689_v43 = vpop.permute.xlu0 %1688  ;;  %v11143_v49 = vrot.slane %v4964_v54, 1  ;;  %v11145_v18 = vmul.f32 0.25, %v4653_v38 }
 0x3b6   : > { %v11134_v62 = vsel %vm3911_vm10, %v3585_v26, %v4023_v21  ;;  %vm3914_vm12 = vcmp.ge.f32.partialorder %v3596_v7, 0.0  ;;  %v4026_v23 = vmul.f32 0.2, %v3596_v7  ;;  %v2071_v63 = vpop.permute.xlu1 %2070  ;;  %v3588_v46 = vadd.f32 %v10630_v36, %v3587_v27  ;;  %v4551_v21 = vld [vmem:[#allocation2 + $0xb1] ss:$2 sm:$0xff] }
 0x3b7   : > { %4354 = vst.msk [vmem:[#allocation2 + $0x150] sm:$0xff] %vm4311_vm13, %v4245_v53  ;;  %v4243_v52 = vadd.f32 %v11134_v62, %v11007_v59  ;;  %v11141_v61 = vsel %vm2336_vm5, %v2329_v48, %v2071_v63  ;;  %14103 = vst [vmem:[#allocation13_spill] sm:$0xff] %v11145_v18  ;;  %v2202_v26 = vsel %vm2078_vm3, %v10573_v6, %v1369_v51  ;;  %v5338_v6 = vrot.slane %v13794_v20, 1  ;;  %v4459_v20 = vld [vmem:[#allocation2 + $0x130] ss:$2 sm:$0xff] }
 0x3b8   : > { %14102 = vst [vmem:[#allocation12_spill] sm:$0xff] %v11141_v61  ;;  %v11149_v3 = vsel %vm3914_vm12, %v3596_v7, %v4026_v23  ;;  %vm3912_vm11 = vcmp.ge.f32.partialorder %v3588_v46, 0.0  ;;  %v4024_v36 = vmul.f32 0.2, %v3588_v46  ;;  %2867 = vrot.lane.b32.xlu1 %v11141_v61, %s13814_s26  ;;  %v2331_v48 = vsel %vm2207_vm4, %v2202_v26, %v1689_v43 }
 0x3b9   : > { %4352 = vst.msk [vmem:[#allocation2 + $0x140] sm:$0xff] %vm4311_vm13, %v4243_v52  ;;  %v4246_v59 = vadd.f32 %v11149_v3, %v11018_v32  ;;  %v2073_v38 = vpop.permute.xlu0 %2072  ;;  %v4962_v53 = vor.u32 %v4960_v57, %v11122_v0  ;;  %v5339_v23 = vrot.slane %v4964_v54, 2  ;;  %v11167_v63 = vpack.c.bf16 %v11145_v18, %v11132_v29 }
 0x3ba   : > { %v11160_v7 = vsel %vm3912_vm11, %v3588_v46, %v4024_v36  ;;  %v2604_v51 = vpop.permute.xlu1 %2603  ;;  %v11163_v27 = vsel %vm2336_vm5, %v2331_v48, %v2073_v38  ;;  %v4647_v52 = vadd.f32 %v4551_v21, %v4443_v60  ;;  %v14105_v54 = vshrl.u32 %v11044_v39, 16  ;;  %v4457_v48 = vld [vmem:[#allocation2 + $0x120] ss:$2 sm:$0xff]  ;;  %v4565_v38 = vld [vmem:[#allocation2 + $0x121] ss:$2 sm:$0xff] }
 0x3bb   : > { %14104 = vst [vmem:[#allocation35_spill] sm:$0xff] %v11163_v27  ;;  %4355 = vst.msk [vmem:[#allocation2 + $0x158] sm:$0xff] %vm4311_vm13, %v4246_v59  ;;  %v4244_v32 = vadd.f32 %v11160_v7, %v11028_v24  ;;  %v4967_v43 = vsel %vm734_vm0, %v4962_v53, %v11143_v49  ;;  %2869 = vrot.lane.b32.xlu0 %v11163_v27, %s13814_s26  ;;  %v5334_v36 = vrot.slane %v4960_v57, 1  ;;  %v14106_v59 = vshll.u32 %v11075_v4, 16  ;;  %s7623_s26 = smul.u32 96, %s13496_s15 }
 0x3bc   : > { %5135 = vrot.lane.b32.xlu1 %v4967_v43, %s8170_s30  ;;  %v4930_v26 = vor.u32 %v14105_v54, %v11087_v13  ;;  %v14107_v21 = vshrl.u32 %v11057_v58, 16  ;;  %v11189_v46 = vmul.f32 0.25, %v11114_v33  ;;  %v4972_v18 = vshll.u32 %v11167_v63, 16 }
 0x3bd   : > { %v5335_v24 = vrot.slane %v14106_v59, 2  ;;  %4353 = vst.msk [vmem:[#allocation2 + $0x148] sm:$0xff] %vm4311_vm13, %v4244_v32  ;;  %v2606_v53 = vpop.permute.xlu0 %2605  ;;  %v11193_v59 = vor.u32 %v5339_v23, %v5338_v6  ;;  %v14109_v32 = vshll.u32 %v11057_v58, 16  ;;  %v14110_v60 = vrot.slane %v11097_v12, 1 }
 0x3be   : > { %v5322_v43 = vrot.slane %v14107_v21, 1  ;;  %14108 = vst [vmem:[#allocation36_spill] sm:$0xff] %v11189_v46  ;;  %v2722_v54 = vpop.permute.xlu1 %2721  ;;  %v4935_v57 = vsel %vm734_vm0, %v4930_v26, %v11109_v10  ;;  %v14111_v21 = vrot.slane %v11075_v4, 1  ;;  %v13802_v34 = vshrl.u32 %v11167_v63, 16 }
 0x3bf   : > { %v5323_v29 = vrot.slane %v14109_v32, 2  ;;  %5127 = vrot.lane.b32.xlu0 %v4935_v57, %s8170_s30  ;;  %v4654_v26 = vadd.f32 %v4565_v38, %v4457_v48  ;;  %v11205_v6 = vmul.f32 0.25, %v4647_v52  ;;  %v11208_v23 = vor.u32 %v5335_v24, %v5334_v36 }
 0x3c0   : > { %v5218_v33 = vsel %vm1438_vm1, %v14111_v21, %v14110_v60  ;;  %v11212_v32 = vor.u32 %v11104_v35, %v11102_v45  ;;  %v14114_v60 = vshll.u32 %v11091_v30, 16  ;;  %v2957_v48 = vsel %vm2875_vm6, %v10370_v14, %v2604_v51 }
 0x3c1   : > { %14112 = vst [vmem:[#allocation37_spill] sm:$0xff] %v11205_v6  ;;  %5269 = vrot.lane.b32.xlu1 %v5218_v33, %s13878_s12  ;;  %v2724_v52 = vpop.permute.xlu0 %2723  ;;  %v14115_v38 = vrot.slane %v11057_v58, 1  ;;  %v14116_v21 = vrot.slane %v11044_v39, 1  ;;  %v4655_v24 = vadd.f32 %v4567_v17, %v4459_v20  ;;  %v11227_v45 = vpack.c.bf16 %v11205_v6, %v11189_v46 }
 0x3c2   : > { %v5327_v57 = vrot.slane %v14114_v60, 2  ;;  %v3074_v56 = vsel %vm2992_vm7, %v2957_v48, %v2722_v54  ;;  %v2840_v35 = vpop.permute.xlu1 %2839  ;;  %v5341_v33 = vsel %vm1694_vm2, %v11208_v23, %v11193_v59  ;;  %v11233_v14 = vrot.slane %v4972_v18, 1  ;;  %v4571_v46 = vld [vmem:[#allocation2 + $0x151] ss:$2 sm:$0xff] }
 0x3c3   : > { %v5210_v36 = vsel %vm1438_vm1, %v14116_v21, %v14115_v38  ;;  %v5324_v51 = vor.u32 %v5323_v29, %v5322_v43  ;;  %v3191_v60 = vsel %vm13855_vm8, %v3074_v56, %v2840_v35  ;;  %v5342_v17 = vrot.slane %v13802_v34, 1  ;;  %v14118_v21 = vld [vmem:[#allocation60_spill] sm:$0xff] }
 0x3c4   : > { %5261 = vrot.lane.b32.xlu0 %v5210_v36, %s13878_s12  ;;  %v5343_v20 = vrot.slane %v4972_v18, 2  ;;  %v11239_v38 = vmul.f32 0.25, %v4654_v26  ;;  %v2959_v54 = vsel %vm2875_vm6, %v14118_v21, %v2606_v53  ;;  %7579 = vmatprep.mubr.msk.bf16.mxu0 %vm3257_vm9, %v3191_v60  ;;  %v14119_v29 = vshll.u32 %v11091_v30, 16 }
 0x3c5   : > { %5430 = vrot.lane.b32.xlu1 %v5341_v33, %s8172_s14  ;;  %v13804_v48 = vrot.slane %v11091_v30, 1  ;;  %v11250_v36 = vor.u32 %v5327_v57, %v5326_v42  ;;  %v3076_v18 = vsel %vm2992_vm7, %v2959_v54, %v2724_v52  ;;  %v2842_v26 = vpop.permute.xlu0 %2841  ;;  %v14120_v56 = vshrl.u32 %v11097_v12, 16 }
 0x3c6   : > { %14117 = vst [vmem:[#allocation39_spill] sm:$0xff] %v11239_v38  ;;  %v11247_v43 = vrot.slane %v14119_v29, 1  ;;  %v11256_v35 = vmul.f32 0.25, %v4655_v24  ;;  %v13808_v33 = vshll.u32 %v11227_v45, 16  ;;  %v2608_v60 = vpop.permute.xlu1 %2607  ;;  %v3193_v21 = vsel %vm13855_vm8, %v3076_v18, %v2842_v26 }
 0x3c7   : > { %v4970_v53 = vor.u32 %v14120_v56, %v11143_v49  ;;  %v5325_v29 = vsel %vm1694_vm2, %v11212_v32, %v5324_v51  ;;  %v14122_v57 = vshrl.u32 %v11057_v58, 16  ;;  %v7549_v49 = vpop.f32.mrf.mxu0  ;;  %7580 = vmatmul.mubr.msk.bf16.gmra.mxu0 %vm3257_vm9, %v3193_v21  ;;  %v11270_v24 = vor.u32 %v5343_v20, %v5342_v17  ;;  %v4461_v20 = vld [vmem:[#allocation2 + $0x140] ss:$2 sm:$0xff] }
 0x3c8   : > { %14121 = vst [vmem:[#allocation14_spill] sm:$0xff] %v11256_v35  ;;  %5422 = vrot.lane.b32.xlu0 %v5325_v29, %s8172_s14  ;;  %v11274_v18 = vpack.c.bf16 %v11256_v35, %v11239_v38  ;;  %v14123_v56 = vrot.slane %v11057_v58, 1  ;;  %v11294_v34 = vrot.slane %v13808_v33, 1  ;;  %v14124_v38 = vrot.slane %v11167_v63, 1 }
 0x3c9   : > { %v4938_v52 = vor.u32 %v14122_v57, %v11109_v10  ;;  %v4975_v54 = vsel %vm734_vm0, %v4970_v53, %v11233_v14  ;;  %v11280_v10 = vld [vmem:[%s14027_s2] ss:$0 sm:$0xff]  ;;  %v4569_v53 = vld [vmem:[#allocation2 + $0x141] ss:$2 sm:$0xff]  ;;  %v3600_v21 = vpop.f32.mrf.mxu0  ;;  %v2610_v29 = vpop.permute.xlu0 %2609  ;;  %v14125_v6 = vrot.slane %v11097_v12, 1  ;;  %v5345_v42 = vsel %vm1694_vm2, %v11193_v59, %v11270_v24 }
 0x3ca   : > { %5137 = vrot.lane.b32.xlu1 %v4975_v54, %s8170_s30  ;;  %v3609_v26 = vadd.f32 %v11280_v10, %v7549_v49  ;;  %v5212_v17 = vsel %vm1438_vm1, %v14123_v56, %v13804_v48  ;;  %v5329_v54 = vsel %vm1694_vm2, %v5324_v51, %v11250_v36  ;;  %v4463_v49 = vld [vmem:[#allocation2 + $0x150] ss:$2 sm:$0xff]  ;;  %v2726_v56 = vpop.permute.xlu1 %2725  ;;  %v3601_v48 = vadd.f32 %v11280_v10, %v3600_v21 }
 0x3cb   : > { %v4943_v57 = vsel %vm734_vm0, %v4938_v52, %v11247_v43  ;;  %v5220_v52 = vsel %vm1438_vm1, %v14125_v6, %v14124_v38  ;;  %v2961_v51 = vsel %vm2875_vm6, %v10488_v8, %v2608_v60  ;;  %v7550_v33 = vpop.f32.mrf.mxu0  ;;  %v4980_v28 = vshll.u32 %v11274_v18, 16 }
 0x3cc   : > { %vm3917_vm14 = vcmp.ge.f32.partialorder %v3609_v26, 0.0  ;;  %v4029_v35 = vmul.f32 0.2, %v3609_v26  ;;  %5129 = vrot.lane.b32.xlu0 %v4943_v57, %s8170_s30  ;;  %v4656_v21 = vadd.f32 %v4569_v53, %v4461_v20  ;;  %vm3915_vm15 = vcmp.ge.f32.partialorder %v3601_v48, 0.0 }
 0x3cd   : > { %v4027_v31 = vmul.f32 0.2, %v3601_v48  ;;  %v3612_v6 = vadd.f32 %v11280_v10, %v7550_v33  ;;  %v3078_v38 = vsel %vm2992_vm7, %v2961_v51, %v2726_v56  ;;  %v3603_v60 = vpop.f32.mrf.mxu0  ;;  %v2728_v57 = vpop.permute.xlu0 %2727  ;;  %v4984_v59 = vshrl.u32 %v11274_v18, 16 }
 0x3ce   : > { %v11310_v27 = vsel %vm3917_vm14, %v3609_v26, %v4029_v35  ;;  %5271 = vrot.lane.b32.xlu1 %v5220_v52, %s13878_s12  ;;  %v4657_v61 = vadd.f32 %v4571_v46, %v4463_v49  ;;  %v2844_v26 = vpop.permute.xlu1 %2843  ;;  %v3604_v20 = vadd.f32 %v11280_v10, %v3603_v60  ;;  %v4982_v53 = vrot.slane %v4980_v28, 1 }
 0x3cf   : > { %v4249_v8 = vadd.f32 %v11310_v27, %v11125_v11  ;;  %v11318_v15 = vsel %vm3915_vm15, %v3601_v48, %v4027_v31  ;;  %vm3918_vm10 = vcmp.ge.f32.partialorder %v3612_v6, 0.0  ;;  %v4030_v35 = vmul.f32 0.2, %v3612_v6 }
 0x3d0   : > { %v4247_v33 = vadd.f32 %v11318_v15, %v11134_v62  ;;  %v3195_v11 = vsel %vm13855_vm8, %v3078_v38, %v2844_v26  ;;  %5263 = vrot.lane.b32.xlu0 %v5212_v17, %s13878_s12  ;;  %v11326_v56 = vmul.f32 0.25, %v4656_v21  ;;  %v2963_v31 = vsel %vm2875_vm6, %v10513_v44, %v2610_v29 }
 0x3d1   : > { %4358 = vst.msk [vmem:[#allocation2 + $0x170] sm:$0xff] %vm4311_vm13, %v4249_v8  ;;  %v11330_v46 = vsel %vm3918_vm10, %v3612_v6, %v4030_v35  ;;  %vm3916_vm12 = vcmp.ge.f32.partialorder %v3604_v20, 0.0  ;;  %v4028_v48 = vmul.f32 0.2, %v3604_v20  ;;  %7583 = vmatprep.mubr.msk.bf16.mxu0 %vm3257_vm9, %v3195_v11  ;;  %v3080_v17 = vsel %vm2992_vm7, %v2963_v31, %v2728_v57  ;;  %v2846_v49 = vpop.permute.xlu0 %2845 }
 0x3d2   : > { %14126 = vst [vmem:[#allocation41_spill] sm:$0xff] %v11326_v56  ;;  %5432 = vrot.lane.b32.xlu1 %v5345_v42, %s8172_s14  ;;  %4356 = vst.msk [vmem:[#allocation2 + $0x160] sm:$0xff] %vm4311_vm13, %v4247_v33  ;;  %v4250_v62 = vadd.f32 %v11330_v46, %v11149_v3  ;;  %v14127_v52 = vshrl.u32 %v11167_v63, 16  ;;  %v11341_v29 = vmul.f32 0.25, %v4657_v61  ;;  %v2612_v21 = vpop.permute.xlu1 %2611  ;;  %v3197_v42 = vsel %vm13855_vm8, %v3080_v17, %v2846_v49 }
 0x3d3   : > { %v11343_v51 = vsel %vm3916_vm12, %v3604_v20, %v4028_v48  ;;  %v5221_v6 = vrot.slane %v11274_v18, 1  ;;  %v5346_v8 = vrot.slane %v4984_v59, 1  ;;  %7584 = vmatmul.mubr.msk.bf16.gmra.mxu0 %vm3257_vm9, %v3197_v42  ;;  %v5347_v61 = vrot.slane %v4980_v28, 2 }
 0x3d4   : > { %v4978_v44 = vor.u32 %v14127_v52, %v11233_v14  ;;  %14128 = vst [vmem:[#allocation49_spill] sm:$0xff] %v11341_v29  ;;  %4359 = vst.msk [vmem:[#allocation2 + $0x178] sm:$0xff] %vm4311_vm13, %v4250_v62  ;;  %v4248_v3 = vadd.f32 %v11343_v51, %v11160_v7  ;;  %5424 = vrot.lane.b32.xlu0 %v5329_v54, %s8172_s14  ;;  %v11357_v14 = vpack.c.bf16 %v11341_v29, %v11326_v56 }
 0x3d5   : > { %v14129_v60 = vshrl.u32 %v11091_v30, 16  ;;  %v2614_v7 = vpop.permute.xlu0 %2613  ;;  %v5213_v26 = vrot.slane %v11227_v45, 1  ;;  %v14130_v28 = vshrl.u32 %v11227_v45, 16  ;;  %v14131_v33 = vshll.u32 %v11227_v45, 16 }
 0x3d6   : > { %v4983_v38 = vsel %vm734_vm0, %v4978_v44, %v4982_v53  ;;  %4357 = vst.msk [vmem:[#allocation2 + $0x168] sm:$0xff] %vm4311_vm13, %v4248_v3  ;;  %v2730_v35 = vpop.permute.xlu1 %2729  ;;  %v14132_v31 = vrot.slane %v11167_v63, 1  ;;  %v11377_v48 = vor.u32 %v5347_v61, %v5346_v8  ;;  %v4988_v62 = vshll.u32 %v11357_v14, 16 }
 0x3d7   : > { %5139 = vrot.lane.b32.xlu1 %v4983_v38, %s8170_s30  ;;  %v4946_v57 = vor.u32 %v14129_v60, %v11247_v43  ;;  %v5330_v20 = vrot.slane %v14130_v28, 1  ;;  %v5331_v11 = vrot.slane %v14131_v33, 2  ;;  %v2965_v17 = vsel %vm2875_vm6, %v10601_v50, %v2612_v21 }
 0x3d8   : > { %v5222_v43 = vsel %vm1438_vm1, %v14132_v31, %v5221_v6  ;;  %v4992_v52 = vshrl.u32 %v11357_v14, 16  ;;  %v3082_v44 = vsel %vm2992_vm7, %v2965_v17, %v2730_v35  ;;  %v14133_v3 = vrot.slane %v11091_v30, 1 }
 0x3d9   : > { %v4951_v54 = vsel %vm734_vm0, %v4946_v57, %v11294_v34  ;;  %v2732_v49 = vpop.permute.xlu0 %2731  ;;  %v11388_v60 = vor.u32 %v5331_v11, %v5330_v20  ;;  %v5349_v50 = vsel %vm1694_vm2, %v11270_v24, %v11377_v48  ;;  %v11395_v21 = vrot.slane %v4988_v62, 1 }
 0x3da   : > { %5131 = vrot.lane.b32.xlu0 %v4951_v54, %s8170_s30  ;;  %v2848_v42 = vpop.permute.xlu1 %2847  ;;  %v5214_v38 = vsel %vm1438_vm1, %v14133_v3, %v5213_v26  ;;  %v2967_v54 = vsel %vm2875_vm6, %v10623_v1, %v2614_v7  ;;  %v4986_v28 = vor.u32 %v4984_v59, %v4982_v53  ;;  %v5350_v31 = vrot.slane %v4992_v52, 1 }
 0x3db   : > { %5273 = vrot.lane.b32.xlu1 %v5222_v43, %s13878_s12  ;;  %v4467_v8 = vld [vmem:[#allocation2 + $0x170] ss:$2 sm:$0xff]  ;;  %v4575_v61 = vld [vmem:[#allocation2 + $0x171] ss:$2 sm:$0xff]  ;;  %v3199_v57 = vsel %vm13855_vm8, %v3082_v44, %v2848_v42  ;;  %v3084_v11 = vsel %vm2992_vm7, %v2967_v54, %v2732_v49  ;;  %v5351_v43 = vrot.slane %v4988_v62, 2  ;;  %v5333_v7 = vsel %vm1694_vm2, %v11250_v36, %v11388_v60 }
 0x3dc   : > { %v4659_v35 = vadd.f32 %v4575_v61, %v4467_v8  ;;  %7587 = vmatprep.mubr.msk.bf16.mxu0 %vm3257_vm9, %v3199_v57  ;;  %v4991_v59 = vsel %vm734_vm0, %v4986_v28, %v11395_v21  ;;  %v5223_v49 = vrot.slane %v11357_v14, 1  ;;  %v14136_v36 = vshrl.u32 %v11227_v45, 16 }
 0x3dd   : > { %v4465_v20 = vld [vmem:[#allocation2 + $0x160] ss:$2 sm:$0xff]  ;;  %v4573_v33 = vld [vmem:[#allocation2 + $0x161] ss:$2 sm:$0xff]  ;;  %v2850_v24 = vpop.permute.xlu0 %2849  ;;  %v11424_v57 = vor.u32 %v5351_v43, %v5350_v31 }
 0x3de   : > { %5265 = vrot.lane.b32.xlu0 %v5214_v38, %s13878_s12  ;;  %v4658_v17 = vadd.f32 %v4573_v33, %v4465_v20  ;;  %v2616_v44 = vpop.permute.xlu1 %2615  ;;  %v3201_v1 = vsel %vm13855_vm8, %v3084_v11, %v2850_v24  ;;  %v11417_v62 = vmul.f32 0.25, %v4659_v35  ;;  %v4954_v38 = vor.u32 %v14136_v36, %v11294_v34 }
 0x3df   : > { %5434 = vrot.lane.b32.xlu1 %v5349_v50, %s8172_s14  ;;  %v7553_v53 = vpop.f32.mrf.mxu0  ;;  %7588 = vmatmul.mubr.msk.bf16.gmra.mxu0 %vm3257_vm9, %v3201_v1  ;;  %v14137_v50 = vrot.slane %v11075_v4, 1  ;;  %v2969_v11 = vsel %vm2875_vm6, %v10713_v9, %v2616_v44 }
 0x3e0   : > { %v11415_v42 = vmul.f32 0.25, %v4658_v17  ;;  %14135 = vst [vmem:[#allocation43_spill] sm:$0xff] %v11417_v62  ;;  %v3625_v3 = vadd.f32 %v11280_v10, %v7553_v53  ;;  %v4959_v34 = vsel %vm734_vm0, %v4954_v38, %v11122_v0 }
 0x3e1   : > { %v3616_v8 = vpop.f32.mrf.mxu0  ;;  %v2618_v61 = vpop.permute.xlu0 %2617  ;;  %v5216_v54 = vsel %vm1438_vm1, %v5213_v26, %v14137_v50  ;;  %v5224_v26 = vsel %vm1438_vm1, %v5221_v6, %v5223_v49 }
 0x3e2   : > { %5426 = vrot.lane.b32.xlu0 %v5333_v7, %s8172_s14  ;;  %14134 = vst [vmem:[#allocation55_spill] sm:$0xff] %v11415_v42  ;;  %v11431_v35 = vpack.c.bf16 %v11417_v62, %v11415_v42  ;;  %vm3921_vm11 = vcmp.ge.f32.partialorder %v3625_v3, 0.0  ;;  %v4033_v28 = vmul.f32 0.2, %v3625_v3  ;;  %v2734_v20 = vpop.permute.xlu1 %2733  ;;  %v3617_v33 = vadd.f32 %v11280_v10, %v3616_v8 }
 0x3e3   : > { %5141 = vrot.lane.b32.xlu1 %v4991_v59, %s8170_s30  ;;  %v7554_v24 = vpop.f32.mrf.mxu0  ;;  %v3086_v6 = vsel %vm2992_vm7, %v2969_v11, %v2734_v20  ;;  %v5353_v59 = vsel %vm1694_vm2, %v11377_v48, %v11424_v57  ;;  %v2971_v20 = vsel %vm2875_vm6, %v10730_v47, %v2618_v61  ;;  %v4994_v47 = vor.u32 %v4992_v52, %v11395_v21 }
 0x3e4   : > { %v4996_v31 = vshll.u32 %v11431_v35, 16  ;;  %v5000_v43 = vshrl.u32 %v11431_v35, 16  ;;  %v11446_v17 = vsel %vm3921_vm11, %v3625_v3, %v4033_v28  ;;  %vm3919_vm14 = vcmp.ge.f32.partialorder %v3617_v33, 0.0 }
 0x3e5   : > { %v4031_v0 = vmul.f32 0.2, %v3617_v33  ;;  %v3628_v9 = vadd.f32 %v11280_v10, %v7554_v24  ;;  %v4253_v44 = vadd.f32 %v11446_v17, %v11310_v27  ;;  %v3619_v1 = vpop.f32.mrf.mxu0  ;;  %v2736_v7 = vpop.permute.xlu0 %2735 }
 0x3e6   : > { %5133 = vrot.lane.b32.xlu0 %v4959_v34, %s8170_s30  ;;  %v11456_v53 = vrot.slane %v4996_v31, 1  ;;  %v2852_v38 = vpop.permute.xlu1 %2851  ;;  %v3620_v8 = vadd.f32 %v11280_v10, %v3619_v1  ;;  %v5354_v48 = vrot.slane %v5000_v43, 1  ;;  %v5355_v28 = vrot.slane %v4996_v31, 2 }
 0x3e7   : > { %5275 = vrot.lane.b32.xlu1 %v5224_v26, %s13878_s12  ;;  %v11458_v3 = vsel %vm3919_vm14, %v3617_v33, %v4031_v0  ;;  %vm3922_vm15 = vcmp.ge.f32.partialorder %v3628_v9, 0.0  ;;  %v4034_v36 = vmul.f32 0.2, %v3628_v9  ;;  %4362 = vst.msk [vmem:[#allocation2 + $0x190] sm:$0xff] %vm4311_vm13, %v4253_v44  ;;  %v3203_v50 = vsel %vm13855_vm8, %v3086_v6, %v2852_v38 }
 0x3e8   : > { %v4251_v27 = vadd.f32 %v11458_v3, %v11318_v15  ;;  %vm3920_vm10 = vcmp.ge.f32.partialorder %v3620_v8, 0.0  ;;  %v4032_v34 = vmul.f32 0.2, %v3620_v8  ;;  %7591 = vmatprep.mubr.msk.bf16.mxu0 %vm3257_vm9, %v3203_v50  ;;  %v5337_v31 = vsel %vm1694_vm2, %v11388_v60, %v11208_v23 }
 0x3e9   : > { %v11470_v33 = vsel %vm3922_vm15, %v3628_v9, %v4034_v36  ;;  %v2854_v11 = vpop.permute.xlu0 %2853  ;;  %v5225_v0 = vrot.slane %v11431_v35, 1  ;;  %v4999_v9 = vsel %vm734_vm0, %v4994_v47, %v11456_v53  ;;  %v11495_v52 = vor.u32 %v5355_v28, %v5354_v48 }
 0x3ea   : > { %5267 = vrot.lane.b32.xlu0 %v5216_v54, %s13878_s12  ;;  %4360 = vst.msk [vmem:[#allocation2 + $0x180] sm:$0xff] %vm4311_vm13, %v4251_v27  ;;  %v4254_v15 = vadd.f32 %v11470_v33, %v11330_v46  ;;  %v3088_v54 = vsel %vm2992_vm7, %v2971_v20, %v2736_v7  ;;  %v11481_v61 = vsel %vm3920_vm10, %v3620_v8, %v4032_v34  ;;  %v2620_v26 = vpop.permute.xlu1 %2619 }
 0x3eb   : > { %5436 = vrot.lane.b32.xlu1 %v5353_v59, %s8172_s14  ;;  %v3205_v24 = vsel %vm13855_vm8, %v3088_v54, %v2854_v11  ;;  %v4252_v46 = vadd.f32 %v11481_v61, %v11343_v51  ;;  %v5226_v51 = vsel %vm1438_vm1, %v5223_v49, %v5225_v0  ;;  %v5357_v21 = vsel %vm1694_vm2, %v11424_v57, %v11495_v52 }
 0x3ec   : > { %4363 = vst.msk [vmem:[#allocation2 + $0x198] sm:$0xff] %vm4311_vm13, %v4254_v15  ;;  %7592 = vmatmul.mubr.msk.bf16.gmra.mxu0 %vm3257_vm9, %v3205_v24  ;;  %v2973_v44 = vsel %vm2875_vm6, %v10774_v5, %v2620_v26  ;;  %v5002_v24 = vor.u32 %v5000_v43, %v11456_v53 }
 0x3ed   : > { %4361 = vst.msk [vmem:[#allocation2 + $0x188] sm:$0xff] %vm4311_vm13, %v4252_v46  ;;  %v2622_v23 = vpop.permute.xlu0 %2621 }
 0x3ee   : > { %5428 = vrot.lane.b32.xlu0 %v5337_v31, %s8172_s14  ;;  %v2738_v60 = vpop.permute.xlu1 %2737  ;;  %v2975_v8 = vsel %vm2875_vm6, %v10791_v37, %v2622_v23  ;;  %v8024_v31 = vld [vmem:[%s14140_s3 + $0x38] sm:$0xff]  }
 0x3ef   : > { %5143 = vrot.lane.b32.xlu1 %v4999_v9, %s8170_s30  ;;  %v3090_v1 = vsel %vm2992_vm7, %v2973_v44, %v2738_v60 }
 0x3f1   : > { %v2740_v6 = vpop.permute.xlu0 %2739 }
 0x3f2   : > { %5277 = vrot.lane.b32.xlu0 %v5226_v51, %s13878_s12  ;;  %v2856_v7 = vpop.permute.xlu1 %2855  ;;  %v3092_v50 = vsel %vm2992_vm7, %v2975_v8, %v2740_v6  ;;  %v13821_v51 = vmov 0  }
 0x3f3   : > { %5438 = vrot.lane.b32.xlu1 %v5357_v21, %s8172_s14  ;;  %v4471_v59 = vld [vmem:[#allocation2 + $0x190] ss:$2 sm:$0xff]  ;;  %v4579_v36 = vld [vmem:[#allocation2 + $0x191] ss:$2 sm:$0xff]  ;;  %v3207_v38 = vsel %vm13855_vm8, %v3090_v1, %v2856_v7  ;;  %5921 = vmatprep.subr.bf16.mxu1 %v13821_v51 }
 0x3f4   : > { %v4661_v49 = vadd.f32 %v4579_v36, %v4471_v59  ;;  %7595 = vmatprep.mubr.msk.bf16.mxu0 %vm3257_vm9, %v3207_v38  ;;  %v4469_v57 = vld [vmem:[#allocation2 + $0x180] ss:$2 sm:$0xff]  ;;  %v4577_v27 = vld [vmem:[#allocation2 + $0x181] ss:$2 sm:$0xff]  ;;  %5922 = vmatpush1.bf16.msra.mxu1 %v8024_v31 }
 0x3f5   : > { %v2858_v48 = vpop.permute.xlu0 %2857  ;;  %v4660_v5 = vadd.f32 %v4577_v27, %v4469_v57  ;;  %5923 = vmatprep.subr.bf16.mxu1 %v13821_v51  ;;  %v8025_v27 = vld [vmem:[%s14140_s3 + $0x30] sm:$0xff]  }
 0x3f6   : > { %v2624_v28 = vpop.permute.xlu1 %2623  ;;  %v3209_v20 = vsel %vm13855_vm8, %v3092_v50, %v2858_v48  ;;  %v11521_v54 = vmul.f32 0.25, %v4661_v49 }
 0x3f7   : > { %v7557_v34 = vpop.f32.mrf.mxu0  ;;  %7596 = vmatmul.mubr.msk.bf16.gmra.mxu0 %vm3257_vm9, %v3209_v20  ;;  %v11519_v15 = vmul.f32 0.25, %v4660_v5  ;;  %v2977_v46 = vsel %vm2875_vm6, %v10819_v40, %v2624_v28 }
 0x3f8   : > { %14139 = vst [vmem:[#allocation32_spill] sm:$0xff] %v11521_v54  ;;  %v3641_v37 = vadd.f32 %v11280_v10, %v7557_v34  ;;  %5924 = vmatpush1.bf16.msra.mxu1 %v8025_v27  ;;  %v4421_v27 = vld [vmem:[#allocation2] ss:$2 sm:$0xff] }
 0x3f9   : > { %14138 = vst [vmem:[#allocation31_spill] sm:$0xff] %v11519_v15  ;;  %v3632_v11 = vpop.f32.mrf.mxu0  ;;  %v2626_v47 = vpop.permute.xlu0 %2625  ;;  %v11526_v26 = vpack.c.bf16 %v11521_v54, %v11519_v15  ;;  %5925 = vmatprep.subr.bf16.mxu1 %v13821_v51 }
 0x3fa   : > { %vm3925_vm12 = vcmp.ge.f32.partialorder %v3641_v37, 0.0  ;;  %v4037_v9 = vmul.f32 0.2, %v3641_v37  ;;  %v2742_v23 = vpop.permute.xlu1 %2741  ;;  %v3633_v60 = vadd.f32 %v11280_v10, %v3632_v11  ;;  %v2979_v28 = vsel %vm2875_vm6, %v10836_v41, %v2626_v47 }
 0x3fb   : > { %v3094_v21 = vsel %vm2992_vm7, %v2977_v46, %v2742_v23  ;;  %v7558_v44 = vpop.f32.mrf.mxu0  ;;  %v5227_v43 = vrot.slane %v11526_v26, 1  ;;  %v5004_v53 = vshll.u32 %v11526_v26, 16  ;;  %v5008_v6 = vshrl.u32 %v11526_v26, 16 }
 0x3fc   : > { %v11542_v1 = vsel %vm3925_vm12, %v3641_v37, %v4037_v9  ;;  %vm3923_vm11 = vcmp.ge.f32.partialorder %v3633_v60, 0.0  ;;  %v4035_v40 = vmul.f32 0.2, %v3633_v60  ;;  %v3644_v7 = vadd.f32 %v11280_v10, %v7558_v44  ;;  %v8026_v37 = vld [vmem:[%s14140_s3 + $0x28] sm:$0xff]  }
 0x3fd   : > { %v4257_v59 = vadd.f32 %v11542_v1, %v11446_v17  ;;  %v3635_v36 = vpop.f32.mrf.mxu0  ;;  %v2744_v38 = vpop.permute.xlu0 %2743  ;;  %v5228_v49 = vsel %vm1438_vm1, %v5225_v0, %v5227_v43  ;;  %v11553_v8 = vrot.slane %v5004_v53, 1  ;;  %v5358_v57 = vrot.slane %v5008_v6, 1  ;;  %5926 = vmatpush1.bf16.msra.mxu1 %v8026_v37 }
 0x3fe   : > { %v11560_v50 = vsel %vm3923_vm11, %v3633_v60, %v4035_v40  ;;  %vm3926_vm14 = vcmp.ge.f32.partialorder %v3644_v7, 0.0  ;;  %v4038_v17 = vmul.f32 0.2, %v3644_v7  ;;  %v2860_v48 = vpop.permute.xlu1 %2859  ;;  %v3636_v5 = vadd.f32 %v11280_v10, %v3635_v36  ;;  %5279 = vrot.lane.b32.xlu1 %v5228_v49, %s13878_s12  ;;  %5927 = vmatprep.subr.bf16.mxu1 %v13821_v51  ;;  %v4423_v49 = vld [vmem:[#allocation2 + $0x10] ss:$2 sm:$0xff] }
 0x3ff   : > { %4366 = vst.msk [vmem:[#allocation2 + $0x1b0] sm:$0xff] %vm4311_vm13, %v4257_v59  ;;  %v4255_v0 = vadd.f32 %v11560_v50, %v11458_v3  ;;  %v3211_v20 = vsel %vm13855_vm8, %v3094_v21, %v2860_v48  ;;  %v5007_v34 = vsel %vm734_vm0, %v5002_v24, %v11553_v8  ;;  %v5359_v3 = vrot.slane %v5004_v53, 2  ;;  %v4531_v48 = vld [vmem:[#allocation2 + $0x11] ss:$2 sm:$0xff] }
 0x400   : > { %v11575_v11 = vsel %vm3926_vm14, %v3644_v7, %v4038_v17  ;;  %vm3924_vm15 = vcmp.ge.f32.partialorder %v3636_v5, 0.0  ;;  %v4036_v31 = vmul.f32 0.2, %v3636_v5  ;;  %7599 = vmatprep.mubr.msk.bf16.mxu0 %vm3257_vm9, %v3211_v20  ;;  %5145 = vrot.lane.b32.xlu0 %v5007_v34, %s8170_s30  ;;  %v3096_v47 = vsel %vm2992_vm7, %v2979_v28, %v2744_v38  ;;  %v4529_v17 = vld [vmem:[#allocation2 + $0x1] ss:$2 sm:$0xff] }
 0x401   : > { %4364 = vst.msk [vmem:[#allocation2 + $0x1a0] sm:$0xff] %vm4311_vm13, %v4255_v0  ;;  %v4258_v41 = vadd.f32 %v11575_v11, %v11470_v33  ;;  %v2862_v24 = vpop.permute.xlu0 %2861  ;;  %v11587_v23 = vor.u32 %v5359_v3, %v5358_v57  ;;  %v8027_v33 = vld [vmem:[%s14140_s3 + $0x20] sm:$0xff]   ;;  %v4636_v3 = vadd.f32 %v4529_v17, %v4421_v27 }
 0x402   : > { %v11584_v46 = vsel %vm3924_vm15, %v3636_v5, %v4036_v31  ;;  %v3213_v9 = vsel %vm13855_vm8, %v3096_v47, %v2862_v24  ;;  %5928 = vmatpush1.bf16.msra.mxu1 %v8027_v33  ;;  %v2628_v44 = vpop.permute.xlu1 %2627  ;;  %v8030_v33 = vld [vmem:[%s14140_s3 + $0x8] sm:$0xff]  }
 0x403   : > { %4367 = vst.msk [vmem:[#allocation2 + $0x1b8] sm:$0xff] %vm4311_vm13, %v4258_v41  ;;  %v4256_v60 = vadd.f32 %v11584_v46, %v11481_v61  ;;  %7600 = vmatmul.mubr.msk.bf16.gmra.mxu0 %vm3257_vm9, %v3213_v9  ;;  %v5361_v21 = vsel %vm1694_vm2, %v11495_v52, %v11587_v23  ;;  %v8028_v61 = vld [vmem:[%s14140_s3 + $0x18] sm:$0xff]   ;;  %5929 = vmatprep.subr.bf16.mxu1 %v13821_v51  ;;  %v8029_v52 = vld [vmem:[%s14140_s3 + $0x10] sm:$0xff]  }
 0x404   : > { %5440 = vrot.lane.b32.xlu0 %v5361_v21, %s8172_s14  ;;  %v2981_v37 = vsel %vm2875_vm6, %v10872_v16, %v2628_v44  ;;  %v11617_v41 = vadd.f32 %v4531_v48, %v4423_v49  ;;  %v5010_v16 = vor.u32 %v5008_v6, %v11553_v8  ;;  %v4425_v8 = vld [vmem:[#allocation2 + $0x20] ss:$2 sm:$0xff]  ;;  %v4533_v49 = vld [vmem:[#allocation2 + $0x21] ss:$2 sm:$0xff] }
 0x405   : > { %4365 = vst.msk [vmem:[#allocation2 + $0x1a8] sm:$0xff] %vm4311_vm13, %v4256_v60  ;;  %v2630_v53 = vpop.permute.xlu0 %2629 }
 0x406   : > { %5930 = vmatpush1.bf16.msra.mxu1 %v8028_v61  ;;  %v2746_v5 = vpop.permute.xlu1 %2745  ;;  %v2983_v24 = vsel %vm2875_vm6, %v10889_v2, %v2630_v53 }
 0x407   : > { %5931 = vmatprep.subr.bf16.mxu1 %v13821_v51  ;;  %v3098_v47 = vsel %vm2992_vm7, %v2981_v37, %v2746_v5  ;;  %v8031_v37 = vld [vmem:[%s14140_s3] sm:$0xff]  }
 0x409   : > { %v2748_v0 = vpop.permute.xlu0 %2747 }
 0x40a   : > { %v4475_v40 = vld [vmem:[#allocation2 + $0x1b0] ss:$2 sm:$0xff]  ;;  %v4583_v7 = vld [vmem:[#allocation2 + $0x1b1] ss:$2 sm:$0xff]  ;;  %5932 = vmatpush1.bf16.msra.mxu1 %v8029_v52  ;;  %v3100_v21 = vsel %vm2992_vm7, %v2983_v24, %v2748_v0 }
 0x40b   : > { %v4663_v59 = vadd.f32 %v4583_v7, %v4475_v40  ;;  %5933 = vmatprep.subr.bf16.mxu1 %v13821_v51  ;;  %v4535_v24 = vld [vmem:[#allocation2 + $0x31] ss:$2 sm:$0xff] }
 0x40c   : > { %v4473_v36 = vld [vmem:[#allocation2 + $0x1a0] ss:$2 sm:$0xff]  ;;  %v4581_v38 = vld [vmem:[#allocation2 + $0x1a1] ss:$2 sm:$0xff] }
 0x40d   : > { %v4662_v57 = vadd.f32 %v4581_v38, %v4473_v36  ;;  %v11612_v34 = vmul.f32 0.25, %v4663_v59 }
 0x40e   : > { %5934 = vmatpush1.bf16.msra.mxu1 %v8030_v33 }
 0x40f   : > { %v7561_v28 = vpop.f32.mrf.mxu0  ;;  %v11610_v20 = vmul.f32 0.25, %v4662_v57  ;;  %14142 = vst [vmem:[#allocation34_spill] sm:$0xff] %v11612_v34  ;;  %5935 = vmatprep.subr.bf16.mxu1 %v13821_v51 }
 0x410   : > { %v3657_v31 = vadd.f32 %v11280_v10, %v7561_v28  ;;  %v4427_v28 = vld [vmem:[#allocation2 + $0x30] ss:$2 sm:$0xff] }
 0x411   : > { %14141 = vst [vmem:[#allocation33_spill] sm:$0xff] %v11610_v20  ;;  %v3648_v9 = vpop.f32.mrf.mxu0  ;;  %v11625_v60 = vpack.c.bf16 %v11612_v34, %v11610_v20 }
 0x412   : > { %vm3929_vm10 = vcmp.ge.f32.partialorder %v3657_v31, 0.0  ;;  %v4041_v61 = vmul.f32 0.2, %v3657_v31  ;;  %v2864_v44 = vpop.permute.xlu1 %2863  ;;  %v3649_v2 = vadd.f32 %v11280_v10, %v3648_v9  ;;  %5936 = vmatpush1.bf16.msra.mxu1 %v8031_v37 }
 0x413   : > { %v3215_v53 = vsel %vm13855_vm8, %v3098_v47, %v2864_v44  ;;  %v7562_v40 = vpop.f32.mrf.mxu0  ;;  %v13820_v7 = vrot.slane %v11625_v60, 1  ;;  %v5012_v59 = vshll.u32 %v11625_v60, 16  ;;  %v5016_v6 = vshrl.u32 %v11625_v60, 16  ;;  %v8032_v44 = vld [vmem:[%s14140_s3 + $0x78] sm:$0xff]   ;;  %5937 = vmatprep.subr.bf16.mxu1 %v13821_v51 }
 0x414   : > { %v11639_v52 = vsel %vm3929_vm10, %v3657_v31, %v4041_v61  ;;  %vm3927_vm12 = vcmp.ge.f32.partialorder %v3649_v2, 0.0  ;;  %v4039_v36 = vmul.f32 0.2, %v3649_v2  ;;  %v3660_v38 = vadd.f32 %v11280_v10, %v7562_v40  ;;  %7603 = vmatprep.mubr.msk.bf16.mxu0 %vm3257_vm9, %v3215_v53 }
 0x415   : > { %v4261_v57 = vadd.f32 %v11639_v52, %v11542_v1  ;;  %v3651_v27 = vpop.f32.mrf.mxu0  ;;  %v2866_v17 = vpop.permute.xlu0 %2865  ;;  %v5230_v48 = vsel %vm1438_vm1, %v5227_v43, %v13820_v7  ;;  %v11651_v5 = vrot.slane %v5012_v59, 1  ;;  %v5362_v0 = vrot.slane %v5016_v6, 1 }
 0x416   : > { %v11658_v31 = vsel %vm3927_vm12, %v3649_v2, %v4039_v36  ;;  %vm3930_vm11 = vcmp.ge.f32.partialorder %v3660_v38, 0.0  ;;  %v4042_v1 = vmul.f32 0.2, %v3660_v38  ;;  %v3652_v47 = vadd.f32 %v11280_v10, %v3651_v27  ;;  %5281 = vrot.lane.b32.xlu0 %v5230_v48, %s13878_s12  ;;  %5938 = vmatpush2.bf16.msra.mxu1 %v8032_v44 }
 0x417   : > { %4370 = vst.msk [vmem:[#allocation2 + $0x1d0] sm:$0xff] %vm4311_vm13, %v4261_v57  ;;  %v4259_v43 = vadd.f32 %v11658_v31, %v11560_v50  ;;  %v3217_v9 = vsel %vm13855_vm8, %v3100_v21, %v2866_v17  ;;  %v5015_v33 = vsel %vm734_vm0, %v5010_v16, %v11651_v5  ;;  %v4638_v61 = vadd.f32 %v4533_v49, %v4425_v8  ;;  %v8034_v17 = vld [vmem:[%s14140_s3 + $0x68] sm:$0xff]  }
 0x418   : > { %v11671_v2 = vsel %vm3930_vm11, %v3660_v38, %v4042_v1  ;;  %vm3928_vm14 = vcmp.ge.f32.partialorder %v3652_v47, 0.0  ;;  %v4040_v53 = vmul.f32 0.2, %v3652_v47  ;;  %7604 = vmatmul.mubr.msk.bf16.gmra.mxu0 %vm3257_vm9, %v3217_v9  ;;  %5147 = vrot.lane.b32.xlu1 %v5015_v33, %s8170_s30  ;;  %v5363_v50 = vrot.slane %v5012_v59, 2 }
 0x419   : > { %4368 = vst.msk [vmem:[#allocation2 + $0x1c0] sm:$0xff] %vm4311_vm13, %v4259_v43  ;;  %v4262_v16 = vadd.f32 %v11671_v2, %v11575_v11  ;;  %v4639_v21 = vadd.f32 %v4535_v24, %v4427_v28  ;;  %v11683_v36 = vmul.f32 0.25, %v4636_v3  ;;  %v11688_v59 = vmul.f32 0.25, %v4638_v61  ;;  %5939 = vmatprep.subr.bf16.mxu1 %v13821_v51  ;;  %v2634_v27 = vpop.permute.xlu0 %2633  ;;  %v8035_v24 = vld [vmem:[%s14140_s3 + $0x60] sm:$0xff]  }
 0x41a   : > { %v11679_v40 = vsel %vm3928_vm14, %v3652_v47, %v4040_v53  ;;  %v11681_v8 = vor.u32 %v5363_v50, %v5362_v0  ;;  %v11694_v49 = vmul.f32 0.25, %v11617_v41  ;;  %v2632_v41 = vpop.permute.xlu1 %2631  ;;  %vm5526_vm14 = vcmask 261120  }
 0x41b   : > { %14143 = vst [vmem:[#allocation18_spill] sm:$0xff] %v11683_v36  ;;  %4371 = vst.msk [vmem:[#allocation2 + $0x1d8] sm:$0xff] %vm4311_vm13, %v4262_v16  ;;  %v4260_v38 = vadd.f32 %v11679_v40, %v11584_v46  ;;  %v11699_v3 = vmul.f32 0.25, %v4639_v21  ;;  %v8033_v46 = vld [vmem:[%s14140_s3 + $0x70] sm:$0xff]  }
 0x41c   : > { %14144 = vst [vmem:[#allocation44_spill] sm:$0xff] %v11688_v59  ;;  %v5365_v11 = vsel %vm1694_vm2, %v11587_v23, %v11681_v8  ;;  %14145 = vst [vmem:[#allocation15_spill] sm:$0xff] %v11694_v49  ;;  %v11706_v57 = vpack.c.bf16 %v11694_v49, %v11683_v36  ;;  %5940 = vmatpush2.bf16.msra.mxu1 %v8033_v46 }
 0x41d   : > { %4369 = vst.msk [vmem:[#allocation2 + $0x1c8] sm:$0xff] %vm4311_vm13, %v4260_v38  ;;  %5442 = vrot.lane.b32.xlu1 %v5365_v11, %s8172_s14  ;;  %14146 = vst [vmem:[#allocation16_spill] sm:$0xff] %v11699_v3  ;;  %v11710_v23 = vpack.c.bf16 %v11699_v3, %v11688_v59  ;;  %5941 = vmatprep.subr.bf16.mxu1 %v13821_v51  ;;  %v2752_v16 = vpop.permute.xlu0 %2751 }
 0x41e   : > { %v13818_v28 = vshrl.u32 %v11706_v57, 16  ;;  %v4911_v37 = vshll.u32 %v11706_v57, 16  ;;  %v2750_v44 = vpop.permute.xlu1 %2749 }
 0x41f   : > { %v4916_v47 = vshll.u32 %v11710_v23, 16  ;;  %v13819_v33 = vshrl.u32 %v11710_v23, 16 }
 0x420   : > { %5942 = vmatpush2.bf16.msra.mxu1 %v8034_v17  ;;  %v4913_v53 = vrot.slane %v4911_v37, 1  ;;  %v11726_v50 = vrot.slane %v13818_v28, 1  ;;  %v11734_v17 = vrot.slane %v4911_v37, 2 }
 0x421   : > { %5943 = vmatprep.subr.bf16.mxu1 %v13821_v51  ;;  %v11732_v46 = vrot.slane %v4916_v47, 1 }
 0x422   : > { %v4479_v48 = vld [vmem:[#allocation2 + $0x1d0] ss:$2 sm:$0xff]  ;;  %v4587_v0 = vld [vmem:[#allocation2 + $0x1d1] ss:$2 sm:$0xff] }
 0x423   : > { %v4665_v1 = vadd.f32 %v4587_v0, %v4479_v48  ;;  %v2985_v48 = vsel %vm2875_vm6, %v10913_v25, %v2632_v41  ;;  %v5018_v25 = vor.u32 %v5016_v6, %v11651_v5  ;;  %v8036_v41 = vld [vmem:[%s14140_s3 + $0x58] sm:$0xff]  }
 0x424   : > { %v4477_v43 = vld [vmem:[#allocation2 + $0x1c0] ss:$2 sm:$0xff]  ;;  %v4585_v9 = vld [vmem:[#allocation2 + $0x1c1] ss:$2 sm:$0xff]  ;;  %5944 = vmatpush2.bf16.msra.mxu1 %v8035_v24 }
 0x425   : > { %v4664_v61 = vadd.f32 %v4585_v9, %v4477_v43  ;;  %v11730_v11 = vmul.f32 0.25, %v4665_v1  ;;  %v5314_v43 = vrot.slane %v13819_v33, 1  ;;  %v5315_v9 = vrot.slane %v4916_v47, 2  ;;  %5945 = vmatprep.subr.bf16.mxu1 %v13821_v51 }
 0x426   : > { %v2987_v1 = vsel %vm2875_vm6, %v10926_v19, %v2634_v27 }
 0x427   : > { %v7565_v21 = vpop.f32.mrf.mxu0  ;;  %v11728_v38 = vmul.f32 0.25, %v4664_v61  ;;  %14148 = vst [vmem:[#allocation21_spill] sm:$0xff] %v11730_v11  ;;  %v3102_v61 = vsel %vm2992_vm7, %v2985_v48, %v2750_v44  ;;  %v3104_v47 = vsel %vm2992_vm7, %v2987_v1, %v2752_v16 }
 0x428   : > { %v3673_v0 = vadd.f32 %v11280_v10, %v7565_v21  ;;  %5946 = vmatpush2.bf16.msra.mxu1 %v8036_v41 }
 0x429   : > { %14147 = vst [vmem:[#allocation20_spill] sm:$0xff] %v11728_v38  ;;  %v3664_v28 = vpop.f32.mrf.mxu0  ;;  %v11747_v37 = vpack.c.bf16 %v11730_v11, %v11728_v38  ;;  %5947 = vmatprep.subr.bf16.mxu1 %v13821_v51 }
 0x42a   : > { %vm3933_vm15 = vcmp.ge.f32.partialorder %v3673_v0, 0.0  ;;  %v4045_v24 = vmul.f32 0.2, %v3673_v0  ;;  %v2868_v44 = vpop.permute.xlu1 %2867  ;;  %v3665_v19 = vadd.f32 %v11280_v10, %v3664_v28 }
 0x42b   : > { %v3219_v27 = vsel %vm13855_vm8, %v3102_v61, %v2868_v44  ;;  %v7566_v21 = vpop.f32.mrf.mxu0  ;;  %v13824_v48 = vrot.slane %v11747_v37, 1  ;;  %v5020_v33 = vshll.u32 %v11747_v37, 16  ;;  %v13825_v6 = vshrl.u32 %v11747_v37, 16 }
 0x42c   : > { %v11761_v5 = vsel %vm3933_vm15, %v3673_v0, %v4045_v24  ;;  %vm3931_vm10 = vcmp.ge.f32.partialorder %v3665_v19, 0.0  ;;  %v4043_v7 = vmul.f32 0.2, %v3665_v19  ;;  %v3676_v16 = vadd.f32 %v11280_v10, %v7566_v21  ;;  %7607 = vmatprep.mubr.msk.bf16.mxu0 %vm3257_vm9, %v3219_v27  ;;  %v8037_v27 = vld [vmem:[%s14140_s3 + $0x50] sm:$0xff]  }
 0x42d   : > { %v4265_v28 = vadd.f32 %v11761_v5, %v11639_v52  ;;  %v3667_v61 = vpop.f32.mrf.mxu0  ;;  %v2870_v1 = vpop.permute.xlu0 %2869  ;;  %v14149_v44 = vrot.slane %v11625_v60, 1  ;;  %v11773_v41 = vrot.slane %v5020_v33, 1  ;;  %v5366_v24 = vrot.slane %v13825_v6, 1  ;;  %5948 = vmatpush2.bf16.msra.mxu1 %v8037_v27 }
 0x42e   : > { %v11780_v21 = vsel %vm3931_vm10, %v3665_v19, %v4043_v7  ;;  %vm3934_vm12 = vcmp.ge.f32.partialorder %v3676_v16, 0.0  ;;  %v4046_v52 = vmul.f32 0.2, %v3676_v16  ;;  %v5136_v51 = vpop.permute.xlu1 %5135  ;;  %v3668_v11 = vadd.f32 %v11280_v10, %v3667_v61  ;;  %v8038_v61 = vld [vmem:[%s14140_s3 + $0x48] sm:$0xff]  }
 0x42f   : > { %v5232_v0 = vsel %vm1438_vm1, %v14149_v44, %v13824_v48  ;;  %4374 = vst.msk [vmem:[#allocation2 + $0x1f0] sm:$0xff] %vm4311_vm13, %v4265_v28  ;;  %v4263_v44 = vadd.f32 %v11780_v21, %v11658_v31  ;;  %v3221_v48 = vsel %vm13855_vm8, %v3104_v47, %v2870_v1  ;;  %v5023_v6 = vsel %vm734_vm0, %v5018_v25, %v11773_v41 }
 0x430   : > { %5283 = vrot.lane.b32.xlu1 %v5232_v0, %s13878_s12  ;;  %v14150_v7 = vshrl.u32 %v11706_v57, 16  ;;  %v11795_v38 = vsel %vm3934_vm12, %v3676_v16, %v4046_v52  ;;  %vm3932_vm11 = vcmp.ge.f32.partialorder %v3668_v11, 0.0  ;;  %v4044_v28 = vmul.f32 0.2, %v3668_v11  ;;  %7608 = vmatmul.mubr.msk.bf16.gmra.mxu0 %vm3257_vm9, %v3221_v48 }
 0x431   : > { %5149 = vrot.lane.b32.xlu0 %v5023_v6, %s8170_s30  ;;  %v5367_v31 = vrot.slane %v5020_v33, 2  ;;  %4372 = vst.msk [vmem:[#allocation2 + $0x1e0] sm:$0xff] %vm4311_vm13, %v4263_v44  ;;  %v4266_v25 = vadd.f32 %v11795_v38, %v11671_v2  ;;  %v11804_v1 = vor.u32 %v5315_v9, %v5314_v43  ;;  %v14151_v16 = vmov 0  }
 0x432   : > { %v4914_v19 = vor.u32 %v4913_v53, %v14150_v7  ;;  %v5128_v53 = vpop.permute.xlu0 %5127  ;;  %5949 = vmatprep.subr.bf16.mxu1 %v14151_v16  ;;  %v11807_v0 = vsel %vm3932_vm11, %v3668_v11, %v4044_v28  ;;  %v5313_v6 = vor.u32 %v11734_v17, %v11726_v50  ;;  %v13827_v11 = vrot.slane %v11710_v23, 1  ;;  %v8039_v50 = vld [vmem:[%s14140_s3 + $0x40] sm:$0xff]  }
 0x433   : > { %v11810_v48 = vor.u32 %v5367_v31, %v5366_v24  ;;  %4375 = vst.msk [vmem:[#allocation2 + $0x1f8] sm:$0xff] %vm4311_vm13, %v4266_v25  ;;  %v4264_v33 = vadd.f32 %v11807_v0, %v11679_v40  ;;  %v5270_v2 = vpop.permute.xlu1 %5269  ;;  %5950 = vmatpush2.bf16.msra.mxu1 %v8038_v61  ;;  %v5477_v17 = vsel %vm4311_vm13, %v11044_v39, %v5128_v53 }
 0x434   : > { %v4919_v47 = vsel %vm734_vm0, %v4914_v19, %v11732_v46  ;;  %5951 = vmatprep.subr.bf16.mxu1 %v14151_v16  ;;  %v5317_v40 = vsel %vm1694_vm2, %v5313_v6, %v11804_v1  ;;  %v5485_v7 = vsel %vm4311_vm13, %v11075_v4, %v5136_v51 }
 0x435   : > { %5123 = vrot.lane.b32.xlu1 %v4919_v47, %s8170_s30  ;;  %v5369_v43 = vsel %vm1694_vm2, %v11681_v8, %v11810_v48  ;;  %4373 = vst.msk [vmem:[#allocation2 + $0x1e8] sm:$0xff] %vm4311_vm13, %v4264_v33  ;;  %v5204_v8 = vrot.slane %v11706_v57, 1  ;;  %v5540_v31 = vsel %vm5526_vm14, %v5485_v7, %v5270_v2 }
 0x436   : > { %5444 = vrot.lane.b32.xlu0 %v5369_v43, %s8172_s14  ;;  %v5262_v9 = vpop.permute.xlu0 %5261 }
 0x437   : > { %5952 = vmatpush2.bf16.msra.mxu1 %v8039_v50  ;;  %v5206_v24 = vsel %vm1438_vm1, %v5204_v8, %v13827_v11  ;;  %v5431_v27 = vpop.permute.xlu1 %5430  ;;  %v5532_v52 = vsel %vm5526_vm14, %v5477_v17, %v5262_v9 }
 0x438   : > { %v11847_v53 = vsel %vm3257_vm9, %v5540_v31, %v5431_v27 }
 0x439   : > { %5418 = vrot.lane.b32.xlu1 %v5317_v40, %s8172_s14 }
 0x43a   : > { %5257 = vrot.lane.b32.xlu0 %v5206_v24, %s13878_s12  ;;  %v5423_v44 = vpop.permute.xlu0 %5422  ;;  %v4483_v61 = vld [vmem:[#allocation2 + $0x1f0] ss:$2 sm:$0xff]  ;;  %v4591_v28 = vld [vmem:[#allocation2 + $0x1f1] ss:$2 sm:$0xff]  ;;  %v11863_v24 = vld [vmem:[%s14027_s2] ss:$0 sm:$0xff] }
 0x43b   : > { %v11841_v19 = vsel %vm3257_vm9, %v5532_v52, %v5423_v44  ;;  %v4667_v25 = vadd.f32 %v4591_v28, %v4483_v61 }
 0x43c   : > { %v4481_v47 = vld [vmem:[#allocation2 + $0x1e0] ss:$2 sm:$0xff]  ;;  %v4589_v33 = vld [vmem:[#allocation2 + $0x1e1] ss:$2 sm:$0xff]  ;;  %v5138_v2 = vpop.permute.xlu1 %5137 }
 0x43d   : > { %5656 = vrot.lane.b32.xlu1 %v11841_v19, %s8174_s25  ;;  %v4666_v4 = vadd.f32 %v4589_v33, %v4481_v47  ;;  %v11853_v43 = vmul.f32 0.25, %v4667_v25 }
 0x43e   : > { %5664 = vrot.lane.b32.xlu0 %v11847_v53, %s8174_s25  ;;  %v5130_v8 = vpop.permute.xlu0 %5129 }
 0x43f   : > { %v7569_v51 = vpop.f32.mrf.mxu0  ;;  %v11851_v6 = vmul.f32 0.25, %v4666_v4  ;;  %14153 = vst [vmem:[#allocation45_spill] sm:$0xff] %v11853_v43 }
 0x440   : > { %v3689_v9 = vadd.f32 %v11280_v10, %v7569_v51  ;;  %v14154_v10 = vshrl.u32 %v11747_v37, 16  ;;  %v14155_v51 = vrot.slane %v11747_v37, 1 }
 0x441   : > { %14152 = vst [vmem:[#allocation17_spill] sm:$0xff] %v11851_v6  ;;  %v3680_v40 = vpop.f32.mrf.mxu0  ;;  %v11858_v50 = vpack.c.bf16 %v11853_v43, %v11851_v6 }
 0x442   : > { %vm3937_vm15 = vcmp.ge.f32.partialorder %v3689_v9, 0.0  ;;  %v4049_v17 = vmul.f32 0.2, %v3689_v9  ;;  %v3681_v27 = vadd.f32 %v11863_v24, %v3680_v40  ;;  %v5026_v7 = vor.u32 %v14154_v10, %v11773_v41 }
 0x443   : > { %v7570_v52 = vpop.f32.mrf.mxu0  ;;  %v13828_v44 = vrot.slane %v11858_v50, 1  ;;  %v5028_v61 = vshll.u32 %v11858_v50, 16  ;;  %v13829_v28 = vshrl.u32 %v11858_v50, 16 }
 0x444   : > { %v11872_v31 = vsel %vm3937_vm15, %v3689_v9, %v4049_v17  ;;  %vm3935_vm10 = vcmp.ge.f32.partialorder %v3681_v27, 0.0  ;;  %v4047_v25 = vmul.f32 0.2, %v3681_v27  ;;  %v3692_v47 = vadd.f32 %v11863_v24, %v7570_v52  ;;  %v5272_v17 = vpop.permute.xlu1 %5271 }
 0x445   : > { %v4269_v33 = vadd.f32 %v11872_v31, %v11761_v5  ;;  %v3683_v4 = vpop.f32.mrf.mxu0  ;;  %v5234_v41 = vsel %vm1438_vm1, %v14155_v51, %v13828_v44  ;;  %v11882_v40 = vrot.slane %v5028_v61, 1  ;;  %v5370_v9 = vrot.slane %v13829_v28, 1 }
 0x446   : > { %v11886_v10 = vsel %vm3935_vm10, %v3681_v27, %v4047_v25  ;;  %vm3938_vm12 = vcmp.ge.f32.partialorder %v3692_v47, 0.0  ;;  %v4050_v52 = vmul.f32 0.2, %v3692_v47  ;;  %v3684_v11 = vadd.f32 %v11863_v24, %v3683_v4  ;;  %5285 = vrot.lane.b32.xlu1 %v5234_v41, %s13878_s12  ;;  %v5264_v27 = vpop.permute.xlu0 %5263 }
 0x447   : > { %4378 = vst.msk [vmem:[#allocation2 + $0x210] sm:$0xff] %vm4311_vm13, %v4269_v33  ;;  %v4267_v5 = vadd.f32 %v11886_v10, %v11780_v21  ;;  %v5031_v51 = vsel %vm734_vm0, %v5026_v7, %v11882_v40  ;;  %v14156_v44 = vshrl.u32 %v11710_v23, 16  ;;  %v5371_v4 = vrot.slane %v5028_v61, 2 }
 0x448   : > { %v11898_v25 = vsel %vm3938_vm12, %v3692_v47, %v4050_v52  ;;  %vm3936_vm11 = vcmp.ge.f32.partialorder %v3684_v11, 0.0  ;;  %v4048_v43 = vmul.f32 0.2, %v3684_v11  ;;  %5151 = vrot.lane.b32.xlu0 %v5031_v51, %s8170_s30  ;;  %v5433_v61 = vpop.permute.xlu1 %5432 }
 0x449   : > { %v4922_v28 = vor.u32 %v14156_v44, %v11732_v46  ;;  %4376 = vst.msk [vmem:[#allocation2 + $0x200] sm:$0xff] %vm4311_vm13, %v4267_v5  ;;  %v4270_v21 = vadd.f32 %v11898_v25, %v11795_v38  ;;  %v11909_v46 = vor.u32 %v5371_v4, %v5370_v9 }
 0x44a   : > { %v11906_v33 = vsel %vm3936_vm11, %v3684_v11, %v4048_v43  ;;  %v5425_v38 = vpop.permute.xlu0 %5424  ;;  %v5479_v11 = vsel %vm4311_vm13, %v11057_v58, %v5130_v8  ;;  %v14157_v43 = vrot.slane %v11044_v39, 1 }
 0x44b   : > { %v4927_v7 = vsel %vm734_vm0, %v4922_v28, %v11087_v13  ;;  %4379 = vst.msk [vmem:[#allocation2 + $0x218] sm:$0xff] %vm4311_vm13, %v4270_v21  ;;  %v4268_v44 = vadd.f32 %v11906_v33, %v11807_v0  ;;  %v5373_v47 = vsel %vm1694_vm2, %v11810_v48, %v11909_v46  ;;  %v5321_v13 = vsel %vm1694_vm2, %v11804_v1, %v11212_v32 }
 0x44c   : > { %5125 = vrot.lane.b32.xlu1 %v4927_v7, %s8170_s30  ;;  %5446 = vrot.lane.b32.xlu0 %v5373_v47, %s8172_s14  ;;  %v5534_v0 = vsel %vm5526_vm14, %v5479_v11, %v5264_v27  ;;  %v14158_v48 = vrot.slane %v11710_v23, 1  ;;  %v5487_v32 = vsel %vm4311_vm13, %v11097_v12, %v5138_v2  ;;  %v5140_v1 = vpop.permute.xlu1 %5139 }
 0x44d   : > { %4377 = vst.msk [vmem:[#allocation2 + $0x208] sm:$0xff] %vm4311_vm13, %v4268_v44  ;;  %v11932_v41 = vsel %vm3257_vm9, %v5534_v0, %v5425_v38  ;;  %v5542_v39 = vsel %vm5526_vm14, %v5487_v32, %v5272_v17  ;;  %v5489_v47 = vsel %vm4311_vm13, %v11167_v63, %v5140_v1 }
 0x44e   : > { %v5208_v28 = vsel %vm1438_vm1, %v14158_v48, %v14157_v43  ;;  %v11941_v52 = vsel %vm3257_vm9, %v5542_v39, %v5433_v61  ;;  %v5132_v44 = vpop.permute.xlu0 %5131  ;;  %v14161_v43 = vshrl.u32 %v11858_v50, 16 }
 0x450   : > { %5420 = vrot.lane.b32.xlu1 %v5321_v13, %s8172_s14  ;;  %5259 = vrot.lane.b32.xlu0 %v5208_v28, %s13878_s12  ;;  %v5274_v21 = vpop.permute.xlu1 %5273  ;;  %v5034_v48 = vor.u32 %v14161_v43, %v11882_v40 }
 0x452   : > { %v4487_v58 = vld [vmem:[#allocation2 + $0x210] ss:$2 sm:$0xff]  ;;  %v4595_v8 = vld [vmem:[#allocation2 + $0x211] ss:$2 sm:$0xff] }
 0x453   : > { %v4669_v9 = vadd.f32 %v4595_v8, %v4487_v58 }
 0x454   : > { %5658 = vrot.lane.b32.xlu1 %v11932_v41, %s8174_s25  ;;  %v4485_v5 = vld [vmem:[#allocation2 + $0x200] ss:$2 sm:$0xff]  ;;  %v4593_v51 = vld [vmem:[#allocation2 + $0x201] ss:$2 sm:$0xff]  ;;  %5666 = vrot.lane.b32.xlu0 %v11941_v52, %s8174_s25 }
 0x455   : > { %v4668_v27 = vadd.f32 %v4593_v51, %v4485_v5  ;;  %v11947_v2 = vmul.f32 0.25, %v4669_v9  ;;  %v14162_v9 = vrot.slane %v11858_v50, 1 }
 0x457   : > { %v7573_v4 = vpop.f32.mrf.mxu0  ;;  %v11945_v12 = vmul.f32 0.25, %v4668_v27  ;;  %14160 = vst [vmem:[#allocation56_spill] sm:$0xff] %v11947_v2  ;;  %v5435_v27 = vpop.permute.xlu1 %5434 }
 0x458   : > { %v3705_v7 = vadd.f32 %v11863_v24, %v7573_v4 }
 0x459   : > { %14159 = vst [vmem:[#allocation54_spill] sm:$0xff] %v11945_v12  ;;  %v3696_v17 = vpop.f32.mrf.mxu0  ;;  %v11952_v61 = vpack.c.bf16 %v11947_v2, %v11945_v12 }
 0x45a   : > { %vm3941_vm15 = vcmp.ge.f32.partialorder %v3705_v7, 0.0  ;;  %v4053_v13 = vmul.f32 0.2, %v3705_v7  ;;  %v3697_v38 = vadd.f32 %v11863_v24, %v3696_v17 }
 0x45b   : > { %v7574_v11 = vpop.f32.mrf.mxu0  ;;  %v5235_v0 = vrot.slane %v11952_v61, 1  ;;  %v5036_v28 = vshll.u32 %v11952_v61, 16  ;;  %v5040_v32 = vshrl.u32 %v11952_v61, 16 }
 0x45c   : > { %v11963_v58 = vsel %vm3941_vm15, %v3705_v7, %v4053_v13  ;;  %vm3939_vm10 = vcmp.ge.f32.partialorder %v3697_v38, 0.0  ;;  %v4051_v8 = vmul.f32 0.2, %v3697_v38  ;;  %v3708_v63 = vadd.f32 %v11863_v24, %v7574_v11  ;;  %v5266_v13 = vpop.permute.xlu0 %5265 }
 0x45d   : > { %v4273_v1 = vadd.f32 %v11963_v58, %v11872_v31  ;;  %v3699_v39 = vpop.f32.mrf.mxu0  ;;  %v5236_v40 = vsel %vm1438_vm1, %v14162_v9, %v5235_v0  ;;  %v11973_v5 = vrot.slane %v5036_v28, 1  ;;  %v5374_v51 = vrot.slane %v5040_v32, 1 }
 0x45e   : > { %v11977_v4 = vsel %vm3939_vm10, %v3697_v38, %v4051_v8  ;;  %vm3942_vm12 = vcmp.ge.f32.partialorder %v3708_v63, 0.0  ;;  %v4054_v7 = vmul.f32 0.2, %v3708_v63  ;;  %v3700_v17 = vadd.f32 %v11863_v24, %v3699_v39  ;;  %5287 = vrot.lane.b32.xlu1 %v5236_v40, %s13878_s12 }
 0x45f   : > { %v5544_v31 = vsel %vm5526_vm14, %v5489_v47, %v5274_v21  ;;  %4382 = vst.msk [vmem:[#allocation2 + $0x230] sm:$0xff] %vm4311_vm13, %v4273_v1  ;;  %v4271_v11 = vadd.f32 %v11977_v4, %v11886_v10  ;;  %v5039_v43 = vsel %vm734_vm0, %v5034_v48, %v11973_v5  ;;  %v5375_v8 = vrot.slane %v5036_v28, 2 }
 0x460   : > { %v11987_v9 = vsel %vm3942_vm12, %v3708_v63, %v4054_v7  ;;  %vm3940_vm11 = vcmp.ge.f32.partialorder %v3700_v17, 0.0  ;;  %v4052_v38 = vmul.f32 0.2, %v3700_v17  ;;  %5153 = vrot.lane.b32.xlu0 %v5039_v43, %s8170_s30  ;;  %v11991_v39 = vsel %vm3257_vm9, %v5544_v31, %v5435_v27  ;;  %v5427_v63 = vpop.permute.xlu0 %5426 }
 0x461   : > { %4380 = vst.msk [vmem:[#allocation2 + $0x220] sm:$0xff] %vm4311_vm13, %v4271_v11  ;;  %v4274_v21 = vadd.f32 %v11987_v9, %v11898_v25  ;;  %v12000_v10 = vor.u32 %v5375_v8, %v5374_v51  ;;  %v5481_v25 = vsel %vm4311_vm13, %v11091_v30, %v5132_v44 }
 0x462   : > { %v11996_v47 = vsel %vm3940_vm11, %v3700_v17, %v4052_v38  ;;  %5668 = vrot.lane.b32.xlu1 %v11991_v39, %s8174_s25  ;;  %v5536_v1 = vsel %vm5526_vm14, %v5481_v25, %v5266_v13 }
 0x463   : > { %4383 = vst.msk [vmem:[#allocation2 + $0x238] sm:$0xff] %vm4311_vm13, %v4274_v21  ;;  %v4272_v48 = vadd.f32 %v11996_v47, %v11906_v33  ;;  %v5377_v28 = vsel %vm1694_vm2, %v11909_v46, %v12000_v10  ;;  %v12014_v40 = vsel %vm3257_vm9, %v5536_v1, %v5427_v63  ;;  %v5142_v33 = vpop.permute.xlu1 %5141 }
 0x464   : > { %5448 = vrot.lane.b32.xlu0 %v5377_v28, %s8172_s14  ;;  %v5134_v44 = vpop.permute.xlu0 %5133  ;;  %v5491_v63 = vsel %vm4311_vm13, %v11274_v18, %v5142_v33  ;;  %v5042_v33 = vor.u32 %v5040_v32, %v11973_v5 }
 0x465   : > { %4381 = vst.msk [vmem:[#allocation2 + $0x228] sm:$0xff] %vm4311_vm13, %v4272_v48 }
 0x467   : > { %v5276_v30 = vpop.permute.xlu1 %5275 }
 0x468   : > { %5660 = vrot.lane.b32.xlu0 %v12014_v40, %s8174_s25 }
 0x46a   : > { %v4491_v51 = vld [vmem:[#allocation2 + $0x230] ss:$2 sm:$0xff]  ;;  %v4599_v27 = vld [vmem:[#allocation2 + $0x231] ss:$2 sm:$0xff] }
 0x46b   : > { %v4671_v46 = vadd.f32 %v4599_v27, %v4491_v51 }
 0x46c   : > { %v4489_v7 = vld [vmem:[#allocation2 + $0x220] ss:$2 sm:$0xff]  ;;  %v4597_v17 = vld [vmem:[#allocation2 + $0x221] ss:$2 sm:$0xff] }
 0x46d   : > { %v4670_v31 = vadd.f32 %v4597_v17, %v4489_v7  ;;  %v12020_v38 = vmul.f32 0.25, %v4671_v46 }
 0x46f   : > { %v7577_v11 = vpop.f32.mrf.mxu0  ;;  %v12018_v43 = vmul.f32 0.25, %v4670_v31  ;;  %14164 = vst [vmem:[#allocation46_spill] sm:$0xff] %v12020_v38 }
 0x470   : > { %v3721_v13 = vadd.f32 %v11863_v24, %v7577_v11 }
 0x471   : > { %14163 = vst [vmem:[#allocation24_spill] sm:$0xff] %v12018_v43  ;;  %v3712_v8 = vpop.f32.mrf.mxu0  ;;  %v12025_v21 = vpack.c.bf16 %v12020_v38, %v12018_v43 }
 0x472   : > { %vm3945_vm15 = vcmp.ge.f32.partialorder %v3721_v13, 0.0  ;;  %v4057_v48 = vmul.f32 0.2, %v3721_v13  ;;  %v3713_v28 = vadd.f32 %v11863_v24, %v3712_v8  ;;  %v5437_v8 = vpop.permute.xlu1 %5436 }
 0x473   : > { %v7578_v25 = vpop.f32.mrf.mxu0  ;;  %v13831_v1 = vrot.slane %v12025_v21, 1  ;;  %v5044_v51 = vshll.u32 %v12025_v21, 16  ;;  %v14165_v5 = vshrl.u32 %v12025_v21, 16 }
 0x474   : > { %v12033_v46 = vsel %vm3945_vm15, %v3721_v13, %v4057_v48  ;;  %vm3943_vm10 = vcmp.ge.f32.partialorder %v3713_v28, 0.0  ;;  %v4055_v7 = vmul.f32 0.2, %v3713_v28  ;;  %v3724_v17 = vadd.f32 %v11863_v24, %v7578_v25  ;;  %v5268_v48 = vpop.permute.xlu0 %5267 }
 0x475   : > { %v4277_v31 = vadd.f32 %v12033_v46, %v11963_v58  ;;  %v3715_v11 = vpop.f32.mrf.mxu0  ;;  %v5238_v18 = vsel %vm1438_vm1, %v5235_v0, %v13831_v1  ;;  %v12046_v13 = vrot.slane %v5044_v51, 1  ;;  %v5378_v1 = vrot.slane %v14165_v5, 1 }
 0x476   : > { %v12048_v27 = vsel %vm3943_vm10, %v3713_v28, %v4055_v7  ;;  %vm3946_vm12 = vcmp.ge.f32.partialorder %v3724_v17, 0.0  ;;  %v4058_v25 = vmul.f32 0.2, %v3724_v17  ;;  %v3716_v58 = vadd.f32 %v11863_v24, %v3715_v11  ;;  %5289 = vrot.lane.b32.xlu0 %v5238_v18, %s13878_s12 }
 0x477   : > { %4386 = vst.msk [vmem:[#allocation2 + $0x250] sm:$0xff] %vm4311_vm13, %v4277_v31  ;;  %v4275_v0 = vadd.f32 %v12048_v27, %v11977_v4  ;;  %v5047_v32 = vsel %vm734_vm0, %v5042_v33, %v12046_v13  ;;  %v5379_v6 = vrot.slane %v5044_v51, 2  ;;  %v5546_v28 = vsel %vm5526_vm14, %v5491_v63, %v5276_v30 }
 0x478   : > { %v12060_v7 = vsel %vm3946_vm12, %v3724_v17, %v4058_v25  ;;  %vm3944_vm11 = vcmp.ge.f32.partialorder %v3716_v58, 0.0  ;;  %v4056_v11 = vmul.f32 0.2, %v3716_v58  ;;  %5155 = vrot.lane.b32.xlu1 %v5047_v32, %s8170_s30  ;;  %v12064_v31 = vsel %vm3257_vm9, %v5546_v28, %v5437_v8  ;;  %v5429_v51 = vpop.permute.xlu0 %5428 }
 0x479   : > { %4384 = vst.msk [vmem:[#allocation2 + $0x240] sm:$0xff] %vm4311_vm13, %v4275_v0  ;;  %v4278_v4 = vadd.f32 %v12060_v7, %v11987_v9  ;;  %v12069_v18 = vor.u32 %v5379_v6, %v5378_v1  ;;  %v5483_v6 = vsel %vm4311_vm13, %v11227_v45, %v5134_v44  ;;  %v5144_v0 = vpop.permute.xlu1 %5143 }
 0x47a   : > { %v12071_v33 = vsel %vm3944_vm11, %v3716_v58, %v4056_v11  ;;  %5670 = vrot.lane.b32.xlu0 %v12064_v31, %s8174_s25  ;;  %v5538_v9 = vsel %vm5526_vm14, %v5483_v6, %v5268_v48 }
 0x47b   : > { %4387 = vst.msk [vmem:[#allocation2 + $0x258] sm:$0xff] %vm4311_vm13, %v4278_v4  ;;  %v4276_v30 = vadd.f32 %v12071_v33, %v11996_v47  ;;  %v5381_v63 = vsel %vm1694_vm2, %v12000_v10, %v12069_v18  ;;  %v12087_v1 = vsel %vm3257_vm9, %v5538_v9, %v5429_v51  ;;  %v5493_v4 = vsel %vm4311_vm13, %v11357_v14, %v5144_v0 }
 0x47c   : > { %5450 = vrot.lane.b32.xlu1 %v5381_v63, %s8172_s14  ;;  %v5278_v44 = vpop.permute.xlu0 %5277  ;;  %v14168_v0 = vrot.slane %v12025_v21, 1 }
 0x47d   : > { %4385 = vst.msk [vmem:[#allocation2 + $0x248] sm:$0xff] %vm4311_vm13, %v4276_v30  ;;  %v5548_v51 = vsel %vm5526_vm14, %v5493_v4, %v5278_v44  ;;  %v14169_v44 = vshrl.u32 %v12025_v21, 16 }
 0x480   : > { %5662 = vrot.lane.b32.xlu1 %v12087_v1, %s8174_s25 }
 0x482   : > { %v4495_v47 = vld [vmem:[#allocation2 + $0x250] ss:$2 sm:$0xff]  ;;  %v4603_v17 = vld [vmem:[#allocation2 + $0x251] ss:$2 sm:$0xff] }
 0x483   : > { %v4673_v8 = vadd.f32 %v4603_v17, %v4495_v47 }
 0x484   : > { %v4493_v10 = vld [vmem:[#allocation2 + $0x240] ss:$2 sm:$0xff]  ;;  %v4601_v25 = vld [vmem:[#allocation2 + $0x241] ss:$2 sm:$0xff] }
 0x485   : > { %v4672_v58 = vadd.f32 %v4601_v25, %v4493_v10  ;;  %v12093_v45 = vmul.f32 0.25, %v4673_v8 }
 0x487   : > { %v7581_v32 = vpop.f32.mrf.mxu0  ;;  %v12091_v5 = vmul.f32 0.25, %v4672_v58  ;;  %14167 = vst [vmem:[#allocation22_spill] sm:$0xff] %v12093_v45 }
 0x488   : > { %v3737_v48 = vadd.f32 %v11863_v24, %v7581_v32 }
 0x489   : > { %14166 = vst [vmem:[#allocation19_spill] sm:$0xff] %v12091_v5  ;;  %v3728_v28 = vpop.f32.mrf.mxu0  ;;  %v12098_v11 = vpack.c.bf16 %v12093_v45, %v12091_v5 }
 0x48a   : > { %vm3949_vm15 = vcmp.ge.f32.partialorder %v3737_v48, 0.0  ;;  %v4061_v30 = vmul.f32 0.2, %v3737_v48  ;;  %v3729_v63 = vadd.f32 %v11863_v24, %v3728_v28  ;;  %v5050_v28 = vor.u32 %v14169_v44, %v12046_v13 }
 0x48b   : > { %v7582_v6 = vpop.f32.mrf.mxu0  ;;  %v13833_v9 = vrot.slane %v12098_v11, 1  ;;  %v5052_v47 = vshll.u32 %v12098_v11, 16 }
 0x48c   : > { %v4173_v8 = vsel %vm3949_vm15, %v3737_v48, %v4061_v30  ;;  %vm3947_vm10 = vcmp.ge.f32.partialorder %v3729_v63, 0.0  ;;  %v4059_v10 = vmul.f32 0.2, %v3729_v63  ;;  %v3740_v25 = vadd.f32 %v11863_v24, %v7582_v6  ;;  %v5439_v48 = vpop.permute.xlu1 %5438 }
 0x48d   : > { %v4281_v14 = vadd.f32 %v4173_v8, %v12033_v46  ;;  %v3731_v58 = vpop.f32.mrf.mxu0  ;;  %v5240_v32 = vsel %vm1438_vm1, %v14168_v0, %v13833_v9  ;;  %v12117_v4 = vrot.slane %v5052_v47, 1  ;;  %v14170_v9 = vshrl.u32 %v12098_v11, 16 }
 0x48e   : > { %v4171_v30 = vsel %vm3947_vm10, %v3729_v63, %v4059_v10  ;;  %vm3950_vm12 = vcmp.ge.f32.partialorder %v3740_v25, 0.0  ;;  %v4062_v17 = vmul.f32 0.2, %v3740_v25  ;;  %v3732_v6 = vadd.f32 %v11863_v24, %v3731_v58  ;;  %5291 = vrot.lane.b32.xlu1 %v5240_v32, %s13878_s12 }
 0x48f   : > { %4390 = vst.msk [vmem:[#allocation2 + $0x270] sm:$0xff] %vm4311_vm13, %v4281_v14  ;;  %v4279_v46 = vadd.f32 %v4171_v30, %v12048_v27  ;;  %v5055_v0 = vsel %vm734_vm0, %v5050_v28, %v12117_v4  ;;  %v5382_v13 = vrot.slane %v14170_v9, 1  ;;  %v5383_v44 = vrot.slane %v5052_v47, 2 }
 0x490   : > { %v4174_v34 = vsel %vm3950_vm12, %v3740_v25, %v4062_v17  ;;  %vm3948_vm11 = vcmp.ge.f32.partialorder %v3732_v6, 0.0  ;;  %v4060_v63 = vmul.f32 0.2, %v3732_v6  ;;  %5157 = vrot.lane.b32.xlu0 %v5055_v0, %s8170_s30  ;;  %v12131_v14 = vsel %vm3257_vm9, %v5548_v51, %v5439_v48  ;;  %v12135_v58 = vpop.permute.xlu1 %5279  ;;  %v5146_v17 = vpop.permute.xlu0 %5145 }
 0x491   : > { %4388 = vst.msk [vmem:[#allocation2 + $0x260] sm:$0xff] %vm4311_vm13, %v4279_v46  ;;  %v4282_v10 = vadd.f32 %v4174_v34, %v12060_v7  ;;  %v12133_v27 = vor.u32 %v5383_v44, %v5382_v13 }
 0x492   : > { %v4172_v32 = vsel %vm3948_vm11, %v3732_v6, %v4060_v63  ;;  %5672 = vrot.lane.b32.xlu1 %v12131_v14, %s8174_s25 }
 0x493   : > { %4391 = vst.msk [vmem:[#allocation2 + $0x278] sm:$0xff] %vm4311_vm13, %v4282_v10  ;;  %v4280_v9 = vadd.f32 %v4172_v32, %v12071_v33  ;;  %v7585_v47 = vpop.f32.mrf.mxu0  ;;  %v5385_v7 = vsel %vm1694_vm2, %v12069_v18, %v12133_v27 }
 0x494   : > { %v3753_v51 = vadd.f32 %v11863_v24, %v7585_v47  ;;  %5452 = vrot.lane.b32.xlu0 %v5385_v7, %s8172_s14  ;;  %v12147_v28 = vpop.permute.xlu1 %5147  ;;  %v12151_v63 = vpop.permute.xlu0 %5440 }
 0x495   : > { %4389 = vst.msk [vmem:[#allocation2 + $0x268] sm:$0xff] %vm4311_vm13, %v4280_v9  ;;  %v3744_v25 = vpop.f32.mrf.mxu0 }
 0x496   : > { %vm3953_vm15 = vcmp.ge.f32.partialorder %v3753_v51, 0.0  ;;  %v4065_v48 = vmul.f32 0.2, %v3753_v51  ;;  %v3745_v6 = vadd.f32 %v11863_v24, %v3744_v25 }
 0x497   : > { %v7586_v33 = vpop.f32.mrf.mxu0 }
 0x498   : > { %v4177_v46 = vsel %vm3953_vm15, %v3753_v51, %v4065_v48  ;;  %vm3951_vm10 = vcmp.ge.f32.partialorder %v3745_v6, 0.0  ;;  %v4063_v0 = vmul.f32 0.2, %v3745_v6  ;;  %v3756_v18 = vadd.f32 %v11863_v24, %v7586_v33  ;;  %v12155_v20 = vpop.permute.xlu1 %5442 }
 0x499   : > { %v4285_v13 = vadd.f32 %v4177_v46, %v4173_v8  ;;  %v3747_v44 = vpop.f32.mrf.mxu0 }
 0x49a   : > { %v4175_v10 = vsel %vm3951_vm10, %v3745_v6, %v4063_v0  ;;  %vm3954_vm12 = vcmp.ge.f32.partialorder %v3756_v18, 0.0  ;;  %v4066_v9 = vmul.f32 0.2, %v3756_v18  ;;  %v3748_v47 = vadd.f32 %v11863_v24, %v3747_v44  ;;  %v4499_v7 = vld [vmem:[#allocation2 + $0x270] ss:$2 sm:$0xff]  ;;  %v12158_v0 = vpop.permute.xlu0 %5281 }
 0x49b   : > { %4394 = vst.msk [vmem:[#allocation2 + $0x290] sm:$0xff] %vm4311_vm13, %v4285_v13  ;;  %v4283_v45 = vadd.f32 %v4175_v10, %v4171_v30  ;;  %v4607_v25 = vld [vmem:[#allocation2 + $0x271] ss:$2 sm:$0xff] }
 0x49c   : > { %v4178_v51 = vsel %vm3954_vm12, %v3756_v18, %v4066_v9  ;;  %vm3952_vm11 = vcmp.ge.f32.partialorder %v3748_v47, 0.0  ;;  %v4064_v48 = vmul.f32 0.2, %v3748_v47  ;;  %v4497_v33 = vld [vmem:[#allocation2 + $0x260] ss:$2 sm:$0xff]  ;;  %v4675_v8 = vadd.f32 %v4607_v25, %v4499_v7 }
 0x49d   : > { %4392 = vst.msk [vmem:[#allocation2 + $0x280] sm:$0xff] %vm4311_vm13, %v4283_v45  ;;  %v4286_v5 = vadd.f32 %v4178_v51, %v4174_v34  ;;  %v4605_v6 = vld [vmem:[#allocation2 + $0x261] ss:$2 sm:$0xff]  ;;  %v5495_v34 = vsel %vm4311_vm13, %v11431_v35, %v5146_v17 }
 0x49e   : > { %v4176_v54 = vsel %vm3952_vm11, %v3748_v47, %v4064_v48  ;;  %v4674_v44 = vadd.f32 %v4605_v6, %v4497_v33  ;;  %v12166_v9 = vmul.f32 0.25, %v4675_v8  ;;  %v5550_v8 = vsel %vm5526_vm14, %v5495_v34, %v12135_v58 }
 0x49f   : > { %4395 = vst.msk [vmem:[#allocation2 + $0x298] sm:$0xff] %vm4311_vm13, %v4286_v5  ;;  %v4284_v13 = vadd.f32 %v4176_v54, %v4172_v32  ;;  %v7589_v30 = vpop.f32.mrf.mxu0 }
 0x4a0   : > { %v3769_v38 = vadd.f32 %v11863_v24, %v7589_v30  ;;  %v12164_v18 = vmul.f32 0.25, %v4674_v44  ;;  %14172 = vst [vmem:[#allocation50_spill] sm:$0xff] %v12166_v9 }
 0x4a1   : > { %4393 = vst.msk [vmem:[#allocation2 + $0x288] sm:$0xff] %vm4311_vm13, %v4284_v13  ;;  %v3760_v45 = vpop.f32.mrf.mxu0 }
 0x4a2   : > { %v12162_v15 = vpop.permute.xlu1 %5283  ;;  %14171 = vst [vmem:[#allocation23_spill] sm:$0xff] %v12164_v18  ;;  %vm3957_vm15 = vcmp.ge.f32.partialorder %v3769_v38, 0.0  ;;  %v4069_v47 = vmul.f32 0.2, %v3769_v38  ;;  %v3761_v5 = vadd.f32 %v11863_v24, %v3760_v45  ;;  %v12176_v7 = vpack.c.bf16 %v12166_v9, %v12164_v18 }
 0x4a3   : > { %v12172_v32 = vpop.permute.xlu0 %5149  ;;  %v7590_v25 = vpop.f32.mrf.mxu0 }
 0x4a4   : > { %v12178_v48 = vsel %vm3957_vm15, %v3769_v38, %v4069_v47  ;;  %vm3955_vm10 = vcmp.ge.f32.partialorder %v3761_v5, 0.0  ;;  %v4067_v33 = vmul.f32 0.2, %v3761_v5  ;;  %v3772_v35 = vadd.f32 %v11863_v24, %v7590_v25 }
 0x4a5   : > { %v4289_v6 = vadd.f32 %v12178_v48, %v4177_v46  ;;  %v3763_v44 = vpop.f32.mrf.mxu0  ;;  %v13844_v13 = vrot.slane %v12176_v7, 1  ;;  %v14173_v25 = vrot.slane %v12098_v11, 1  ;;  %v5060_v34 = vshll.u32 %v12176_v7, 16 }
 0x4a6   : > { %v12185_v30 = vsel %vm3955_vm10, %v3761_v5, %v4067_v33  ;;  %vm3958_vm12 = vcmp.ge.f32.partialorder %v3772_v35, 0.0  ;;  %v4070_v45 = vmul.f32 0.2, %v3772_v35  ;;  %v3764_v38 = vadd.f32 %v11863_v24, %v3763_v44  ;;  %v4503_v33 = vld [vmem:[#allocation2 + $0x290] ss:$2 sm:$0xff] }
 0x4a7   : > { %v5124_v17 = vpop.permute.xlu1 %5123  ;;  %4398 = vst.msk [vmem:[#allocation2 + $0x2b0] sm:$0xff] %vm4311_vm13, %v4289_v6  ;;  %v4287_v47 = vadd.f32 %v12185_v30, %v4175_v10  ;;  %v5242_v58 = vsel %vm1438_vm1, %v14173_v25, %v13844_v13  ;;  %v5064_v5 = vshrl.u32 %v12176_v7, 16  ;;  %v4611_v9 = vld [vmem:[#allocation2 + $0x291] ss:$2 sm:$0xff]  ;;  %v14174_v44 = vshrl.u32 %v12098_v11, 16 }
 0x4a8   : > { %v12195_v46 = vpop.permute.xlu0 %5444  ;;  %v12199_v18 = vsel %vm3958_vm12, %v3772_v35, %v4070_v45  ;;  %vm3956_vm11 = vcmp.ge.f32.partialorder %v3764_v38, 0.0  ;;  %v4068_v6 = vmul.f32 0.2, %v3764_v38  ;;  %5293 = vrot.lane.b32.xlu1 %v5242_v58, %s13878_s12  ;;  %v4501_v25 = vld [vmem:[#allocation2 + $0x280] ss:$2 sm:$0xff]  ;;  %v5062_v62 = vrot.slane %v5060_v34, 1 }
 0x4a9   : > { %v5058_v43 = vor.u32 %v14174_v44, %v12117_v4  ;;  %4396 = vst.msk [vmem:[#allocation2 + $0x2a0] sm:$0xff] %vm4311_vm13, %v4287_v47  ;;  %v4290_v13 = vadd.f32 %v12199_v18, %v4178_v51  ;;  %v5386_v2 = vrot.slane %v5064_v5, 1  ;;  %v5387_v42 = vrot.slane %v5060_v34, 2  ;;  %v4609_v12 = vld [vmem:[#allocation2 + $0x281] ss:$2 sm:$0xff] }
 0x4aa   : > { %v12209_v35 = vsel %vm3257_vm9, %v5550_v8, %v12151_v63  ;;  %v12211_v45 = vsel %vm3956_vm11, %v3764_v38, %v4068_v6  ;;  %v4676_v58 = vadd.f32 %v4609_v12, %v4501_v25  ;;  %v4677_v29 = vadd.f32 %v4611_v9, %v4503_v33 }
 0x4ab   : > { %v5419_v10 = vpop.permute.xlu1 %5418  ;;  %4399 = vst.msk [vmem:[#allocation2 + $0x2b8] sm:$0xff] %vm4311_vm13, %v4290_v13  ;;  %v5473_v4 = vsel %vm4311_vm13, %v11706_v57, %v5124_v17  ;;  %v4288_v47 = vadd.f32 %v12211_v45, %v4176_v54  ;;  %v5063_v51 = vsel %vm734_vm0, %v5058_v43, %v5062_v62  ;;  %v12218_v56 = vor.u32 %v5387_v42, %v5386_v2 }
 0x4ac   : > { %v5258_v44 = vpop.permute.xlu0 %5257  ;;  %v7593_v34 = vpop.f32.mrf.mxu0  ;;  %5159 = vrot.lane.b32.xlu0 %v5063_v51, %s8170_s30  ;;  %5674 = vrot.lane.b32.xlu1 %v12209_v35, %s8174_s25  ;;  %vm5710_vm15 = vcmask 523264   ;;  %v12225_v9 = vmul.f32 0.25, %v4676_v58  ;;  %v12229_v42 = vmul.f32 0.25, %v4677_v29  ;;  %v5497_v2 = vsel %vm4311_vm13, %v11526_v26, %v12147_v28 }
 0x4ad   : > { %v5528_v12 = vsel %vm5526_vm14, %v5473_v4, %v5258_v44  ;;  %v3785_v63 = vadd.f32 %v11863_v24, %v7593_v34  ;;  %4397 = vst.msk [vmem:[#allocation2 + $0x2a8] sm:$0xff] %vm4311_vm13, %v4288_v47  ;;  %v5389_v13 = vsel %vm1694_vm2, %v12133_v27, %v12218_v56 }
 0x4ae   : > { %14175 = vst [vmem:[#allocation47_spill] sm:$0xff] %v12225_v9  ;;  %v3776_v54 = vpop.f32.mrf.mxu0  ;;  %v5582_v43 = vsel %vm3257_vm9, %v5528_v12, %v5419_v10  ;;  %14176 = vst [vmem:[#allocation48_spill] sm:$0xff] %v12229_v42  ;;  %v12241_v29 = vpack.c.bf16 %v12229_v42, %v12225_v9  ;;  %v5066_v10 = vor.u32 %v5064_v5, %v5062_v62 }
 0x4af   : > { %v5657_v57 = vpop.permute.xlu1 %5656  ;;  %vm3961_vm10 = vcmp.ge.f32.partialorder %v3785_v63, 0.0  ;;  %v4073_v17 = vmul.f32 0.2, %v3785_v63  ;;  %v3777_v8 = vadd.f32 %v11863_v24, %v3776_v54 }
 0x4b0   : > { %v5665_v38 = vpop.permute.xlu0 %5664  ;;  %v7594_v33 = vpop.f32.mrf.mxu0  ;;  %v5712_v6 = vsel %vm5710_vm15, %v5582_v43, %v5657_v57  ;;  %5454 = vrot.lane.b32.xlu0 %v5389_v13, %s8172_s14  ;;  %v5243_v47 = vrot.slane %v12241_v29, 1  ;;  %v5068_v62 = vshll.u32 %v12241_v29, 16  ;;  %v5072_v54 = vshrl.u32 %v12241_v29, 16 }
 0x4b1   : > { %v12243_v25 = vsel %vm3961_vm10, %v3785_v63, %v4073_v17  ;;  %vm3959_vm12 = vcmp.ge.f32.partialorder %v3777_v8, 0.0  ;;  %v4071_v26 = vmul.f32 0.2, %v3777_v8  ;;  %v3788_v28 = vadd.f32 %v11863_v24, %v7594_v33 }
 0x4b2   : > { %v4293_v27 = vadd.f32 %v12243_v25, %v12178_v48  ;;  %v12251_v58 = vsel %vm5710_vm15, %v12014_v40, %v5665_v38  ;;  %v3779_v4 = vpop.f32.mrf.mxu0  ;;  %v4507_v34 = vld [vmem:[#allocation2 + $0x2b0] ss:$2 sm:$0xff]  ;;  %v14177_v48 = vrot.slane %v12176_v7, 1  ;;  %v12267_v63 = vrot.slane %v5068_v62, 1  ;;  %v4615_v57 = vld [vmem:[#allocation2 + $0x2b1] ss:$2 sm:$0xff] }
 0x4b3   : > { %v12255_v5 = vsel %vm3959_vm12, %v3777_v8, %v4071_v26  ;;  %vm3962_vm11 = vcmp.ge.f32.partialorder %v3788_v28, 0.0  ;;  %v4074_v51 = vmul.f32 0.2, %v3788_v28  ;;  %5953 = vmatprep.mubr.bf16.mxu1 %v12251_v58  ;;  %v3780_v44 = vadd.f32 %v11863_v24, %v3779_v4 }
 0x4b4   : > { %4402 = vst.msk [vmem:[#allocation2 + $0x2d0] sm:$0xff] %vm4311_vm13, %v4293_v27  ;;  %v4291_v40 = vadd.f32 %v12255_v5, %v12185_v30  ;;  %5954 = vmatmul.mubr.bf16.vlgmr.msra.gmra.mxu1 %v5712_v6  ;;  %v5244_v12 = vsel %vm1438_vm1, %v14177_v48, %v5243_v47  ;;  %v5391_v8 = vrot.slane %v5068_v62, 2  ;;  %v4505_v30 = vld [vmem:[#allocation2 + $0x2a0] ss:$2 sm:$0xff]  ;;  %v5071_v38 = vsel %vm734_vm0, %v5066_v10, %v12267_v63  ;;  %v4613_v6 = vld [vmem:[#allocation2 + $0x2a1] ss:$2 sm:$0xff] }
 0x4b5   : > { %v12270_v43 = vsel %vm3962_vm11, %v3788_v28, %v4074_v51  ;;  %vm3960_vm10 = vcmp.ge.f32.partialorder %v3780_v44, 0.0  ;;  %v4072_v17 = vmul.f32 0.2, %v3780_v44  ;;  %5295 = vrot.lane.b32.xlu1 %v5244_v12, %s13878_s12  ;;  %v5390_v33 = vrot.slane %v5072_v54, 1  ;;  %5161 = vrot.lane.b32.xlu0 %v5071_v38, %s8170_s30 }
 0x4b6   : > { %4400 = vst.msk [vmem:[#allocation2 + $0x2c0] sm:$0xff] %vm4311_vm13, %v4291_v40  ;;  %v4294_v13 = vadd.f32 %v12270_v43, %v12199_v18  ;;  %v4679_v26 = vadd.f32 %v4615_v57, %v4507_v34  ;;  %v5552_v28 = vsel %vm5526_vm14, %v5497_v2, %v12158_v0  ;;  %v4678_v4 = vadd.f32 %v4613_v6, %v4505_v30 }
 0x4b7   : > { %v12282_v27 = vsel %vm3960_vm10, %v3780_v44, %v4072_v17  ;;  %v12287_v62 = vsel %vm3257_vm9, %v5552_v28, %v12155_v20  ;;  %v7597_v10 = vpop.f32.mrf.mxu0  ;;  %v12292_v51 = vor.u32 %v5391_v8, %v5390_v33  ;;  %v5499_v20 = vsel %vm4311_vm13, %v11625_v60, %v12172_v32 }
 0x4b8   : > { %4403 = vst.msk [vmem:[#allocation2 + $0x2d8] sm:$0xff] %vm4311_vm13, %v4294_v13  ;;  %v4292_v18 = vadd.f32 %v12282_v27, %v12211_v45  ;;  %v3801_v0 = vadd.f32 %v11863_v24, %v7597_v10  ;;  %v12297_v2 = vpop.permute.xlu1 %5285  ;;  %v12299_v44 = vmul.f32 0.25, %v4678_v4  ;;  %v12301_v34 = vmul.f32 0.25, %v4679_v26 }
 0x4b9   : > { %5676 = vrot.lane.b32.xlu1 %v12287_v62, %s8174_s25  ;;  %v5393_v45 = vsel %vm1694_vm2, %v12218_v56, %v12292_v51  ;;  %v3792_v40 = vpop.f32.mrf.mxu0  ;;  %v5554_v13 = vsel %vm5526_vm14, %v5499_v20, %v12162_v15 }
 0x4ba   : > { %14178 = vst [vmem:[#allocation53_spill] sm:$0xff] %v12299_v44  ;;  %14179 = vst [vmem:[#allocation51_spill] sm:$0xff] %v12301_v34  ;;  %vm3965_vm12 = vcmp.ge.f32.partialorder %v3801_v0, 0.0  ;;  %v4077_v48 = vmul.f32 0.2, %v3801_v0  ;;  %5456 = vrot.lane.b32.xlu0 %v5393_v45, %s8172_s14  ;;  %v3793_v12 = vadd.f32 %v11863_v24, %v3792_v40  ;;  %v5152_v57 = vpop.permute.xlu0 %5151  ;;  %v12314_v17 = vpack.c.bf16 %v12301_v34, %v12299_v44 }
 0x4bb   : > { %4401 = vst.msk [vmem:[#allocation2 + $0x2c8] sm:$0xff] %vm4311_vm13, %v4292_v18  ;;  %v7598_v8 = vpop.f32.mrf.mxu0 }
 0x4bc   : > { %v12316_v60 = vsel %vm3965_vm12, %v3801_v0, %v4077_v48  ;;  %vm3963_vm11 = vcmp.ge.f32.partialorder %v3793_v12, 0.0  ;;  %v4075_v32 = vmul.f32 0.2, %v3793_v12  ;;  %v3804_v30 = vadd.f32 %v11863_v24, %v7598_v8 }
 0x4bd   : > { %v4297_v38 = vadd.f32 %v12316_v60, %v12243_v25  ;;  %v3795_v33 = vpop.f32.mrf.mxu0  ;;  %v13851_v6 = vrot.slane %v12314_v17, 1  ;;  %v5076_v10 = vshll.u32 %v12314_v17, 16  ;;  %v5080_v0 = vshrl.u32 %v12314_v17, 16 }
 0x4be   : > { %v5126_v56 = vpop.permute.xlu1 %5125  ;;  %v12324_v26 = vsel %vm3963_vm11, %v3793_v12, %v4075_v32  ;;  %vm3966_vm10 = vcmp.ge.f32.partialorder %v3804_v30, 0.0  ;;  %v4078_v28 = vmul.f32 0.2, %v3804_v30  ;;  %v3796_v4 = vadd.f32 %v11863_v24, %v3795_v33  ;;  %v12335_v25 = vpop.permute.xlu0 %5446 }
 0x4bf   : > { %4406 = vst.msk [vmem:[#allocation2 + $0x2f0] sm:$0xff] %vm4311_vm13, %v4297_v38  ;;  %v4295_v18 = vadd.f32 %v12324_v26, %v12255_v5  ;;  %v5246_v15 = vsel %vm1438_vm1, %v5243_v47, %v13851_v6  ;;  %v4511_v20 = vld [vmem:[#allocation2 + $0x2d0] ss:$2 sm:$0xff]  ;;  %v4619_v45 = vld [vmem:[#allocation2 + $0x2d1] ss:$2 sm:$0xff]  ;;  %v5074_v12 = vor.u32 %v5072_v54, %v12267_v63  ;;  %v5078_v32 = vrot.slane %v5076_v10, 1 }
 0x4c0   : > { %v12339_v40 = vsel %vm3966_vm10, %v3804_v30, %v4078_v28  ;;  %vm3964_vm12 = vcmp.ge.f32.partialorder %v3796_v4, 0.0  ;;  %v4076_v48 = vmul.f32 0.2, %v3796_v4  ;;  %5297 = vrot.lane.b32.xlu1 %v5246_v15, %s13878_s12  ;;  %v5394_v38 = vrot.slane %v5080_v0, 1 }
 0x4c1   : > { %4404 = vst.msk [vmem:[#allocation2 + $0x2e0] sm:$0xff] %vm4311_vm13, %v4295_v18  ;;  %v4298_v8 = vadd.f32 %v12339_v40, %v12270_v43  ;;  %v5395_v33 = vrot.slane %v5076_v10, 2  ;;  %v12350_v28 = vsel %vm3257_vm9, %v5554_v13, %v12195_v46  ;;  %v4681_v34 = vadd.f32 %v4619_v45, %v4511_v20 }
 0x4c2   : > { %v5421_v5 = vpop.permute.xlu1 %5420  ;;  %v4509_v47 = vld [vmem:[#allocation2 + $0x2c0] ss:$2 sm:$0xff]  ;;  %v4617_v30 = vld [vmem:[#allocation2 + $0x2c1] ss:$2 sm:$0xff]  ;;  %v12352_v15 = vsel %vm3964_vm12, %v3796_v4, %v4076_v48  ;;  %v5475_v63 = vsel %vm4311_vm13, %v11710_v23, %v5126_v56  ;;  %v5079_v43 = vsel %vm734_vm0, %v5074_v12, %v5078_v32  ;;  %v5260_v18 = vpop.permute.xlu0 %5259  ;;  %v5501_v45 = vsel %vm4311_vm13, %v11747_v37, %v5152_v57 }
 0x4c3   : > { %v4680_v6 = vadd.f32 %v4617_v30, %v4509_v47  ;;  %4407 = vst.msk [vmem:[#allocation2 + $0x2f8] sm:$0xff] %vm4311_vm13, %v4298_v8  ;;  %v4296_v54 = vadd.f32 %v12352_v15, %v12282_v27  ;;  %v7601_v10 = vpop.f32.mrf.mxu0  ;;  %v12360_v44 = vor.u32 %v5395_v33, %v5394_v38  ;;  %5163 = vrot.lane.b32.xlu0 %v5079_v43, %s8170_s30  ;;  %v12371_v20 = vmul.f32 0.25, %v4681_v34 }
 0x4c4   : > { %5678 = vrot.lane.b32.xlu1 %v12350_v28, %s8174_s25  ;;  %v5530_v46 = vsel %vm5526_vm14, %v5475_v63, %v5260_v18  ;;  %v3817_v13 = vadd.f32 %v11863_v24, %v7601_v10  ;;  %v5082_v34 = vor.u32 %v5080_v0, %v5078_v32 }
 0x4c5   : > { %v12367_v23 = vmul.f32 0.25, %v4680_v6  ;;  %4405 = vst.msk [vmem:[#allocation2 + $0x2e8] sm:$0xff] %vm4311_vm13, %v4296_v54  ;;  %v3808_v27 = vpop.f32.mrf.mxu0  ;;  %v5584_v56 = vsel %vm3257_vm9, %v5530_v46, %v5421_v5  ;;  %14181 = vst [vmem:[#allocation65_spill] sm:$0xff] %v12371_v20  ;;  %v5397_v47 = vsel %vm1694_vm2, %v12292_v51, %v12360_v44 }
 0x4c6   : > { %v5659_v4 = vpop.permute.xlu1 %5658  ;;  %vm3969_vm11 = vcmp.ge.f32.partialorder %v3817_v13, 0.0  ;;  %v4081_v48 = vmul.f32 0.2, %v3817_v13  ;;  %v3809_v12 = vadd.f32 %v11863_v24, %v3808_v27  ;;  %v5667_v6 = vpop.permute.xlu0 %5666 }
 0x4c7   : > { %14180 = vst [vmem:[#allocation60_spill] sm:$0xff] %v12367_v23  ;;  %v7602_v8 = vpop.f32.mrf.mxu0  ;;  %v5715_v38 = vsel %vm5710_vm15, %v5584_v56, %v5659_v4  ;;  %v12382_v5 = vpack.c.bf16 %v12371_v20, %v12367_v23  ;;  %5458 = vrot.lane.b32.xlu0 %v5397_v47, %s8172_s14  ;;  %v12392_v30 = vsel %vm5710_vm15, %v12087_v1, %v5667_v6 }
 0x4c8   : > { %v12384_v33 = vsel %vm3969_vm11, %v3817_v13, %v4081_v48  ;;  %vm3967_vm10 = vcmp.ge.f32.partialorder %v3809_v12, 0.0  ;;  %v4079_v37 = vmul.f32 0.2, %v3809_v12  ;;  %v3820_v57 = vadd.f32 %v11863_v24, %v7602_v8  ;;  %5961 = vmatprep.mubr.bf16.mxu1 %v12392_v30 }
 0x4c9   : > { %v4301_v51 = vadd.f32 %v12384_v33, %v12316_v60  ;;  %v3811_v63 = vpop.f32.mrf.mxu0  ;;  %v5247_v54 = vrot.slane %v12382_v5, 1  ;;  %v5084_v0 = vshll.u32 %v12382_v5, 16  ;;  %5962 = vmatmul.mubr.bf16.gmra.mxu1 %v5715_v38  ;;  %v14182_v60 = vrot.slane %v12314_v17, 1 }
 0x4ca   : > { %v12396_v32 = vsel %vm3967_vm10, %v3809_v12, %v4079_v37  ;;  %vm3970_vm12 = vcmp.ge.f32.partialorder %v3820_v57, 0.0  ;;  %v4082_v43 = vmul.f32 0.2, %v3820_v57  ;;  %v3812_v18 = vadd.f32 %v11863_v24, %v3811_v63  ;;  %v4515_v10 = vld [vmem:[#allocation2 + $0x2f0] ss:$2 sm:$0xff] }
 0x4cb   : > { %4410 = vst.msk [vmem:[#allocation2 + $0x310] sm:$0xff] %vm4311_vm13, %v4301_v51  ;;  %v4299_v1 = vadd.f32 %v12396_v32, %v12324_v26  ;;  %v5248_v46 = vsel %vm1438_vm1, %v14182_v60, %v5247_v54  ;;  %v5086_v13 = vrot.slane %v5084_v0, 1  ;;  %v5088_v4 = vshrl.u32 %v12382_v5, 16  ;;  %v4623_v27 = vld [vmem:[#allocation2 + $0x2f1] ss:$2 sm:$0xff] }
 0x4cc   : > { %v12407_v56 = vsel %vm3970_vm12, %v3820_v57, %v4082_v43  ;;  %vm3968_vm11 = vcmp.ge.f32.partialorder %v3812_v18, 0.0  ;;  %v4080_v48 = vmul.f32 0.2, %v3812_v18  ;;  %5299 = vrot.lane.b32.xlu1 %v5248_v46, %s13878_s12  ;;  %v5399_v24 = vrot.slane %v5084_v0, 2  ;;  %v4513_v12 = vld [vmem:[#allocation2 + $0x2e0] ss:$2 sm:$0xff] }
 0x4cd   : > { %4408 = vst.msk [vmem:[#allocation2 + $0x300] sm:$0xff] %vm4311_vm13, %v4299_v1  ;;  %v4302_v26 = vadd.f32 %v12407_v56, %v12339_v40  ;;  %v5087_v47 = vsel %vm734_vm0, %v5082_v34, %v5086_v13  ;;  %v5398_v6 = vrot.slane %v5088_v4, 1  ;;  %v4621_v8 = vld [vmem:[#allocation2 + $0x2e1] ss:$2 sm:$0xff]  ;;  %v4683_v38 = vadd.f32 %v4623_v27, %v4515_v10 }
 0x4ce   : > { %v5556_v37 = vsel %vm5526_vm14, %v5501_v45, %v12297_v2  ;;  %v12416_v57 = vsel %vm3968_vm11, %v3812_v18, %v4080_v48  ;;  %5165 = vrot.lane.b32.xlu0 %v5087_v47, %s8170_s30  ;;  %v4682_v51 = vadd.f32 %v4621_v8, %v4513_v12  ;;  %v5090_v27 = vor.u32 %v5088_v4, %v5086_v13 }
 0x4cf   : > { %v12421_v63 = vsel %vm3257_vm9, %v5556_v37, %v12335_v25  ;;  %4411 = vst.msk [vmem:[#allocation2 + $0x318] sm:$0xff] %vm4311_vm13, %v4302_v26  ;;  %v4300_v40 = vadd.f32 %v12416_v57, %v12352_v15  ;;  %v5400_v34 = vor.u32 %v5399_v24, %v5398_v6  ;;  %v12430_v45 = vmul.f32 0.25, %v4683_v38 }
 0x4d0   : > { %5680 = vrot.lane.b32.xlu1 %v12421_v63, %s8174_s25  ;;  %v5288_v0 = vpop.permute.xlu1 %5287  ;;  %v12428_v2 = vmul.f32 0.25, %v4682_v51 }
 0x4d1   : > { %14184 = vst [vmem:[#allocation67_spill] sm:$0xff] %v12430_v45  ;;  %4409 = vst.msk [vmem:[#allocation2 + $0x308] sm:$0xff] %vm4311_vm13, %v4300_v40  ;;  %v5401_v25 = vsel %vm1694_vm2, %v12360_v44, %v5400_v34 }
 0x4d2   : > { %14183 = vst [vmem:[#allocation66_spill] sm:$0xff] %v12428_v2  ;;  %5460 = vrot.lane.b32.xlu0 %v5401_v25, %s8172_s14  ;;  %v5154_v43 = vpop.permute.xlu0 %5153  ;;  %v12438_v15 = vpack.c.bf16 %v12430_v45, %v12428_v2 }
 0x4d3   : > { %v5503_v46 = vsel %vm4311_vm13, %v11858_v50, %v5154_v43 }
 0x4d4   : > { %v5669_v18 = vpop.permute.xlu1 %5668  ;;  %v5249_v10 = vrot.slane %v12438_v15, 1  ;;  %v5092_v1 = vshll.u32 %v12438_v15, 16  ;;  %v5096_v60 = vshrl.u32 %v12438_v15, 16  ;;  %v5558_v51 = vsel %vm5526_vm14, %v5503_v46, %v5288_v0 }
 0x4d5   : > { %v12447_v44 = vsel %vm5710_vm15, %v11847_v53, %v5669_v18 }
 0x4d6   : > { %v5250_v48 = vsel %vm1438_vm1, %v5247_v54, %v5249_v10  ;;  %5969 = vmatprep.mubr.bf16.mxu1 %v12447_v44  ;;  %v5094_v24 = vrot.slane %v5092_v1, 1  ;;  %v5402_v12 = vrot.slane %v5096_v60, 1  ;;  %v5403_v26 = vrot.slane %v5092_v1, 2  ;;  %v4519_v47 = vld [vmem:[#allocation2 + $0x310] ss:$2 sm:$0xff]  ;;  %v5449_v6 = vpop.permute.xlu0 %5448 }
 0x4d7   : > { %5301 = vrot.lane.b32.xlu1 %v5250_v48, %s13878_s12  ;;  %v4627_v8 = vld [vmem:[#allocation2 + $0x311] ss:$2 sm:$0xff]  ;;  %v12459_v54 = vld [vmem:[%s14027_s2] ss:$0 sm:$0xff]  ;;  %v12464_v43 = vsel %vm3257_vm9, %v5558_v51, %v5449_v6 }
 0x4d8   : > { %v7605_v50 = vpop.f32.mrf.mxu0  ;;  %v5095_v38 = vsel %vm734_vm0, %v5090_v27, %v5094_v24  ;;  %v5404_v53 = vor.u32 %v5403_v26, %v5402_v12  ;;  %v4517_v37 = vld [vmem:[#allocation2 + $0x300] ss:$2 sm:$0xff]  ;;  %v4625_v13 = vld [vmem:[#allocation2 + $0x301] ss:$2 sm:$0xff]  ;;  %v4685_v4 = vadd.f32 %v4627_v8, %v4519_v47 }
 0x4d9   : > { %v3833_v40 = vadd.f32 %v12459_v54, %v7605_v50  ;;  %5167 = vrot.lane.b32.xlu0 %v5095_v38, %s8170_s30  ;;  %v4684_v25 = vadd.f32 %v4625_v13, %v4517_v37 }
 0x4da   : > { %v3824_v18 = vpop.f32.mrf.mxu0  ;;  %v5661_v0 = vpop.permute.xlu0 %5660  ;;  %v5405_v12 = vsel %vm1694_vm2, %v5400_v34, %v5404_v53  ;;  %v12474_v47 = vmul.f32 0.25, %v4685_v4 }
 0x4db   : > { %vm3973_vm10 = vcmp.ge.f32.partialorder %v3833_v40, 0.0  ;;  %v4085_v1 = vmul.f32 0.2, %v3833_v40  ;;  %v3825_v27 = vadd.f32 %v12459_v54, %v3824_v18  ;;  %5682 = vrot.lane.b32.xlu1 %v12464_v43, %s8174_s25  ;;  %v12469_v46 = vmul.f32 0.25, %v4684_v25 }
 0x4dc   : > { %v7606_v48 = vpop.f32.mrf.mxu0  ;;  %v5718_v26 = vsel %vm5710_vm15, %v11841_v19, %v5661_v0  ;;  %14186 = vst [vmem:[#allocation69_spill] sm:$0xff] %v12474_v47 }
 0x4dd   : > { %14185 = vst [vmem:[#allocation68_spill] sm:$0xff] %v12469_v46  ;;  %v12476_v6 = vsel %vm3973_vm10, %v3833_v40, %v4085_v1  ;;  %vm3971_vm12 = vcmp.ge.f32.partialorder %v3825_v27, 0.0  ;;  %v4083_v8 = vmul.f32 0.2, %v3825_v27  ;;  %v3836_v50 = vadd.f32 %v12459_v54, %v7606_v48  ;;  %5462 = vrot.lane.b32.xlu0 %v5405_v12, %s8172_s14  ;;  %5970 = vmatmul.mubr.bf16.gmra.mxu1 %v5718_v26 }
 0x4de   : > { %v4305_v38 = vadd.f32 %v12476_v6, %v12384_v33  ;;  %v3827_v37 = vpop.f32.mrf.mxu0  ;;  %v12484_v34 = vpack.c.bf16 %v12474_v47, %v12469_v46 }
 0x4df   : > { %v12486_v19 = vsel %vm3971_vm12, %v3825_v27, %v4083_v8  ;;  %vm3974_vm11 = vcmp.ge.f32.partialorder %v3836_v50, 0.0  ;;  %v4086_v13 = vmul.f32 0.2, %v3836_v50  ;;  %v3828_v4 = vadd.f32 %v12459_v54, %v3827_v37 }
 0x4e0   : > { %4414 = vst.msk [vmem:[#allocation2 + $0x330] sm:$0xff] %vm4311_vm13, %v4305_v38  ;;  %v4303_v51 = vadd.f32 %v12486_v19, %v12396_v32  ;;  %v5251_v40 = vrot.slane %v12484_v34, 1  ;;  %v5100_v33 = vshll.u32 %v12484_v34, 16  ;;  %v5104_v25 = vshrl.u32 %v12484_v34, 16 }
 0x4e1   : > { %v12495_v18 = vsel %vm3974_vm11, %v3836_v50, %v4086_v13  ;;  %vm3972_vm10 = vcmp.ge.f32.partialorder %v3828_v4, 0.0  ;;  %v4084_v1 = vmul.f32 0.2, %v3828_v4  ;;  %v5098_v27 = vor.u32 %v5096_v60, %v5094_v24 }
 0x4e2   : > { %4412 = vst.msk [vmem:[#allocation2 + $0x320] sm:$0xff] %vm4311_vm13, %v4303_v51  ;;  %v4306_v0 = vadd.f32 %v12495_v18, %v12407_v56  ;;  %v5252_v32 = vsel %vm1438_vm1, %v5249_v10, %v5251_v40  ;;  %v5102_v48 = vrot.slane %v5100_v33, 1  ;;  %v5406_v12 = vrot.slane %v5104_v25, 1 }
 0x4e3   : > { %v12505_v26 = vsel %vm3972_vm10, %v3828_v4, %v4084_v1  ;;  %5303 = vrot.lane.b32.xlu1 %v5252_v32, %s13878_s12  ;;  %v5407_v8 = vrot.slane %v5100_v33, 2 }
 0x4e4   : > { %4415 = vst.msk [vmem:[#allocation2 + $0x338] sm:$0xff] %vm4311_vm13, %v4306_v0  ;;  %v4304_v60 = vadd.f32 %v12505_v26, %v12416_v57  ;;  %v5103_v56 = vsel %vm734_vm0, %v5098_v27, %v5102_v48 }
 0x4e5   : > { %5169 = vrot.lane.b32.xlu0 %v5103_v56, %s8170_s30  ;;  %v12513_v24 = vor.u32 %v5407_v8, %v5406_v12 }
 0x4e6   : > { %4413 = vst.msk [vmem:[#allocation2 + $0x328] sm:$0xff] %vm4311_vm13, %v4304_v60 }
 0x4e7   : > { %v5409_v10 = vsel %vm1694_vm2, %v5404_v53, %v12513_v24 }
 0x4e8   : > { %v5290_v50 = vpop.permute.xlu0 %5289 }
 0x4e9   : > { %5464 = vrot.lane.b32.xlu0 %v5409_v10, %s8172_s14 }
 0x4ea   : > { %v5156_v38 = vpop.permute.xlu1 %5155 }
 0x4eb   : > { %v5505_v37 = vsel %vm4311_vm13, %v11952_v61, %v5156_v38  ;;  %v4523_v13 = vld [vmem:[#allocation2 + $0x330] ss:$2 sm:$0xff]  ;;  %v4631_v57 = vld [vmem:[#allocation2 + $0x331] ss:$2 sm:$0xff] }
 0x4ec   : > { %v5671_v4 = vpop.permute.xlu0 %5670  ;;  %v4687_v51 = vadd.f32 %v4631_v57, %v4523_v13  ;;  %v5560_v53 = vsel %vm5526_vm14, %v5505_v37, %v5290_v50 }
 0x4ed   : > { %v12523_v33 = vsel %vm5710_vm15, %v11941_v52, %v5671_v4  ;;  %v4521_v1 = vld [vmem:[#allocation2 + $0x320] ss:$2 sm:$0xff]  ;;  %v4629_v27 = vld [vmem:[#allocation2 + $0x321] ss:$2 sm:$0xff] }
 0x4ee   : > { %v5451_v0 = vpop.permute.xlu1 %5450  ;;  %5977 = vmatprep.mubr.bf16.mxu1 %v12523_v33  ;;  %v4686_v32 = vadd.f32 %v4629_v27, %v4521_v1  ;;  %v12534_v60 = vmul.f32 0.25, %v4687_v51  ;;  %v5106_v51 = vor.u32 %v5104_v25, %v5102_v48 }
 0x4ef   : > { %v12528_v12 = vsel %vm3257_vm9, %v5560_v53, %v5451_v0 }
 0x4f0   : > { %v7609_v61 = vpop.f32.mrf.mxu0  ;;  %5684 = vrot.lane.b32.xlu1 %v12528_v12, %s8174_s25  ;;  %v12532_v8 = vmul.f32 0.25, %v4686_v32  ;;  %14188 = vst [vmem:[#allocation71_spill] sm:$0xff] %v12534_v60 }
 0x4f1   : > { %v3849_v52 = vadd.f32 %v12459_v54, %v7609_v61 }
 0x4f2   : > { %14187 = vst [vmem:[#allocation70_spill] sm:$0xff] %v12532_v8  ;;  %v3840_v56 = vpop.f32.mrf.mxu0  ;;  %v5663_v10 = vpop.permute.xlu1 %5662  ;;  %v12539_v50 = vpack.c.bf16 %v12534_v60, %v12532_v8 }
 0x4f3   : > { %vm3977_vm12 = vcmp.ge.f32.partialorder %v3849_v52, 0.0  ;;  %v4089_v38 = vmul.f32 0.2, %v3849_v52  ;;  %v3841_v37 = vadd.f32 %v12459_v54, %v3840_v56  ;;  %v5721_v13 = vsel %vm5710_vm15, %v11932_v41, %v5663_v10 }
 0x4f4   : > { %v7610_v57 = vpop.f32.mrf.mxu0  ;;  %5978 = vmatmul.mubr.bf16.gmra.mxu1 %v5721_v13  ;;  %v5253_v4 = vrot.slane %v12539_v50, 1  ;;  %v5108_v1 = vshll.u32 %v12539_v50, 16  ;;  %v5112_v27 = vshrl.u32 %v12539_v50, 16 }
 0x4f5   : > { %v4201_v0 = vsel %vm3977_vm12, %v3849_v52, %v4089_v38  ;;  %vm3975_vm11 = vcmp.ge.f32.partialorder %v3841_v37, 0.0  ;;  %v4087_v53 = vmul.f32 0.2, %v3841_v37  ;;  %v3852_v32 = vadd.f32 %v12459_v54, %v7610_v57 }
 0x4f6   : > { %v4309_v61 = vadd.f32 %v4201_v0, %v12476_v6  ;;  %v3843_v56 = vpop.f32.mrf.mxu0  ;;  %v5254_v41 = vsel %vm1438_vm1, %v5251_v40, %v5253_v4  ;;  %v5110_v10 = vrot.slane %v5108_v1, 1  ;;  %v5410_v13 = vrot.slane %v5112_v27, 1 }
 0x4f7   : > { %v4199_v60 = vsel %vm3975_vm11, %v3841_v37, %v4087_v53  ;;  %vm3978_vm10 = vcmp.ge.f32.partialorder %v3852_v32, 0.0  ;;  %v4090_v25 = vmul.f32 0.2, %v3852_v32  ;;  %v3844_v48 = vadd.f32 %v12459_v54, %v3843_v56  ;;  %5305 = vrot.lane.b32.xlu1 %v5254_v41, %s13878_s12 }
 0x4f8   : > { %4418 = vst.msk [vmem:[#allocation2 + $0x350] sm:$0xff] %vm4311_vm13, %v4309_v61  ;;  %v4307_v52 = vadd.f32 %v4199_v60, %v12486_v19  ;;  %v5111_v6 = vsel %vm734_vm0, %v5106_v51, %v5110_v10  ;;  %v5411_v38 = vrot.slane %v5108_v1, 2  ;;  %vm4419_vm12 = vcmask 125952  }
 0x4f9   : > { %v4202_v57 = vsel %vm3978_vm10, %v3852_v32, %v4090_v25  ;;  %vm3976_vm8 = vcmp.ge.f32.partialorder %v3844_v48, 0.0  ;;  %v4088_v40 = vmul.f32 0.2, %v3844_v48  ;;  %5171 = vrot.lane.b32.xlu0 %v5111_v6, %s8170_s30  ;;  %vm6456_vm10 = vcmask 256000  }
 0x4fa   : > { %4416 = vst.msk [vmem:[#allocation2 + $0x340] sm:$0xff] %vm4311_vm13, %v4307_v52  ;;  %v4310_v37 = vadd.f32 %v4202_v57, %v12495_v18  ;;  %v5412_v54 = vor.u32 %v5411_v38, %v5410_v13 }
 0x4fb   : > { %v4200_v0 = vsel %vm3976_vm8, %v3844_v48, %v4088_v40 }
 0x4fc   : > { %4420 = vst.msk [vmem:[#allocation2 + $0x358] sm:$0xf] %vm4419_vm12, %v4310_v37  ;;  %v4308_v53 = vadd.f32 %v4200_v0, %v12505_v26  ;;  %v5413_v19 = vsel %vm1694_vm2, %v12513_v24, %v5412_v54  ;;  %v5114_v37 = vor.u32 %v5112_v27, %v5110_v10 }
 0x4fd   : > { %5466 = vrot.lane.b32.xlu0 %v5413_v19, %s8172_s14 }
 0x4fe   : > { %4417 = vst.msk [vmem:[#allocation2 + $0x348] sm:$0xff] %vm4311_vm13, %v4308_v53 }
 0x500   : > { %v5292_v60 = vpop.permute.xlu1 %5291 }
 0x502   : > { %v5158_v51 = vpop.permute.xlu0 %5157 }
 0x503   : > { %v5507_v1 = vsel %vm4311_vm13, %v12025_v21, %v5158_v51  ;;  %v4527_v32 = vld [vmem:[#allocation2 + $0x350] ss:$2 sm:$0x3f]  ;;  %v4635_v61 = vld [vmem:[#allocation2 + $0x351] ss:$2 sm:$0x3f] }
 0x504   : > { %v5673_v18 = vpop.permute.xlu1 %5672  ;;  %v4689_v56 = vadd.f32 %v4635_v61, %v4527_v32  ;;  %v5562_v24 = vsel %vm5526_vm14, %v5507_v1, %v5292_v60 }
 0x505   : > { %v12569_v41 = vsel %vm5710_vm15, %v11991_v39, %v5673_v18  ;;  %v4525_v26 = vld [vmem:[#allocation2 + $0x340] ss:$2 sm:$0xff]  ;;  %v4633_v13 = vld [vmem:[#allocation2 + $0x341] ss:$2 sm:$0xff] }
 0x506   : > { %5985 = vmatprep.mubr.bf16.mxu1 %v12569_v41  ;;  %v5453_v25 = vpop.permute.xlu0 %5452  ;;  %v4688_v48 = vadd.f32 %v4633_v13, %v4525_v26  ;;  %v12581_v39 = vmul.f32 0.25, %v4689_v56 }
 0x507   : > { %v12574_v52 = vsel %vm3257_vm9, %v5562_v24, %v5453_v25  ;;  %5986 = vmatmul.mubr.bf16.gmra.mxu1 %v12251_v58 }
 0x508   : > { %5686 = vrot.lane.b32.xlu1 %v12574_v52, %s8174_s25  ;;  %v12579_v21 = vmul.f32 0.25, %v4688_v48  ;;  %14190 = vst [vmem:[#allocation73_spill] sm:$0xff] %v12581_v39 }
 0x50a   : > { %14189 = vst [vmem:[#allocation72_spill] sm:$0xff] %v12579_v21  ;;  %v12585_v6 = vpack.c.bf16 %v12581_v39, %v12579_v21 }
 0x50c   : > { %v5255_v38 = vrot.slane %v12585_v6, 1  ;;  %v5116_v57 = vshll.u32 %v12585_v6, 16  ;;  %v5120_v40 = vshrl.u32 %v12585_v6, 16 }
 0x50e   : > { %v5256_v58 = vsel %vm1438_vm1, %v5253_v4, %v5255_v38  ;;  %v5118_v0 = vrot.slane %v5116_v57, 1  ;;  %v5414_v53 = vrot.slane %v5120_v40, 1  ;;  %v5415_v19 = vrot.slane %v5116_v57, 2 }
 0x50f   : > { %5307 = vrot.lane.b32.xlu1 %v5256_v58, %s13878_s12 }
 0x510   : > { %v5119_v60 = vsel %vm734_vm0, %v5114_v37, %v5118_v0  ;;  %v5416_v51 = vor.u32 %v5415_v19, %v5414_v53  ;;  %v5122_v32 = vor.u32 %v5120_v40, %v5118_v0 }
 0x511   : > { %5173 = vrot.lane.b32.xlu0 %v5119_v60, %s8170_s30 }
 0x512   : > { %v5417_v1 = vsel %vm1694_vm2, %v5412_v54, %v5416_v51 }
 0x515   : > { %5468 = vrot.lane.b32.xlu0 %v5417_v1, %s8172_s14 }
 0x519   : > { %5175 = vrot.lane.b32.xlu0 %v5122_v32, %s8170_s30  ;;  %s14196_s30 = smov 24  }
 0x51a   : > { %v5294_v27 = vpop.permute.xlu1 %5293 }
 0x51d   : > { %5470 = vrot.lane.b32.xlu0 %v5416_v51, %s8172_s14 }
 0x51e   : > { %v5160_v4 = vpop.permute.xlu0 %5159  ;;  %v5675_v10 = vpop.permute.xlu1 %5674 }
 0x51f   : > { %v5509_v61 = vsel %vm4311_vm13, %v12098_v11, %v5160_v4  ;;  %v5739_v18 = vsel %vm5710_vm15, %v12064_v31, %v5675_v10 }
 0x520   : > { %5993 = vmatprep.mubr.bf16.mxu1 %v5739_v18  ;;  %v5564_v54 = vsel %vm5526_vm14, %v5509_v61, %v5294_v27 }
 0x521   : > { %5994 = vmatmul.mubr.bf16.gmra.mxu1 %v12392_v30 }
 0x522   : > { %v5455_v56 = vpop.permute.xlu0 %5454 }
 0x523   : > { %v12605_v26 = vsel %vm3257_vm9, %v5564_v54, %v5455_v56 }
 0x524   : > { %5688 = vrot.lane.b32.xlu1 %v12605_v26, %s8174_s25 }
 0x527   : > { %v5296_v13 = vpop.permute.xlu1 %5295  ;;  %v5162_v24 = vpop.permute.xlu0 %5161 }
 0x528   : > { %5309 = vrot.lane.b32.xlu1 %v5255_v38, %s13878_s12  ;;  %v5511_v11 = vsel %vm4311_vm13, %v12176_v7, %v5162_v24 }
 0x529   : > { %v5566_v25 = vsel %vm5526_vm14, %v5511_v11, %v5296_v13 }
 0x52b   : > { %v5677_v31 = vpop.permute.xlu1 %5676 }
 0x52c   : > { %v5742_v30 = vsel %vm5710_vm15, %v12131_v14, %v5677_v31  ;;  %v5457_v48 = vpop.permute.xlu0 %5456 }
 0x52d   : > { %6001 = vmatprep.mubr.bf16.mxu1 %v5742_v30  ;;  %v12616_v57 = vsel %vm3257_vm9, %v5566_v25, %v5457_v48 }
 0x52e   : > { %6002 = vmatmul.mubr.bf16.gmra.mxu1 %v12447_v44  ;;  %5690 = vrot.lane.b32.xlu1 %v12616_v57, %s8174_s25 }
 0x532   : > { %v5298_v38 = vpop.permute.xlu1 %5297 }
 0x535   : > { %v5164_v40 = vpop.permute.xlu0 %5163 }
 0x536   : > { %v5679_v37 = vpop.permute.xlu1 %5678  ;;  %v5513_v7 = vsel %vm4311_vm13, %v12241_v29, %v5164_v40 }
 0x537   : > { %v5745_v14 = vsel %vm5710_vm15, %v12209_v35, %v5679_v37  ;;  %v5568_v58 = vsel %vm5526_vm14, %v5513_v7, %v5298_v38 }
 0x538   : > { %6009 = vmatprep.mubr.bf16.mxu1 %v5745_v14 }
 0x539   : > { %6010 = vmatmul.mubr.bf16.gmra.mxu1 %v12523_v33  ;;  %v5459_v0 = vpop.permute.xlu0 %5458 }
 0x53a   : > { %v12628_v44 = vsel %vm3257_vm9, %v5568_v58, %v5459_v0  ;;  %v14191_v0 = vld [vmem:[#allocation40_spill] sm:$0xff] }
 0x53b   : > { %5692 = vrot.lane.b32.xlu0 %v12628_v44, %s8174_s25 }
 0x53e   : > { %v5300_v53 = vpop.permute.xlu1 %5299 }
 0x540   : > { %v5166_v19 = vpop.permute.xlu0 %5165 }
 0x541   : > { %v5515_v29 = vsel %vm4311_vm13, %v12314_v17, %v5166_v19  ;;  %v14192_v19 = vld [vmem:[#allocation42_spill] sm:$0xff] }
 0x542   : > { %v5681_v60 = vpop.permute.xlu1 %5680  ;;  %v5570_v33 = vsel %vm5526_vm14, %v5515_v29, %v5300_v53  ;;  %v8014_v53 = vunpack.i.h.bf16 %v14191_v0  ;;  %v8019_v29 = vunpack.i.h.bf16 %v14192_v19  ;;  %v14195_v0 = vld [vmem:[#allocation25_spill] sm:$0xff] }
 0x543   : > { %v12636_v35 = vsel %vm5710_vm15, %v12287_v62, %v5681_v60 }
 0x544   : > { %6017 = vmatprep.mubr.bf16.mxu1 %v12636_v35  ;;  %v5461_v51 = vpop.permute.xlu0 %5460  ;;  %v12691_v60 = vpack.c.bf16 %v8019_v29, %v8014_v53 }
 0x545   : > { %v12641_v1 = vsel %vm3257_vm9, %v5570_v33, %v5461_v51  ;;  %6018 = vmatmul.mubr.bf16.gmra.mxu1 %v12569_v41 }
 0x546   : > { %5694 = vrot.lane.b32.xlu1 %v12641_v1, %s8174_s25 }
 0x549   : > { %v5302_v32 = vpop.permute.xlu1 %5301 }
 0x54b   : > { %v5168_v17 = vpop.permute.xlu0 %5167 }
 0x54c   : > { %v5517_v27 = vsel %vm4311_vm13, %v12382_v5, %v5168_v17 }
 0x54d   : > { %v5683_v62 = vpop.permute.xlu1 %5682  ;;  %v5572_v10 = vsel %vm5526_vm14, %v5517_v27, %v5302_v32  ;;  %v1239_v32 = vshll.u32 %v12691_v60, 16 }
 0x54e   : > { %v12650_v4 = vsel %vm5710_vm15, %v12350_v28, %v5683_v62 }
 0x54f   : > { %6025 = vmatprep.mubr.bf16.mxu1 %v12650_v4  ;;  %v5463_v61 = vpop.permute.xlu0 %5462 }
 0x550   : > { %v12655_v41 = vsel %vm3257_vm9, %v5572_v10, %v5463_v61  ;;  %6026 = vmatmul.mubr.bf16.gmra.mxu1 %v5739_v18  ;;  %v1241_v10 = vrot.slane %v1239_v32, 1  ;;  %v1243_v61 = vshrl.u32 %v12691_v60, 16 }
 0x551   : > { %5696 = vrot.lane.b32.xlu0 %v12655_v41, %s8174_s25 }
 0x555   : > { %v5304_v56 = vpop.permute.xlu1 %5303 }
 0x557   : > { %v5170_v54 = vpop.permute.xlu0 %5169 }
 0x558   : > { %v5519_v5 = vsel %vm4311_vm13, %v12438_v15, %v5170_v54  ;;  %v14193_v54 = vld [vmem:[#allocation57_spill] sm:$0xff] }
 0x559   : > { %v5574_v28 = vsel %vm5526_vm14, %v5519_v5, %v5304_v56  ;;  %v1242_v5 = vsel %vm734_vm0, %v14193_v54, %v1241_v10  ;;  %v1946_v56 = vrot.slane %v1243_v61, 1  ;;  %v14199_v54 = vld [vmem:[#allocation35_spill] sm:$0xff]  ;;  %vm14202_vm0 = vcmask 293888  }
 0x55b   : > { %v5465_v13 = vpop.permute.xlu0 %5464 }
 0x55c   : > { %v12663_v24 = vsel %vm3257_vm9, %v5574_v28, %v5465_v13  ;;  %v1947_v28 = vrot.slane %v1239_v32, 2 }
 0x55d   : > { %5702 = vrot.lane.b32.xlu1 %v12663_v24, %s8174_s25 }
 0x562   : > { %v5685_v11 = vpop.permute.xlu1 %5684 }
 0x563   : > { %v12669_v18 = vsel %vm5710_vm15, %v12421_v63, %v5685_v11 }
 0x564   : > { %6033 = vmatprep.mubr.bf16.mxu1 %v12669_v18 }
 0x565   : > { %6034 = vmatmul.mubr.bf16.gmra.mxu1 %v5742_v30 }
 0x569   : > { %v5306_v25 = vpop.permute.xlu1 %5305 }
 0x56b   : > { %v5172_v31 = vpop.permute.xlu0 %5171 }
 0x56c   : > { %v5521_v15 = vsel %vm4311_vm13, %v12484_v34, %v5172_v31  ;;  %v14194_v31 = vrot.slane %v14070_v22, 1 }
 0x56d   : > { %v5576_v48 = vsel %vm5526_vm14, %v5521_v15, %v5306_v25  ;;  %v1948_v25 = vor.u32 %v1947_v28, %v1946_v56 }
 0x56f   : > { %v5467_v38 = vpop.permute.xlu0 %5466 }
 0x570   : > { %v12676_v40 = vsel %vm3257_vm9, %v5576_v48, %v5467_v38  ;;  %v1949_v38 = vsel %vm1694_vm2, %v10676_v55, %v1948_v25 }
 0x571   : > { %5704 = vrot.lane.b32.xlu0 %v12676_v40, %s8174_s25 }
 0x574   : > { %v12680_v37 = vpop.f32.mrf.mxu1 }
 0x576   : > { %v5957_v63 = vpop.f32.mrf.mxu1 }
 0x578   : > { %v12682_v7 = vpop.f32.mrf.mxu1 }
 0x57a   : > { %v5960_v30 = vpop.f32.mrf.mxu1  ;;  %v5687_v58 = vpop.permute.xlu1 %5686 }
 0x57b   : > { %v12686_v34 = vsel %vm5710_vm15, %v12464_v43, %v5687_v58 }
 0x57c   : > { %6041 = vmatprep.mubr.bf16.mxu1 %v12686_v34 }
 0x57d   : > { %6042 = vmatmul.mubr.bf16.gmra.mxu1 %v5745_v14 }
 0x581   : > { %v5308_v17 = vpop.permute.xlu1 %5307 }
 0x583   : > { %v5174_v33 = vpop.permute.xlu0 %5173 }
 0x584   : > { %v5523_v51 = vsel %vm4311_vm13, %v12539_v50, %v5174_v33  ;;  %v1564_v50 = vrot.slane %v12691_v60, 1 }
 0x585   : > { %v5578_v27 = vsel %vm5526_vm14, %v5523_v51, %v5308_v17 }
 0x586   : > { %v1565_v15 = vsel %vm1438_vm1, %v14194_v31, %v1564_v50  ;;  %vm14204_vm1 = vmmov %vm14202_vm0 }
 0x587   : > { %v5469_v43 = vpop.permute.xlu0 %5468 }
 0x588   : > { %v5632_v62 = vsel %vm3257_vm9, %v5578_v27, %v5469_v43 }
 0x589   : > { %5706 = vrot.lane.b32.xlu1 %v5632_v62, %s8174_s25  ;;  %v12700_v14 = vpop.f32.mrf.mxu1  ;;  %v14198_v62 = vld [vmem:[#allocation64_spill] sm:$0xff] }
 0x58b   : > { %v5965_v13 = vpop.f32.mrf.mxu1  ;;  %v5176_v63 = vpop.permute.xlu0 %5175 }
 0x58c   : > { %v5525_v53 = vsel %vm4311_vm13, %v12585_v6, %v5176_v63 }
 0x58d   : > { %1370 = vrot.lane.b32.xlu1 %v1242_v5, %s8164_s16  ;;  %v12706_v11 = vpop.f32.mrf.mxu1 }
 0x58f   : > { %v5968_v48 = vpop.f32.mrf.mxu1  ;;  %v5471_v29 = vpop.permute.xlu0 %5470 }
 0x591   : > { %1690 = vrot.lane.b32.xlu1 %v1565_v15, %s8165_s17 }
 0x595   : > { %2074 = vrot.lane.b32.xlu1 %v1949_v38, %s8166_s18 }
 0x596   : > { %v5689_v30 = vpop.permute.xlu1 %5688 }
 0x597   : > { %v5760_v58 = vsel %vm5710_vm15, %v12528_v12, %v5689_v30  ;;  %v14197_v12 = vld [vmem:[#allocation12_spill] sm:$0xff] }
 0x598   : > { %6049 = vmatprep.mubr.bf16.mxu1 %v5760_v58 }
 0x599   : > { %6050 = vmatmul.mubr.bf16.gmra.mxu1 %v12636_v35  ;;  %2635 = vrot.lane.b32.xlu1 %v14195_v0, %s8167_s13  ;;  %v1245_v35 = vor.u32 %v1243_v61, %v1241_v10 }
 0x59a   : > { %v5310_v19 = vpop.permute.xlu1 %5309 }
 0x59b   : > { %v5580_v55 = vsel %vm5526_vm14, %v5525_v53, %v5310_v19 }
 0x59c   : > { %v5634_v33 = vsel %vm3257_vm9, %v5580_v55, %v5471_v29 }
 0x59d   : > { %5708 = vrot.lane.b32.xlu0 %v5634_v33, %s8174_s25  ;;  %v12725_v51 = vpop.f32.mrf.mxu1  ;;  %2753 = vrot.lane.b32.xlu1 %v14197_v12, %s14196_s30  ;;  %s7158_s25 = sand.u32 1, %s8267_s8  }
 0x59e   : > { %s13574_s12 = scalar_lea.sflag [#allocation7], %s7158_s25 }
 0x59f   : > { %v5973_v32 = vpop.f32.mrf.mxu1 }
 0x5a0   : > { %v5691_v17 = vpop.permute.xlu1 %5690 }
 0x5a1   : > { %1372 = vrot.lane.b32.xlu0 %v1245_v35, %s8164_s16  ;;  %v12730_v27 = vpop.f32.mrf.mxu1  ;;  %v5763_v6 = vsel %vm5710_vm15, %v12574_v52, %v5691_v17  ;;  %s14200_s16 = smov 36  }
 0x5a2   : > { %6057 = vmatprep.mubr.bf16.mxu1 %v5763_v6 }
 0x5a3   : > { %6058 = vmatmul.mubr.bf16.gmra.mxu1 %v12650_v4  ;;  %v5976_v43 = vpop.f32.mrf.mxu1 }
 0x5a5   : > { %1692 = vrot.lane.b32.xlu0 %v1564_v50, %s8165_s17 }
 0x5a9   : > { %2076 = vrot.lane.b32.xlu0 %v1948_v25, %s8166_s18 }
 0x5ad   : > { %2637 = vrot.lane.b32.xlu0 %v14198_v62, %s8167_s13  ;;  %v5693_v10 = vpop.permute.xlu0 %5692  ;;  %s7334_s13 = sshll.u32 %s13496_s15, 6 }
 0x5ae   : > { %v5766_v61 = vsel %vm5710_vm15, %v12605_v26, %v5693_v10  ;;  %s13557_s14 = scalar_lea.vmem [#allocation4], %s7334_s13  ;;  %s13570_s13 = scalar_lea.hbm %s13684_s10, %s7625_s23 }
 0x5af   : > { %6065 = vmatprep.mubr.bf16.mxu1 %v5766_v61 }
 0x5b0   : > { %6066 = vmatmul.mubr.bf16.gmra.mxu1 %v12669_v18 }
 0x5b1   : > { %2755 = vrot.lane.b32.xlu0 %v14199_v54, %s14196_s30 }
 0x5b4   : > { %v12744_v52 = vpop.f32.mrf.mxu1 }
 0x5b6   : > { %v5981_v4 = vpop.f32.mrf.mxu1 }
 0x5b8   : > { %v5695_v5 = vpop.permute.xlu1 %5694  ;;  %v12746_v50 = vpop.f32.mrf.mxu1 }
 0x5b9   : > { %v5769_v56 = vsel %vm5710_vm15, %v12616_v57, %v5695_v5 }
 0x5ba   : > { %6073 = vmatprep.mubr.bf16.mxu1 %v5769_v56  ;;  %v5984_v28 = vpop.f32.mrf.mxu1 }
 0x5bb   : > { %6074 = vmatmul.mubr.bf16.gmra.mxu1 %v12686_v34 }
 0x5c3   : > { %v5697_v26 = vpop.permute.xlu0 %5696 }
 0x5c4   : > { %v5772_v13 = vsel %vm5710_vm15, %v12628_v44, %v5697_v26 }
 0x5c5   : > { %6081 = vmatprep.mubr.bf16.mxu1 %v5772_v13 }
 0x5c6   : > { %6082 = vmatmul.mubr.bf16.gmra.mxu1 %v5760_v58 }
 0x5c7   : > { %v12753_v18 = vpop.f32.mrf.mxu1 }
 0x5c9   : > { %v5989_v31 = vpop.f32.mrf.mxu1 }
 0x5cb   : > { %v12755_v15 = vpop.f32.mrf.mxu1 }
 0x5cd   : > { %v5992_v25 = vpop.f32.mrf.mxu1 }
 0x5cf   : > { %v5703_v48 = vpop.permute.xlu1 %5702 }
 0x5d0   : > { %v5775_v57 = vsel %vm5710_vm15, %v12641_v1, %v5703_v48 }
 0x5d1   : > { %6089 = vmatprep.mubr.bf16.mxu1 %v5775_v57 }
 0x5d2   : > { %6090 = vmatmul.mubr.bf16.gmra.mxu1 %v5763_v6 }
 0x5e1   : > { %v12759_v38 = vpop.f32.mrf.mxu1 }
 0x5e3   : > { %v5997_v34 = vpop.f32.mrf.mxu1  ;;  %v5705_v63 = vpop.permute.xlu0 %5704 }
 0x5e4   : > { %v5778_v44 = vsel %vm5710_vm15, %v12655_v41, %v5705_v63 }
 0x5e5   : > { %v12763_v30 = vpop.f32.mrf.mxu1  ;;  %6097 = vmatprep.mubr.bf16.mxu1 %v5778_v44 }
 0x5e6   : > { %6098 = vmatmul.mubr.bf16.gmra.mxu1 %v5766_v61 }
 0x5e7   : > { %v6000_v58 = vpop.f32.mrf.mxu1 }
 0x5ee   : > { %v12765_v0 = vpop.f32.mrf.mxu1 }
 0x5f0   : > { %v6005_v53 = vpop.f32.mrf.mxu1 }
 0x5f2   : > { %v12767_v19 = vpop.f32.mrf.mxu1 }
 0x5f4   : > { %v6008_v1 = vpop.f32.mrf.mxu1 }
 0x5f9   : > { %v12769_v29 = vpop.f32.mrf.mxu1 }
 0x5fb   : > { %v6013_v55 = vpop.f32.mrf.mxu1  ;;  %v5707_v33 = vpop.permute.xlu1 %5706 }
 0x5fc   : > { %v5781_v12 = vsel %vm5710_vm15, %v12663_v24, %v5707_v33 }
 0x5fd   : > { %v12773_v35 = vpop.f32.mrf.mxu1  ;;  %6105 = vmatprep.mubr.bf16.mxu1 %v5781_v12 }
 0x5fe   : > { %6106 = vmatmul.mubr.bf16.gmra.mxu1 %v5769_v56 }
 0x5ff   : > { %v6016_v41 = vpop.f32.mrf.mxu1  ;;  %v1371_v32 = vpop.permute.xlu1 %1370 }
 0x600   : > { %v2204_v43 = vsel %vm2078_vm3, %v14070_v22, %v1371_v32 }
 0x603   : > { %v1691_v17 = vpop.permute.xlu1 %1690 }
 0x604   : > { %v2333_v62 = vsel %vm2207_vm4, %v2204_v43, %v1691_v17 }
 0x605   : > { %v12775_v6 = vpop.f32.mrf.mxu1 }
 0x607   : > { %v6021_v10 = vpop.f32.mrf.mxu1  ;;  %v2075_v61 = vpop.permute.xlu1 %2074 }
 0x608   : > { %v2462_v54 = vsel %vm2336_vm5, %v2333_v62, %v2075_v61 }
 0x609   : > { %v12781_v4 = vpop.f32.mrf.mxu1  ;;  %2871 = vrot.lane.b32.xlu1 %v2462_v54, %s14200_s16 }
 0x60b   : > { %v6024_v24 = vpop.f32.mrf.mxu1  ;;  %v2636_v54 = vpop.permute.xlu1 %2635 }
 0x60f   : > { %v5709_v5 = vpop.permute.xlu0 %5708 }
 0x610   : > { %v5784_v56 = vsel %vm5710_vm15, %v12676_v40, %v5709_v5  ;;  %v12786_v28 = vpop.f32.mrf.mxu1 }
 0x611   : > { %6113 = vmatprep.mubr.bf16.mxu1 %v5784_v56 }
 0x612   : > { %6114 = vmatmul.mubr.bf16.gmra.mxu1 %v5772_v13  ;;  %v6029_v22 = vpop.f32.mrf.mxu1 }
 0x613   : > { %v1373_v26 = vpop.permute.xlu0 %1372  ;;  %7072 = vmatprep.mubr.bf16.mxu1 %v14151_v16  ;;  %v2754_v22 = vpop.permute.xlu1 %2753 }
 0x614   : > { %v12789_v31 = vpop.f32.mrf.mxu1  ;;  %v2206_v57 = vsel %vm2078_vm3, %v12691_v60, %v1373_v26 }
 0x616   : > { %v6032_v25 = vpop.f32.mrf.mxu1 }
 0x617   : > { %v1693_v48 = vpop.permute.xlu0 %1692  ;;  %v14201_v25 = vld [vmem:[#allocation61_spill] sm:$0xff] }
 0x618   : > { %v2335_v34 = vsel %vm2207_vm4, %v2206_v57, %v1693_v48  ;;  %v2989_v48 = vsel %vm2875_vm6, %v14201_v25, %v2636_v54 }
 0x619   : > { %v3106_v57 = vsel %vm2992_vm7, %v2989_v48, %v2754_v22 }
 0x61b   : > { %v2077_v63 = vpop.permute.xlu0 %2076 }
 0x61c   : > { %v2464_v40 = vsel %vm2336_vm5, %v2335_v34, %v2077_v63 }
 0x61d   : > { %2873 = vrot.lane.b32.xlu0 %v2464_v40, %s14200_s16  ;;  %s13503_s16 = scalar_lea.vmem [#allocation6], %s7623_s26 }
 0x61e   : > { %s7193_s26 = sshll.u32 %s13503_s16, 4  ;;  %s13572_s26 = int_to_ptr.vmem [resolvable:$true] %s7193_s26 }
 0x61f   : > { %s8046_s0 = scalar_lea.vmem %s13572_s26, 1536 }
 0x620   : > { %p8047_p11 = scmp.ne.s32.totalorder %s13572_s26, %s8046_s0 }
 0x622   : > { %p8048_p12 = pnand %p8047_p11, %p8286_p5 }
 0x624   : > { %p8049_p13 = pneg %p8048_p12 }
 0x625   : > { %v12796_v44 = vpop.f32.mrf.mxu1 }
 0x627   : > { %v6037_v13 = vpop.f32.mrf.mxu1 }
 0x629   : > { %v12798_v58 = vpop.f32.mrf.mxu1 }
 0x62b   : > { %v6040_v53 = vpop.f32.mrf.mxu1 }
 0x63d   : > { %v12800_v1 = vpop.f32.mrf.mxu1 }
 0x63f   : > { %v6045_v55 = vpop.f32.mrf.mxu1 }
 0x641   : > { %v12802_v33 = vpop.f32.mrf.mxu1 }
 0x643   : > { %v6048_v12 = vpop.f32.mrf.mxu1 }
 0x644   : > { %v2638_v12 = vpop.permute.xlu0 %2637 }
 0x659   : > { %v12804_v60 = vpop.f32.mrf.mxu1 }
 0x65b   : > { %v6053_v41 = vpop.f32.mrf.mxu1 }
 0x65d   : > { %v12806_v32 = vpop.f32.mrf.mxu1 }
 0x65f   : > { %v6056_v17 = vpop.f32.mrf.mxu1 }
 0x663   : > { %v12808_v43 = vpop.f32.mrf.mxu1 }
 0x665   : > { %v6061_v62 = vpop.f32.mrf.mxu1 }
 0x667   : > { %v12810_v10 = vpop.f32.mrf.mxu1 }
 0x669   : > { %v6064_v61 = vpop.f32.mrf.mxu1 }
 0x66a   : > { %v2756_v61 = vpop.permute.xlu0 %2755 }
 0x670   : > { %v12812_v24 = vpop.f32.mrf.mxu1 }
 0x672   : > { %v6069_v5 = vpop.f32.mrf.mxu1 }
 0x673   : > { %v14203_v5 = vld [vmem:[#allocation52_spill] sm:$0xff] }
 0x674   : > { %v12814_v56 = vpop.f32.mrf.mxu1  ;;  %v2991_v22 = vsel %vm2875_vm6, %v14203_v5, %v2638_v12  ;;  %v12846_v5 = vld [vmem:[%s13678_s4] ss:$0 sm:$0xff] }
 0x675   : > { %v12865_v16 = vadd.f32 %v12846_v5, %v12730_v27  ;;  %v12877_v27 = vadd.f32 %v12846_v5, %v12755_v15 }
 0x676   : > { %v6072_v26 = vpop.f32.mrf.mxu1 }
 0x677   : > { %v3108_v26 = vsel %vm2992_vm7, %v2991_v22, %v2756_v61 }
 0x67b   : > { %v12819_v34 = vpop.f32.mrf.mxu1  ;;  %v2872_v63 = vpop.permute.xlu1 %2871 }
 0x67c   : > { %v3223_v40 = vsel %vm14202_vm0, %v3106_v57, %v2872_v63 }
 0x67d   : > { %v6077_v13 = vpop.f32.mrf.mxu1  ;;  %7611 = vmatprep.mubr.msk.bf16.mxu0 %vm3257_vm9, %v3223_v40 }
 0x67e   : > { %v13856_v13 = vlaneseq }
 0x67f   : > { %v12823_v53 = vpop.f32.mrf.mxu1 }
 0x681   : > { %v6080_v55 = vpop.f32.mrf.mxu1 }
 0x686   : > { %v12825_v41 = vpop.f32.mrf.mxu1 }
 0x688   : > { %v6085_v17 = vpop.f32.mrf.mxu1 }
 0x689   : > { %v12839_v17 = vshrl.u32 %v13856_v13, 7  ;;  %v12860_v13 = vadd.f32 %v12846_v5, %v12680_v37 }
 0x68a   : > { %v12827_v62 = vpop.f32.mrf.mxu1 }
 0x68b   : > { %14205 = vst [vmem:[#allocation40_spill] sm:$0xff] %v12839_v17  ;;  %v6128_v61 = vadd.s32 40, %v12839_v17  ;;  %v6466_v37 = vmul.f32 %v12860_v13, %v12860_v13  ;;  %v6148_v3 = vadd.s32 200, %v12839_v17 }
 0x68c   : > { %v6088_v54 = vpop.f32.mrf.mxu1 }
 0x68d   : > { %v6124_v54 = vadd.s32 8, %v12839_v17 }
 0x68f   : > { %v2874_v25 = vpop.permute.xlu0 %2873  ;;  %v6166_v12 = vand.u32 31, %v6124_v54 }
 0x690   : > { %v3225_v48 = vsel %vm14204_vm1, %v3108_v26, %v2874_v25  ;;  %v12852_v26 = vadd.f32 %v12846_v5, %v12682_v7  ;;  %v6170_v25 = vand.u32 31, %v6128_v61  ;;  %v12869_v7 = vadd.f32 %v12846_v5, %v12725_v51 }
 0x691   : > { %7612 = vmatmul.mubr.msk.bf16.gmra.mxu0 %vm3257_vm9, %v3225_v48  ;;  %vm6208_vm2 = vcmp.lt.s32.totalorder %v6166_v12, 11  ;;  %v6132_v48 = vadd.s32 72, %v12839_v17 }
 0x692   : > { %v12834_v57 = vpop.f32.mrf.mxu1  ;;  %v6334_v39 = vsel %vm6208_vm2, %v12852_v26, 0.0  ;;  %vm6212_vm3 = vcmp.lt.s32.totalorder %v6170_v25, 11  ;;  %v6470_v51 = vmul.f32 %v12869_v7, %v12869_v7  ;;  %v12884_v25 = vadd.f32 %v12846_v5, %v12753_v18 }
 0x693   : > { %v6174_v12 = vand.u32 31, %v6132_v48  ;;  %v6467_v21 = vmul.f32 %v6334_v39, %v6334_v39  ;;  %v6338_v47 = vsel %vm6212_vm3, %v12865_v16, 0.0  ;;  %v6376_v46 = vsel %vm5526_vm14, %v6334_v39, 0.0 }
 0x694   : > { %v6093_v63 = vpop.f32.mrf.mxu1  ;;  %14206 = vst [vmem:[#allocation42_spill] sm:$0xff] %v12884_v25  ;;  %v6375_v48 = vsel %vm5526_vm14, %v12860_v13, 0.0  ;;  %v6382_v15 = vsel %vm5526_vm14, %v12869_v7, 0.0  ;;  %v6471_v39 = vmul.f32 %v6338_v47, %v6338_v47  ;;  %v6508_v18 = vsel %vm5526_vm14, %v6466_v37, 0.0 }
 0x695   : > { %vm6216_vm4 = vcmp.lt.s32.totalorder %v6174_v12, 11  ;;  %v6509_v45 = vsel %vm5526_vm14, %v6467_v21, 0.0  ;;  %v6377_v20 = vadd.f32 %v6376_v46, %v6375_v48  ;;  %v6515_v23 = vsel %vm5526_vm14, %v6470_v51, 0.0 }
 0x696   : > { %v12836_v40 = vpop.f32.mrf.mxu1  ;;  %v6342_v12 = vsel %vm6216_vm4, %v12877_v27, 0.0  ;;  %v6384_v21 = vsel %vm5526_vm14, %v6338_v47, 0.0  ;;  %v6474_v42 = vmul.f32 %v12884_v25, %v12884_v25  ;;  %v6510_v9 = vadd.f32 %v6509_v45, %v6508_v18 }
 0x697   : > { %v6383_v37 = vadd.f32 %v6382_v15, %v6377_v20  ;;  %v6390_v51 = vsel %vm5526_vm14, %v12884_v25, 0.0  ;;  %v6475_v47 = vmul.f32 %v6342_v12, %v6342_v12  ;;  %v12923_v20 = vadd.f32 %v12846_v5, %v12781_v4 }
 0x698   : > { %v6096_v55 = vpop.f32.mrf.mxu1  ;;  %v6516_v59 = vadd.f32 %v6515_v23, %v6510_v9  ;;  %v12931_v15 = vadd.f32 %v12846_v5, %v12775_v6  ;;  %v6152_v4 = vadd.s32 232, %v12839_v17  ;;  %v6156_v46 = vadd.s32 264, %v12839_v17 }
 0x699   : > { %v6136_v55 = vadd.s32 104, %v12839_v17  ;;  %v6385_v49 = vadd.f32 %v6384_v21, %v6383_v37 }
 0x69b   : > { %v6178_v8 = vand.u32 31, %v6136_v55  ;;  %v6391_v23 = vadd.f32 %v6390_v51, %v6385_v49  ;;  %v12946_v49 = vadd.f32 %v12846_v5, %v12798_v58  ;;  %v6406_v58 = vsel %vm5526_vm14, %v12931_v15, 0.0 }
 0x69d   : > { %vm12892_vm5 = vcmp.lt.s32.totalorder %v6178_v8, 11  ;;  %v12908_v8 = vadd.f32 %v12846_v5, %v12765_v0  ;;  %v6523_v0 = vsel %vm5526_vm14, %v6474_v42, 0.0 }
 0x69f   : > { %v6398_v42 = vsel %vm5526_vm14, %v12908_v8, 0.0 }
 0x6a6   : > { %v12848_v22 = vpop.f32.mrf.mxu1 }
 0x6a8   : > { %v6101_v63 = vpop.f32.mrf.mxu1 }
 0x6a9   : > { %v6140_v63 = vadd.s32 136, %v12839_v17 }
 0x6aa   : > { %v12856_v54 = vpop.f32.mrf.mxu1 }
 0x6ab   : > { %v6182_v55 = vand.u32 31, %v6140_v63  ;;  %v12900_v63 = vadd.f32 %v12846_v5, %v12767_v19  ;;  %v6517_v19 = vsel %vm5526_vm14, %v6471_v39, 0.0  ;;  %v6525_v39 = vsel %vm5526_vm14, %v6475_v47, 0.0 }
 0x6ac   : > { %v6104_v61 = vpop.f32.mrf.mxu1  ;;  %v6518_v9 = vadd.f32 %v6517_v19, %v6516_v59  ;;  %v6482_v19 = vmul.f32 %v12931_v15, %v12931_v15 }
 0x6ad   : > { %v6144_v61 = vadd.s32 168, %v12839_v17  ;;  %vm12910_vm6 = vcmp.lt.s32.totalorder %v6182_v55, 11  ;;  %v6346_v45 = vsel %vm12892_vm5, %v12900_v63, 0.0  ;;  %v6392_v55 = vsel %vm5526_vm14, %v6342_v12, 0.0 }
 0x6ae   : > { %v6479_v18 = vmul.f32 %v6346_v45, %v6346_v45  ;;  %v6190_v12 = vand.u32 31, %v6148_v3  ;;  %v6524_v21 = vadd.f32 %v6523_v0, %v6518_v9  ;;  %v6393_v37 = vadd.f32 %v6392_v55, %v6391_v23 }
 0x6af   : > { %v6186_v48 = vand.u32 31, %v6144_v61  ;;  %v6478_v61 = vmul.f32 %v12908_v8, %v12908_v8  ;;  %v6350_v59 = vsel %vm12910_vm6, %v12923_v20, 0.0  ;;  %v12954_v3 = vadd.f32 %v12846_v5, %v12796_v44 }
 0x6b0   : > { %v6526_v51 = vadd.f32 %v6525_v39, %v6524_v21  ;;  %v6399_v47 = vadd.f32 %v6398_v42, %v6393_v37  ;;  %v6194_v0 = vand.u32 31, %v6152_v4  ;;  %v6533_v55 = vsel %vm5526_vm14, %v6479_v18, 0.0 }
 0x6b1   : > { %vm12933_vm7 = vcmp.lt.s32.totalorder %v6186_v48, 11  ;;  %v6531_v6 = vsel %vm5526_vm14, %v6478_v61, 0.0  ;;  %v6400_v48 = vsel %vm5526_vm14, %v6346_v45, 0.0  ;;  %v6483_v61 = vmul.f32 %v6350_v59, %v6350_v59 }
 0x6b2   : > { %vm12960_vm8 = vcmp.lt.s32.totalorder %v6190_v12, 11  ;;  %v6532_v23 = vadd.f32 %v6531_v6, %v6526_v51  ;;  %v6401_v44 = vadd.f32 %v6400_v48, %v6399_v47  ;;  %v6354_v4 = vsel %vm12933_vm7, %v12946_v49, 0.0 }
 0x6b3   : > { %v12971_v39 = vadd.f32 %v12846_v5, %v12806_v32  ;;  %v6539_v42 = vsel %vm5526_vm14, %v6482_v19, 0.0  ;;  %v6408_v18 = vsel %vm5526_vm14, %v6350_v59, 0.0  ;;  %v6486_v12 = vmul.f32 %v12954_v3, %v12954_v3 }
 0x6b4   : > { %v12979_v21 = vadd.f32 %v12846_v5, %v12804_v60  ;;  %v6534_v6 = vadd.f32 %v6533_v55, %v6532_v23  ;;  %v6407_v48 = vadd.f32 %v6406_v58, %v6401_v44  ;;  %vm12981_vm9 = vcmp.lt.s32.totalorder %v6194_v0, 11 }
 0x6b5   : > { %14215 = vst [vmem:[#allocation57_spill] sm:$0xff] %v12971_v39  ;;  %v6198_v32 = vand.u32 31, %v6156_v46  ;;  %v6541_v51 = vsel %vm5526_vm14, %v6483_v61, 0.0  ;;  %v6414_v59 = vsel %vm5526_vm14, %v12954_v3, 0.0  ;;  %v6487_v19 = vmul.f32 %v6354_v4, %v6354_v4 }
 0x6b6   : > { %14216 = vst [vmem:[#allocation25_spill] sm:$0xff] %v12979_v21  ;;  %v6160_v47 = vadd.s32 296, %v12839_v17  ;;  %v6540_v60 = vadd.f32 %v6539_v42, %v6534_v6  ;;  %v6409_v25 = vadd.f32 %v6408_v18, %v6407_v48  ;;  %v6358_v0 = vsel %vm12960_vm8, %v12971_v39, 0.0 }
 0x6b7   : > { %v12996_v55 = vadd.f32 %v12846_v5, %v12814_v56  ;;  %v6547_v46 = vsel %vm5526_vm14, %v6486_v12, 0.0  ;;  %v6416_v58 = vsel %vm5526_vm14, %v6354_v4, 0.0  ;;  %v6490_v61 = vmul.f32 %v12979_v21, %v12979_v21 }
 0x6b8   : > { %v13004_v23 = vadd.f32 %v12846_v5, %v12812_v24  ;;  %v6542_v42 = vadd.f32 %v6541_v51, %v6540_v60  ;;  %v6415_v18 = vadd.f32 %v6414_v59, %v6409_v25  ;;  %vm13006_vm13 = vcmp.lt.s32.totalorder %v6198_v32, 11 }
 0x6b9   : > { %v6549_v56 = vsel %vm5526_vm14, %v6487_v19, 0.0  ;;  %v6422_v12 = vsel %vm5526_vm14, %v12979_v21, 0.0  ;;  %v6491_v4 = vmul.f32 %v6358_v0, %v6358_v0  ;;  %v6362_v24 = vsel %vm12981_vm9, %v12996_v55, 0.0 }
 0x6ba   : > { %v6548_v6 = vadd.f32 %v6547_v46, %v6542_v42  ;;  %v6417_v48 = vadd.f32 %v6416_v58, %v6415_v18  ;;  %v13018_v25 = vadd.f32 %v12846_v5, %v12827_v62  ;;  %v6555_v32 = vsel %vm5526_vm14, %v6490_v61, 0.0 }
 0x6bb   : > { %v6424_v51 = vsel %vm5526_vm14, %v6358_v0, 0.0  ;;  %v6494_v59 = vmul.f32 %v13004_v23, %v13004_v23  ;;  %v13026_v19 = vadd.f32 %v12846_v5, %v12825_v41  ;;  %v6557_v2 = vsel %vm5526_vm14, %v6491_v4, 0.0 }
 0x6bc   : > { %v6423_v60 = vadd.f32 %v6422_v12, %v6417_v48  ;;  %v6430_v46 = vsel %vm5526_vm14, %v13004_v23, 0.0  ;;  %v6495_v62 = vmul.f32 %v6362_v24, %v6362_v24  ;;  %v13040_v41 = vadd.f32 %v12846_v5, %v12856_v54 }
 0x6bd   : > { %v6563_v42 = vsel %vm5526_vm14, %v6494_v59, 0.0  ;;  %v6432_v18 = vsel %vm5526_vm14, %v6362_v24, 0.0  ;;  %v13048_v12 = vadd.f32 %v12846_v5, %v12848_v22  ;;  %v6164_v48 = vadd.s32 328, %v12839_v17 }
 0x6be   : > { %v12964_v9 = vpop.f32.mrf.mxu1  ;;  %v6425_v61 = vadd.f32 %v6424_v51, %v6423_v60  ;;  %v6565_v45 = vsel %vm5526_vm14, %v6495_v62, 0.0 }
 0x6bf   : > { %v6446_v62 = vsel %vm5526_vm14, %v13048_v12, 0.0 }
 0x6c0   : > { %v6109_v37 = vpop.f32.mrf.mxu1 }
 0x6c1   : > { %v6202_v37 = vand.u32 31, %v6160_v47  ;;  %v6550_v47 = vadd.f32 %v6549_v56, %v6548_v6  ;;  %v6498_v56 = vmul.f32 %v13026_v19, %v13026_v19  ;;  %v6438_v6 = vsel %vm5526_vm14, %v13026_v19, 0.0 }
 0x6c2   : > { %v12989_v36 = vpop.f32.mrf.mxu1 }
 0x6c3   : > { %vm13031_vm15 = vcmp.lt.s32.totalorder %v6202_v37, 11  ;;  %v6556_v0 = vadd.f32 %v6555_v32, %v6550_v47  ;;  %v6431_v37 = vadd.f32 %v6430_v46, %v6425_v61  ;;  %v6571_v59 = vsel %vm5526_vm14, %v6498_v56, 0.0 }
 0x6c4   : > { %v6112_v44 = vpop.f32.mrf.mxu1  ;;  %v6370_v24 = vsel %vm13031_vm15, %v13040_v41, 0.0  ;;  %v6502_v47 = vmul.f32 %v13048_v12, %v13048_v12 }
 0x6c5   : > { %v6366_v44 = vsel %vm13006_vm13, %v13018_v25, 0.0  ;;  %v6558_v4 = vadd.f32 %v6557_v2, %v6556_v0  ;;  %v6433_v51 = vadd.f32 %v6432_v18, %v6431_v37  ;;  %v6503_v0 = vmul.f32 %v6370_v24, %v6370_v24 }
 0x6c6   : > { %v6499_v54 = vmul.f32 %v6366_v44, %v6366_v44  ;;  %v6440_v22 = vsel %vm5526_vm14, %v6366_v44, 0.0  ;;  %v6579_v44 = vsel %vm5526_vm14, %v6502_v47, 0.0  ;;  %v6448_v56 = vsel %vm5526_vm14, %v6370_v24, 0.0 }
 0x6c7   : > { %v6564_v32 = vadd.f32 %v6563_v42, %v6558_v4  ;;  %v6439_v2 = vadd.f32 %v6438_v6, %v6433_v51  ;;  %v6206_v42 = vand.u32 31, %v6164_v48 }
 0x6c8   : > { %v6573_v46 = vsel %vm5526_vm14, %v6499_v54, 0.0 }
 0x6c9   : > { %v6566_v60 = vadd.f32 %v6565_v45, %v6564_v32  ;;  %v6441_v58 = vadd.f32 %v6440_v22, %v6439_v2  ;;  %v6581_v32 = vsel %vm5526_vm14, %v6503_v0, 0.0  ;;  %vm6248_vm11 = vcmp.lt.s32.totalorder %v6206_v42, 11 }
 0x6cb   : > { %v6572_v18 = vadd.f32 %v6571_v59, %v6566_v60  ;;  %v6447_v6 = vadd.f32 %v6446_v62, %v6441_v58 }
 0x6cd   : > { %v6574_v45 = vadd.f32 %v6573_v46, %v6572_v18  ;;  %v6449_v22 = vadd.f32 %v6448_v56, %v6447_v6 }
 0x6cf   : > { %v6580_v59 = vadd.f32 %v6579_v44, %v6574_v45 }
 0x6d1   : > { %v6582_v2 = vadd.f32 %v6581_v32, %v6580_v59 }
 0x6d2   : > { %v6115_v61 = vpop.f32.mrf.mxu1 }
 0x6d3   : > { %v13065_v4 = vadd.f32 %v12846_v5, %v6115_v61 }
 0x6d4   : > { %v6117_v37 = vpop.f32.mrf.mxu1 }
 0x6d5   : > { %v6506_v54 = vmul.f32 %v13065_v4, %v13065_v4  ;;  %v6454_v48 = vsel %vm5526_vm14, %v13065_v4, 0.0 }
 0x6d6   : > { %v6118_v51 = vpop.f32.mrf.mxu1  ;;  %v6455_v46 = vadd.f32 %v6454_v48, %v6449_v22  ;;  %v5964_v22 = vadd.f32 %v12846_v5, %v12700_v14  ;;  %v5999_v14 = vadd.f32 %v12846_v5, %v12763_v30  ;;  %v6031_v30 = vadd.f32 %v12846_v5, %v12789_v31 }
 0x6d7   : > { %v13075_v60 = vadd.f32 %v12846_v5, %v6118_v51  ;;  %v6587_v24 = vsel %vm5526_vm14, %v6506_v54, 0.0 }
 0x6d8   : > { %v6120_v47 = vpop.f32.mrf.mxu1  ;;  %v6588_v18 = vadd.f32 %v6587_v24, %v6582_v2  ;;  %v5967_v24 = vadd.f32 %v12846_v5, %v12706_v11  ;;  %v5983_v2 = vadd.f32 %v12846_v5, %v12746_v50  ;;  %v6012_v11 = vadd.f32 %v12846_v5, %v12769_v29 }
 0x6d9   : > { %v6374_v62 = vsel %vm6248_vm11, %v13075_v60, 0.0 }
 0x6da   : > { %v6457_v61 = vsel %vm6456_vm10, %v6374_v62, 0.0  ;;  %v6507_v0 = vmul.f32 %v6374_v62, %v6374_v62 }
 0x6db   : > { %v6458_v58 = vadd.f32 %v6457_v61, %v6455_v46 }
 0x6dc   : > { %v6589_v37 = vsel %vm6456_vm10, %v6507_v0, 0.0 }
 0x6dd   : > { %v6459_v17 = vrot.slane %v6458_v58, 4  ;;  %v6590_v42 = vadd.f32 %v6589_v37, %v6588_v18  ;;  %v6044_v37 = vadd.f32 %v12846_v5, %v12800_v1  ;;  %v6076_v1 = vadd.f32 %v12846_v5, %v12819_v34 }
 0x6df   : > { %v6460_v44 = vadd.f32 %v6459_v17, %v6458_v58  ;;  %v6591_v56 = vrot.slane %v6590_v42, 4  ;;  %v5980_v17 = vadd.f32 %v12846_v5, %v12744_v52 }
 0x6e1   : > { %v6461_v45 = vrot.slane %v6460_v44, 2  ;;  %v6592_v6 = vadd.f32 %v6591_v56, %v6590_v42  ;;  %v6060_v56 = vadd.f32 %v12846_v5, %v12808_v43  ;;  %v6092_v43 = vadd.f32 %v12846_v5, %v12834_v57 }
 0x6e3   : > { %v6462_v51 = vadd.f32 %v6461_v45, %v6460_v44  ;;  %v6593_v39 = vrot.slane %v6592_v6, 2 }
 0x6e5   : > { %v6463_v21 = vrot.slane %v6462_v51, 1  ;;  %v6594_v54 = vadd.f32 %v6593_v39, %v6592_v6  ;;  %v5996_v39 = vadd.f32 %v12846_v5, %v12759_v38  ;;  %v6015_v38 = vadd.f32 %v12846_v5, %v12773_v35 }
 0x6e6   : > { %v6047_v35 = vadd.f32 %v12846_v5, %v12802_v33  ;;  %v6063_v6 = vadd.f32 %v12846_v5, %v12810_v10 }
 0x6e7   : > { %v6464_v47 = vadd.f32 %v6463_v21, %v6462_v51  ;;  %v6595_v32 = vrot.slane %v6594_v54, 1 }
 0x6e9   : > { %v13079_v48 = vmul.f32 0.008264462, %v6464_v47  ;;  %v6596_v59 = vadd.f32 %v6595_v32, %v6594_v54  ;;  %v6079_v54 = vadd.f32 %v12846_v5, %v12823_v53  ;;  %v6095_v32 = vadd.f32 %v12846_v5, %v12836_v40 }
 0x6ea   : > { %v6111_v53 = vadd.f32 %v12846_v5, %v12989_v36  ;;  %v13154_v36 = vld [vmem:[%s13679_s5] ss:$0 sm:$0xff] }
 0x6eb   : > { %v6597_v21 = vmul.f32 0.008264462, %v6596_v59  ;;  %v6598_v46 = vmul.f32 %v13079_v48, %v13079_v48  ;;  %v6642_v62 = vsub.f32 %v13075_v60, %v13079_v48  ;;  %v6603_v52 = vsub.f32 %v5964_v22, %v13079_v48 }
 0x6ec   : > { %v6604_v50 = vsub.f32 %v5967_v24, %v13079_v48  ;;  %v6607_v0 = vsub.f32 %v5980_v17, %v13079_v48  ;;  %v6608_v18 = vsub.f32 %v5983_v2, %v13079_v48  ;;  %v6028_v60 = vadd.f32 %v12846_v5, %v12786_v28 }
 0x6ed   : > { %v6599_v61 = vsub.f32 %v6597_v21, %v6598_v46  ;;  %v6611_v29 = vsub.f32 %v5996_v39, %v13079_v48  ;;  %v6612_v58 = vsub.f32 %v5999_v14, %v13079_v48  ;;  %v6615_v44 = vsub.f32 %v6012_v11, %v13079_v48 }
 0x6ee   : > { %v6616_v28 = vsub.f32 %v6015_v38, %v13079_v48  ;;  %v6617_v31 = vsub.f32 %v12931_v15, %v13079_v48  ;;  %v6619_v45 = vsub.f32 %v6028_v60, %v13079_v48  ;;  %v6620_v51 = vsub.f32 %v6031_v30, %v13079_v48 }
 0x6ef   : > { %v6600_v42 = vmax.f32 %v6599_v61, 0.0  ;;  %v6623_v47 = vsub.f32 %v6044_v37, %v13079_v48  ;;  %v6624_v15 = vsub.f32 %v6047_v35, %v13079_v48  ;;  %v6627_v10 = vsub.f32 %v6060_v56, %v13079_v48 }
 0x6f0   : > { %v6628_v34 = vsub.f32 %v6063_v6, %v13079_v48  ;;  %v6108_v59 = vadd.f32 %v12846_v5, %v12964_v9  ;;  %v6631_v57 = vsub.f32 %v6076_v1, %v13079_v48  ;;  %v6632_v22 = vsub.f32 %v6079_v54, %v13079_v48 }
 0x6f1   : > { %v6643_v33 = vadd.f32 1e-05, %v6600_v42  ;;  %v6635_v24 = vsub.f32 %v6092_v43, %v13079_v48  ;;  %v6636_v17 = vsub.f32 %v6095_v32, %v13079_v48  ;;  %v6640_v2 = vsub.f32 %v6111_v53, %v13079_v48  ;;  %v13245_v43 = vld [vmem:[%s13680_s6] ss:$0 sm:$0xff] }
 0x6f2   : > { %v6639_v40 = vsub.f32 %v6108_v59, %v13079_v48  ;;  %v6641_v39 = vsub.f32 %v13065_v4, %v13079_v48  ;;  %v6610_v9 = vsub.f32 %v12877_v27, %v13079_v48  ;;  %v6613_v14 = vsub.f32 %v12908_v8, %v13079_v48 }
 0x6f3   : > { %8040 = vrsqrt.f32 %v6643_v33  ;;  %v6614_v4 = vsub.f32 %v12900_v63, %v13079_v48  ;;  %v6629_v27 = vsub.f32 %v13004_v23, %v13079_v48  ;;  %v6630_v23 = vsub.f32 %v12996_v55, %v13079_v48 }
 0x6f4   : > { %v6637_v42 = vsub.f32 %v13048_v12, %v13079_v48  ;;  %v6638_v55 = vsub.f32 %v13040_v41, %v13079_v48  ;;  %v6602_v59 = vsub.f32 %v12852_v26, %v13079_v48  ;;  %v6618_v53 = vsub.f32 %v12923_v20, %v13079_v48 }
 0x6f5   : > { %v6621_v26 = vsub.f32 %v12954_v3, %v13079_v48 }
 0x700   : > { %v13149_v21 = vpop.eup %8040 }
 0x701   : > { %v6686_v5 = vmul.f32 %v13149_v21, %v6642_v62  ;;  %v13160_v46 = vmul.f32 %v13149_v21, %v6603_v52  ;;  %v13167_v11 = vmul.f32 %v13149_v21, %v6604_v50  ;;  %v13170_v38 = vmul.f32 %v13149_v21, %v6607_v0 }
 0x702   : > { %v13178_v52 = vmul.f32 %v13149_v21, %v6608_v18  ;;  %v13181_v8 = vmul.f32 %v13149_v21, %v6610_v9  ;;  %v13184_v63 = vmul.f32 %v13149_v21, %v6611_v29  ;;  %v13187_v50 = vmul.f32 %v13149_v21, %v6612_v58 }
 0x703   : > { %v13173_v62 = vmul.f32 %v13154_v36, %v6686_v5  ;;  %v13190_v61 = vmul.f32 %v13149_v21, %v6613_v14  ;;  %v13193_v0 = vmul.f32 %v13149_v21, %v6614_v4  ;;  %v6659_v18 = vmul.f32 %v13149_v21, %v6615_v44 }
 0x704   : > { %v6660_v60 = vmul.f32 %v13149_v21, %v6616_v28  ;;  %v6661_v30 = vmul.f32 %v13149_v21, %v6617_v31  ;;  %v6633_v29 = vsub.f32 %v13026_v19, %v13079_v48  ;;  %v6634_v58 = vsub.f32 %v13018_v25, %v13079_v48 }
 0x705   : > { %v6663_v37 = vmul.f32 %v13149_v21, %v6619_v45  ;;  %v6664_v35 = vmul.f32 %v13149_v21, %v6620_v51  ;;  %v13211_v44 = vmul.f32 %v13149_v21, %v6623_v47  ;;  %v13214_v56 = vmul.f32 %v13149_v21, %v6624_v15 }
 0x706   : > { %v13217_v19 = vmul.f32 %v13149_v21, %v6627_v10  ;;  %v13220_v25 = vmul.f32 %v13149_v21, %v6628_v34  ;;  %v13223_v28 = vmul.f32 %v13149_v21, %v6629_v27  ;;  %v13226_v12 = vmul.f32 %v13149_v21, %v6630_v23 }
 0x707   : > { %v13229_v41 = vmul.f32 %v13149_v21, %v6631_v57  ;;  %v6676_v31 = vmul.f32 %v13149_v21, %v6632_v22  ;;  %v13233_v45 = vmul.f32 %v13149_v21, %v6633_v29  ;;  %v6678_v6 = vmul.f32 %v13149_v21, %v6634_v58 }
 0x708   : > { %v6679_v1 = vmul.f32 %v13149_v21, %v6635_v24  ;;  %v6680_v33 = vmul.f32 %v13149_v21, %v6636_v17  ;;  %v13239_v51 = vmul.f32 %v13149_v21, %v6637_v42  ;;  %v6682_v54 = vmul.f32 %v13149_v21, %v6638_v55 }
 0x709   : > { %v6683_v47 = vmul.f32 %v13149_v21, %v6639_v40  ;;  %v6684_v15 = vmul.f32 %v13149_v21, %v6640_v2  ;;  %v13250_v32 = vmul.f32 %v13149_v21, %v6641_v39  ;;  %v6710_v10 = vmul.f32 %v13154_v36, %v6661_v30 }
 0x70a   : > { %v6601_v34 = vsub.f32 %v12860_v13, %v13079_v48  ;;  %v6646_v24 = vmul.f32 %v13149_v21, %v6602_v59  ;;  %v6662_v17 = vmul.f32 %v13149_v21, %v6618_v53  ;;  %v13264_v2 = vmul.f32 %v13154_v36, %v6659_v18 }
 0x70b   : > { %v6759_v57 = vadd.f32 %v13245_v43, %v6710_v10  ;;  %v13267_v13 = vmul.f32 %v13154_v36, %v6660_v60  ;;  %v6605_v14 = vsub.f32 %v12869_v7, %v13079_v48  ;;  %v6622_v4 = vsub.f32 %v12946_v49, %v13079_v48 }
 0x70c   : > { %v6645_v22 = vmul.f32 %v13149_v21, %v6601_v34  ;;  %v6695_v5 = vmul.f32 %v13154_v36, %v6646_v24  ;;  %v6711_v9 = vmul.f32 %v13154_v36, %v6662_v17  ;;  %v6665_v27 = vmul.f32 %v13149_v21, %v6621_v26 }
 0x70d   : > { %vm6801_vm12 = vcmp.ge.f32.partialorder %v6759_v57, 0.0  ;;  %v6843_v40 = vmul.f32 0.2, %v6759_v57  ;;  %v6712_v23 = vmul.f32 %v13154_v36, %v6663_v37  ;;  %v6696_v3 = vmul.f32 %v13154_v36, %v13160_v46 }
 0x70e   : > { %v6694_v39 = vmul.f32 %v13154_v36, %v6645_v22  ;;  %v6713_v18 = vmul.f32 %v13154_v36, %v6664_v35  ;;  %v13284_v60 = vmul.f32 %v13154_v36, %v6676_v31  ;;  %v13287_v30 = vmul.f32 %v13154_v36, %v6678_v6 }
 0x70f   : > { %v6885_v20 = vsel %vm6801_vm12, %v6759_v57, %v6843_v40  ;;  %v13290_v7 = vmul.f32 %v13154_v36, %v6679_v1  ;;  %v13293_v49 = vmul.f32 %v13154_v36, %v6680_v33  ;;  %v13296_v29 = vmul.f32 %v13154_v36, %v6682_v54 }
 0x710   : > { %6943 = vxpose.xlu1.b32.start [1/16] (narrow) %v6885_v20, 32  ;;  %v13299_v58 = vmul.f32 %v13154_v36, %v6683_v47  ;;  %v13302_v46 = vmul.f32 %v13154_v36, %v6684_v15  ;;  %v6743_v37 = vadd.f32 %v13245_v43, %v6694_v39  ;;  %v6760_v35 = vadd.f32 %v13245_v43, %v6711_v9  ;;  %v14223_v9 = vld [vmem:[#allocation25_spill] sm:$0xff] }
 0x711   : > { %v6744_v42 = vadd.f32 %v13245_v43, %v6695_v5  ;;  %v6606_v55 = vsub.f32 %v12865_v16, %v13079_v48  ;;  %v6649_v31 = vmul.f32 %v13149_v21, %v6605_v14  ;;  %v6666_v6 = vmul.f32 %v13149_v21, %v6622_v4 }
 0x712   : > { %v6761_v1 = vadd.f32 %v13245_v43, %v6712_v23  ;;  %vm6785_vm0 = vcmp.ge.f32.partialorder %v6743_v37, 0.0  ;;  %v6827_v33 = vmul.f32 0.2, %v6743_v37  ;;  %vm6802_vm1 = vcmp.ge.f32.partialorder %v6760_v35, 0.0 }
 0x713   : > { %v6844_v54 = vmul.f32 0.2, %v6760_v35  ;;  %v6697_v47 = vmul.f32 %v13154_v36, %v13167_v11  ;;  %v6714_v15 = vmul.f32 %v13154_v36, %v6665_v27  ;;  %v6745_v10 = vadd.f32 %v13245_v43, %v6696_v3 }
 0x714   : > { %v6762_v34 = vadd.f32 %v13245_v43, %v6713_v18  ;;  %v6869_v16 = vsel %vm6785_vm0, %v6743_v37, %v6827_v33  ;;  %v6828_v53 = vmul.f32 0.2, %v6744_v42  ;;  %v6845_v57 = vmul.f32 0.2, %v6761_v1 }
 0x715   : > { %v6886_v59 = vsel %vm6802_vm1, %v6760_v35, %v6844_v54  ;;  %6911 = vxpose.xlu0.b32.start [1/16] (narrow) %v6869_v16, 32  ;;  %vm6786_vm2 = vcmp.ge.f32.partialorder %v6744_v42, 0.0  ;;  %vm6803_vm3 = vcmp.ge.f32.partialorder %v6761_v1, 0.0  ;;  %v6650_v22 = vmul.f32 %v13149_v21, %v6606_v55  ;;  %v14224_v55 = vld [vmem:[#allocation42_spill] sm:$0xff] }
 0x716   : > { %6944 = vxpose.xlu1.b32.cont [2/16] (narrow) %v6886_v59, 32  ;;  %v6698_v24 = vmul.f32 %v13154_v36, %v6649_v31  ;;  %v6715_v11 = vmul.f32 %v13154_v36, %v6666_v6  ;;  %vm6787_vm4 = vcmp.ge.f32.partialorder %v6745_v10, 0.0  ;;  %v6829_v17 = vmul.f32 0.2, %v6745_v10  ;;  %v14225_v6 = vld [vmem:[#allocation57_spill] sm:$0xff] }
 0x717   : > { %v6746_v40 = vadd.f32 %v13245_v43, %v6697_v47  ;;  %v6870_v26 = vsel %vm6786_vm2, %v6744_v42, %v6828_v53  ;;  %v6887_v20 = vsel %vm6803_vm3, %v6761_v1, %v6845_v57  ;;  %v6846_v39 = vmul.f32 0.2, %v6762_v34 }
 0x718   : > { %v6763_v5 = vadd.f32 %v13245_v43, %v6714_v15  ;;  %vm6804_vm5 = vcmp.ge.f32.partialorder %v6762_v34, 0.0  ;;  %v6625_v14 = vsub.f32 %v14223_v9, %v13079_v48  ;;  %v6699_v4 = vmul.f32 %v13154_v36, %v6650_v22 }
 0x719   : > { %6912 = vxpose.xlu0.b32.cont [2/16] (narrow) %v6870_v26, 32  ;;  %v6716_v27 = vmul.f32 %v13154_v36, %v13211_v44  ;;  %v6871_v23 = vsel %vm6787_vm4, %v6745_v10, %v6829_v17  ;;  %vm6788_vm6 = vcmp.ge.f32.partialorder %v6746_v40, 0.0  ;;  %v6830_v3 = vmul.f32 0.2, %v6746_v40 }
 0x71a   : > { %6945 = vxpose.xlu1.b32.cont [3/16] (narrow) %v6887_v20, 32  ;;  %v6888_v18 = vsel %vm6804_vm5, %v6762_v34, %v6846_v39  ;;  %v6847_v37 = vmul.f32 0.2, %v6763_v5  ;;  %v6747_v35 = vadd.f32 %v13245_v43, %v6698_v24  ;;  %v6764_v42 = vadd.f32 %v13245_v43, %v6715_v11 }
 0x71b   : > { %vm6805_vm7 = vcmp.ge.f32.partialorder %v6763_v5, 0.0  ;;  %v6609_v31 = vsub.f32 %v14224_v55, %v13079_v48  ;;  %v6626_v1 = vsub.f32 %v14225_v6, %v13079_v48  ;;  %v6669_v44 = vmul.f32 %v13149_v21, %v6625_v14 }
 0x71c   : > { %v6700_v33 = vmul.f32 %v13154_v36, %v13170_v38  ;;  %v6717_v54 = vmul.f32 %v13154_v36, %v13214_v56  ;;  %v6872_v47 = vsel %vm6788_vm6, %v6746_v40, %v6830_v3  ;;  %v6748_v15 = vadd.f32 %v13245_v43, %v6699_v4 }
 0x71d   : > { %6913 = vxpose.xlu0.b32.cont [3/16] (narrow) %v6871_v23, 32  ;;  %v6889_v10 = vsel %vm6805_vm7, %v6763_v5, %v6847_v37  ;;  %v6831_v34 = vmul.f32 0.2, %v6747_v35  ;;  %v6848_v16 = vmul.f32 0.2, %v6764_v42  ;;  %v6765_v59 = vadd.f32 %v13245_v43, %v6716_v27 }
 0x71e   : > { %6946 = vxpose.xlu1.b32.cont [4/16] (narrow) %v6888_v18, 32  ;;  %v6653_v53 = vmul.f32 %v13149_v21, %v6609_v31  ;;  %vm6789_vm8 = vcmp.ge.f32.partialorder %v6747_v35, 0.0  ;;  %vm6806_vm9 = vcmp.ge.f32.partialorder %v6764_v42, 0.0  ;;  %v6670_v48 = vmul.f32 %v13149_v21, %v6626_v1 }
 0x71f   : > { %v6701_v38 = vmul.f32 %v13154_v36, %v13178_v52  ;;  %v6718_v56 = vmul.f32 %v13154_v36, %v6669_v44  ;;  %v6832_v57 = vmul.f32 0.2, %v6748_v15  ;;  %v6749_v22 = vadd.f32 %v13245_v43, %v6700_v33 }
 0x720   : > { %v6873_v24 = vsel %vm6789_vm8, %v6747_v35, %v6831_v34  ;;  %v6890_v11 = vsel %vm6806_vm9, %v6764_v42, %v6848_v16  ;;  %v6849_v17 = vmul.f32 0.2, %v6765_v59  ;;  %v6766_v40 = vadd.f32 %v13245_v43, %v6717_v54 }
 0x721   : > { %6914 = vxpose.xlu0.b32.cont [4/16] (narrow) %v6872_v47, 32  ;;  %v6702_v26 = vmul.f32 %v13154_v36, %v6653_v53  ;;  %vm6790_vm13 = vcmp.ge.f32.partialorder %v6748_v15, 0.0  ;;  %vm6807_vm15 = vcmp.ge.f32.partialorder %v6765_v59, 0.0  ;;  %v6719_v21 = vmul.f32 %v13154_v36, %v6670_v48 }
 0x722   : > { %6947 = vxpose.xlu1.b32.cont [5/16] (narrow) %v6889_v10, 32  ;;  %vm6791_vm11 = vcmp.ge.f32.partialorder %v6749_v22, 0.0  ;;  %v6833_v52 = vmul.f32 0.2, %v6749_v22  ;;  %v6750_v20 = vadd.f32 %v13245_v43, %v6701_v38  ;;  %v6874_v39 = vsel %vm6790_vm13, %v6748_v15, %v6832_v57 }
 0x723   : > { %v6891_v5 = vsel %vm6807_vm15, %v6765_v59, %v6849_v17  ;;  %v6850_v9 = vmul.f32 0.2, %v6766_v40  ;;  %v6767_v14 = vadd.f32 %v13245_v43, %v6718_v56  ;;  %vm6808_vm10 = vcmp.ge.f32.partialorder %v6766_v40, 0.0 }
 0x724   : > { %v6751_v4 = vadd.f32 %v13245_v43, %v6702_v26  ;;  %v13354_v27 = vadd.f32 %v13245_v43, %v13264_v2  ;;  %v6703_v23 = vmul.f32 %v13154_v36, %v13181_v8  ;;  %v6704_v3 = vmul.f32 %v13154_v36, %v13184_v63 }
 0x725   : > { %6915 = vxpose.xlu0.b32.cont [5/16] (narrow) %v6873_v24, 32  ;;  %v6720_v18 = vmul.f32 %v13154_v36, %v13217_v19  ;;  %v6875_v37 = vsel %vm6791_vm11, %v6749_v22, %v6833_v52  ;;  %v6834_v35 = vmul.f32 0.2, %v6750_v20  ;;  %v6892_v42 = vsel %vm6808_vm10, %v6766_v40, %v6850_v9 }
 0x726   : > { %6948 = vxpose.xlu1.b32.cont [6/16] (narrow) %v6890_v11, 32  ;;  %vm6792_vm12 = vcmp.ge.f32.partialorder %v6750_v20, 0.0  ;;  %v6851_v55 = vmul.f32 0.2, %v6767_v14  ;;  %v6768_v31 = vadd.f32 %v13245_v43, %v6719_v21  ;;  %v6721_v2 = vmul.f32 %v13154_v36, %v13220_v25 }
 0x727   : > { %vm6809_vm0 = vcmp.ge.f32.partialorder %v6767_v14, 0.0  ;;  %v6835_v8 = vmul.f32 0.2, %v6751_v4  ;;  %v13367_v63 = vadd.f32 %v13245_v43, %v13284_v60  ;;  %v6752_v19 = vadd.f32 %v13245_v43, %v6703_v23 }
 0x728   : > { %v13372_v6 = vadd.f32 %v13245_v43, %v13267_v13  ;;  %v6726_v1 = vmul.f32 %v13154_v36, %v13233_v45  ;;  %v13378_v25 = vadd.f32 %v13245_v43, %v13287_v30  ;;  %v6876_v44 = vsel %vm6792_vm12, %v6750_v20, %v6834_v35 }
 0x729   : > { %6916 = vxpose.xlu0.b32.cont [6/16] (narrow) %v6874_v39, 32  ;;  %vm6793_vm1 = vcmp.ge.f32.partialorder %v6751_v4, 0.0  ;;  %v13382_v33 = vadd.f32 %v13245_v43, %v13290_v7  ;;  %v13386_v60 = vadd.f32 %v13245_v43, %v13293_v49  ;;  %v6893_v54 = vsel %vm6809_vm0, %v6767_v14, %v6851_v55 }
 0x72a   : > { %6949 = vxpose.xlu1.b32.cont [7/16] (narrow) %v6891_v5, 32  ;;  %v6852_v13 = vmul.f32 0.2, %v6768_v31  ;;  %v6769_v47 = vadd.f32 %v13245_v43, %v6720_v18  ;;  %v13390_v45 = vadd.f32 %v13245_v43, %v6726_v1  ;;  %v6705_v30 = vmul.f32 %v13154_v36, %v13187_v50 }
 0x72b   : > { %vm6810_vm2 = vcmp.ge.f32.partialorder %v6768_v31, 0.0  ;;  %v6722_v7 = vmul.f32 %v13154_v36, %v13223_v28  ;;  %v6877_v15 = vsel %vm6793_vm1, %v6751_v4, %v6835_v8  ;;  %vm6794_vm3 = vcmp.ge.f32.partialorder %v6752_v19, 0.0 }
 0x72c   : > { %v6836_v49 = vmul.f32 0.2, %v6752_v19  ;;  %v6753_v10 = vadd.f32 %v13245_v43, %v6704_v3  ;;  %v6770_v34 = vadd.f32 %v13245_v43, %v6721_v2  ;;  %v6730_v16 = vmul.f32 %v13154_v36, %v13239_v51 }
 0x72d   : > { %6917 = vxpose.xlu0.b32.cont [7/16] (narrow) %v6875_v37, 32  ;;  %v13402_v59 = vadd.f32 %v13245_v43, %v13296_v29  ;;  %v6894_v50 = vsel %vm6810_vm2, %v6768_v31, %v6852_v13  ;;  %v6853_v53 = vmul.f32 0.2, %v6769_v47  ;;  %v13406_v48 = vadd.f32 %v13245_v43, %v13299_v58 }
 0x72e   : > { %6950 = vxpose.xlu1.b32.cont [8/16] (narrow) %v6892_v42, 32  ;;  %v13410_v28 = vadd.f32 %v13245_v43, %v13302_v46  ;;  %vm6811_vm4 = vcmp.ge.f32.partialorder %v6769_v47, 0.0  ;;  %v13413_v38 = vadd.f32 %v13245_v43, %v6730_v16  ;;  %v6706_v51 = vmul.f32 %v13154_v36, %v13190_v61 }
 0x72f   : > { %v6723_v29 = vmul.f32 %v13154_v36, %v13226_v12  ;;  %v6754_v56 = vadd.f32 %v13245_v43, %v6705_v30  ;;  %v6878_v58 = vsel %vm6794_vm3, %v6752_v19, %v6836_v49  ;;  %vm6795_vm5 = vcmp.ge.f32.partialorder %v6753_v10, 0.0  ;;  %v14229_v49 = vld [vmem:[#allocation16_spill] sm:$0xff] }
 0x730   : > { %v6837_v57 = vmul.f32 0.2, %v6753_v10  ;;  %v6734_v46 = vmul.f32 %v13154_v36, %v13250_v32  ;;  %v6895_v22 = vsel %vm6811_vm4, %v6769_v47, %v6853_v53  ;;  %v6854_v24 = vmul.f32 0.2, %v6770_v34  ;;  %v14227_v47 = vld [vmem:[#allocation15_spill] sm:$0xff] }
 0x731   : > { %6918 = vxpose.xlu0.b32.cont [8/16] (narrow) %v6876_v44, 32  ;;  %v6771_v11 = vadd.f32 %v13245_v43, %v6722_v7  ;;  %v13426_v17 = vadd.f32 %v13245_v43, %v13173_v62  ;;  %vm6812_vm6 = vcmp.ge.f32.partialorder %v6770_v34, 0.0  ;;  %v6707_v12 = vmul.f32 %v13154_v36, %v13193_v0  ;;  %v14228_v7 = vld [vmem:[#allocation44_spill] sm:$0xff] }
 0x732   : > { %6951 = vxpose.xlu1.b32.cont [9/16] (narrow) %v6893_v54, 32  ;;  %v13429_v61 = vadd.f32 %v13245_v43, %v6734_v46  ;;  %v6724_v32 = vmul.f32 %v13154_v36, %v13229_v41  ;;  %v6879_v40 = vsel %vm6795_vm5, %v6753_v10, %v6837_v57  ;;  %vm6796_vm7 = vcmp.ge.f32.partialorder %v6754_v56, 0.0  ;;  %v14226_v54 = vld [vmem:[#allocation18_spill] sm:$0xff]  ;;  %v14234_v57 = vld [vmem:[#allocation28_spill] sm:$0xff] }
 0x733   : > { %v6838_v26 = vmul.f32 0.2, %v6754_v56  ;;  %v6896_v21 = vsel %vm6812_vm6, %v6770_v34, %v6854_v24  ;;  %v6855_v52 = vmul.f32 0.2, %v6771_v11  ;;  %v6755_v62 = vadd.f32 %v13245_v43, %v6706_v51  ;;  %v14230_v34 = vld [vmem:[#allocation58_spill] sm:$0xff] }
 0x734   : > { %v6772_v20 = vadd.f32 %v13245_v43, %v6723_v29  ;;  %vm6813_vm8 = vcmp.ge.f32.partialorder %v6771_v11, 0.0  ;;  %v6756_v5 = vadd.f32 %v13245_v43, %v6707_v12  ;;  %v6773_v36 = vadd.f32 %v13245_v43, %v6724_v32  ;;  %v14232_v51 = vld [vmem:[#allocation38_spill] sm:$0xff]  ;;  %v14238_v12 = vld [vmem:[#allocation37_spill] sm:$0xff] }
 0x735   : > { %6919 = vxpose.xlu0.b32.cont [9/16] (narrow) %v6877_v15, 32  ;;  %v6880_v39 = vsel %vm6796_vm7, %v6754_v56, %v6838_v26  ;;  %v6897_v9 = vsel %vm6813_vm8, %v6771_v11, %v6855_v52  ;;  %v6839_v0 = vmul.f32 0.2, %v6755_v62  ;;  %vm6797_vm9 = vcmp.ge.f32.partialorder %v6755_v62, 0.0  ;;  %v14233_v56 = vld [vmem:[#allocation59_spill] sm:$0xff]  ;;  %v14239_v32 = vld [vmem:[#allocation13_spill] sm:$0xff] }
 0x736   : > { %6952 = vxpose.xlu1.b32.cont [10/16] (narrow) %v6894_v50, 32  ;;  %v6856_v14 = vmul.f32 0.2, %v6772_v20  ;;  %vm6814_vm13 = vcmp.ge.f32.partialorder %v6772_v20, 0.0  ;;  %v6840_v23 = vmul.f32 0.2, %v6756_v5 }
 0x737   : > { %v6881_v41 = vsel %vm6797_vm9, %v6755_v62, %v6839_v0  ;;  %v6857_v3 = vmul.f32 0.2, %v6773_v36  ;;  %vm6798_vm15 = vcmp.ge.f32.partialorder %v6756_v5, 0.0  ;;  %vm6815_vm11 = vcmp.ge.f32.partialorder %v6773_v36, 0.0  ;;  %v14231_v50 = vld [vmem:[#allocation26_spill] sm:$0xff]  ;;  %v14237_v11 = vld [vmem:[#allocation11_spill] sm:$0xff] }
 0x738   : > { %v6898_v4 = vsel %vm6814_vm13, %v6772_v20, %v6856_v14  ;;  %v6882_v18 = vsel %vm6798_vm15, %v6756_v5, %v6840_v23  ;;  %v6841_v35 = vmul.f32 0.2, %v13354_v27  ;;  %v6858_v42 = vmul.f32 0.2, %v13367_v63  ;;  %v14242_v26 = vld [vmem:[#allocation27_spill] sm:$0xff]  ;;  %v14245_v52 = vld [vmem:[#allocation41_spill] sm:$0xff] }
 0x739   : > { %6920 = vxpose.xlu0.b32.cont [10/16] (narrow) %v6878_v58, 32  ;;  %v6899_v37 = vsel %vm6815_vm11, %v6773_v36, %v6857_v3  ;;  %vm6799_vm10 = vcmp.ge.f32.partialorder %v13354_v27, 0.0  ;;  %vm6816_vm12 = vcmp.ge.f32.partialorder %v13367_v63, 0.0  ;;  %v6842_v2 = vmul.f32 0.2, %v13372_v6  ;;  %v14246_v62 = vld [vmem:[#allocation63_spill] sm:$0xff] }
 0x73a   : > { %6953 = vxpose.xlu1.b32.cont [11/16] (narrow) %v6895_v22, 32  ;;  %v6883_v55 = vsel %vm6799_vm10, %v13354_v27, %v6841_v35  ;;  %v6900_v31 = vsel %vm6816_vm12, %v13367_v63, %v6858_v42  ;;  %vm6800_vm0 = vcmp.ge.f32.partialorder %v13372_v6, 0.0  ;;  %v6859_v44 = vmul.f32 0.2, %v13390_v45  ;;  %v14235_v22 = vld [vmem:[#allocation30_spill] sm:$0xff]  ;;  %v14249_v14 = vld [vmem:[#allocation55_spill] sm:$0xff] }
 0x73b   : > { %v6884_v1 = vsel %vm6800_vm0, %v13372_v6, %v6842_v2  ;;  %vm6817_vm1 = vcmp.ge.f32.partialorder %v13390_v45, 0.0  ;;  %v6860_v13 = vmul.f32 0.2, %v13378_v25  ;;  %vm6818_vm2 = vcmp.ge.f32.partialorder %v13378_v25, 0.0  ;;  %v14251_v23 = vld [vmem:[#allocation43_spill] sm:$0xff] }
 0x73c   : > { %v6901_v63 = vsel %vm6817_vm1, %v13390_v45, %v6859_v44  ;;  %v6861_v6 = vmul.f32 0.2, %v13382_v33  ;;  %vm6819_vm3 = vcmp.ge.f32.partialorder %v13382_v33, 0.0  ;;  %v6862_v45 = vmul.f32 0.2, %v13386_v60 }
 0x73d   : > { %6921 = vxpose.xlu0.b32.cont [11/16] (narrow) %v6879_v40, 32  ;;  %v6902_v30 = vsel %vm6818_vm2, %v13378_v25, %v6860_v13  ;;  %vm6820_vm4 = vcmp.ge.f32.partialorder %v13386_v60, 0.0  ;;  %v6863_v25 = vmul.f32 0.2, %v13413_v38  ;;  %vm6821_vm5 = vcmp.ge.f32.partialorder %v13413_v38, 0.0  ;;  %v14240_v40 = vld [vmem:[#allocation62_spill] sm:$0xff] }
 0x73e   : > { %6954 = vxpose.xlu1.b32.cont [12/16] (narrow) %v6896_v21, 32  ;;  %v6903_v15 = vsel %vm6819_vm3, %v13382_v33, %v6861_v6  ;;  %v6904_v10 = vsel %vm6820_vm4, %v13386_v60, %v6862_v45  ;;  %v6864_v33 = vmul.f32 0.2, %v13402_v59  ;;  %vm6822_vm6 = vcmp.ge.f32.partialorder %v13402_v59, 0.0  ;;  %v14243_v21 = vld [vmem:[#allocation14_spill] sm:$0xff]  ;;  %v14265_v45 = vld [vmem:[#allocation17_spill] sm:$0xff] }
 0x73f   : > { %v6905_v16 = vsel %vm6821_vm5, %v13413_v38, %v6863_v25  ;;  %v6865_v60 = vmul.f32 0.2, %v13406_v48  ;;  %vm6823_vm7 = vcmp.ge.f32.partialorder %v13406_v48, 0.0  ;;  %v6866_v38 = vmul.f32 0.2, %v13410_v28  ;;  %v14259_v13 = vld [vmem:[#allocation34_spill] sm:$0xff] }
 0x740   : > { %v6906_v53 = vsel %vm6822_vm6, %v13402_v59, %v6864_v33  ;;  %vm6824_vm8 = vcmp.ge.f32.partialorder %v13410_v28, 0.0  ;;  %v6867_v59 = vmul.f32 0.2, %v13429_v61  ;;  %vm6825_vm9 = vcmp.ge.f32.partialorder %v13429_v61, 0.0  ;;  %v7020_v44 = vld [vmem:[%s13681_s7] sm:$0x1] }
 0x741   : > { %6922 = vxpose.xlu0.b32.cont [12/16] (narrow) %v6880_v39, 32  ;;  %v6907_v29 = vsel %vm6823_vm7, %v13406_v48, %v6865_v60  ;;  %v6908_v58 = vsel %vm6824_vm8, %v13410_v28, %v6866_v38  ;;  %v6868_v48 = vmul.f32 0.2, %v13426_v17  ;;  %vm6826_vm13 = vcmp.ge.f32.partialorder %v13426_v17, 0.0  ;;  %v14236_v28 = vld [vmem:[#allocation36_spill] sm:$0xff]  ;;  %v14247_v39 = vld [vmem:[#allocation49_spill] sm:$0xff] }
 0x742   : > { %6955 = vxpose.xlu1.b32.cont [13/16] (narrow) %v6897_v9, 32  ;;  %v6909_v46 = vsel %vm6825_vm9, %v13429_v61, %v6867_v59  ;;  %v14241_v61 = vld [vmem:[#allocation39_spill] sm:$0xff]  ;;  %v14248_v9 = vld [vmem:[#allocation54_spill] sm:$0xff]  ;;  %vm8176_vm15 = vmmov 0   ;;  %v14268_v25 = vld [vmem:[#allocation53_spill] sm:$0xff]  ;;  %vm7009_vm11 = vcmask 613376  }
 0x743   : > { %v6910_v24 = vsel %vm6826_vm13, %v13426_v17, %v6868_v48  ;;  %v14244_v17 = vld [vmem:[#allocation29_spill] sm:$0xff]  ;;  %v14262_v6 = vld [vmem:[#allocation50_spill] sm:$0xff] }
 0x744   : > { %v14271_v33 = vld [vmem:[#allocation65_spill] sm:$0xff]  ;;  %v7027_v48 = vld [vmem:[#allocation3] sm:$0x1] }
 0x745   : > { %6923 = vxpose.xlu0.b32.cont [13/16] (narrow) %v6881_v41, 32  ;;  %v14250_v41 = vld [vmem:[#allocation56_spill] sm:$0xff]  ;;  %v14275_v38 = vld [vmem:[#allocation69_spill] sm:$0xff] }
 0x746   : > { %6956 = vxpose.xlu1.b32.cont [14/16] (narrow) %v6898_v4, 32 }
 0x749   : > { %6924 = vxpose.xlu0.b32.cont [14/16] (narrow) %v6882_v18, 32  ;;  %v14252_v18 = vld [vmem:[#allocation24_spill] sm:$0xff] }
 0x74a   : > { %6957 = vxpose.xlu1.b32.cont [15/16] (narrow) %v6899_v37, 32 }
 0x74d   : > { %6925 = vxpose.xlu0.b32.cont [15/16] (narrow) %v6883_v55, 32 }
 0x74e   : > { %6958 = vxpose.xlu1.b32.end [16/16] (narrow) %v6900_v31, 32  ;;  %v14254_v31 = vld [vmem:[#allocation46_spill] sm:$0xff] }
 0x751   : > { %v7613_v43 = vpop.f32.mrf.mxu0  ;;  %6926 = vxpose.xlu0.b32.end [16/16] (narrow) %v6884_v1, 32  ;;  %v14256_v1 = vld [vmem:[#allocation19_spill] sm:$0xff] }
 0x752   : > { %4744 = vxpose.xlu1.b32.start [1/16] (narrow) %v14226_v54, 16  ;;  %v14253_v43 = vld [vmem:[#allocation31_spill] sm:$0xff]  ;;  %v14257_v54 = vld [vmem:[#allocation33_spill] sm:$0xff] }
 0x753   : > { %v3856_v8 = vpop.f32.mrf.mxu0 }
 0x755   : > { %v7614_v19 = vpop.f32.mrf.mxu0  ;;  %6975 = vxpose.xlu0.b32.start [1/10] (short) (narrow) %v6901_v63, 32  ;;  %v14258_v63 = vld [vmem:[#allocation22_spill] sm:$0xff] }
 0x756   : > { %4745 = vxpose.xlu1.b32.cont [2/16] (narrow) %v14227_v47, 16  ;;  %v14255_v19 = vld [vmem:[#allocation32_spill] sm:$0xff]  ;;  %v14260_v47 = vld [vmem:[#allocation23_spill] sm:$0xff] }
 0x757   : > { %v3858_v27 = vpop.f32.mrf.mxu0 }
 0x758   : > { %v8175_v27 = vmov 0.0  }
 0x759   : > { %6976 = vxpose.xlu0.b32.cont [2/10] (short) (narrow) %v6902_v30, 32  ;;  %v14261_v30 = vld [vmem:[#allocation20_spill] sm:$0xff] }
 0x75a   : > { %4746 = vxpose.xlu1.b32.cont [3/16] (narrow) %v14228_v7, 16  ;;  %v14263_v7 = vld [vmem:[#allocation21_spill] sm:$0xff] }
 0x75d   : > { %6977 = vxpose.xlu0.b32.cont [3/10] (short) (narrow) %v6903_v15, 32  ;;  %v14264_v15 = vld [vmem:[#allocation47_spill] sm:$0xff] }
 0x75e   : > { %4747 = vxpose.xlu1.b32.cont [4/16] (narrow) %v14229_v49, 16  ;;  %v14266_v49 = vld [vmem:[#allocation48_spill] sm:$0xff] }
 0x761   : > { %6978 = vxpose.xlu0.b32.cont [4/10] (short) (narrow) %v6904_v10, 32  ;;  %v14267_v10 = vld [vmem:[#allocation45_spill] sm:$0xff] }
 0x762   : > { %4748 = vxpose.xlu1.b32.cont [5/16] (narrow) %v14230_v34, 16  ;;  %v14269_v34 = vld [vmem:[#allocation51_spill] sm:$0xff] }
 0x765   : > { %6979 = vxpose.xlu0.b32.cont [5/10] (short) (narrow) %v6905_v16, 32  ;;  %v14270_v16 = vld [vmem:[#allocation60_spill] sm:$0xff] }
 0x766   : > { %4749 = vxpose.xlu1.b32.cont [6/16] (narrow) %v14231_v50, 16  ;;  %v14272_v50 = vld [vmem:[#allocation66_spill] sm:$0xff] }
 0x769   : > { %6980 = vxpose.xlu0.b32.cont [6/10] (short) (narrow) %v6906_v53, 32  ;;  %v14273_v53 = vld [vmem:[#allocation67_spill] sm:$0xff] }
 0x76a   : > { %4750 = vxpose.xlu1.b32.cont [7/16] (narrow) %v14232_v51, 16  ;;  %v14274_v51 = vld [vmem:[#allocation68_spill] sm:$0xff] }
 0x76d   : > { %6981 = vxpose.xlu0.b32.cont [7/10] (short) (narrow) %v6907_v29, 32 }
 0x76e   : > { %4751 = vxpose.xlu1.b32.cont [8/16] (narrow) %v14233_v56, 16 }
 0x771   : > { %6982 = vxpose.xlu0.b32.cont [8/10] (short) (narrow) %v6908_v58, 32  ;;  %v14276_v58 = vld [vmem:[#allocation70_spill] sm:$0xff] }
 0x772   : > { %4752 = vxpose.xlu1.b32.cont [9/16] (narrow) %v14234_v57, 16  ;;  %v14277_v57 = vld [vmem:[#allocation71_spill] sm:$0xff] }
 0x775   : > { %6983 = vxpose.xlu0.b32.cont [9/10] (short) (narrow) %v6909_v46, 32 }
 0x776   : > { %4753 = vxpose.xlu1.b32.cont [10/16] (narrow) %v14235_v22, 16  ;;  %v14278_v22 = vld [vmem:[#allocation72_spill] sm:$0xff] }
 0x779   : > { %6984 = vxpose.xlu0.b32.end [10/10] (short) (narrow) %v6910_v24, 32 }
 0x77a   : > { %4754 = vxpose.xlu1.b32.cont [11/16] (narrow) %v14236_v28, 16  ;;  %v14279_v28 = vmov 0  }
 0x77d   : > { %4776 = vxpose.xlu0.b32.start [1/16] (narrow) %v14237_v11, 16  ;;  %v14280_v11 = vld [vmem:[#allocation73_spill] sm:$0xff] }
 0x77e   : > { %4755 = vxpose.xlu1.b32.cont [12/16] (narrow) %v14238_v12, 16 }
 0x781   : > { %4777 = vxpose.xlu0.b32.cont [2/16] (narrow) %v14239_v32, 16 }
 0x782   : > { %4756 = vxpose.xlu1.b32.cont [13/16] (narrow) %v14240_v40, 16 }
 0x785   : > { %4778 = vxpose.xlu0.b32.cont [3/16] (narrow) %v14241_v61, 16 }
 0x786   : > { %4757 = vxpose.xlu1.b32.cont [14/16] (narrow) %v14242_v26, 16 }
 0x789   : > { %4779 = vxpose.xlu0.b32.cont [4/16] (narrow) %v14243_v21, 16 }
 0x78a   : > { %4758 = vxpose.xlu1.b32.cont [15/16] (narrow) %v14244_v17, 16 }
 0x78d   : > { %4780 = vxpose.xlu0.b32.cont [5/16] (narrow) %v14245_v52, 16 }
 0x78e   : > { %4759 = vxpose.xlu1.b32.end [16/16] (narrow) %v14246_v62, 16  ;;  %v6959_v20 = vpop.trf.xlu1 }
 0x78f   : > { %7008 = vst [vmem:[%s13503_s16 + $0x8] sm:$0xff] %v6959_v20 }
 0x791   : > { %4781 = vxpose.xlu0.b32.cont [6/16] (narrow) %v14247_v39, 16  ;;  %v6927_v5 = vpop.trf.xlu0 }
 0x792   : > { %4808 = vxpose.xlu1.b32.start [1/16] (narrow) %v14248_v9, 16  ;;  %v6960_v0 = vpop.trf.xlu1  ;;  %7007 = vst [vmem:[%s13503_s16] sm:$0xff] %v6927_v5 }
 0x793   : > { %7012 = vst [vmem:[%s13503_s16 + $0x20] sm:$0xff] %v6960_v0  ;;  %v7022_v42 = vpack.c.bf16 %v6960_v0, %v6959_v20 }
 0x795   : > { %4782 = vxpose.xlu0.b32.cont [7/16] (narrow) %v14249_v14, 16  ;;  %v6928_v36 = vpop.trf.xlu0 }
 0x796   : > { %4809 = vxpose.xlu1.b32.cont [2/16] (narrow) %v14250_v41, 16  ;;  %v6961_v4 = vpop.trf.xlu1  ;;  %7011 = vst [vmem:[%s13503_s16 + $0x18] sm:$0xff] %v6928_v36  ;;  %v7021_v8 = vpack.c.bf16 %v6928_v36, %v6927_v5 }
 0x797   : > { %7015 = vst [vmem:[%s13503_s16 + $0x38] sm:$0xff] %v6961_v4 }
 0x799   : > { %4783 = vxpose.xlu0.b32.cont [8/16] (narrow) %v14251_v23, 16  ;;  %v6929_v3 = vpop.trf.xlu0 }
 0x79a   : > { %4810 = vxpose.xlu1.b32.cont [3/16] (narrow) %v14252_v18, 16  ;;  %v6962_v37 = vpop.trf.xlu1  ;;  %7014 = vst [vmem:[%s13503_s16 + $0x30] sm:$0xff] %v6929_v3 }
 0x79b   : > { %7018 = vst [vmem:[%s13503_s16 + $0x50] sm:$0xff] %v6962_v37  ;;  %v7025_v35 = vpack.c.bf16 %v6962_v37, %v6961_v4 }
 0x79d   : > { %7052 = vmatprep.subr.bf16.mxu1 %v7025_v35  ;;  %4784 = vxpose.xlu0.b32.cont [9/16] (narrow) %v14253_v43, 16  ;;  %v6930_v55 = vpop.trf.xlu0 }
 0x79e   : > { %4811 = vxpose.xlu1.b32.cont [4/16] (narrow) %v14254_v31, 16  ;;  %7017 = vst [vmem:[%s13503_s16 + $0x48] sm:$0xff] %v6930_v55  ;;  %v7024_v2 = vpack.c.bf16 %v6930_v55, %v6929_v3 }
 0x7a0   : > { %7053 = vmatpush1.bf16.msra.mxu1 %v7024_v2 }
 0x7a1   : > { %4785 = vxpose.xlu0.b32.cont [10/16] (narrow) %v14255_v19, 16  ;;  %7054 = vmatprep.subr.bf16.mxu1 %v7022_v42 }
 0x7a2   : > { %4812 = vxpose.xlu1.b32.cont [5/16] (narrow) %v14256_v1, 16 }
 0x7a4   : > { %7055 = vmatpush1.bf16.msra.mxu1 %v7021_v8 }
 0x7a5   : > { %4786 = vxpose.xlu0.b32.cont [11/16] (narrow) %v14257_v54, 16  ;;  %7615 = vmatprep.subr.bf16.mxu1 %v8175_v27 }
 0x7a6   : > { %4813 = vxpose.xlu1.b32.cont [6/16] (narrow) %v14258_v63, 16 }
 0x7a7   : > { %7418 = vmatmul.mubr.msk.bf16.vlgmr.msra.gmra.mxu1 %vm5526_vm14, %v7020_v44 }
 0x7a8   : > { %7619 = vmatprep.mubr.msk.bf16.mxu1 %vm8176_vm15, %v8175_v27 }
 0x7a9   : > { %4787 = vxpose.xlu0.b32.cont [12/16] (narrow) %v14259_v13, 16 }
 0x7aa   : > { %4814 = vxpose.xlu1.b32.cont [7/16] (narrow) %v14260_v47, 16 }
 0x7ad   : > { %4788 = vxpose.xlu0.b32.cont [13/16] (narrow) %v14261_v30, 16 }
 0x7ae   : > { %4815 = vxpose.xlu1.b32.cont [8/16] (narrow) %v14262_v6, 16 }
 0x7b1   : > { %4789 = vxpose.xlu0.b32.cont [14/16] (narrow) %v14263_v7, 16 }
 0x7b2   : > { %4816 = vxpose.xlu1.b32.cont [9/16] (narrow) %v14264_v15, 16 }
 0x7b5   : > { %4790 = vxpose.xlu0.b32.cont [15/16] (narrow) %v14265_v45, 16 }
 0x7b6   : > { %4817 = vxpose.xlu1.b32.cont [10/16] (narrow) %v14266_v49, 16 }
 0x7b9   : > { %4791 = vxpose.xlu0.b32.end [16/16] (narrow) %v14267_v10, 16 }
 0x7ba   : > { %4818 = vxpose.xlu1.b32.cont [11/16] (narrow) %v14268_v25, 16 }
 0x7be   : > { %4819 = vxpose.xlu1.b32.cont [12/16] (narrow) %v14269_v34, 16 }
 0x7c2   : > { %4820 = vxpose.xlu1.b32.cont [13/16] (narrow) %v14270_v16, 16 }
 0x7c6   : > { %4821 = vxpose.xlu1.b32.cont [14/16] (narrow) %v14271_v33, 16 }
 0x7ca   : > { %4822 = vxpose.xlu1.b32.cont [15/16] (narrow) %v14272_v50, 16 }
 0x7ce   : > { %4823 = vxpose.xlu1.b32.end [16/16] (narrow) %v14273_v53, 16  ;;  %v4760_v12 = vpop.trf.xlu1 }
 0x7cf   : > { %4872 = vst [vmem:[%s13557_s14] sm:$0xff] %v4760_v12 }
 0x7d1   : > { %v6991_v60 = vpop.trf.xlu0 }
 0x7d2   : > { %4840 = vxpose.xlu1.b32.start [1/6] (short) (narrow) %v14274_v51, 16  ;;  %7010 = vst.msk [vmem:[%s13503_s16 + $0x10] sm:$0xff] %vm7009_vm11, %v6991_v60  ;;  %v4761_v32 = vpop.trf.xlu1 }
 0x7d3   : > { %4877 = vst [vmem:[%s13557_s14 + $0x20] sm:$0xff] %v4761_v32 }
 0x7d5   : > { %v6992_v29 = vpop.trf.xlu0 }
 0x7d6   : > { %4841 = vxpose.xlu1.b32.cont [2/6] (short) (narrow) %v14275_v38, 16  ;;  %7013 = vst.msk [vmem:[%s13503_s16 + $0x28] sm:$0xff] %vm7009_vm11, %v6992_v29  ;;  %v7023_v24 = vpack.c.bf16 %v6992_v29, %v6991_v60 }
 0x7d9   : > { %v6993_v56 = vpop.trf.xlu0 }
 0x7da   : > { %4842 = vxpose.xlu1.b32.cont [3/6] (short) (narrow) %v14276_v58, 16  ;;  %7016 = vst.msk [vmem:[%s13503_s16 + $0x40] sm:$0xff] %vm7009_vm11, %v6993_v56 }
 0x7dd   : > { %v6994_v59 = vpop.trf.xlu0 }
 0x7de   : > { %4843 = vxpose.xlu1.b32.cont [4/6] (short) (narrow) %v14277_v57, 16  ;;  %7019 = vst.msk [vmem:[%s13503_s16 + $0x58] sm:$0xff] %vm7009_vm11, %v6994_v59  ;;  %v7026_v46 = vpack.c.bf16 %v6994_v59, %v6993_v56  ;;  %s8050_s16 = sshll.u32 %s8177_s1, 4  ;;  %s8051_s16 = int_to_ptr.vmem [resolvable:$false] %s8050_s16 }
 0x7df   : > { %s8052_s2 = scalar_lea.vmem %s8051_s16, 3072  ;;  %p8053_p0 = scmp.lt.s32.totalorder %s13572_s26, %s8051_s16 }
 0x7e0   : > { %7616 = vmatpush3.bf16.msra.mxu1 %v7026_v46  ;;  %p8054_p1 = scmp.lt.s32.totalorder %s8052_s2, %s8046_s0 }
 0x7e1   : > { %7617 = vmatprep.subr.bf16.mxu1 %v8175_v27 }
 0x7e2   : > { %4844 = vxpose.xlu1.b32.cont [5/6] (short) (narrow) %v14278_v22, 16  ;;  %8020 = vset.pattern.permute.xlu0 %v14279_v28  ;;  %p8055_p2 = por %p8054_p1, %p8053_p0 }
 0x7e3   : > { %7030 = vperm.xlu0 %8020, %v7027_v48  }
 0x7e4   : > { %7618 = vmatpush3.bf16.msra.mxu1 %v7023_v24  ;;  %p8056_p3 = pnand %p8055_p2, %p8049_p13 }
 0x7e6   : > { %4845 = vxpose.xlu1.b32.end [6/6] (short) (narrow) %v14280_v11, 16 }
 0x7e7   : > { %7620 = vmatmul.mubr.msk.bf16.vlgmr.msra.gmra.mxu1 %vm5526_vm14, %v7020_v44 }
 0x7f9   : > { %v4792_v40 = vpop.trf.xlu0 }
 0x7fa   : > { %4873 = vst [vmem:[%s13557_s14 + $0x8] sm:$0xff] %v4792_v40 }
 0x7fd   : > { %v4793_v61 = vpop.trf.xlu0 }
 0x7fe   : > { %4878 = vst [vmem:[%s13557_s14 + $0x28] sm:$0xff] %v4793_v61 }
 0x80e   : > { %v4824_v26 = vpop.trf.xlu1 }
 0x80f   : > { %4874 = vst [vmem:[%s13557_s14 + $0x10] sm:$0xff] %v4824_v26 }
 0x812   : > { %v4825_v21 = vpop.trf.xlu1 }
 0x813   : > { %8059 = shalt.err (!%p8056_p3)
}
 0x814   : > { %s8060_s25 = scalar_lea.hbm %s13570_s13, 1536  ;;  %s8064_s1 = scalar_lea.hbm %s13684_s10, 3072 }
 0x815   : > { %p8061_p4 = scmp.ne.s32.totalorder %s13570_s13, %s8060_s25  ;;  %p8065_p9 = scmp.lt.s32.totalorder %s13570_s13, %s13684_s10 }
 0x816   : > { %p8066_p10 = scmp.lt.s32.totalorder %s8064_s1, %s8060_s25 }
 0x817   : > { %p8062_p7 = pnand %p8061_p4, %p8286_p5 }
 0x818   : > { %p8067_p11 = por %p8066_p10, %p8065_p9 }
 0x819   : > { %p8063_p8 = pneg %p8062_p7 }
 0x81b   : > { %p8068_p12 = pnand %p8067_p11, %p8063_p8 }
 0x81d   : > { %8071 = shalt.err (!%p8068_p12)
}
 0x81e   : > { %s8178_s0 = smov 384   ;;  %4879 = vst [vmem:[%s13557_s14 + $0x30] sm:$0xff] %v4825_v21  ;;  %vm4875_vm14 = vcmask 375808   ;;  %s7177_s2 = sshll.u32 %s13557_s14, 4  ;;  %s13602_s2 = int_to_ptr.vmem [resolvable:$true] %s7177_s2 }
 0x81f   : > { %7628 = dma.vmem_to_hbm [thread:$0]  (%p8286_p5), %s13572_s26, 1536, %s13570_s13, %s13574_s12, %s8178_s0, %s8178_s0, %s14196_s30  }
 0x820   : > { %s7428_s3 = sshll.u32 %s8267_s8, 10  ;;  %s7154_s17 = scalar_lea.sflag [#allocation5], %s13496_s15 }
 0x821   : > { %s13607_s23 = scalar_lea.hbm %s13683_s9, %s7428_s3  ;;  %s8072_s30 = scalar_lea.vmem %s13602_s2, 1024 }
 0x822   : > { %p8073_p13 = scmp.ne.s32.totalorder %s13602_s2, %s8072_s30  ;;  %s8179_s26 = smov [#allocation4]  }
 0x823   : > { %s8076_s13 = sshll.u32 %s8179_s26, 4  ;;  %s8077_s13 = int_to_ptr.vmem [resolvable:$false] %s8076_s13 }
 0x824   : > { %p8074_p0 = pnand %p8073_p13, %p8286_p5  ;;  %s8078_s1 = scalar_lea.vmem %s8077_s13, 2048 }
 0x825   : > { %p8079_p2 = scmp.lt.s32.totalorder %s13602_s2, %s8077_s13  ;;  %p8080_p3 = scmp.lt.s32.totalorder %s8078_s1, %s8072_s30 }
 0x826   : > { %p8075_p1 = pneg %p8074_p0 }
 0x827   : > { %p8081_p4 = por %p8080_p3, %p8079_p2 }
 0x829   : > { %p8082_p7 = pnand %p8081_p4, %p8075_p1 }
 0x84e   : > { %v4856_v17 = vpop.trf.xlu1 }
 0x84f   : > { %4876 = vst.msk [vmem:[%s13557_s14 + $0x18] sm:$0xff] %vm4875_vm14, %v4856_v17 }
 0x852   : > { %v4857_v52 = vpop.trf.xlu1 }
 0x853   : > { %4880 = vst.msk [vmem:[%s13557_s14 + $0x38] sm:$0xff] %vm4875_vm14, %v4857_v52 }
 0x854   : > { %8085 = shalt.err (!%p8082_p7)
}
 0x855   : > { %s8086_s14 = scalar_lea.hbm %s13607_s23, 1024  ;;  %s8090_s3 = scalar_lea.hbm %s13683_s9, 2048 }
 0x856   : > { %p8087_p8 = scmp.ne.s32.totalorder %s13607_s23, %s8086_s14  ;;  %p8091_p11 = scmp.lt.s32.totalorder %s13607_s23, %s13683_s9 }
 0x857   : > { %p8092_p12 = scmp.lt.s32.totalorder %s8090_s3, %s8086_s14 }
 0x858   : > { %p8088_p9 = pnand %p8087_p8, %p8286_p5 }
 0x859   : > { %p8093_p13 = por %p8092_p12, %p8091_p11 }
 0x85a   : > { %p8089_p10 = pneg %p8088_p9 }
 0x85c   : > { %p8094_p0 = pnand %p8093_p13, %p8089_p10 }
 0x85e   : > { %8097 = shalt.err (!%p8094_p0)
}
 0x85f   : > { %s8180_s30 = smov 512   ;;  %s14281_s26 = smov 32   ;;  %v14282_v9 = vld [vmem:[#allocation40_spill] sm:$0xff]  ;;  %v7031_v14 = vpop.permute.xlu0 %7030  ;;  %v8181_v41 = vmov 1966171168   ;;  %v14283_v44 = vlaneseq }
 0x860   : > { %7627 = dma.vmem_to_hbm [thread:$0]  (%p8286_p5), %s13602_s2, 1024, %s13607_s23, %s7154_s17, %s8180_s30, %s8180_s30, %s14281_s26   ;;  %v7035_v0 = vsub.s32 0, %v14282_v9  ;;  %v7126_v4 = vunpack.c.l.s4 %v8181_v41 }
 0x861   : > { %s7624_s13 = smul.u32 3, %s13496_s15  ;;  %vm7150_vm10 = vcmp.lt.s32.totalorder %v14283_v44, 331 }
 0x862   : > { %v7036_v36 = vrot.slane %v7031_v14, %v7035_v0  ;;  %v7127_v18 = vunpack.c.0.s8 %v7126_v4  ;;  %s7626_s2 = smul.u32 48, %s8267_s8  ;;  %s8182_s8 = smov [#allocation8]  }
 0x863   : > { %s399_s23 = scalar_lea.vmem [#allocation8], %s7624_s13  ;;  %s8102_s0 = sshll.u32 %s8182_s8, 4  ;;  %s8103_s0 = int_to_ptr.vmem [resolvable:$false] %s8102_s0 }
 0x864   : > { %v7130_v35 = vsub.s32 %v7127_v18, %v14282_v9  ;;  %s7210_s17 = sshll.u32 %s399_s23, 4  ;;  %s7208_s14 = scalar_lea.hbm %s13685_s11, %s7626_s2  ;;  %s7211_s17 = int_to_ptr.vmem [resolvable:$true] %s7210_s17 }
 0x865   : > { %s8098_s18 = scalar_lea.vmem %s7211_s17, 48  ;;  %s8104_s3 = scalar_lea.vmem %s8103_s0, 96 }
 0x866   : > { %p8099_p1 = scmp.ne.s32.totalorder %s7211_s17, %s8098_s18  ;;  %p8105_p4 = scmp.lt.s32.totalorder %s7211_s17, %s8103_s0 }
 0x867   : > { %v7074_v62 = vpop.f32.mrf.mxu1  ;;  %p8106_p7 = scmp.lt.s32.totalorder %s8104_s3, %s8098_s18 }
 0x868   : > { %v7075_v23 = vadd.f32 %v7074_v62, %v7036_v36  ;;  %p8100_p2 = pnand %p8099_p1, %p8286_p5 }
 0x869   : > { %v7076_v20 = vpop.f32.mrf.mxu1  ;;  %p8107_p8 = por %p8106_p7, %p8105_p4 }
 0x86a   : > { %v7077_v3 = vadd.f32 %v7076_v20, %v7036_v36  ;;  %p8101_p3 = pneg %p8100_p2 }
 0x86b   : > { %v7078_v39 = vpop.f32.mrf.mxu1 }
 0x86c   : > { %v7124_v37 = vcombine.low %v7075_v23, %v7077_v3  ;;  %p8108_p9 = pnand %p8107_p8, %p8101_p3 }
 0x86d   : > { %v7079_v5 = vpop.f32.mrf.mxu1 }
 0x86e   : > { %v7131_v31 = vrot.slane %v7124_v37, %v7130_v35 }
 0x8a7   : > { %v7115_v42 = vpop.f32.mrf.mxu1 }
 0x8a8   : > { %v7116_v43 = vadd.f32 %v7115_v42, %v7036_v36 }
 0x8a9   : > { %v7621_v55 = vpop.f32.mrf.mxu1 }
 0x8aa   : > { %v7138_v2 = vrot.slane %v7116_v43, %v7130_v35 }
 0x8ab   : > { %v7118_v8 = vpop.f32.mrf.mxu1 }
 0x8ac   : > { %v7139_v19 = vcombine.low %v7131_v31, %v7138_v2 }
 0x8ad   : > { %v7622_v1 = vpop.f32.mrf.mxu1 }
 0x8ae   : > { %v7146_v54 = vrot.slane %v7139_v19, %v7130_v35 }
 0x8b0   : > { %7152 = vst.msk [vmem:[%s399_s23] sm:$0x7] %vm7150_vm10, %v7146_v54 }
 0x8b1   : > { %8111 = shalt.err (!%p8108_p9)
}
 0x8b2   : > { %s8112_s16 = scalar_lea.hbm %s7208_s14, 48  ;;  %s8116_s26 = scalar_lea.hbm %s13685_s11, 96 }
 0x8b3   : > { %p8113_p10 = scmp.ne.s32.totalorder %s7208_s14, %s8112_s16  ;;  %p8117_p13 = scmp.lt.s32.totalorder %s7208_s14, %s13685_s11 }
 0x8b4   : > { %p8118_p0 = scmp.lt.s32.totalorder %s8116_s26, %s8112_s16 }
 0x8b5   : > { %p8114_p11 = pnand %p8113_p10, %p8286_p5 }
 0x8b6   : > { %p8119_p1 = por %p8118_p0, %p8117_p13 }
 0x8b7   : > { %p8115_p12 = pneg %p8114_p11 }
 0x8b9   : > { %p8120_p2 = pnand %p8119_p1, %p8115_p12 }
 0x8bb   : > { %8123 = shalt.err (!%p8120_p2)
}
 0x8bc   : > { %7629 = dma.vmem_to_hbm [thread:$0]  (%p8286_p5), %s7211_s17, 48, %s7208_s14, %s13574_s12  }
 0x8bd PF: > { %p7643_p3 = scmp.ge.s32.totalorder %s8162_s22, 2  ;;  %s7222_s23 = sand.u32 1, %s8150_s19  }
 0x8be   : > { %s7223_s1 = scalar_lea.sflag [#allocation5], %s7222_s23 }
 0x8bf   : > { %p7634_p4 = pnand %p7643_p3, %p8290_p6 }
 0x8c1   : > { %p7635_p7 = pneg %p7634_p4 }
 0x8c3   : > { %8141 = dma.done.wait (%p7635_p7), %s7223_s1, 1024  }
 0x8c4   : > { %8143 = vsyncadd (%p7635_p7), %s7223_s1, 4294966272  ;;  %s14284_s15 = sadd.s32 4294967294, %s8162_s22  }
 0x8c5   : > { %s7231_s18 = sand.u32 1, %s14284_s15  }
 0x8c6   : > { %s7232_s8 = scalar_lea.sflag [#allocation7], %s7231_s18 }
 0x8c7   : > { %8145 = dma.done.wait (%p7635_p7), %s7232_s8, 1584  }
 0x8c8   : > { %8147 = vsyncadd (%p7635_p7), %s7232_s8, 4294965712  ;;  %p27_p5 = scmp.ge.s32.totalorder %s8271_s24, 4   ;;  %s14285_s19 = smov %s8154_s20 }
 0x8c9   : > { %s14286_s20 = smov %s8158_s21  ;;  %s14287_s21 = smov %s8284_s27 }
 0x8ca   : > { %s14288_s22 = smov %s8271_s24  ;;  %29 = sbr.rel (!%p27_p5) target bundleno = 10 (0xa), region = 230 }
 0x8cf   :  { %7246 = vsyncpa [#allocation5], 1 }
 0x8d0   :  { %7248 = vsyncpa [#allocation5 + $0x1], 1 }
 0x8d1   :  { %7249 = vsyncpa [#allocation7], 1 }
 0x8d2   :  { %7251 = vsyncpa [#allocation7 + $0x1], 1 }

</bundles_post_ra>
